<compile_context>
chip_gen: v5e
topology: v5e:2x2
jax: 0.10.0
libtpu: 0.0.40
codegen_flags: <defaults>
</compile_context>

<pallas_src>
import functools
import math

import jax
import jax.numpy as jnp
from jax.experimental import pallas as pl
from jax.experimental.pallas import tpu as pltpu

_NT = (((1,), (1,)), ((), ()))   # dot_general: contract last dim of both (A @ B^T)


# ----------------------------------------------------------------------------
# Fused kernel: one grid step == one chunk of C=(B*S)/num_chunks (b, s) steps.
# All activations are flat [rows, D] slabs; per-step structure is carried by
# block-diagonal masks / one-hot matrices over the flattened row axis.
# ----------------------------------------------------------------------------

def _hier_gat_block_kernel(
    x_ref,        # [R, D]     R = C*N  flattened (step, node) rows
    enc_ref,      # [Rm, D]    Rm = C*M flattened (step, memory) rows
    eattr_ref,    # [C, E, Fe]
    src_ref,      # [C, E] int32
    tgt_ref,      # [C, E] int32
    emask_ref,    # [C, E] int32 (1 = valid edge)
    bias_sa_ref,  # [1, R, R]  f32 in {0, -1e9, -2e9}
    bias_ed_ref,  # [1, R, Rm] f32 in {0, -1e9, -2e9}
    gat_w_ref,    # [D, D]
    a_nodes_ref,  # [2, D]     row 0 = a_src, row 1 = a_tgt
    a_edge_ref,   # [1, Fe]
    sa_w_ref,     # [4, D, D]  (wq, wk, wv, wo) self-attention
    ed_w_ref,     # [4, D, D]  (wq, wk, wv, wo) enc-dec attention
    ff_w1_ref,    # [D, F]
    ff_b1_ref,    # [1, F]
    ff_w2_ref,    # [F, D]
    ff_b2_ref,    # [1, D]
    ln_g_ref,     # [4, D]
    ln_b_ref,     # [4, D]
    o_ref,        # [R, D]
    *, heads):
    f32 = jnp.float32
    xf = x_ref[...]                      # [R, D]
    encf = enc_ref[...]                  # [Rm, D]
    C, E = src_ref.shape
    R, D = xf.shape
    N = R // C
    H = heads
    dk = D // H
    scale = 1.0 / math.sqrt(dk)

    ln_g = ln_g_ref[...]                 # [4, D]
    ln_b = ln_b_ref[...]

    def add_norm(y, idx):
        # PyTorch: LayerNorm(y + dropout(y)); dropout is identity at inference, so the
        # LN input is exactly 2*y.  LN(2y) == (y - mean(y)) * rsqrt(var(y) + eps/4)*g + b,
        # so the doubling add is folded exactly into the epsilon (eps = 1e-5 / 4).
        mu = jnp.mean(y, axis=-1, keepdims=True)
        var = jnp.mean(jnp.square(y - mu), axis=-1, keepdims=True)
        return ((y - mu) * jax.lax.rsqrt(var + 0.25e-5) * ln_g[idx:idx + 1, :]
                + ln_b[idx:idx + 1, :])

    # Per-head lane masks [H, D] (0/1): per-head math without sub-tile lane slicing.
    h_iota = jax.lax.broadcasted_iota(jnp.int32, (H, D), 0)
    l_iota = jax.lax.broadcasted_iota(jnp.int32, (H, D), 1)
    head_mask = ((l_iota >= h_iota * dk) & (l_iota < (h_iota + 1) * dk)).astype(f32)

    def mha(q_in, kv_in, w_ref, bias):
        # q_in [R, D], kv_in [Rk, D], bias [R, Rk] (0 keep / -1e9 masked row / -2e9 other step)
        Rk = kv_in.shape[0]
        q = jnp.dot(q_in, w_ref[0], preferred_element_type=f32)
        k = jnp.dot(kv_in, w_ref[1], preferred_element_type=f32)
        v = jnp.dot(kv_in, w_ref[2], preferred_element_type=f32)
        # Stack the H head-masked copies of q along rows: one scores matmul for all
        # heads & all steps, contracting the full D=32 (no dk=8 contractions).
        q_stack = jnp.concatenate([q * head_mask[h:h + 1, :] for h in range(H)], axis=0)
        s = jax.lax.dot_general(q_stack, k, _NT, preferred_element_type=f32) * scale
        s = s.reshape(H, R, Rk)
        b = bias[None, :, :]
        s = jnp.where(b < -0.5, b, s)                       # exact masked_fill semantics
        mx = jnp.max(s, axis=-1, keepdims=True)
        p = jnp.exp(s - mx)
        attn = p / jnp.sum(p, axis=-1, keepdims=True)       # [H, R, Rk]
        ctx = jnp.dot(attn.reshape(H * R, Rk), v,
                      preferred_element_type=f32).reshape(H, R, D)
        ctx = jnp.sum(ctx * head_mask[:, None, :], axis=0)  # == concat over heads
        return jnp.dot(ctx, w_ref[3], preferred_element_type=f32)   # [R, D]

    # ------------------------------ GAT layer --------------------------------
    hpf = jnp.dot(xf, gat_w_ref[...], preferred_element_type=f32)    # h' [R, D]

    em = emask_ref[...] != 0
    vsrc = jnp.where(em, src_ref[...], 0)      # clamp(min=0) semantics of the reference
    vtgt = jnp.where(em, tgt_ref[...], 0)
    c_iota = jax.lax.broadcasted_iota(jnp.int32, (C, E), 0)
    fsrc = c_iota * N + vsrc                   # flat node-row index per edge
    ftgt = c_iota * N + vtgt
    r_iota = jax.lax.broadcasted_iota(jnp.int32, (C, E, R), 2)
    oh_src = (r_iota == fsrc[:, :, None]).astype(f32)    # [C, E, R] one-hot (block-diag)
    oh_tgt = (r_iota == ftgt[:, :, None]).astype(f32)

    # Per-node scalar scores a_src.h'_r / a_tgt.h'_r on lanes: [2, R]; gather scalars
    # through the one-hots -> no [E, D] feature gathers for the logits.
    s_nodes = jax.lax.dot_general(a_nodes_ref[...], hpf, _NT, preferred_element_type=f32)
    l_src = jnp.sum(oh_src * s_nodes[0:1, :][:, None, :], axis=-1)   # [C, E]
    l_tgt = jnp.sum(oh_tgt * s_nodes[1:2, :][:, None, :], axis=-1)
    l_edge = jnp.sum(eattr_ref[...] * a_edge_ref[...][:, None, :], axis=-1)

    e_log = l_src + l_tgt + l_edge
    e_log = jnp.where(e_log > 0, e_log, 0.2 * e_log)                 # LeakyReLU(0.2)
    e_log = jnp.where(em, e_log, -1e30)                              # masked_fill(~edge_mask)
    row_has = jnp.any(em, axis=-1, keepdims=True)
    e_log = jnp.where(row_has, e_log, 0.0)        # rows w/o valid edges -> uniform softmax
    mx = jnp.max(e_log, axis=-1, keepdims=True)
    p = jnp.exp(e_log - mx)
    alpha = p / jnp.sum(p, axis=-1, keepdims=True)                   # [C, E]

    # Gather + scatter collapsed into one block-diagonal node x node matrix:
    #   A[r, s] = sum_e alpha_e [ftgt_e == r] [fsrc_e == s];  agg = (A + A^T) @ h'.
    ohs2 = oh_src.reshape(C * E, R)
    ohtw2 = (oh_tgt * alpha[:, :, None]).reshape(C * E, R)
    amat = jnp.dot(ohtw2.T, ohs2, preferred_element_type=f32)        # [R, R]
    agg = jnp.dot(amat + amat.T, hpf, preferred_element_type=f32)    # [R, D]
    g = jnp.where(agg > 0.0, agg, jnp.exp(jnp.minimum(agg, 0.0)) - 1.0)   # ELU

    # --------------------- AddNorm / attention / FFN chain -------------------
    h1 = add_norm(g, 0)
    h2 = add_norm(mha(h1, h1, sa_w_ref, bias_sa_ref[0]), 1)
    h3 = add_norm(mha(h2, encf, ed_w_ref, bias_ed_ref[0]), 2)

    ff = jnp.dot(h3, ff_w1_ref[...], preferred_element_type=f32) + ff_b1_ref[...]
    ff = jnp.maximum(ff, 0.0)                                        # ReLU
    ff = jnp.dot(ff, ff_w2_ref[...], preferred_element_type=f32) + ff_b2_ref[...]
    o_ref[...] = add_norm(ff, 3)


# ----------------------------------------------------------------------------
# Wrapper: flattening, mask precomputation, BlockSpecs, single pallas_call.
# ----------------------------------------------------------------------------

def hier_gat_block(params, x, edge_index, edge_attr, enc_output,
                   node_mask, edge_mask, heads, num_chunks=None):
    B, S, N, D = x.shape
    M = enc_output.shape[2]
    E = edge_index.shape[2]
    Fe = edge_attr.shape[3]
    G = B * S

    if num_chunks is None:
        # 2 keeps both v7x TensorCores busy ("parallel" grid axis); it costs the
        # single-core v5e/v6e only one extra ~0.35us grid step.  Pass num_chunks=1
        # there if that matters.  Fall back to 1 if chunking breaks the (8,128) rule.
        num_chunks = 2 if (G % 2 == 0 and (G // 2) % 8 == 0) else 1
    assert G % num_chunks == 0
    C = G // num_chunks
    R, Rm = C * N, C * M

    # Free HBM-metadata reshapes: dense math runs on [rows, D] slabs.
    x_flat = x.reshape(G * N, D).astype(jnp.float32)
    enc_flat = enc_output.reshape(G * M, D).astype(jnp.float32)
    eattr = edge_attr.reshape(G, E, Fe).astype(jnp.float32)
    src = edge_index[..., 0].reshape(G, E).astype(jnp.int32)
    tgt = edge_index[..., 1].reshape(G, E).astype(jnp.int32)
    em = edge_mask.reshape(G, E).astype(jnp.int32)

    # Precomputed attention masks (exact masked_fill semantics):
    #   0    keep score
    #  -1e9  query row masked (node_mask True)  -> uniform softmax over own step's keys
    #  -2e9  key belongs to a different (b, s) step -> zero weight
    nm = node_mask.reshape(num_chunks, R).astype(bool)
    qstep = jnp.repeat(jnp.arange(G, dtype=jnp.int32), N).reshape(num_chunks, R)

    def build_bias(keys_per_step, rk):
        kstep = jnp.repeat(jnp.arange(G, dtype=jnp.int32), keys_per_step)
        kstep = kstep.reshape(num_chunks, rk)
        same = qstep[:, :, None] == kstep[:, None, :]
        within = jnp.where(nm[:, :, None], jnp.float32(-1e9), jnp.float32(0.0))
        return jnp.where(same, within, jnp.float32(-2e9))

    bias_sa = build_bias(N, R)       # [nc, R, R]
    bias_ed = build_bias(M, Rm)      # [nc, R, Rm]

    def cspec(block_shape):          # one chunk of (b, s) steps per grid step
        nd = len(block_shape)
        return pl.BlockSpec(tuple(block_shape),
                            lambda i, _n=nd: (i,) + (0,) * (_n - 1))

    def wspec(shape):                # replicated weights
        nd = len(shape)
        return pl.BlockSpec(tuple(shape), lambda i, _n=nd: (0,) * _n)

    kern = functools.partial(_hier_gat_block_kernel, heads=heads)
    out_flat = pl.pallas_call(
        kern,
        out_shape=jax.ShapeDtypeStruct((G * N, D), jnp.float32),
        grid=(num_chunks,),
        in_specs=[
            cspec((R, D)),            # x (flattened)
            cspec((Rm, D)),           # enc_output (flattened)
            cspec((C, E, Fe)),        # edge_attr
            cspec((C, E)),            # src indices
            cspec((C, E)),            # tgt indices
            cspec((C, E)),            # edge mask
            cspec((1, R, R)),         # self-attn mask
            cspec((1, R, Rm)),        # enc-dec attn mask
            wspec(params['gat_W'].shape),
            wspec(params['gat_a_nodes'].shape),
            wspec(params['gat_a_edge'].shape),
            wspec(params['sa_w'].shape),
            wspec(params['ed_w'].shape),
            wspec(params['ff_w1'].shape),
            wspec(params['ff_b1'].shape),
            wspec(params['ff_w2'].shape),
            wspec(params['ff_b2'].shape),
            wspec(params['ln_g'].shape),
            wspec(params['ln_b'].shape),
        ],
        out_specs=cspec((R, D)),
        compiler_params=pltpu.CompilerParams(dimension_semantics=("parallel",)),
    )(x_flat, enc_flat, eattr, src, tgt, em, bias_sa, bias_ed,
      params['gat_W'], params['gat_a_nodes'], params['gat_a_edge'],
      params['sa_w'], params['ed_w'],
      params['ff_w1'], params['ff_b1'], params['ff_w2'], params['ff_b2'],
      params['ln_g'], params['ln_b'])
    return out_flat.reshape(B, S, N, D)


# ----------------------------------------------------------------------------
# Deterministic parameter construction
# ----------------------------------------------------------------------------

def init_params(key, embed_dim, edge_dim, heads, ff_dim):
    D, Fe, F = embed_dim, edge_dim, ff_dim
    keys = jax.random.split(key, 12)

    def xavier(k, shape):
        bound = math.sqrt(6.0 / (shape[0] + shape[1]))
        return jax.random.uniform(k, shape, jnp.float32, -bound, bound)

    a_full = xavier(keys[1], (2 * D + Fe, 1))           # torch GAT `a`: [2D+Fe, 1]
    return {
        'gat_W': xavier(keys[0], (D, D)),
        'gat_a_nodes': jnp.stack([a_full[:D, 0], a_full[D:2 * D, 0]]),   # [2, D]
        'gat_a_edge': a_full[2 * D:, 0].reshape(1, Fe),
        # attention projections stacked (q, k, v, o), math orientation [in, out]
        'sa_w': jnp.stack([xavier(keys[i], (D, D)) for i in range(2, 6)]),
        'ed_w': jnp.stack([xavier(keys[i], (D, D)) for i in range(6, 10)]),
        'ff_w1': xavier(keys[10], (D, F)), 'ff_b1': jnp.zeros((1, F), jnp.float32),
        'ff_w2': xavier(keys[11], (F, D)), 'ff_b2': jnp.zeros((1, D), jnp.float32),
        'ln_g': jnp.ones((4, D), jnp.float32),
        'ln_b': jnp.zeros((4, D), jnp.float32),
    }


# ----------------------------------------------------------------------------

if __name__ == "__main__":
    B, S, embed_dim, edge_dim, heads, ff_dim = 2, 8, 32, 8, 4, 64
    N = S + 1        # num_nodes (seq + root), per GATLayer.expand_data
    E = S            # num_edges
    M = N            # encoder memory length per step

    key = jax.random.PRNGKey(0)
    k_par, kx, ke, kenc = jax.random.split(key, 4)
    params = init_params(k_par, embed_dim, edge_dim, heads, ff_dim)

    x = jax.random.normal(kx, (B, S, N, embed_dim), jnp.float32)
    enc_output = jax.random.normal(kenc, (B, S, M, embed_dim), jnp.float32)
    edge_attr = jax.random.normal(ke, (B, S, E, edge_dim), jnp.float32)

    s_idx = jnp.arange(S)
    e_idx = jnp.arange(E)
    edge_mask = jnp.broadcast_to((e_idx[None, :] <= s_idx[:, None])[None], (B, S, E))
    src = jnp.where(edge_mask, e_idx[None, None, :], -1).astype(jnp.int32)
    tgt = jnp.where(edge_mask, e_idx[None, None, :] + 1, -1).astype(jnp.int32)
    edge_index = jnp.stack([src, tgt], axis=-1)                       # [B, S, E, 2]

    n_idx = jnp.arange(N)
    node_mask = jnp.broadcast_to(
        n_idx[None, None, :] > (s_idx[None, :, None] + 1), (B, S, N))  # True = masked

    out = hier_gat_block(params, x, edge_index, edge_attr, enc_output,
                         node_mask, edge_mask, heads)
    out = jax.block_until_ready(out)
    assert out.shape == (B, S, N, embed_dim)
    assert bool(jnp.all(jnp.isfinite(out)))
    print("KERNEL_OK")
</pallas_src>

<mosaic_0001>
module attributes {stable_mosaic.version = 11 : i64} {
  func.func @_hier_gat_block_kernel(%arg0: i32, %arg1: memref<72x32xf32, #tpu.memory_space<vmem>>, %arg2: memref<72x32xf32, #tpu.memory_space<vmem>>, %arg3: memref<8x8x8xf32, #tpu.memory_space<vmem>>, %arg4: memref<8x8xi32, #tpu.memory_space<vmem>>, %arg5: memref<8x8xi32, #tpu.memory_space<vmem>>, %arg6: memref<8x8xi32, #tpu.memory_space<vmem>>, %arg7: memref<1x72x72xf32, #tpu.memory_space<vmem>>, %arg8: memref<1x72x72xf32, #tpu.memory_space<vmem>>, %arg9: memref<32x32xf32, #tpu.memory_space<vmem>>, %arg10: memref<2x32xf32, #tpu.memory_space<vmem>>, %arg11: memref<1x8xf32, #tpu.memory_space<vmem>>, %arg12: memref<4x32x32xf32, #tpu.memory_space<vmem>>, %arg13: memref<4x32x32xf32, #tpu.memory_space<vmem>>, %arg14: memref<32x64xf32, #tpu.memory_space<vmem>>, %arg15: memref<1x64xf32, #tpu.memory_space<vmem>>, %arg16: memref<64x32xf32, #tpu.memory_space<vmem>>, %arg17: memref<1x32xf32, #tpu.memory_space<vmem>>, %arg18: memref<4x32xf32, #tpu.memory_space<vmem>>, %arg19: memref<4x32xf32, #tpu.memory_space<vmem>>, %arg20: memref<72x32xf32, #tpu.memory_space<vmem>>) attributes {dimension_semantics = [#tpu.dimension_semantics<parallel>], iteration_bounds = array<i64: 2>, scalar_prefetch = 0 : i64, scratch_operands = 0 : i64, tpu.core_type = #tpu.core_type<tc>, window_params = [{transform_indices = @transform_0, window_bounds = array<i64: 72, 32>}, {transform_indices = @transform_1, window_bounds = array<i64: 72, 32>}, {transform_indices = @transform_2, window_bounds = array<i64: 8, 8, 8>}, {transform_indices = @transform_3, window_bounds = array<i64: 8, 8>}, {transform_indices = @transform_4, window_bounds = array<i64: 8, 8>}, {transform_indices = @transform_5, window_bounds = array<i64: 8, 8>}, {transform_indices = @transform_6, window_bounds = array<i64: 1, 72, 72>}, {transform_indices = @transform_7, window_bounds = array<i64: 1, 72, 72>}, {pipeline_mode = #tpu.pipeline_mode<synchronous>, transform_indices = @transform_8, window_bounds = array<i64: 32, 32>}, {pipeline_mode = #tpu.pipeline_mode<synchronous>, transform_indices = @transform_9, window_bounds = array<i64: 2, 32>}, {pipeline_mode = #tpu.pipeline_mode<synchronous>, transform_indices = @transform_10, window_bounds = array<i64: 1, 8>}, {pipeline_mode = #tpu.pipeline_mode<synchronous>, transform_indices = @transform_11, window_bounds = array<i64: 4, 32, 32>}, {pipeline_mode = #tpu.pipeline_mode<synchronous>, transform_indices = @transform_12, window_bounds = array<i64: 4, 32, 32>}, {pipeline_mode = #tpu.pipeline_mode<synchronous>, transform_indices = @transform_13, window_bounds = array<i64: 32, 64>}, {pipeline_mode = #tpu.pipeline_mode<synchronous>, transform_indices = @transform_14, window_bounds = array<i64: 1, 64>}, {pipeline_mode = #tpu.pipeline_mode<synchronous>, transform_indices = @transform_15, window_bounds = array<i64: 64, 32>}, {pipeline_mode = #tpu.pipeline_mode<synchronous>, transform_indices = @transform_16, window_bounds = array<i64: 1, 32>}, {pipeline_mode = #tpu.pipeline_mode<synchronous>, transform_indices = @transform_17, window_bounds = array<i64: 4, 32>}, {pipeline_mode = #tpu.pipeline_mode<synchronous>, transform_indices = @transform_18, window_bounds = array<i64: 4, 32>}, {transform_indices = @transform_19, window_bounds = array<i64: 72, 32>}]} {
    %c0 = arith.constant 0 : index
    %c0_0 = arith.constant 0 : index
    %0 = vector.load %arg1[%c0, %c0_0] : memref<72x32xf32, #tpu.memory_space<vmem>>, vector<72x32xf32>
    %c0_1 = arith.constant 0 : index
    %c0_2 = arith.constant 0 : index
    %1 = vector.load %arg2[%c0_1, %c0_2] : memref<72x32xf32, #tpu.memory_space<vmem>>, vector<72x32xf32>
    %c0_3 = arith.constant 0 : index
    %c0_4 = arith.constant 0 : index
    %2 = vector.load %arg18[%c0_3, %c0_4] : memref<4x32xf32, #tpu.memory_space<vmem>>, vector<4x32xf32>
    %c0_5 = arith.constant 0 : index
    %c0_6 = arith.constant 0 : index
    %3 = vector.load %arg19[%c0_5, %c0_6] : memref<4x32xf32, #tpu.memory_space<vmem>>, vector<4x32xf32>
    %4 = tpu.iota {dimensions = array<i32: 0>} : vector<4x32xi32>
    %5 = tpu.iota {dimensions = array<i32: 1>} : vector<4x32xi32>
    %c8_i32 = arith.constant 8 : i32
    %6 = vector.broadcast %c8_i32 : i32 to vector<4x32xi32>
    %7 = arith.muli %4, %6 : vector<4x32xi32>
    %8 = arith.cmpi sge, %5, %7 : vector<4x32xi32>
    %c1_i32 = arith.constant 1 : i32
    %9 = vector.broadcast %c1_i32 : i32 to vector<4x32xi32>
    %10 = arith.addi %4, %9 : vector<4x32xi32>
    %c8_i32_7 = arith.constant 8 : i32
    %11 = vector.broadcast %c8_i32_7 : i32 to vector<4x32xi32>
    %12 = arith.muli %10, %11 : vector<4x32xi32>
    %13 = arith.cmpi slt, %5, %12 : vector<4x32xi32>
    %14 = arith.andi %8, %13 : vector<4x32xi1>
    %15 = arith.extui %14 : vector<4x32xi1> to vector<4x32xi32>
    %16 = arith.sitofp %15 : vector<4x32xi32> to vector<4x32xf32>
    %c0_8 = arith.constant 0 : index
    %c0_9 = arith.constant 0 : index
    %17 = vector.load %arg9[%c0_8, %c0_9] : memref<32x32xf32, #tpu.memory_space<vmem>>, vector<32x32xf32>
    %cst = arith.constant dense<0.000000e+00> : vector<72x32xf32>
    %18 = tpu.matmul %0, %17, %cst {dimension_numbers = #tpu.dot_dimension_numbers<[1], [0], [0], [1], [0, 0, 1, 1], [], []>} : vector<72x32xf32>, vector<32x32xf32>, vector<72x32xf32> -> vector<72x32xf32>
    %c0_10 = arith.constant 0 : index
    %c0_11 = arith.constant 0 : index
    %19 = vector.load %arg6[%c0_10, %c0_11] : memref<8x8xi32, #tpu.memory_space<vmem>>, vector<8x8xi32>
    %c0_i32 = arith.constant 0 : i32
    %20 = vector.broadcast %c0_i32 : i32 to vector<8x8xi32>
    %21 = arith.cmpi ne, %19, %20 : vector<8x8xi32>
    %c0_12 = arith.constant 0 : index
    %c0_13 = arith.constant 0 : index
    %22 = vector.load %arg4[%c0_12, %c0_13] : memref<8x8xi32, #tpu.memory_space<vmem>>, vector<8x8xi32>
    %c0_i32_14 = arith.constant 0 : i32
    %23 = vector.broadcast %c0_i32_14 : i32 to vector<8x8xi32>
    %24 = arith.select %21, %22, %23 : vector<8x8xi1>, vector<8x8xi32>
    %c0_15 = arith.constant 0 : index
    %c0_16 = arith.constant 0 : index
    %25 = vector.load %arg5[%c0_15, %c0_16] : memref<8x8xi32, #tpu.memory_space<vmem>>, vector<8x8xi32>
    %c0_i32_17 = arith.constant 0 : i32
    %26 = vector.broadcast %c0_i32_17 : i32 to vector<8x8xi32>
    %27 = arith.select %21, %25, %26 : vector<8x8xi1>, vector<8x8xi32>
    %28 = tpu.iota {dimensions = array<i32: 0>} : vector<8x8xi32>
    %c9_i32 = arith.constant 9 : i32
    %29 = vector.broadcast %c9_i32 : i32 to vector<8x8xi32>
    %30 = arith.muli %28, %29 : vector<8x8xi32>
    %31 = arith.addi %30, %24 : vector<8x8xi32>
    %c9_i32_18 = arith.constant 9 : i32
    %32 = vector.broadcast %c9_i32_18 : i32 to vector<8x8xi32>
    %33 = arith.muli %28, %32 : vector<8x8xi32>
    %34 = arith.addi %33, %27 : vector<8x8xi32>
    %35 = tpu.iota {dimensions = array<i32: 2>} : vector<8x8x72xi32>
    %36 = vector.shape_cast %31 : vector<8x8xi32> to vector<8x8x1xi32>
    %37 = vector.broadcast %36 : vector<8x8x1xi32> to vector<8x8x72xi32>
    %38 = arith.cmpi eq, %35, %37 : vector<8x8x72xi32>
    %39 = arith.extui %38 : vector<8x8x72xi1> to vector<8x8x72xi32>
    %40 = arith.sitofp %39 : vector<8x8x72xi32> to vector<8x8x72xf32>
    %41 = vector.shape_cast %34 : vector<8x8xi32> to vector<8x8x1xi32>
    %42 = vector.broadcast %41 : vector<8x8x1xi32> to vector<8x8x72xi32>
    %43 = arith.cmpi eq, %35, %42 : vector<8x8x72xi32>
    %44 = arith.extui %43 : vector<8x8x72xi1> to vector<8x8x72xi32>
    %45 = arith.sitofp %44 : vector<8x8x72xi32> to vector<8x8x72xf32>
    %c0_19 = arith.constant 0 : index
    %c0_20 = arith.constant 0 : index
    %46 = vector.load %arg10[%c0_19, %c0_20] : memref<2x32xf32, #tpu.memory_space<vmem>>, vector<2x32xf32>
    %cst_21 = arith.constant dense<0.000000e+00> : vector<2x72xf32>
    %47 = tpu.matmul %46, %18, %cst_21 {dimension_numbers = #tpu.dot_dimension_numbers<[1], [1], [0], [0], [0, 0, 1, 0], [], []>} : vector<2x32xf32>, vector<72x32xf32>, vector<2x72xf32> -> vector<2x72xf32>
    %48 = vector.extract_strided_slice %47 {offsets = [0, 0], sizes = [1, 72], strides = [1, 1]} : vector<2x72xf32> to vector<1x72xf32>
    %49 = vector.shape_cast %48 : vector<1x72xf32> to vector<1x1x72xf32>
    %50 = vector.broadcast %49 : vector<1x1x72xf32> to vector<8x8x72xf32>
    %51 = arith.mulf %40, %50 : vector<8x8x72xf32>
    %cst_22 = arith.constant dense<0.000000e+00> : vector<8x8xf32>
    %52 = vector.multi_reduction <add>, %51, %cst_22 [2] : vector<8x8x72xf32> to vector<8x8xf32>
    %53 = vector.extract_strided_slice %47 {offsets = [1, 0], sizes = [1, 72], strides = [1, 1]} : vector<2x72xf32> to vector<1x72xf32>
    %54 = vector.shape_cast %53 : vector<1x72xf32> to vector<1x1x72xf32>
    %55 = vector.broadcast %54 : vector<1x1x72xf32> to vector<8x8x72xf32>
    %56 = arith.mulf %45, %55 : vector<8x8x72xf32>
    %cst_23 = arith.constant dense<0.000000e+00> : vector<8x8xf32>
    %57 = vector.multi_reduction <add>, %56, %cst_23 [2] : vector<8x8x72xf32> to vector<8x8xf32>
    %c0_24 = arith.constant 0 : index
    %c0_25 = arith.constant 0 : index
    %c0_26 = arith.constant 0 : index
    %58 = vector.load %arg3[%c0_24, %c0_25, %c0_26] : memref<8x8x8xf32, #tpu.memory_space<vmem>>, vector<8x8x8xf32>
    %c0_27 = arith.constant 0 : index
    %c0_28 = arith.constant 0 : index
    %59 = vector.load %arg11[%c0_27, %c0_28] : memref<1x8xf32, #tpu.memory_space<vmem>>, vector<1x8xf32>
    %60 = vector.shape_cast %59 : vector<1x8xf32> to vector<1x1x8xf32>
    %61 = vector.broadcast %60 : vector<1x1x8xf32> to vector<8x8x8xf32>
    %62 = arith.mulf %58, %61 : vector<8x8x8xf32>
    %cst_29 = arith.constant dense<0.000000e+00> : vector<8x8xf32>
    %63 = vector.multi_reduction <add>, %62, %cst_29 [2] : vector<8x8x8xf32> to vector<8x8xf32>
    %64 = arith.addf %52, %57 : vector<8x8xf32>
    %65 = arith.addf %64, %63 : vector<8x8xf32>
    %cst_30 = arith.constant 0.000000e+00 : f32
    %66 = vector.broadcast %cst_30 : f32 to vector<8x8xf32>
    %67 = arith.cmpf ogt, %65, %66 : vector<8x8xf32>
    %cst_31 = arith.constant 2.000000e-01 : f32
    %68 = vector.broadcast %cst_31 : f32 to vector<8x8xf32>
    %69 = arith.mulf %68, %65 : vector<8x8xf32>
    %70 = arith.select %67, %65, %69 : vector<8x8xi1>, vector<8x8xf32>
    %cst_32 = arith.constant -1.000000e+30 : f32
    %71 = vector.broadcast %cst_32 : f32 to vector<8x8xf32>
    %72 = arith.select %21, %70, %71 : vector<8x8xi1>, vector<8x8xf32>
    %cst_33 = arith.constant 1.000000e+00 : f32
    %cst_34 = arith.constant 0.000000e+00 : f32
    %73 = vector.broadcast %cst_33 : f32 to vector<8x8xf32>
    %74 = vector.broadcast %cst_34 : f32 to vector<8x8xf32>
    %75 = arith.select %21, %73, %74 : vector<8x8xi1>, vector<8x8xf32>
    %cst_35 = arith.constant dense<0xFF800000> : vector<8xf32>
    %76 = vector.multi_reduction <maximumf>, %75, %cst_35 [1] : vector<8x8xf32> to vector<8xf32>
    %cst_36 = arith.constant 0.000000e+00 : f32
    %77 = vector.broadcast %cst_36 : f32 to vector<8xf32>
    %78 = arith.cmpf ogt, %76, %77 : vector<8xf32>
    %79 = vector.shape_cast %78 : vector<8xi1> to vector<8x1xi1>
    %cst_37 = arith.constant 0.000000e+00 : f32
    %80 = vector.shape_cast %79 : vector<8x1xi1> to vector<8x1xi1>
    %81 = vector.broadcast %80 : vector<8x1xi1> to vector<8x8xi1>
    %82 = vector.broadcast %cst_37 : f32 to vector<8x8xf32>
    %83 = arith.select %81, %72, %82 : vector<8x8xi1>, vector<8x8xf32>
    %cst_38 = arith.constant dense<0xFF800000> : vector<8xf32>
    %84 = vector.multi_reduction <maximumf>, %83, %cst_38 [1] : vector<8x8xf32> to vector<8xf32>
    %85 = vector.shape_cast %84 : vector<8xf32> to vector<8x1xf32>
    %86 = vector.broadcast %85 : vector<8x1xf32> to vector<8x8xf32>
    %87 = arith.subf %83, %86 : vector<8x8xf32>
    %88 = math.exp %87 : vector<8x8xf32>
    %cst_39 = arith.constant dense<0.000000e+00> : vector<8xf32>
    %89 = vector.multi_reduction <add>, %88, %cst_39 [1] : vector<8x8xf32> to vector<8xf32>
    %90 = vector.shape_cast %89 : vector<8xf32> to vector<8x1xf32>
    %91 = vector.broadcast %90 : vector<8x1xf32> to vector<8x8xf32>
    %92 = arith.divf %88, %91 : vector<8x8xf32>
    %93 = vector.shape_cast %40 : vector<8x8x72xf32> to vector<64x72xf32>
    %94 = vector.shape_cast %92 : vector<8x8xf32> to vector<8x8x1xf32>
    %95 = vector.broadcast %94 : vector<8x8x1xf32> to vector<8x8x72xf32>
    %96 = arith.mulf %45, %95 : vector<8x8x72xf32>
    %97 = vector.shape_cast %96 : vector<8x8x72xf32> to vector<64x72xf32>
    %98 = tpu.transpose %97, [1, 0] : vector<64x72xf32> -> vector<72x64xf32>
    %cst_40 = arith.constant dense<0.000000e+00> : vector<72x72xf32>
    %99 = tpu.matmul %98, %93, %cst_40 {dimension_numbers = #tpu.dot_dimension_numbers<[1], [0], [0], [1], [0, 0, 1, 1], [], []>} : vector<72x64xf32>, vector<64x72xf32>, vector<72x72xf32> -> vector<72x72xf32>
    %100 = tpu.transpose %99, [1, 0] : vector<72x72xf32> -> vector<72x72xf32>
    %101 = arith.addf %99, %100 : vector<72x72xf32>
    %cst_41 = arith.constant dense<0.000000e+00> : vector<72x32xf32>
    %102 = tpu.matmul %101, %18, %cst_41 {dimension_numbers = #tpu.dot_dimension_numbers<[1], [0], [0], [1], [0, 0, 1, 1], [], []>} : vector<72x72xf32>, vector<72x32xf32>, vector<72x32xf32> -> vector<72x32xf32>
    %cst_42 = arith.constant 0.000000e+00 : f32
    %103 = vector.broadcast %cst_42 : f32 to vector<72x32xf32>
    %104 = arith.cmpf ogt, %102, %103 : vector<72x32xf32>
    %cst_43 = arith.constant 0.000000e+00 : f32
    %105 = vector.broadcast %cst_43 : f32 to vector<72x32xf32>
    %106 = arith.minimumf %102, %105 : vector<72x32xf32>
    %107 = math.exp %106 : vector<72x32xf32>
    %cst_44 = arith.constant 1.000000e+00 : f32
    %108 = vector.broadcast %cst_44 : f32 to vector<72x32xf32>
    %109 = arith.subf %107, %108 : vector<72x32xf32>
    %110 = arith.select %104, %102, %109 : vector<72x32xi1>, vector<72x32xf32>
    %cst_45 = arith.constant dense<0.000000e+00> : vector<72xf32>
    %111 = vector.multi_reduction <add>, %110, %cst_45 [1] : vector<72x32xf32> to vector<72xf32>
    %112 = vector.shape_cast %111 : vector<72xf32> to vector<72x1xf32>
    %cst_46 = arith.constant 3.200000e+01 : f32
    %113 = vector.broadcast %cst_46 : f32 to vector<72x1xf32>
    %114 = arith.divf %112, %113 : vector<72x1xf32>
    %115 = vector.broadcast %114 : vector<72x1xf32> to vector<72x32xf32>
    %116 = arith.subf %110, %115 : vector<72x32xf32>
    %117 = arith.mulf %116, %116 : vector<72x32xf32>
    %cst_47 = arith.constant dense<0.000000e+00> : vector<72xf32>
    %118 = vector.multi_reduction <add>, %117, %cst_47 [1] : vector<72x32xf32> to vector<72xf32>
    %119 = vector.shape_cast %118 : vector<72xf32> to vector<72x1xf32>
    %cst_48 = arith.constant 3.200000e+01 : f32
    %120 = vector.broadcast %cst_48 : f32 to vector<72x1xf32>
    %121 = arith.divf %119, %120 : vector<72x1xf32>
    %122 = vector.broadcast %114 : vector<72x1xf32> to vector<72x32xf32>
    %123 = arith.subf %110, %122 : vector<72x32xf32>
    %cst_49 = arith.constant 2.500000e-06 : f32
    %124 = vector.broadcast %cst_49 : f32 to vector<72x1xf32>
    %125 = arith.addf %121, %124 : vector<72x1xf32>
    %126 = math.rsqrt %125 : vector<72x1xf32>
    %127 = vector.broadcast %126 : vector<72x1xf32> to vector<72x32xf32>
    %128 = arith.mulf %123, %127 : vector<72x32xf32>
    %129 = vector.extract_strided_slice %2 {offsets = [0, 0], sizes = [1, 32], strides = [1, 1]} : vector<4x32xf32> to vector<1x32xf32>
    %130 = vector.broadcast %129 : vector<1x32xf32> to vector<72x32xf32>
    %131 = arith.mulf %128, %130 : vector<72x32xf32>
    %132 = vector.extract_strided_slice %3 {offsets = [0, 0], sizes = [1, 32], strides = [1, 1]} : vector<4x32xf32> to vector<1x32xf32>
    %133 = vector.broadcast %132 : vector<1x32xf32> to vector<72x32xf32>
    %134 = arith.addf %131, %133 : vector<72x32xf32>
    %c0_50 = arith.constant 0 : index
    %c0_51 = arith.constant 0 : index
    %c0_52 = arith.constant 0 : index
    %135 = vector.load %arg7[%c0_50, %c0_51, %c0_52] : memref<1x72x72xf32, #tpu.memory_space<vmem>>, vector<1x72x72xf32>
    %136 = vector.shape_cast %135 : vector<1x72x72xf32> to vector<72x72xf32>
    %c0_53 = arith.constant 0 : index
    %c0_54 = arith.constant 0 : index
    %c0_55 = arith.constant 0 : index
    %137 = vector.load %arg12[%c0_53, %c0_54, %c0_55] : memref<4x32x32xf32, #tpu.memory_space<vmem>>, vector<1x32x32xf32>
    %138 = vector.shape_cast %137 : vector<1x32x32xf32> to vector<32x32xf32>
    %cst_56 = arith.constant dense<0.000000e+00> : vector<72x32xf32>
    %139 = tpu.matmul %134, %138, %cst_56 {dimension_numbers = #tpu.dot_dimension_numbers<[1], [0], [0], [1], [0, 0, 1, 1], [], []>} : vector<72x32xf32>, vector<32x32xf32>, vector<72x32xf32> -> vector<72x32xf32>
    %c1 = arith.constant 1 : index
    %c0_57 = arith.constant 0 : index
    %c0_58 = arith.constant 0 : index
    %140 = vector.load %arg12[%c1, %c0_57, %c0_58] : memref<4x32x32xf32, #tpu.memory_space<vmem>>, vector<1x32x32xf32>
    %141 = vector.shape_cast %140 : vector<1x32x32xf32> to vector<32x32xf32>
    %cst_59 = arith.constant dense<0.000000e+00> : vector<72x32xf32>
    %142 = tpu.matmul %134, %141, %cst_59 {dimension_numbers = #tpu.dot_dimension_numbers<[1], [0], [0], [1], [0, 0, 1, 1], [], []>} : vector<72x32xf32>, vector<32x32xf32>, vector<72x32xf32> -> vector<72x32xf32>
    %c2 = arith.constant 2 : index
    %c0_60 = arith.constant 0 : index
    %c0_61 = arith.constant 0 : index
    %143 = vector.load %arg12[%c2, %c0_60, %c0_61] : memref<4x32x32xf32, #tpu.memory_space<vmem>>, vector<1x32x32xf32>
    %144 = vector.shape_cast %143 : vector<1x32x32xf32> to vector<32x32xf32>
    %cst_62 = arith.constant dense<0.000000e+00> : vector<72x32xf32>
    %145 = tpu.matmul %134, %144, %cst_62 {dimension_numbers = #tpu.dot_dimension_numbers<[1], [0], [0], [1], [0, 0, 1, 1], [], []>} : vector<72x32xf32>, vector<32x32xf32>, vector<72x32xf32> -> vector<72x32xf32>
    %146 = vector.extract_strided_slice %16 {offsets = [0, 0], sizes = [1, 32], strides = [1, 1]} : vector<4x32xf32> to vector<1x32xf32>
    %147 = vector.broadcast %146 : vector<1x32xf32> to vector<72x32xf32>
    %148 = arith.mulf %139, %147 : vector<72x32xf32>
    %149 = vector.extract_strided_slice %16 {offsets = [1, 0], sizes = [1, 32], strides = [1, 1]} : vector<4x32xf32> to vector<1x32xf32>
    %150 = vector.broadcast %149 : vector<1x32xf32> to vector<72x32xf32>
    %151 = arith.mulf %139, %150 : vector<72x32xf32>
    %152 = vector.extract_strided_slice %16 {offsets = [2, 0], sizes = [1, 32], strides = [1, 1]} : vector<4x32xf32> to vector<1x32xf32>
    %153 = vector.broadcast %152 : vector<1x32xf32> to vector<72x32xf32>
    %154 = arith.mulf %139, %153 : vector<72x32xf32>
    %155 = vector.extract_strided_slice %16 {offsets = [3, 0], sizes = [1, 32], strides = [1, 1]} : vector<4x32xf32> to vector<1x32xf32>
    %156 = vector.broadcast %155 : vector<1x32xf32> to vector<72x32xf32>
    %157 = arith.mulf %139, %156 : vector<72x32xf32>
    %158 = tpu.concatenate %148, %151, %154, %157 in 0 : vector<72x32xf32>, vector<72x32xf32>, vector<72x32xf32>, vector<72x32xf32> -> vector<288x32xf32>
    %cst_63 = arith.constant dense<0.000000e+00> : vector<288x72xf32>
    %159 = tpu.matmul %158, %142, %cst_63 {dimension_numbers = #tpu.dot_dimension_numbers<[1], [1], [0], [0], [0, 0, 1, 0], [], []>} : vector<288x32xf32>, vector<72x32xf32>, vector<288x72xf32> -> vector<288x72xf32>
    %cst_64 = arith.constant 0.353553385 : f32
    %160 = vector.broadcast %cst_64 : f32 to vector<288x72xf32>
    %161 = arith.mulf %159, %160 : vector<288x72xf32>
    %162 = vector.shape_cast %161 : vector<288x72xf32> to vector<4x72x72xf32>
    %163 = vector.shape_cast %136 : vector<72x72xf32> to vector<1x72x72xf32>
    %cst_65 = arith.constant -5.000000e-01 : f32
    %164 = vector.broadcast %cst_65 : f32 to vector<1x72x72xf32>
    %165 = arith.cmpf olt, %163, %164 : vector<1x72x72xf32>
    %166 = vector.shape_cast %165 : vector<1x72x72xi1> to vector<1x72x72xi1>
    %167 = vector.broadcast %166 : vector<1x72x72xi1> to vector<4x72x72xi1>
    %168 = vector.shape_cast %163 : vector<1x72x72xf32> to vector<1x72x72xf32>
    %169 = vector.broadcast %168 : vector<1x72x72xf32> to vector<4x72x72xf32>
    %170 = arith.select %167, %169, %162 : vector<4x72x72xi1>, vector<4x72x72xf32>
    %cst_66 = arith.constant dense<0xFF800000> : vector<4x72xf32>
    %171 = vector.multi_reduction <maximumf>, %170, %cst_66 [2] : vector<4x72x72xf32> to vector<4x72xf32>
    %172 = vector.shape_cast %171 : vector<4x72xf32> to vector<4x72x1xf32>
    %173 = vector.broadcast %172 : vector<4x72x1xf32> to vector<4x72x72xf32>
    %174 = arith.subf %170, %173 : vector<4x72x72xf32>
    %175 = math.exp %174 : vector<4x72x72xf32>
    %cst_67 = arith.constant dense<0.000000e+00> : vector<4x72xf32>
    %176 = vector.multi_reduction <add>, %175, %cst_67 [2] : vector<4x72x72xf32> to vector<4x72xf32>
    %177 = vector.shape_cast %176 : vector<4x72xf32> to vector<4x72x1xf32>
    %178 = vector.broadcast %177 : vector<4x72x1xf32> to vector<4x72x72xf32>
    %179 = arith.divf %175, %178 : vector<4x72x72xf32>
    %180 = vector.shape_cast %179 : vector<4x72x72xf32> to vector<288x72xf32>
    %cst_68 = arith.constant dense<0.000000e+00> : vector<288x32xf32>
    %181 = tpu.matmul %180, %145, %cst_68 {dimension_numbers = #tpu.dot_dimension_numbers<[1], [0], [0], [1], [0, 0, 1, 1], [], []>} : vector<288x72xf32>, vector<72x32xf32>, vector<288x32xf32> -> vector<288x32xf32>
    %182 = vector.shape_cast %181 : vector<288x32xf32> to vector<4x72x32xf32>
    %183 = vector.shape_cast %16 : vector<4x32xf32> to vector<4x1x32xf32>
    %184 = vector.broadcast %183 : vector<4x1x32xf32> to vector<4x72x32xf32>
    %185 = arith.mulf %182, %184 : vector<4x72x32xf32>
    %cst_69 = arith.constant dense<0.000000e+00> : vector<72x32xf32>
    %186 = vector.multi_reduction <add>, %185, %cst_69 [0] : vector<4x72x32xf32> to vector<72x32xf32>
    %c3 = arith.constant 3 : index
    %c0_70 = arith.constant 0 : index
    %c0_71 = arith.constant 0 : index
    %187 = vector.load %arg12[%c3, %c0_70, %c0_71] : memref<4x32x32xf32, #tpu.memory_space<vmem>>, vector<1x32x32xf32>
    %188 = vector.shape_cast %187 : vector<1x32x32xf32> to vector<32x32xf32>
    %cst_72 = arith.constant dense<0.000000e+00> : vector<72x32xf32>
    %189 = tpu.matmul %186, %188, %cst_72 {dimension_numbers = #tpu.dot_dimension_numbers<[1], [0], [0], [1], [0, 0, 1, 1], [], []>} : vector<72x32xf32>, vector<32x32xf32>, vector<72x32xf32> -> vector<72x32xf32>
    %cst_73 = arith.constant dense<0.000000e+00> : vector<72xf32>
    %190 = vector.multi_reduction <add>, %189, %cst_73 [1] : vector<72x32xf32> to vector<72xf32>
    %191 = vector.shape_cast %190 : vector<72xf32> to vector<72x1xf32>
    %cst_74 = arith.constant 3.200000e+01 : f32
    %192 = vector.broadcast %cst_74 : f32 to vector<72x1xf32>
    %193 = arith.divf %191, %192 : vector<72x1xf32>
    %194 = vector.broadcast %193 : vector<72x1xf32> to vector<72x32xf32>
    %195 = arith.subf %189, %194 : vector<72x32xf32>
    %196 = arith.mulf %195, %195 : vector<72x32xf32>
    %cst_75 = arith.constant dense<0.000000e+00> : vector<72xf32>
    %197 = vector.multi_reduction <add>, %196, %cst_75 [1] : vector<72x32xf32> to vector<72xf32>
    %198 = vector.shape_cast %197 : vector<72xf32> to vector<72x1xf32>
    %cst_76 = arith.constant 3.200000e+01 : f32
    %199 = vector.broadcast %cst_76 : f32 to vector<72x1xf32>
    %200 = arith.divf %198, %199 : vector<72x1xf32>
    %201 = vector.broadcast %193 : vector<72x1xf32> to vector<72x32xf32>
    %202 = arith.subf %189, %201 : vector<72x32xf32>
    %cst_77 = arith.constant 2.500000e-06 : f32
    %203 = vector.broadcast %cst_77 : f32 to vector<72x1xf32>
    %204 = arith.addf %200, %203 : vector<72x1xf32>
    %205 = math.rsqrt %204 : vector<72x1xf32>
    %206 = vector.broadcast %205 : vector<72x1xf32> to vector<72x32xf32>
    %207 = arith.mulf %202, %206 : vector<72x32xf32>
    %208 = vector.extract_strided_slice %2 {offsets = [1, 0], sizes = [1, 32], strides = [1, 1]} : vector<4x32xf32> to vector<1x32xf32>
    %209 = vector.broadcast %208 : vector<1x32xf32> to vector<72x32xf32>
    %210 = arith.mulf %207, %209 : vector<72x32xf32>
    %211 = vector.extract_strided_slice %3 {offsets = [1, 0], sizes = [1, 32], strides = [1, 1]} : vector<4x32xf32> to vector<1x32xf32>
    %212 = vector.broadcast %211 : vector<1x32xf32> to vector<72x32xf32>
    %213 = arith.addf %210, %212 : vector<72x32xf32>
    %c0_78 = arith.constant 0 : index
    %c0_79 = arith.constant 0 : index
    %c0_80 = arith.constant 0 : index
    %214 = vector.load %arg8[%c0_78, %c0_79, %c0_80] : memref<1x72x72xf32, #tpu.memory_space<vmem>>, vector<1x72x72xf32>
    %215 = vector.shape_cast %214 : vector<1x72x72xf32> to vector<72x72xf32>
    %c0_81 = arith.constant 0 : index
    %c0_82 = arith.constant 0 : index
    %c0_83 = arith.constant 0 : index
    %216 = vector.load %arg13[%c0_81, %c0_82, %c0_83] : memref<4x32x32xf32, #tpu.memory_space<vmem>>, vector<1x32x32xf32>
    %217 = vector.shape_cast %216 : vector<1x32x32xf32> to vector<32x32xf32>
    %cst_84 = arith.constant dense<0.000000e+00> : vector<72x32xf32>
    %218 = tpu.matmul %213, %217, %cst_84 {dimension_numbers = #tpu.dot_dimension_numbers<[1], [0], [0], [1], [0, 0, 1, 1], [], []>} : vector<72x32xf32>, vector<32x32xf32>, vector<72x32xf32> -> vector<72x32xf32>
    %c1_85 = arith.constant 1 : index
    %c0_86 = arith.constant 0 : index
    %c0_87 = arith.constant 0 : index
    %219 = vector.load %arg13[%c1_85, %c0_86, %c0_87] : memref<4x32x32xf32, #tpu.memory_space<vmem>>, vector<1x32x32xf32>
    %220 = vector.shape_cast %219 : vector<1x32x32xf32> to vector<32x32xf32>
    %cst_88 = arith.constant dense<0.000000e+00> : vector<72x32xf32>
    %221 = tpu.matmul %1, %220, %cst_88 {dimension_numbers = #tpu.dot_dimension_numbers<[1], [0], [0], [1], [0, 0, 1, 1], [], []>} : vector<72x32xf32>, vector<32x32xf32>, vector<72x32xf32> -> vector<72x32xf32>
    %c2_89 = arith.constant 2 : index
    %c0_90 = arith.constant 0 : index
    %c0_91 = arith.constant 0 : index
    %222 = vector.load %arg13[%c2_89, %c0_90, %c0_91] : memref<4x32x32xf32, #tpu.memory_space<vmem>>, vector<1x32x32xf32>
    %223 = vector.shape_cast %222 : vector<1x32x32xf32> to vector<32x32xf32>
    %cst_92 = arith.constant dense<0.000000e+00> : vector<72x32xf32>
    %224 = tpu.matmul %1, %223, %cst_92 {dimension_numbers = #tpu.dot_dimension_numbers<[1], [0], [0], [1], [0, 0, 1, 1], [], []>} : vector<72x32xf32>, vector<32x32xf32>, vector<72x32xf32> -> vector<72x32xf32>
    %225 = vector.extract_strided_slice %16 {offsets = [0, 0], sizes = [1, 32], strides = [1, 1]} : vector<4x32xf32> to vector<1x32xf32>
    %226 = vector.broadcast %225 : vector<1x32xf32> to vector<72x32xf32>
    %227 = arith.mulf %218, %226 : vector<72x32xf32>
    %228 = vector.extract_strided_slice %16 {offsets = [1, 0], sizes = [1, 32], strides = [1, 1]} : vector<4x32xf32> to vector<1x32xf32>
    %229 = vector.broadcast %228 : vector<1x32xf32> to vector<72x32xf32>
    %230 = arith.mulf %218, %229 : vector<72x32xf32>
    %231 = vector.extract_strided_slice %16 {offsets = [2, 0], sizes = [1, 32], strides = [1, 1]} : vector<4x32xf32> to vector<1x32xf32>
    %232 = vector.broadcast %231 : vector<1x32xf32> to vector<72x32xf32>
    %233 = arith.mulf %218, %232 : vector<72x32xf32>
    %234 = vector.extract_strided_slice %16 {offsets = [3, 0], sizes = [1, 32], strides = [1, 1]} : vector<4x32xf32> to vector<1x32xf32>
    %235 = vector.broadcast %234 : vector<1x32xf32> to vector<72x32xf32>
    %236 = arith.mulf %218, %235 : vector<72x32xf32>
    %237 = tpu.concatenate %227, %230, %233, %236 in 0 : vector<72x32xf32>, vector<72x32xf32>, vector<72x32xf32>, vector<72x32xf32> -> vector<288x32xf32>
    %cst_93 = arith.constant dense<0.000000e+00> : vector<288x72xf32>
    %238 = tpu.matmul %237, %221, %cst_93 {dimension_numbers = #tpu.dot_dimension_numbers<[1], [1], [0], [0], [0, 0, 1, 0], [], []>} : vector<288x32xf32>, vector<72x32xf32>, vector<288x72xf32> -> vector<288x72xf32>
    %cst_94 = arith.constant 0.353553385 : f32
    %239 = vector.broadcast %cst_94 : f32 to vector<288x72xf32>
    %240 = arith.mulf %238, %239 : vector<288x72xf32>
    %241 = vector.shape_cast %240 : vector<288x72xf32> to vector<4x72x72xf32>
    %242 = vector.shape_cast %215 : vector<72x72xf32> to vector<1x72x72xf32>
    %cst_95 = arith.constant -5.000000e-01 : f32
    %243 = vector.broadcast %cst_95 : f32 to vector<1x72x72xf32>
    %244 = arith.cmpf olt, %242, %243 : vector<1x72x72xf32>
    %245 = vector.shape_cast %244 : vector<1x72x72xi1> to vector<1x72x72xi1>
    %246 = vector.broadcast %245 : vector<1x72x72xi1> to vector<4x72x72xi1>
    %247 = vector.shape_cast %242 : vector<1x72x72xf32> to vector<1x72x72xf32>
    %248 = vector.broadcast %247 : vector<1x72x72xf32> to vector<4x72x72xf32>
    %249 = arith.select %246, %248, %241 : vector<4x72x72xi1>, vector<4x72x72xf32>
    %cst_96 = arith.constant dense<0xFF800000> : vector<4x72xf32>
    %250 = vector.multi_reduction <maximumf>, %249, %cst_96 [2] : vector<4x72x72xf32> to vector<4x72xf32>
    %251 = vector.shape_cast %250 : vector<4x72xf32> to vector<4x72x1xf32>
    %252 = vector.broadcast %251 : vector<4x72x1xf32> to vector<4x72x72xf32>
    %253 = arith.subf %249, %252 : vector<4x72x72xf32>
    %254 = math.exp %253 : vector<4x72x72xf32>
    %cst_97 = arith.constant dense<0.000000e+00> : vector<4x72xf32>
    %255 = vector.multi_reduction <add>, %254, %cst_97 [2] : vector<4x72x72xf32> to vector<4x72xf32>
    %256 = vector.shape_cast %255 : vector<4x72xf32> to vector<4x72x1xf32>
    %257 = vector.broadcast %256 : vector<4x72x1xf32> to vector<4x72x72xf32>
    %258 = arith.divf %254, %257 : vector<4x72x72xf32>
    %259 = vector.shape_cast %258 : vector<4x72x72xf32> to vector<288x72xf32>
    %cst_98 = arith.constant dense<0.000000e+00> : vector<288x32xf32>
    %260 = tpu.matmul %259, %224, %cst_98 {dimension_numbers = #tpu.dot_dimension_numbers<[1], [0], [0], [1], [0, 0, 1, 1], [], []>} : vector<288x72xf32>, vector<72x32xf32>, vector<288x32xf32> -> vector<288x32xf32>
    %261 = vector.shape_cast %260 : vector<288x32xf32> to vector<4x72x32xf32>
    %262 = vector.shape_cast %16 : vector<4x32xf32> to vector<4x1x32xf32>
    %263 = vector.broadcast %262 : vector<4x1x32xf32> to vector<4x72x32xf32>
    %264 = arith.mulf %261, %263 : vector<4x72x32xf32>
    %cst_99 = arith.constant dense<0.000000e+00> : vector<72x32xf32>
    %265 = vector.multi_reduction <add>, %264, %cst_99 [0] : vector<4x72x32xf32> to vector<72x32xf32>
    %c3_100 = arith.constant 3 : index
    %c0_101 = arith.constant 0 : index
    %c0_102 = arith.constant 0 : index
    %266 = vector.load %arg13[%c3_100, %c0_101, %c0_102] : memref<4x32x32xf32, #tpu.memory_space<vmem>>, vector<1x32x32xf32>
    %267 = vector.shape_cast %266 : vector<1x32x32xf32> to vector<32x32xf32>
    %cst_103 = arith.constant dense<0.000000e+00> : vector<72x32xf32>
    %268 = tpu.matmul %265, %267, %cst_103 {dimension_numbers = #tpu.dot_dimension_numbers<[1], [0], [0], [1], [0, 0, 1, 1], [], []>} : vector<72x32xf32>, vector<32x32xf32>, vector<72x32xf32> -> vector<72x32xf32>
    %cst_104 = arith.constant dense<0.000000e+00> : vector<72xf32>
    %269 = vector.multi_reduction <add>, %268, %cst_104 [1] : vector<72x32xf32> to vector<72xf32>
    %270 = vector.shape_cast %269 : vector<72xf32> to vector<72x1xf32>
    %cst_105 = arith.constant 3.200000e+01 : f32
    %271 = vector.broadcast %cst_105 : f32 to vector<72x1xf32>
    %272 = arith.divf %270, %271 : vector<72x1xf32>
    %273 = vector.broadcast %272 : vector<72x1xf32> to vector<72x32xf32>
    %274 = arith.subf %268, %273 : vector<72x32xf32>
    %275 = arith.mulf %274, %274 : vector<72x32xf32>
    %cst_106 = arith.constant dense<0.000000e+00> : vector<72xf32>
    %276 = vector.multi_reduction <add>, %275, %cst_106 [1] : vector<72x32xf32> to vector<72xf32>
    %277 = vector.shape_cast %276 : vector<72xf32> to vector<72x1xf32>
    %cst_107 = arith.constant 3.200000e+01 : f32
    %278 = vector.broadcast %cst_107 : f32 to vector<72x1xf32>
    %279 = arith.divf %277, %278 : vector<72x1xf32>
    %280 = vector.broadcast %272 : vector<72x1xf32> to vector<72x32xf32>
    %281 = arith.subf %268, %280 : vector<72x32xf32>
    %cst_108 = arith.constant 2.500000e-06 : f32
    %282 = vector.broadcast %cst_108 : f32 to vector<72x1xf32>
    %283 = arith.addf %279, %282 : vector<72x1xf32>
    %284 = math.rsqrt %283 : vector<72x1xf32>
    %285 = vector.broadcast %284 : vector<72x1xf32> to vector<72x32xf32>
    %286 = arith.mulf %281, %285 : vector<72x32xf32>
    %287 = vector.extract_strided_slice %2 {offsets = [2, 0], sizes = [1, 32], strides = [1, 1]} : vector<4x32xf32> to vector<1x32xf32>
    %288 = vector.broadcast %287 : vector<1x32xf32> to vector<72x32xf32>
    %289 = arith.mulf %286, %288 : vector<72x32xf32>
    %290 = vector.extract_strided_slice %3 {offsets = [2, 0], sizes = [1, 32], strides = [1, 1]} : vector<4x32xf32> to vector<1x32xf32>
    %291 = vector.broadcast %290 : vector<1x32xf32> to vector<72x32xf32>
    %292 = arith.addf %289, %291 : vector<72x32xf32>
    %c0_109 = arith.constant 0 : index
    %c0_110 = arith.constant 0 : index
    %293 = vector.load %arg14[%c0_109, %c0_110] : memref<32x64xf32, #tpu.memory_space<vmem>>, vector<32x64xf32>
    %cst_111 = arith.constant dense<0.000000e+00> : vector<72x64xf32>
    %294 = tpu.matmul %292, %293, %cst_111 {dimension_numbers = #tpu.dot_dimension_numbers<[1], [0], [0], [1], [0, 0, 1, 1], [], []>} : vector<72x32xf32>, vector<32x64xf32>, vector<72x64xf32> -> vector<72x64xf32>
    %c0_112 = arith.constant 0 : index
    %c0_113 = arith.constant 0 : index
    %295 = vector.load %arg15[%c0_112, %c0_113] : memref<1x64xf32, #tpu.memory_space<vmem>>, vector<1x64xf32>
    %296 = vector.broadcast %295 : vector<1x64xf32> to vector<72x64xf32>
    %297 = arith.addf %294, %296 : vector<72x64xf32>
    %cst_114 = arith.constant 0.000000e+00 : f32
    %298 = vector.broadcast %cst_114 : f32 to vector<72x64xf32>
    %299 = arith.maximumf %297, %298 : vector<72x64xf32>
    %c0_115 = arith.constant 0 : index
    %c0_116 = arith.constant 0 : index
    %300 = vector.load %arg16[%c0_115, %c0_116] : memref<64x32xf32, #tpu.memory_space<vmem>>, vector<64x32xf32>
    %cst_117 = arith.constant dense<0.000000e+00> : vector<72x32xf32>
    %301 = tpu.matmul %299, %300, %cst_117 {dimension_numbers = #tpu.dot_dimension_numbers<[1], [0], [0], [1], [0, 0, 1, 1], [], []>} : vector<72x64xf32>, vector<64x32xf32>, vector<72x32xf32> -> vector<72x32xf32>
    %c0_118 = arith.constant 0 : index
    %c0_119 = arith.constant 0 : index
    %302 = vector.load %arg17[%c0_118, %c0_119] : memref<1x32xf32, #tpu.memory_space<vmem>>, vector<1x32xf32>
    %303 = vector.broadcast %302 : vector<1x32xf32> to vector<72x32xf32>
    %304 = arith.addf %301, %303 : vector<72x32xf32>
    %cst_120 = arith.constant dense<0.000000e+00> : vector<72xf32>
    %305 = vector.multi_reduction <add>, %304, %cst_120 [1] : vector<72x32xf32> to vector<72xf32>
    %306 = vector.shape_cast %305 : vector<72xf32> to vector<72x1xf32>
    %cst_121 = arith.constant 3.200000e+01 : f32
    %307 = vector.broadcast %cst_121 : f32 to vector<72x1xf32>
    %308 = arith.divf %306, %307 : vector<72x1xf32>
    %309 = vector.broadcast %308 : vector<72x1xf32> to vector<72x32xf32>
    %310 = arith.subf %304, %309 : vector<72x32xf32>
    %311 = arith.mulf %310, %310 : vector<72x32xf32>
    %cst_122 = arith.constant dense<0.000000e+00> : vector<72xf32>
    %312 = vector.multi_reduction <add>, %311, %cst_122 [1] : vector<72x32xf32> to vector<72xf32>
    %313 = vector.shape_cast %312 : vector<72xf32> to vector<72x1xf32>
    %cst_123 = arith.constant 3.200000e+01 : f32
    %314 = vector.broadcast %cst_123 : f32 to vector<72x1xf32>
    %315 = arith.divf %313, %314 : vector<72x1xf32>
    %316 = vector.broadcast %308 : vector<72x1xf32> to vector<72x32xf32>
    %317 = arith.subf %304, %316 : vector<72x32xf32>
    %cst_124 = arith.constant 2.500000e-06 : f32
    %318 = vector.broadcast %cst_124 : f32 to vector<72x1xf32>
    %319 = arith.addf %315, %318 : vector<72x1xf32>
    %320 = math.rsqrt %319 : vector<72x1xf32>
    %321 = vector.broadcast %320 : vector<72x1xf32> to vector<72x32xf32>
    %322 = arith.mulf %317, %321 : vector<72x32xf32>
    %323 = vector.extract_strided_slice %2 {offsets = [3, 0], sizes = [1, 32], strides = [1, 1]} : vector<4x32xf32> to vector<1x32xf32>
    %324 = vector.broadcast %323 : vector<1x32xf32> to vector<72x32xf32>
    %325 = arith.mulf %322, %324 : vector<72x32xf32>
    %326 = vector.extract_strided_slice %3 {offsets = [3, 0], sizes = [1, 32], strides = [1, 1]} : vector<4x32xf32> to vector<1x32xf32>
    %327 = vector.broadcast %326 : vector<1x32xf32> to vector<72x32xf32>
    %328 = arith.addf %325, %327 : vector<72x32xf32>
    %c0_125 = arith.constant 0 : index
    %c0_126 = arith.constant 0 : index
    %329 = vector.load %arg20[%c0_125, %c0_126] : memref<72x32xf32, #tpu.memory_space<vmem>>, vector<72x32xf32>
    tpu.vector_store %arg20[%c0_125, %c0_126], %328 {strides = array<i32>} : memref<72x32xf32, #tpu.memory_space<vmem>>, vector<72x32xf32>,
    return
  }
  func.func @transform_0(%arg0: i32) -> (i32, i32) {
    %c0_i32 = arith.constant 0 : i32
    %c0_i32_0 = arith.constant 0 : i32
    return %arg0, %c0_i32 : i32, i32
  }
  func.func @transform_1(%arg0: i32) -> (i32, i32) {
    %c0_i32 = arith.constant 0 : i32
    %c0_i32_0 = arith.constant 0 : i32
    return %arg0, %c0_i32 : i32, i32
  }
  func.func @transform_2(%arg0: i32) -> (i32, i32, i32) {
    %c0_i32 = arith.constant 0 : i32
    %c0_i32_0 = arith.constant 0 : i32
    %c0_i32_1 = arith.constant 0 : i32
    return %arg0, %c0_i32, %c0_i32_0 : i32, i32, i32
  }
  func.func @transform_3(%arg0: i32) -> (i32, i32) {
    %c0_i32 = arith.constant 0 : i32
    %c0_i32_0 = arith.constant 0 : i32
    return %arg0, %c0_i32 : i32, i32
  }
  func.func @transform_4(%arg0: i32) -> (i32, i32) {
    %c0_i32 = arith.constant 0 : i32
    %c0_i32_0 = arith.constant 0 : i32
    return %arg0, %c0_i32 : i32, i32
  }
  func.func @transform_5(%arg0: i32) -> (i32, i32) {
    %c0_i32 = arith.constant 0 : i32
    %c0_i32_0 = arith.constant 0 : i32
    return %arg0, %c0_i32 : i32, i32
  }
  func.func @transform_6(%arg0: i32) -> (i32, i32, i32) {
    %c0_i32 = arith.constant 0 : i32
    %c0_i32_0 = arith.constant 0 : i32
    %c0_i32_1 = arith.constant 0 : i32
    return %arg0, %c0_i32, %c0_i32_0 : i32, i32, i32
  }
  func.func @transform_7(%arg0: i32) -> (i32, i32, i32) {
    %c0_i32 = arith.constant 0 : i32
    %c0_i32_0 = arith.constant 0 : i32
    %c0_i32_1 = arith.constant 0 : i32
    return %arg0, %c0_i32, %c0_i32_0 : i32, i32, i32
  }
  func.func @transform_8(%arg0: i32) -> (i32, i32) {
    %c0_i32 = arith.constant 0 : i32
    %c0_i32_0 = arith.constant 0 : i32
    %c0_i32_1 = arith.constant 0 : i32
    return %c0_i32, %c0_i32_0 : i32, i32
  }
  func.func @transform_9(%arg0: i32) -> (i32, i32) {
    %c0_i32 = arith.constant 0 : i32
    %c0_i32_0 = arith.constant 0 : i32
    %c0_i32_1 = arith.constant 0 : i32
    return %c0_i32, %c0_i32_0 : i32, i32
  }
  func.func @transform_10(%arg0: i32) -> (i32, i32) {
    %c0_i32 = arith.constant 0 : i32
    %c0_i32_0 = arith.constant 0 : i32
    %c0_i32_1 = arith.constant 0 : i32
    return %c0_i32, %c0_i32_0 : i32, i32
  }
  func.func @transform_11(%arg0: i32) -> (i32, i32, i32) {
    %c0_i32 = arith.constant 0 : i32
    %c0_i32_0 = arith.constant 0 : i32
    %c0_i32_1 = arith.constant 0 : i32
    %c0_i32_2 = arith.constant 0 : i32
    return %c0_i32, %c0_i32_0, %c0_i32_1 : i32, i32, i32
  }
  func.func @transform_12(%arg0: i32) -> (i32, i32, i32) {
    %c0_i32 = arith.constant 0 : i32
    %c0_i32_0 = arith.constant 0 : i32
    %c0_i32_1 = arith.constant 0 : i32
    %c0_i32_2 = arith.constant 0 : i32
    return %c0_i32, %c0_i32_0, %c0_i32_1 : i32, i32, i32
  }
  func.func @transform_13(%arg0: i32) -> (i32, i32) {
    %c0_i32 = arith.constant 0 : i32
    %c0_i32_0 = arith.constant 0 : i32
    %c0_i32_1 = arith.constant 0 : i32
    return %c0_i32, %c0_i32_0 : i32, i32
  }
  func.func @transform_14(%arg0: i32) -> (i32, i32) {
    %c0_i32 = arith.constant 0 : i32
    %c0_i32_0 = arith.constant 0 : i32
    %c0_i32_1 = arith.constant 0 : i32
    return %c0_i32, %c0_i32_0 : i32, i32
  }
  func.func @transform_15(%arg0: i32) -> (i32, i32) {
    %c0_i32 = arith.constant 0 : i32
    %c0_i32_0 = arith.constant 0 : i32
    %c0_i32_1 = arith.constant 0 : i32
    return %c0_i32, %c0_i32_0 : i32, i32
  }
  func.func @transform_16(%arg0: i32) -> (i32, i32) {
    %c0_i32 = arith.constant 0 : i32
    %c0_i32_0 = arith.constant 0 : i32
    %c0_i32_1 = arith.constant 0 : i32
    return %c0_i32, %c0_i32_0 : i32, i32
  }
  func.func @transform_17(%arg0: i32) -> (i32, i32) {
    %c0_i32 = arith.constant 0 : i32
    %c0_i32_0 = arith.constant 0 : i32
    %c0_i32_1 = arith.constant 0 : i32
    return %c0_i32, %c0_i32_0 : i32, i32
  }
  func.func @transform_18(%arg0: i32) -> (i32, i32) {
    %c0_i32 = arith.constant 0 : i32
    %c0_i32_0 = arith.constant 0 : i32
    %c0_i32_1 = arith.constant 0 : i32
    return %c0_i32, %c0_i32_0 : i32, i32
  }
  func.func @transform_19(%arg0: i32) -> (i32, i32) {
    %c0_i32 = arith.constant 0 : i32
    %c0_i32_0 = arith.constant 0 : i32
    return %arg0, %c0_i32 : i32, i32
  }
}

</mosaic_0001>

<bundles_post_ra>
// kernel: tpu_custom_call.1
= control target key start
LH: loop header
LB: loop body
LE: loop exit
PB: predicated region body
PF: predicated region fallthrough
CT: control target
= control target key end

     0   :  { %s10439_s0 = inlined_call_operand.vmem [shape: f32[144,32], index: 0, kind: input, shape index: {}]   ;;  %s10440_s1 = inlined_call_operand.vmem [shape: f32[144,32], index: 1, kind: input, shape index: {}]   ;;  %s10441_s2 = inlined_call_operand.vmem [shape: f32[16,8,8], index: 2, kind: input, shape index: {}]   ;;  %s10442_s3 = inlined_call_operand.vmem [shape: s32[16,8], index: 3, kind: input, shape index: {}]   ;;  %s10443_s4 = inlined_call_operand.vmem [shape: s32[16,8], index: 4, kind: input, shape index: {}]   ;;  %s10444_s5 = inlined_call_operand.vmem [shape: s32[16,8], index: 5, kind: input, shape index: {}]   ;;  %s10445_s6 = inlined_call_operand.vmem [shape: f32[2,72,72], index: 6, kind: input, shape index: {}]   ;;  %s10446_s7 = inlined_call_operand.vmem [shape: f32[2,72,72], index: 7, kind: input, shape index: {}]   ;;  %s10447_s8 = inlined_call_operand.vmem [shape: f32[32,32], index: 8, kind: input, shape index: {}]   ;;  %s10448_s9 = inlined_call_operand.vmem [shape: f32[2,32], index: 9, kind: input, shape index: {}]   ;;  %s10449_s10 = inlined_call_operand.vmem [shape: f32[1,8], index: 10, kind: input, shape index: {}]   ;;  %s10450_s11 = inlined_call_operand.vmem [shape: f32[4,32,32], index: 11, kind: input, shape index: {}]   ;;  %s10451_s12 = inlined_call_operand.hbm [shape: f32[4,32,32], index: 12, kind: input, shape index: {}]   ;;  %s10452_s13 = inlined_call_operand.vmem [shape: f32[32,64], index: 13, kind: input, shape index: {}]   ;;  %s10453_s14 = inlined_call_operand.vmem [shape: f32[1,64], index: 14, kind: input, shape index: {}]   ;;  %s10454_s15 = inlined_call_operand.vmem [shape: f32[64,32], index: 15, kind: input, shape index: {}]   ;;  %s10455_s16 = inlined_call_operand.vmem [shape: f32[1,32], index: 16, kind: input, shape index: {}]   ;;  %s10456_s17 = inlined_call_operand.vmem [shape: f32[4,32], index: 17, kind: input, shape index: {}]   ;;  %s10457_s18 = inlined_call_operand.vmem [shape: f32[4,32], index: 18, kind: input, shape index: {}]   ;;  %s10458_s19 = inlined_call_operand.vmem [shape: f32[144,32], index: 19, kind: output, shape index: {}]  }
   0x1   :  { %10460 = sst [smem:[#allocation5_spill]] %s10439_s0 }
   0x2   :  { %10461 = sst [smem:[#allocation6_spill]] %s10440_s1 }
   0x3   :  { %10462 = sst [smem:[#allocation7_spill]] %s10441_s2 }
   0x4   :  { %10463 = sst [smem:[#allocation8_spill]] %s10442_s3 }
   0x5   :  { %24 = vsyncpa [#allocation3], 0  ;;  %s7539_s0 = smov 0  }
   0x6 LB: > { %s523_s21 = sshll.u32 %s10451_s12, 4  ;;  %s7548_s1 = sadd.s32 4294967295, %s7431_s0   ;;  %s7431_s0 = sphi %s7539_s0, %s30_s0   ;;  %s524_s21 = int_to_ptr.hbm [resolvable:$true] %s523_s21 }
   0x7   : > { %p6590_p0 = scmp.ge.s32.totalorder %s7431_s0, 1  ;;  %p500_p1 = scmp.lt.s32.totalorder %s7431_s0, 3 }
   0x8   : > { %p6963_p2 = scmp.eq.s32.totalorder %s7548_s1, 0  ;;  %s7433_s22 = smov [#allocation2]  }
   0x9   : > { %p501_p3 = pnand %p6590_p0, %p500_p1  ;;  %s525_s2 = sshll.u32 %s7433_s22, 4  ;;  %s526_s2 = int_to_ptr.vmem [resolvable:$true] %s525_s2 }
   0xa   : > { %s7434_s23 = smov 128   ;;  %s7435_s24 = smov 8  }
   0xb   : > { %p6959_p4 = pneg %p501_p3  ;;  %623 = sbr.rel (%p501_p3) target bundleno = 5603 (0x15e3), region = 96 }
   0xd   : > { %p6960_p5 = pnand %p6963_p2, %p6959_p4 }
   0xf   : > { %6962 = dma.hbm_to_vmem [thread:$0]  (!%p6960_p5), %s524_s21, 2048, %s526_s2, [#allocation3], %s7434_s23, %s7434_s23, %s7435_s24  }
  0x10   : > { %7426 = dma.done.wait (%p6963_p2), [#allocation3], 2048  }
  0x11   : > { %7428 = vsyncadd (%p6963_p2), [#allocation3], 4294965248  ;;  %s712_s25 = smul.u32 9, %s7548_s1  ;;  %v793_v0 = vld [vmem:[%s10447_s8 + $0x18] sm:$0xff]  ;;  %v792_v1 = vld [vmem:[%s10447_s8 + $0x10] sm:$0xff]  ;;  %s10464_s2 = sld [smem:[#allocation5_spill]]  ;;  %v778_v13 = vlaneseq }
  0x12   : > { %6943 = vmatpush.msra.mxu3 %v793_v0  ;;  %834 = vmatpush.msra.mxu0 %v793_v0  ;;  %v791_v2 = vld [vmem:[%s10447_s8 + $0x8] sm:$0xff]  ;;  %v790_v3 = vld [vmem:[%s10447_s8] sm:$0xff]  ;;  %vm794_vm0 = vcmask 261120   ;;  %p730_p7 = scmp.lt.s32.totalorder %s7548_s1, 1  ;;  %s10465_s22 = sld [smem:[#allocation8_spill]]  ;;  %vm1173_vm2 = vcmask 64512  }
  0x13   : > { %p713_p6 = scmp.lt.s32.totalorder %s712_s25, 17  ;;  %6942 = vmatpush.msra.mxu2 %v793_v0  ;;  %v7587_v14 = vshrl.u32 %v778_v13, 7  ;;  %v1035_v48 = vld [vmem:[%s10448_s9] sm:$0x3]  ;;  %s6597_s29 = sshll.u32 %s7548_s1, 3  ;;  %vm1095_vm12 = vcmask 588800  }
  0x14   : > { %6945 = vmatpush.msra.mxu3 %v792_v1  ;;  %835 = vmatpush.msra.mxu0 %v792_v1  ;;  %s7583_s26 = scalar_select %p730_p7, %s7548_s1, 1  ;;  %v7632_v50 = vld [vmem:[%s10449_s10] ss:$0 sm:$0xff] }
  0x15   : > { %s10480_s25 = smov (!%p713_p6, %s712_s25), 17  ;;  %6944 = vmatpush.msra.mxu2 %v792_v1  ;;  %6979 = vset.pattern.permute.xlu0 %v7587_v14  ;;  %v872_v17 = vmul.u32 9, %v7587_v14  ;;  %p725_p8 = scmp.lt.s32.totalorder %s6597_s29, 15 }
  0x16   : > { %s7554_s3 = sshll.u32 %s10480_s25, 3  ;;  %6947 = vmatpush.msra.mxu3 %v791_v2  ;;  %836 = vmatpush.msra.mxu0 %v791_v2  ;;  %s6599_s27 = sshll.u32 %s7583_s26, 3 }
  0x17   : > { %s716_s23 = scalar_lea.vmem %s10464_s2, %s7554_s3  ;;  %6946 = vmatpush.msra.mxu2 %v791_v2  ;;  %s741_s30 = scalar_lea.vmem %s10444_s5, %s6599_s27  ;;  %6980 = vset.pattern.permute.xlu1 %v7587_v14 }
  0x18   : > { %v764_v4 = vld [vmem:[%s716_s23 + $0x30] sm:$0xff]  ;;  %v758_v5 = vld [vmem:[%s716_s23] sm:$0xff]  ;;  %6949 = vmatpush.msra.mxu3 %v790_v3  ;;  %837 = vmatpush.msra.mxu0 %v790_v3  ;;  %v765_v7 = vld [vmem:[%s716_s23 + $0x38] sm:$0xff]  ;;  %s733_s2 = scalar_lea.vmem %s10465_s22, %s6599_s27  ;;  %s737_s25 = scalar_lea.vmem %s10443_s4, %s6599_s27 }
  0x19   : > { %v762_v6 = vld [vmem:[%s716_s23 + $0x20] sm:$0xff]  ;;  %6612 = vmatmul.msk.f32.vlgmr.msra.gmra.mxu3 %vm794_vm0, %v764_v4  ;;  %6606 = vmatmul.msk.f32.vlgmr.msra.gmra.mxu0 %vm794_vm0, %v758_v5  ;;  %v759_v8 = vld [vmem:[%s716_s23 + $0x8] sm:$0xff]  ;;  %v760_v11 = vld [vmem:[%s716_s23 + $0x10] sm:$0xff]  ;;  %s10482_s29 = smov (!%p725_p8, %s6597_s29), 15  ;;  %s10466_s22 = sld [smem:[#allocation7_spill]] }
  0x1a   : > { %6948 = vmatpush.msra.mxu2 %v790_v3  ;;  %v763_v9 = vld [vmem:[%s716_s23 + $0x28] sm:$0xff]  ;;  %v766_v10 = vld [vmem:[%s716_s23 + $0x40] sm:$0xff]  ;;  %v761_v12 = vld [vmem:[%s716_s23 + $0x18] sm:$0xff]  ;;  %6981 = vset.pattern.permute.xlu2 %v7587_v14  ;;  %s10384_s24 = scalar_lea.vmem %s10458_s19, %s7554_s3 }
  0x1b   : > { %6610 = vmatmul.msk.f32.vlgmr.msra.gmra.mxu2 %vm794_vm0, %v762_v6  ;;  %v7597_v15 = vld [vmem:[%s741_s30] sm:$0xff]  ;;  %s6598_s30 = sshll.u32 %s10482_s29, 3  ;;  %s6954_s29 = smul.u32 72, %s7583_s26 }
  0x1c   : > { %vm867_vm1 = vcmp.ne.s32.totalorder %v7597_v15, 0  ;;  %v868_v16 = vld [vmem:[%s733_s2] sm:$0xff] }
  0x1d   : > { %v869_v18 = vsel %vm867_vm1, %v868_v16, 0  ;;  %v870_v21 = vld [vmem:[%s737_s25] sm:$0xff]  ;;  %s8186_s21 = scalar_lea.vmem %s10445_s6, %s6954_s29  ;;  %s9287_s28 = scalar_lea.vmem %s10446_s7, %s6954_s29 }
  0x1e   : > { %v873_v19 = vadd.s32 %v872_v17, %v869_v18  ;;  %v871_v22 = vsel %vm867_vm1, %v870_v21, 0  ;;  %v7436_v18 = vmov 1.0  }
  0x1f   : > { %v874_v24 = vadd.s32 %v872_v17, %v871_v22  ;;  %s7626_s2 = scalar_lea.vmem %s10466_s22, %s6598_s30 }
  0x20   : > { %v875_v20 = vperm.slane %v873_v19, 0  ;;  %v882_v23 = vperm.slane %v873_v19, 1  ;;  %v896_v27 = vperm.slane %v873_v19, 3  ;;  %v889_v30 = vperm.slane %v873_v19, 2  ;;  %v1154_v49 = vld [vmem:[%s7626_s2 + $0x8] sm:$0xff]  ;;  %v1155_v55 = vld [vmem:[%s7626_s2 + $0x10] sm:$0xff] }
  0x21   : > { %6613 = vmatmul.msk.f32.gmra.mxu3 %vm794_vm0, %v765_v7  ;;  %6607 = vmatmul.msk.f32.gmra.mxu0 %vm794_vm0, %v759_v8  ;;  %v955_v25 = vperm.slane %v874_v24, 0  ;;  %v962_v28 = vperm.slane %v874_v24, 1  ;;  %v983_v31 = vperm.slane %v874_v24, 4  ;;  %v976_v33 = vperm.slane %v874_v24, 3  ;;  %v1156_v60 = vld [vmem:[%s7626_s2 + $0x18] sm:$0xff]  ;;  %v1153_v1 = vld [vmem:[%s7626_s2] sm:$0xff] }
  0x22   : > { %880 = vperm.xlu0 %6979, %v875_v20   ;;  %894 = vperm.xlu2 %6981, %v889_v30   ;;  %v969_v35 = vperm.slane %v874_v24, 2  ;;  %v917_v36 = vperm.slane %v873_v19, 6  ;;  %v910_v38 = vperm.slane %v873_v19, 5  ;;  %v903_v41 = vperm.slane %v873_v19, 4  ;;  %v1157_v2 = vld [vmem:[%s7626_s2 + $0x20] sm:$0xff] }
  0x23   : > { %6611 = vmatmul.msk.f32.gmra.mxu2 %vm794_vm0, %v763_v9  ;;  %960 = vperm.xlu1 %6980, %v955_v25   ;;  %v1004_v43 = vperm.slane %v874_v24, 7  ;;  %v997_v44 = vperm.slane %v874_v24, 6  ;;  %v990_v45 = vperm.slane %v874_v24, 5  ;;  %v924_v47 = vperm.slane %v873_v19, 7 }
  0x24   : > { %v1166_v51 = vmul.f32 %v7632_v50, %v1154_v49  ;;  %v1167_v56 = vmul.f32 %v7632_v50, %v1155_v55  ;;  %v1168_v61 = vmul.f32 %v7632_v50, %v1156_v60  ;;  %v1165_v3 = vmul.f32 %v7632_v50, %v1153_v1 }
  0x25   : > { %v1169_v5 = vmul.f32 %v7632_v50, %v1157_v2 }
  0x26   : > { %v1177_v53 = vsel %vm1173_vm2, %v1166_v51, 0.0  ;;  %v1180_v57 = vsel %vm1173_vm2, %v1167_v56, 0.0  ;;  %v1183_v63 = vsel %vm1173_vm2, %v1168_v61, 0.0  ;;  %v1174_v6 = vsel %vm1173_vm2, %v1165_v3, 0.0 }
  0x27   : > { %v1186_v8 = vsel %vm1173_vm2, %v1169_v5, 0.0 }
  0x29   : > { %6614 = vmatmul.msk.f32.gmra.mxu3 %vm794_vm0, %v766_v10  ;;  %6608 = vmatmul.msk.f32.gmra.mxu0 %vm794_vm0, %v760_v11 }
  0x2a   : > { %887 = vperm.xlu0 %6979, %v882_v23   ;;  %974 = vperm.xlu2 %6981, %v969_v35  }
  0x2b   : > { %967 = vperm.xlu1 %6980, %v962_v28  }
  0x31   : > { %6609 = vmatmul.msk.f32.gmra.mxu0 %vm794_vm0, %v761_v12  ;;  %v7659_v12 = vand.u32 127, %v778_v13  ;;  %v7437_v13 = vmov 0.0  }
  0x32   : > { %901 = vperm.xlu0 %6979, %v896_v27   ;;  %908 = vperm.xlu2 %6981, %v903_v41  }
  0x33   : > { %981 = vperm.xlu1 %6980, %v976_v33  }
  0x3a   : > { %988 = vperm.xlu0 %6979, %v983_v31   ;;  %995 = vperm.xlu2 %6981, %v990_v45  }
  0x3b   : > { %915 = vperm.xlu1 %6980, %v910_v38   ;;  %v1158_v38 = vld [vmem:[%s7626_s2 + $0x28] sm:$0xff] }
  0x42   : > { %922 = vperm.xlu0 %6979, %v917_v36   ;;  %929 = vperm.xlu2 %6981, %v924_v47  }
  0x43   : > { %1002 = vperm.xlu1 %6980, %v997_v44   ;;  %v1170_v44 = vmul.f32 %v7632_v50, %v1158_v38 }
  0x45   : > { %v1189_v47 = vsel %vm1173_vm2, %v1170_v44, 0.0 }
  0x4a   : > { %1009 = vperm.xlu0 %6979, %v1004_v43  }
  0x6b   : > { %1175 = vadd.xlane.f32.xlu2 %v1174_v6 }
  0x74   : > { %1178 = vadd.xlane.f32.xlu0 %v1177_v53 }
  0x7c   : > { %v7635_v52 = vpop.permute.xlu2 %894  ;;  %1181 = vadd.xlane.f32.xlu0 %v1180_v57 }
  0x7d   : > { %vm933_vm8 = vcmp.eq.s32.totalorder %v7659_v12, %v7635_v52 }
  0x7e   : > { %v6617_v33 = vsel %vm933_vm8, 1.0, %v7437_v13 }
  0x84   : > { %v7641_v58 = vpop.permute.xlu2 %974  ;;  %1184 = vadd.xlane.f32.xlu0 %v1183_v63 }
  0x85   : > { %vm1013_vm14 = vcmp.eq.s32.totalorder %v7659_v12, %v7641_v58 }
  0x86   : > { %v7736_v41 = vsel %vm1013_vm14, 1.0, %v7437_v13  ;;  %vm1254_vm14 = vcmask 1041409  }
  0x8c   : > { %v7646_v0 = vpop.permute.xlu2 %908  ;;  %1187 = vadd.xlane.f32.xlu0 %v1186_v8 }
  0x8d   : > { %vm935_vm6 = vcmp.eq.s32.totalorder %v7659_v12, %v7646_v0 }
  0x8e   : > { %v6619_v51 = vsel %vm935_vm6, 1.0, %v7437_v13 }
  0x94   : > { %v881_v54 = vpop.permute.xlu0 %880  ;;  %v7654_v9 = vpop.permute.xlu2 %995 }
  0x95   : > { %v961_v62 = vpop.permute.xlu1 %960  ;;  %vm931_vm10 = vcmp.eq.s32.totalorder %v7659_v12, %v881_v54 }
  0x96   : > { %v839_v26 = vpop.f32.mrf.mxu0  ;;  %vm1011_vm11 = vcmp.eq.s32.totalorder %v7659_v12, %v961_v62  ;;  %v6615_v25 = vsel %vm931_vm10, 1.0, %v7437_v13 }
  0x97   : > { %v7699_v20 = vsel %vm1011_vm11, 1.0, %v7437_v13 }
  0x9c   : > { %v857_v29 = vpop.f32.mrf.mxu3  ;;  %v888_v59 = vpop.permute.xlu0 %887 }
  0x9d   : > { %v968_v7 = vpop.permute.xlu1 %967  ;;  %v7661_v16 = vpop.permute.xlu2 %929  ;;  %vm932_vm9 = vcmp.eq.s32.totalorder %v7659_v12, %v888_v59  ;;  %v1270_v59 = vsel %vm867_vm1, 1.0, %v7437_v13 }
  0x9e   : > { %v842_v32 = vpop.f32.mrf.mxu0  ;;  %v851_v37 = vpop.f32.mrf.mxu2  ;;  %vm938_vm3 = vcmp.eq.s32.totalorder %v7659_v12, %v7661_v16  ;;  %v6616_v24 = vsel %vm932_vm9, 1.0, %v7437_v13  ;;  %vm1012_vm13 = vcmp.eq.s32.totalorder %v7659_v12, %v968_v7  ;;  %v1271_v61 = vsel %vm1173_vm2, %v1270_v59, -inf }
  0x9f   : > { %6641 = vmatpush.msk.msrb.mxu2 %vm938_vm3, %v7436_v18 }
  0xa4   : > { %v860_v34 = vpop.f32.mrf.mxu3  ;;  %v902_v4 = vpop.permute.xlu0 %901 }
  0xa5   : > { %v982_v11 = vpop.permute.xlu1 %981  ;;  %vm934_vm7 = vcmp.eq.s32.totalorder %v7659_v12, %v902_v4 }
  0xa6   : > { %v845_v39 = vpop.f32.mrf.mxu0  ;;  %v854_v42 = vpop.f32.mrf.mxu2  ;;  %vm1014_vm15 = vcmp.eq.s32.totalorder %v7659_v12, %v982_v11 }
  0xa7   : > { %v7740_v43 = vsel %vm1014_vm15, 1.0, %v7437_v13  ;;  %vm1256_vm15 = vcmask 1042434  }
  0xac   : > { %v863_v40 = vpop.f32.mrf.mxu3  ;;  %v7656_v10 = vpop.permute.xlu0 %988 }
  0xad   : > { %6631 = vmatpush.xpose.msk.msra.mxu1 %vm794_vm0, %v863_v40  ;;  %1545 = vmatpush.msrb.mxu3 %v863_v40  ;;  %v7672_v19 = vpop.permute.xlu1 %915 }
  0xae   : > { %v848_v46 = vpop.f32.mrf.mxu0  ;;  %vm936_vm5 = vcmp.eq.s32.totalorder %v7659_v12, %v7672_v19 }
  0xaf   : > { %1546 = vmatpush.msrb.mxu3 %v860_v34  ;;  %v6620_v58 = vsel %vm936_vm5, 1.0, %v7437_v13 }
  0xb1   : > { %6632 = vmatpush.xpose.msk.msra.mxu1 %vm794_vm0, %v860_v34  ;;  %1547 = vmatpush.msrb.mxu3 %v857_v29  ;;  %v6618_v34 = vsel %vm934_vm7, 1.0, %v7437_v13 }
  0xb3   : > { %1548 = vmatpush.msrb.mxu3 %v854_v42 }
  0xb4   : > { %v7665_v17 = vpop.permute.xlu0 %922 }
  0xb5   : > { %6633 = vmatpush.xpose.msk.msra.mxu1 %vm794_vm0, %v857_v29  ;;  %1549 = vmatpush.msrb.mxu3 %v851_v37  ;;  %vm937_vm4 = vcmp.eq.s32.totalorder %v7659_v12, %v7665_v17  ;;  %v1003_v60 = vpop.permute.xlu1 %1002 }
  0xb6   : > { %6642 = vmatpush.msk.msrb.mxu2 %vm937_vm4, %v7436_v18  ;;  %v6621_v3 = vsel %vm937_vm4, 1.0, %v7437_v13 }
  0xb7   : > { %1550 = vmatpush.msrb.mxu3 %v848_v46 }
  0xb8   : > { %6643 = vmatpush.msk.msrb.mxu2 %vm936_vm5, %v7436_v18 }
  0xb9   : > { %6634 = vmatpush.xpose.msk.msra.mxu1 %vm794_vm0, %v854_v42  ;;  %1551 = vmatpush.msrb.mxu3 %v845_v39 }
  0xba   : > { %6644 = vmatpush.msk.msrb.mxu2 %vm935_vm6, %v7436_v18  ;;  %vm1017_vm6 = vcmp.eq.s32.totalorder %v7659_v12, %v1003_v60 }
  0xbb   : > { %1552 = vmatpush.msrb.mxu3 %v842_v32  ;;  %v7783_v1 = vsel %vm1017_vm6, 1.0, %v7437_v13 }
  0xbc   : > { %6645 = vmatpush.msk.msrb.mxu2 %vm934_vm7, %v7436_v18  ;;  %vm1015_vm7 = vcmp.eq.s32.totalorder %v7659_v12, %v7656_v10  ;;  %v1010_v5 = vpop.permute.xlu0 %1009 }
  0xbd   : > { %6635 = vmatpush.xpose.msk.msra.mxu1 %vm794_vm0, %v851_v37  ;;  %1553 = vmatpush.msrb.mxu3 %v839_v26  ;;  %v7757_v52 = vsel %vm1015_vm7, 1.0, %v7437_v13  ;;  %vm1018_vm5 = vcmp.eq.s32.totalorder %v7659_v12, %v1010_v5  ;;  %vm1258_vm7 = vcmask 1043459  }
  0xbe   : > { %6646 = vmatpush.msk.msrb.mxu2 %vm933_vm8, %v7436_v18  ;;  %vm1016_vm8 = vcmp.eq.s32.totalorder %v7659_v12, %v7654_v9  ;;  %v6622_v9 = vsel %vm938_vm3, 1.0, %v7437_v13  ;;  %v7801_v10 = vsel %vm1018_vm5, 1.0, %v7437_v13  ;;  %vm1260_vm5 = vcmask 1044484  }
  0xbf   : > { %v7766_v56 = vsel %vm1016_vm8, 1.0, %v7437_v13 }
  0xc0   : > { %6647 = vmatpush.msk.msrb.mxu2 %vm932_vm9, %v7436_v18 }
  0xc1   : > { %6636 = vmatpush.xpose.msk.msra.mxu1 %vm794_vm0, %v848_v46 }
  0xc2   : > { %6648 = vmatpush.msk.msrb.mxu2 %vm931_vm10, %v7436_v18  ;;  %v1160_v18 = vld [vmem:[%s7626_s2 + $0x38] sm:$0xff] }
  0xc3   : > { %v1172_v16 = vmul.f32 %v7632_v50, %v1160_v18 }
  0xc5   : > { %6637 = vmatpush.xpose.msk.msra.mxu1 %vm794_vm0, %v845_v39 }
  0xc9   : > { %6638 = vmatpush.xpose.msk.msra.mxu1 %vm794_vm0, %v842_v32  ;;  %v7716_v32 = vsel %vm1012_vm13, 1.0, %v7437_v13 }
  0xcd   : > { %6639 = vmatpush.xpose.msk.msra.mxu1 %vm794_vm0, %v839_v26 }
  0xd0   : > { %6640 = vmatmul.msk.f32.vlgmr.msra.gmra.mxu1 %vm794_vm0, %v1035_v48 }
 0x14d   : > { %v1083_v21 = vpop.f32.mrf.mxu1 }
 0x14e   : > { %v7701_v22 = vperm.slane %v1083_v21, 0  ;;  %v7703_v23 = vperm.slane %v1083_v21, 1  ;;  %v1159_v21 = vld [vmem:[%s7626_s2 + $0x30] sm:$0xff] }
 0x150   : > { %v1121_v26 = vmul.f32 %v7699_v20, %v7703_v23  ;;  %v1088_v27 = vmul.f32 %v6616_v24, %v7701_v22  ;;  %v1087_v28 = vmul.f32 %v6615_v25, %v7701_v22  ;;  %v1090_v35 = vmul.f32 %v6618_v34, %v7701_v22 }
 0x151   : > { %v1122_v36 = vmul.f32 %v7716_v32, %v7703_v23  ;;  %v1089_v37 = vmul.f32 %v6617_v33, %v7701_v22  ;;  %v1123_v45 = vmul.f32 %v7736_v41, %v7703_v23  ;;  %v1124_v46 = vmul.f32 %v7740_v43, %v7703_v23 }
 0x152   : > { %v1129_v29 = vsel %vm1095_vm12, %v1121_v26, 0.0  ;;  %v1099_v30 = vsel %vm1095_vm12, %v1088_v27, 0.0  ;;  %v1096_v31 = vsel %vm1095_vm12, %v1087_v28, 0.0  ;;  %v1105_v39 = vsel %vm1095_vm12, %v1090_v35, 0.0 }
 0x153   : > { %1130 = vadd.xlane.f32.xlu0 %v1129_v29  ;;  %1100 = vadd.xlane.f32.xlu2 %v1099_v30  ;;  %v1132_v40 = vsel %vm1095_vm12, %v1122_v36, 0.0  ;;  %v1102_v42 = vsel %vm1095_vm12, %v1089_v37, 0.0  ;;  %v1135_v48 = vsel %vm1095_vm12, %v1123_v45, 0.0  ;;  %v1138_v49 = vsel %vm1095_vm12, %v1124_v46, 0.0 }
 0x154   : > { %1097 = vadd.xlane.f32.xlu1 %v1096_v31  ;;  %v1125_v53 = vmul.f32 %v7757_v52, %v7703_v23  ;;  %v1091_v54 = vmul.f32 %v6619_v51, %v7701_v22  ;;  %v1126_v62 = vmul.f32 %v7766_v56, %v7703_v23  ;;  %v1092_v63 = vmul.f32 %v6620_v58, %v7701_v22 }
 0x155   : > { %v1127_v4 = vmul.f32 %v7783_v1, %v7703_v23  ;;  %v1093_v6 = vmul.f32 %v6621_v3, %v7701_v22  ;;  %v1128_v11 = vmul.f32 %v7801_v10, %v7703_v23  ;;  %v1094_v17 = vmul.f32 %v6622_v9, %v7701_v22  ;;  %v1179_v23 = vpop.xlane.xlu0 %1178  ;;  %v1176_v22 = vpop.xlane.xlu2 %1175 }
 0x156   : > { %v1141_v55 = vsel %vm1095_vm12, %v1125_v53, 0.0  ;;  %v1108_v57 = vsel %vm1095_vm12, %v1091_v54, 0.0  ;;  %v1144_v0 = vsel %vm1095_vm12, %v1126_v62, 0.0  ;;  %v1111_v2 = vsel %vm1095_vm12, %v1092_v63, 0.0 }
 0x157   : > { %v1147_v7 = vsel %vm1095_vm12, %v1127_v4, 0.0  ;;  %v1114_v8 = vsel %vm1095_vm12, %v1093_v6, 0.0  ;;  %v1150_v19 = vsel %vm1095_vm12, %v1128_v11, 0.0  ;;  %v1117_v24 = vsel %vm1095_vm12, %v1094_v17, 0.0 }
 0x158   : > { %v1171_v25 = vmul.f32 %v7632_v50, %v1159_v21  ;;  %v1195_v26 = vsel %vm1173_vm2, %v1172_v16, 0.0 }
 0x15a   : > { %v1192_v27 = vsel %vm1173_vm2, %v1171_v25, 0.0 }
 0x15b   : > { %1106 = vadd.xlane.f32.xlu0 %v1105_v39  ;;  %1133 = vadd.xlane.f32.xlu2 %v1132_v40 }
 0x15c   : > { %1103 = vadd.xlane.f32.xlu1 %v1102_v42 }
 0x15d   : > { %v1182_v28 = vpop.xlane.xlu0 %1181 }
 0x163   : > { %1136 = vadd.xlane.f32.xlu2 %v1135_v48  ;;  %1190 = vadd.xlane.f32.xlu0 %v1189_v47 }
 0x164   : > { %1139 = vadd.xlane.f32.xlu1 %v1138_v49 }
 0x165   : > { %v1185_v31 = vpop.xlane.xlu0 %1184 }
 0x16b   : > { %1142 = vadd.xlane.f32.xlu2 %v1141_v55  ;;  %1272 = vmax.xlane.f32.xlu0 %v1271_v61 }
 0x16c   : > { %1109 = vadd.xlane.f32.xlu1 %v1108_v57 }
 0x16d   : > { %v1188_v37 = vpop.xlane.xlu0 %1187 }
 0x173   : > { %1145 = vadd.xlane.f32.xlu2 %v1144_v0 }
 0x174   : > { %1112 = vadd.xlane.f32.xlu1 %v1111_v2 }
 0x17b   : > { %1148 = vadd.xlane.f32.xlu2 %v1147_v7 }
 0x17c   : > { %1115 = vadd.xlane.f32.xlu1 %v1114_v8 }
 0x183   : > { %1151 = vadd.xlane.f32.xlu2 %v1150_v19 }
 0x184   : > { %1118 = vadd.xlane.f32.xlu1 %v1117_v24 }
 0x18b   : > { %1196 = vadd.xlane.f32.xlu2 %v1195_v26 }
 0x18c   : > { %1193 = vadd.xlane.f32.xlu1 %v1192_v27 }
 0x1c6   : > { %v1101_v29 = vpop.xlane.xlu2 %1100  ;;  %v1131_v50 = vpop.xlane.xlu0 %1130 }
 0x1c7   : > { %v1098_v30 = vpop.xlane.xlu1 %1097 }
 0x1c8   : > { %v1198_v48 = vadd.f32 %v1131_v50, %v1098_v30 }
 0x1ca   : > { %v1206_v57 = vadd.f32 %v1198_v48, %v1176_v22 }
 0x1cc   : > { %v1222_v2 = vmul.f32 0.2, %v1206_v57  ;;  %vm1214_vm9 = vcmp.gt.f32.partialorder %v1206_v57, 0.0 }
 0x1ce   : > { %v1134_v33 = vpop.xlane.xlu2 %1133  ;;  %v1107_v44 = vpop.xlane.xlu0 %1106  ;;  %v1230_v9 = vsel %vm1214_vm9, %v1206_v57, %v1222_v2  ;;  %vm1266_vm9 = vcmask 1047559  }
 0x1cf   : > { %v1104_v34 = vpop.xlane.xlu1 %1103  ;;  %v1199_v45 = vadd.f32 %v1134_v33, %v1101_v29  ;;  %v1246_v24 = vperm.slane %v1230_v9, %v7659_v12 }
 0x1d1   : > { %v1207_v51 = vadd.f32 %v1199_v45, %v1179_v23 }
 0x1d3   : > { %v1223_v60 = vmul.f32 0.2, %v1207_v51  ;;  %vm1215_vm3 = vcmp.gt.f32.partialorder %v1207_v51, 0.0 }
 0x1d5   : > { %v1231_v5 = vsel %vm1215_vm3, %v1207_v51, %v1223_v60  ;;  %vm1262_vm3 = vcmask 1045509  }
 0x1d6   : > { %v1137_v35 = vpop.xlane.xlu2 %1136  ;;  %v1191_v59 = vpop.xlane.xlu0 %1190  ;;  %v1247_v17 = vperm.slane %v1231_v5, %v7659_v12 }
 0x1d7   : > { %v1140_v36 = vpop.xlane.xlu1 %1139  ;;  %v1200_v46 = vadd.f32 %v1137_v35, %v1104_v34 }
 0x1d8   : > { %v1201_v53 = vadd.f32 %v1140_v36, %v1107_v44 }
 0x1d9   : > { %v1208_v54 = vadd.f32 %v1200_v46, %v1182_v28  ;;  %v1255_v28 = vsel %vm1254_vm14, %v1247_v17, %v1246_v24 }
 0x1da   : > { %v1209_v61 = vadd.f32 %v1201_v53, %v1185_v31 }
 0x1db   : > { %v1224_v62 = vmul.f32 0.2, %v1208_v54  ;;  %vm1216_vm4 = vcmp.gt.f32.partialorder %v1208_v54, 0.0 }
 0x1dc   : > { %v1225_v6 = vmul.f32 0.2, %v1209_v61  ;;  %vm1217_vm10 = vcmp.gt.f32.partialorder %v1209_v61, 0.0 }
 0x1dd   : > { %v1232_v7 = vsel %vm1216_vm4, %v1208_v54, %v1224_v62  ;;  %vm1264_vm4 = vcmask 1046534  }
 0x1de   : > { %v1143_v38 = vpop.xlane.xlu2 %1142  ;;  %v1248_v18 = vperm.slane %v1232_v7, %v7659_v12  ;;  %v1233_v19 = vsel %vm1217_vm10, %v1209_v61, %v1225_v6  ;;  %v1273_v50 = vpop.xlane.xlu0 %1272 }
 0x1df   : > { %v1110_v39 = vpop.xlane.xlu1 %1109  ;;  %v1249_v29 = vperm.slane %v1233_v19, %v7659_v12  ;;  %vm1274_vm10 = vcmp.gt.f32.partialorder %v1273_v50, 0.0 }
 0x1e0   : > { %v1202_v55 = vadd.f32 %v1143_v38, %v1110_v39  ;;  %v1257_v31 = vsel %vm1256_vm15, %v1248_v18, %v1255_v28 }
 0x1e2   : > { %v1210_v63 = vadd.f32 %v1202_v55, %v1188_v37 }
 0x1e4   : > { %v1226_v8 = vmul.f32 0.2, %v1210_v63  ;;  %vm1218_vm11 = vcmp.gt.f32.partialorder %v1210_v63, 0.0 }
 0x1e6   : > { %v1146_v40 = vpop.xlane.xlu2 %1145  ;;  %v1234_v16 = vsel %vm1218_vm11, %v1210_v63, %v1226_v8 }
 0x1e7   : > { %v1113_v42 = vpop.xlane.xlu1 %1112  ;;  %v1250_v33 = vperm.slane %v1234_v16, %v7659_v12 }
 0x1e8   : > { %v1203_v58 = vadd.f32 %v1146_v40, %v1113_v42  ;;  %v1259_v40 = vsel %vm1258_vm7, %v1249_v29, %v1257_v31 }
 0x1e9   : > { %v1261_v44 = vsel %vm1260_vm5, %v1250_v33, %v1259_v40 }
 0x1ea   : > { %v1211_v3 = vadd.f32 %v1203_v58, %v1191_v59 }
 0x1ec   : > { %v1227_v11 = vmul.f32 0.2, %v1211_v3  ;;  %vm1219_vm13 = vcmp.gt.f32.partialorder %v1211_v3, 0.0 }
 0x1ee   : > { %v1149_v47 = vpop.xlane.xlu2 %1148  ;;  %v1235_v27 = vsel %vm1219_vm13, %v1211_v3, %v1227_v11 }
 0x1ef   : > { %v1116_v49 = vpop.xlane.xlu1 %1115  ;;  %v1251_v35 = vperm.slane %v1235_v27, %v7659_v12 }
 0x1f0   : > { %v1204_v25 = vadd.f32 %v1149_v47, %v1116_v49 }
 0x1f1   : > { %v1263_v45 = vsel %vm1262_vm3, %v1251_v35, %v1261_v44 }
 0x1f6   : > { %v1152_v0 = vpop.xlane.xlu2 %1151 }
 0x1f7   : > { %v1119_v4 = vpop.xlane.xlu1 %1118 }
 0x1f8   : > { %v1205_v21 = vadd.f32 %v1152_v0, %v1119_v4 }
 0x1fe   : > { %v1197_v26 = vpop.xlane.xlu2 %1196 }
 0x1ff   : > { %v1213_v23 = vadd.f32 %v1205_v21, %v1197_v26  ;;  %v1194_v22 = vpop.xlane.xlu1 %1193 }
 0x200   : > { %v1212_v30 = vadd.f32 %v1204_v25, %v1194_v22 }
 0x201   : > { %vm1221_vm8 = vcmp.gt.f32.partialorder %v1213_v23, 0.0  ;;  %v1229_v34 = vmul.f32 0.2, %v1213_v23 }
 0x202   : > { %vm1220_vm6 = vcmp.gt.f32.partialorder %v1212_v30, 0.0  ;;  %v1228_v36 = vmul.f32 0.2, %v1212_v30 }
 0x203   : > { %v1237_v37 = vsel %vm1221_vm8, %v1213_v23, %v1229_v34 }
 0x204   : > { %v1253_v38 = vperm.slane %v1237_v37, %v7659_v12  ;;  %v1236_v39 = vsel %vm1220_vm6, %v1212_v30, %v1228_v36 }
 0x205   : > { %v1252_v42 = vperm.slane %v1236_v39, %v7659_v12 }
 0x207   : > { %v1265_v46 = vsel %vm1264_vm4, %v1252_v42, %v1263_v45 }
 0x208   : > { %v1267_v47 = vsel %vm1266_vm9, %v1253_v38, %v1265_v46 }
 0x209   : > { %v1269_v48 = vsel %vm867_vm1, %v1267_v47, -1e+30 }
 0x20a   : > { %v1277_v49 = vsel %vm1274_vm10, %v1269_v48, 0.0 }
 0x20b   : > { %v1278_v51 = vsel %vm1173_vm2, %v1277_v49, -inf }
 0x20c   : > { %1279 = vmax.xlane.f32.xlu1 %v1278_v51 }
 0x27f   : > { %v1280_v53 = vpop.xlane.xlu1 %1279 }
 0x280   : > { %v1281_v54 = vsub.f32 %v1277_v49, %v1280_v53 }
 0x282   : > { %v1282_v55 = vmul.f32 1.442695, %v1281_v54 }
 0x284   : > { %6985 = vpow2.f32 %v1282_v55 }
 0x28a   : > { %v6986_v57 = vpop.eup %6985 }
 0x28b   : > { %v1284_v58 = vsel %vm1173_vm2, %v6986_v57, 0.0  ;;  %vm10459_vm2 = vcmask 523264  }
 0x28c   : > { %1285 = vadd.xlane.f32.xlu2 %v1284_v58 }
 0x2ff   : > { %v1286_v59 = vpop.xlane.xlu2 %1285 }
 0x300   : > { %6987 = vrcp.f32 %v1286_v59  ;;  %v1298_v63 = vand.u32 2147483648, %v1286_v59  ;;  %v1296_v0 = vand.u32 2147483647, %v1286_v59  ;;  %vm1292_vm11 = vweird.f32 %v1286_v59 }
 0x302   : > { %v1299_v3 = vor.u32 1.1754944e-38, %v1298_v63  ;;  %vm1297_vm14 = vcmp.eq.f32.partialorder %v1296_v0, 8.507059e+37 }
 0x306   : > { %v6988_v60 = vpop.eup %6987 }
 0x307   : > { %v1288_v61 = vmul.f32 %v6988_v60, %v1286_v59  ;;  %vm1293_vm1 = vweird.f32 %v6988_v60 }
 0x308   : > { %vm1294_vm13 = vmor %vm1292_vm11, %vm1293_vm1 }
 0x309   : > { %v1289_v62 = vsub.f32 1.0, %v1288_v61 }
 0x30b   : > { %v1290_v15 = vmul.f32 %v6988_v60, %v1289_v62 }
 0x30d   : > { %v1291_v2 = vadd.f32 %v6988_v60, %v1290_v15 }
 0x30f   : > { %v1295_v4 = vsel %vm1294_vm13, %v6988_v60, %v1291_v2 }
 0x310   : > { %v1300_v5 = vsel %vm1297_vm14, %v1299_v3, %v1295_v4 }
 0x311   : > { %v1301_v6 = vmul.f32 %v6986_v57, %v1300_v5 }
 0x313   : > { %v1316_v7 = vperm.slane %v1301_v6, 2  ;;  %v1309_v8 = vperm.slane %v1301_v6, 1  ;;  %v1302_v9 = vperm.slane %v1301_v6, 0  ;;  %v1344_v11 = vperm.slane %v1301_v6, 6 }
 0x314   : > { %v1330_v17 = vperm.slane %v1301_v6, 4  ;;  %v1323_v18 = vperm.slane %v1301_v6, 3  ;;  %v1351_v19 = vperm.slane %v1301_v6, 7  ;;  %v1337_v21 = vperm.slane %v1301_v6, 5 }
 0x315   : > { %1321 = vperm.xlu2 %6981, %v1316_v7   ;;  %1314 = vperm.xlu1 %6980, %v1309_v8  }
 0x316   : > { %1307 = vperm.xlu0 %6979, %v1302_v9  }
 0x31d   : > { %1349 = vperm.xlu2 %6981, %v1344_v11   ;;  %1335 = vperm.xlu1 %6980, %v1330_v17  }
 0x31e   : > { %1328 = vperm.xlu0 %6979, %v1323_v18  }
 0x325   : > { %1356 = vperm.xlu1 %6980, %v1351_v19  }
 0x326   : > { %1342 = vperm.xlu0 %6979, %v1337_v21  }
 0x36f   : > { %v1322_v27 = vpop.permute.xlu2 %1321 }
 0x370   : > { %v1360_v23 = vmul.f32 %v7736_v41, %v1322_v27 }
 0x377   : > { %v1350_v33 = vpop.permute.xlu2 %1349 }
 0x387   : > { %v1315_v25 = vpop.permute.xlu1 %1314 }
 0x388   : > { %v1308_v24 = vpop.permute.xlu0 %1307  ;;  %v1359_v26 = vmul.f32 %v7716_v32, %v1315_v25  ;;  %v1364_v32 = vmul.f32 %v7783_v1, %v1350_v33 }
 0x389   : > { %v1358_v16 = vmul.f32 %v7699_v20, %v1308_v24 }
 0x38b   : > { %1366 = vxpose.xlu0.b32.start [1/8] (short) (narrow) %v1358_v16, 72 }
 0x38f   : > { %v1336_v29 = vpop.permute.xlu1 %1335 }
 0x390   : > { %v1329_v22 = vpop.permute.xlu0 %1328  ;;  %v1362_v30 = vmul.f32 %v7757_v52, %v1336_v29 }
 0x391   : > { %v1361_v28 = vmul.f32 %v7740_v43, %v1329_v22 }
 0x393   : > { %1367 = vxpose.xlu0.b32.cont [2/8] (short) (narrow) %v1359_v26, 72 }
 0x397   : > { %v1357_v34 = vpop.permute.xlu1 %1356 }
 0x398   : > { %v1343_v31 = vpop.permute.xlu0 %1342  ;;  %v1365_v41 = vmul.f32 %v7801_v10, %v1357_v34 }
 0x399   : > { %v1363_v20 = vmul.f32 %v7766_v56, %v1343_v31 }
 0x39b   : > { %1368 = vxpose.xlu0.b32.cont [3/8] (short) (narrow) %v1360_v23, 72 }
 0x3a3   : > { %1369 = vxpose.xlu0.b32.cont [4/8] (short) (narrow) %v1361_v28, 72 }
 0x3ab   : > { %1370 = vxpose.xlu0.b32.cont [5/8] (short) (narrow) %v1362_v30, 72 }
 0x3b3   : > { %1371 = vxpose.xlu0.b32.cont [6/8] (short) (narrow) %v1363_v20, 72 }
 0x3bb   : > { %1372 = vxpose.xlu0.b32.cont [7/8] (short) (narrow) %v1364_v32, 72 }
 0x3c3   : > { %1373 = vxpose.xlu0.b32.end [8/8] (short) (narrow) %v1365_v41, 72 }
 0x42f   : > { %v1382_v35 = vpop.trf.xlu0 }
 0x430   : > { %6649 = vmatmul.msk.f32.vlgmr.msrb.gmra.mxu2 %vm10459_vm2, %v1382_v35 }
 0x437   : > { %v1383_v43 = vpop.trf.xlu0 }
 0x438   : > { %6650 = vmatmul.msk.f32.gmra.mxu2 %vm10459_vm2, %v1383_v43 }
 0x43f   : > { %v1384_v52 = vpop.trf.xlu0 }
 0x440   : > { %6651 = vmatmul.msk.f32.gmra.mxu2 %vm10459_vm2, %v1384_v52 }
 0x447   : > { %v1385_v56 = vpop.trf.xlu0 }
 0x448   : > { %6652 = vmatmul.msk.f32.gmra.mxu2 %vm10459_vm2, %v1385_v56 }
 0x44f   : > { %v1386_v36 = vpop.trf.xlu0 }
 0x450   : > { %6653 = vmatmul.msk.f32.gmra.mxu2 %vm10459_vm2, %v1386_v36 }
 0x457   : > { %v1387_v1 = vpop.trf.xlu0 }
 0x458   : > { %6654 = vmatmul.msk.f32.gmra.mxu2 %vm10459_vm2, %v1387_v1 }
 0x45f   : > { %v1388_v10 = vpop.trf.xlu0 }
 0x460   : > { %6655 = vmatmul.msk.f32.gmra.mxu2 %vm10459_vm2, %v1388_v10 }
 0x467   : > { %v1389_v37 = vpop.trf.xlu0 }
 0x468   : > { %6656 = vmatmul.msk.f32.gmra.mxu2 %vm10459_vm2, %v1389_v37 }
 0x46f   : > { %v1390_v38 = vpop.trf.xlu0 }
 0x470   : > { %6657 = vmatmul.msk.f32.gmra.mxu2 %vm10459_vm2, %v1390_v38 }
 0x4b3   : > { %v1443_v39 = vpop.f32.mrf.mxu2 }
 0x4b4   : > { %1470 = vxpose.xlu2.b32.start [1/9] (short) (narrow) %v1443_v39, 72 }
 0x4bb   : > { %v1446_v50 = vpop.f32.mrf.mxu2 }
 0x4bc   : > { %1471 = vxpose.xlu2.b32.cont [2/9] (short) (narrow) %v1446_v50, 72 }
 0x4c3   : > { %v1449_v40 = vpop.f32.mrf.mxu2 }
 0x4c4   : > { %1472 = vxpose.xlu2.b32.cont [3/9] (short) (narrow) %v1449_v40, 72 }
 0x4cb   : > { %v1452_v42 = vpop.f32.mrf.mxu2 }
 0x4cc   : > { %1473 = vxpose.xlu2.b32.cont [4/9] (short) (narrow) %v1452_v42, 72 }
 0x4d3   : > { %v1455_v44 = vpop.f32.mrf.mxu2 }
 0x4d4   : > { %1474 = vxpose.xlu2.b32.cont [5/9] (short) (narrow) %v1455_v44, 72 }
 0x4db   : > { %v1458_v45 = vpop.f32.mrf.mxu2 }
 0x4dc   : > { %1475 = vxpose.xlu2.b32.cont [6/9] (short) (narrow) %v1458_v45, 72 }
 0x4e3   : > { %v1461_v46 = vpop.f32.mrf.mxu2 }
 0x4e4   : > { %1476 = vxpose.xlu2.b32.cont [7/9] (short) (narrow) %v1461_v46, 72 }
 0x4eb   : > { %v1464_v47 = vpop.f32.mrf.mxu2 }
 0x4ec   : > { %1477 = vxpose.xlu2.b32.cont [8/9] (short) (narrow) %v1464_v47, 72 }
 0x4f3   : > { %v1467_v48 = vpop.f32.mrf.mxu2 }
 0x4f4   : > { %1478 = vxpose.xlu2.b32.end [9/9] (short) (narrow) %v1467_v48, 72 }
 0x54d   : > { %v1486_v49 = vpop.trf.xlu2 }
 0x54e   : > { %v1502_v51 = vadd.f32 %v1486_v49, %v1443_v39 }
 0x550   : > { %6658 = vmatmul.msk.f32.vlgmr.msrb.gmra.mxu3 %vm1095_vm12, %v1502_v51 }
 0x555   : > { %v1487_v53 = vpop.trf.xlu2 }
 0x556   : > { %v1503_v54 = vadd.f32 %v1487_v53, %v1446_v50 }
 0x558   : > { %6659 = vmatmul.msk.f32.gmra.mxu3 %vm1095_vm12, %v1503_v54 }
 0x55d   : > { %v1488_v55 = vpop.trf.xlu2 }
 0x55e   : > { %v1504_v57 = vadd.f32 %v1488_v55, %v1449_v40 }
 0x560   : > { %6660 = vmatmul.msk.f32.gmra.mxu3 %vm1095_vm12, %v1504_v57 }
 0x565   : > { %v1489_v58 = vpop.trf.xlu2 }
 0x566   : > { %v1505_v59 = vadd.f32 %v1489_v58, %v1452_v42 }
 0x568   : > { %6661 = vmatmul.msk.f32.gmra.mxu3 %vm1095_vm12, %v1505_v59 }
 0x56d   : > { %v1490_v60 = vpop.trf.xlu2 }
 0x56e   : > { %v1506_v61 = vadd.f32 %v1490_v60, %v1455_v44 }
 0x570   : > { %6662 = vmatmul.msk.f32.gmra.mxu3 %vm1095_vm12, %v1506_v61 }
 0x575   : > { %v1491_v62 = vpop.trf.xlu2 }
 0x576   : > { %v1507_v63 = vadd.f32 %v1491_v62, %v1458_v45 }
 0x578   : > { %6663 = vmatmul.msk.f32.gmra.mxu3 %vm1095_vm12, %v1507_v63 }
 0x57d   : > { %v1492_v15 = vpop.trf.xlu2 }
 0x57e   : > { %v1508_v0 = vadd.f32 %v1492_v15, %v1461_v46 }
 0x580   : > { %6664 = vmatmul.msk.f32.gmra.mxu3 %vm1095_vm12, %v1508_v0  ;;  %v7438_v0 = vmov 32.0  }
 0x585   : > { %v1493_v2 = vpop.trf.xlu2 }
 0x586   : > { %v1509_v3 = vadd.f32 %v1493_v2, %v1464_v47 }
 0x588   : > { %6665 = vmatmul.msk.f32.gmra.mxu3 %vm1095_vm12, %v1509_v3 }
 0x58d   : > { %v1494_v4 = vpop.trf.xlu2 }
 0x58e   : > { %v1510_v5 = vadd.f32 %v1494_v4, %v1467_v48 }
 0x590   : > { %6666 = vmatmul.msk.f32.gmra.mxu3 %vm1095_vm12, %v1510_v5 }
 0x5d3   : > { %v1555_v6 = vpop.f32.mrf.mxu3 }
 0x5d4   : > { %v1591_v7 = vmin.f32 %v1555_v6, 0.0  ;;  %vm1582_vm15 = vcmp.gt.f32.partialorder %v1555_v6, 0.0 }
 0x5d6   : > { %v1600_v8 = vmul.f32 1.442695, %v1591_v7 }
 0x5d8   : > { %6989 = vpow2.f32 %v1600_v8 }
 0x5db   : > { %v1558_v9 = vpop.f32.mrf.mxu3 }
 0x5dc   : > { %v1592_v11 = vmin.f32 %v1558_v9, 0.0  ;;  %vm1583_vm7 = vcmp.gt.f32.partialorder %v1558_v9, 0.0 }
 0x5de   : > { %v6990_v17 = vpop.eup %6989  ;;  %v1602_v18 = vmul.f32 1.442695, %v1592_v11 }
 0x5df   : > { %v6667_v19 = vadd.f32 -1.0, %v6990_v17 }
 0x5e0   : > { %6991 = vpow2.f32 %v1602_v18 }
 0x5e1   : > { %v7852_v21 = vsel %vm1582_vm15, %v1555_v6, %v6667_v19 }
 0x5e2   : > { %v1636_v24 = vsel %vm794_vm0, %v7852_v21, 0.0 }
 0x5e3   : > { %1637 = vadd.xlane.f32.xlu1 %v1636_v24  ;;  %v1561_v16 = vpop.f32.mrf.mxu3 }
 0x5e4   : > { %v1593_v25 = vmin.f32 %v1561_v16, 0.0  ;;  %vm1584_vm8 = vcmp.gt.f32.partialorder %v1561_v16, 0.0 }
 0x5e6   : > { %v6992_v26 = vpop.eup %6991  ;;  %v1604_v27 = vmul.f32 1.442695, %v1593_v25 }
 0x5e7   : > { %v6668_v23 = vadd.f32 -1.0, %v6992_v26 }
 0x5e8   : > { %6993 = vpow2.f32 %v1604_v27 }
 0x5e9   : > { %v7856_v22 = vsel %vm1583_vm7, %v1558_v9, %v6668_v23 }
 0x5ea   : > { %v1639_v28 = vsel %vm794_vm0, %v7856_v22, 0.0 }
 0x5eb   : > { %1640 = vadd.xlane.f32.xlu1 %v1639_v28  ;;  %v1564_v29 = vpop.f32.mrf.mxu3 }
 0x5ec   : > { %v1594_v30 = vmin.f32 %v1564_v29, 0.0  ;;  %vm1585_vm6 = vcmp.gt.f32.partialorder %v1564_v29, 0.0 }
 0x5ee   : > { %v6994_v31 = vpop.eup %6993  ;;  %v1606_v20 = vmul.f32 1.442695, %v1594_v30 }
 0x5ef   : > { %v6669_v33 = vadd.f32 -1.0, %v6994_v31 }
 0x5f0   : > { %6995 = vpow2.f32 %v1606_v20 }
 0x5f1   : > { %v7860_v32 = vsel %vm1584_vm8, %v1561_v16, %v6669_v33 }
 0x5f2   : > { %v1642_v34 = vsel %vm794_vm0, %v7860_v32, 0.0 }
 0x5f3   : > { %1643 = vadd.xlane.f32.xlu1 %v1642_v34  ;;  %v1567_v41 = vpop.f32.mrf.mxu3 }
 0x5f4   : > { %v1595_v35 = vmin.f32 %v1567_v41, 0.0  ;;  %vm1586_vm5 = vcmp.gt.f32.partialorder %v1567_v41, 0.0 }
 0x5f6   : > { %v6996_v43 = vpop.eup %6995  ;;  %v1608_v52 = vmul.f32 1.442695, %v1595_v35 }
 0x5f7   : > { %v6670_v56 = vadd.f32 -1.0, %v6996_v43 }
 0x5f8   : > { %6997 = vpow2.f32 %v1608_v52 }
 0x5f9   : > { %v7864_v36 = vsel %vm1585_vm6, %v1564_v29, %v6670_v56 }
 0x5fa   : > { %v1645_v1 = vsel %vm794_vm0, %v7864_v36, 0.0 }
 0x5fb   : > { %1646 = vadd.xlane.f32.xlu1 %v1645_v1  ;;  %v1570_v10 = vpop.f32.mrf.mxu3 }
 0x5fc   : > { %v1596_v37 = vmin.f32 %v1570_v10, 0.0  ;;  %vm1587_vm3 = vcmp.gt.f32.partialorder %v1570_v10, 0.0 }
 0x5fe   : > { %v6998_v38 = vpop.eup %6997  ;;  %v1610_v39 = vmul.f32 1.442695, %v1596_v37 }
 0x5ff   : > { %v6671_v50 = vadd.f32 -1.0, %v6998_v38 }
 0x600   : > { %6999 = vpow2.f32 %v1610_v39 }
 0x601   : > { %v7868_v40 = vsel %vm1586_vm5, %v1567_v41, %v6671_v50 }
 0x602   : > { %v1648_v42 = vsel %vm794_vm0, %v7868_v40, 0.0 }
 0x603   : > { %1649 = vadd.xlane.f32.xlu1 %v1648_v42  ;;  %v1573_v44 = vpop.f32.mrf.mxu3 }
 0x604   : > { %v1597_v45 = vmin.f32 %v1573_v44, 0.0  ;;  %vm1588_vm4 = vcmp.gt.f32.partialorder %v1573_v44, 0.0 }
 0x606   : > { %v7000_v46 = vpop.eup %6999  ;;  %v1612_v47 = vmul.f32 1.442695, %v1597_v45 }
 0x607   : > { %v6672_v48 = vadd.f32 -1.0, %v7000_v46 }
 0x608   : > { %7001 = vpow2.f32 %v1612_v47 }
 0x609   : > { %v7872_v49 = vsel %vm1587_vm3, %v1570_v10, %v6672_v48 }
 0x60a   : > { %v1651_v51 = vsel %vm794_vm0, %v7872_v49, 0.0 }
 0x60b   : > { %1652 = vadd.xlane.f32.xlu1 %v1651_v51  ;;  %v1576_v53 = vpop.f32.mrf.mxu3 }
 0x60c   : > { %v1598_v54 = vmin.f32 %v1576_v53, 0.0  ;;  %vm1589_vm9 = vcmp.gt.f32.partialorder %v1576_v53, 0.0 }
 0x60e   : > { %v7002_v55 = vpop.eup %7001  ;;  %v1614_v57 = vmul.f32 1.442695, %v1598_v54 }
 0x60f   : > { %v6673_v58 = vadd.f32 -1.0, %v7002_v55 }
 0x610   : > { %7003 = vpow2.f32 %v1614_v57 }
 0x611   : > { %v7876_v59 = vsel %vm1588_vm4, %v1573_v44, %v6673_v58  ;;  %7005 = vrcp.f32 %v7438_v0  ;;  %v1873_v58 = vld [vmem:[%s10450_s11 + $0x18] sm:$0xff] }
 0x612   : > { %v1654_v60 = vsel %vm794_vm0, %v7876_v59, 0.0  ;;  %1913 = vmatpush.msrb.mxu1 %v1873_v58 }
 0x613   : > { %1655 = vadd.xlane.f32.xlu0 %v1654_v60  ;;  %v1579_v7 = vpop.f32.mrf.mxu3  ;;  %v1872_v60 = vld [vmem:[%s10450_s11 + $0x10] sm:$0xff] }
 0x614   : > { %v1599_v9 = vmin.f32 %v1579_v7, 0.0  ;;  %vm1590_vm1 = vcmp.gt.f32.partialorder %v1579_v7, 0.0  ;;  %1914 = vmatpush.msrb.mxu1 %v1872_v60 }
 0x616   : > { %v7004_v61 = vpop.eup %7003  ;;  %v1616_v18 = vmul.f32 1.442695, %v1599_v9 }
 0x617   : > { %v6674_v62 = vadd.f32 -1.0, %v7004_v61  ;;  %v7006_v2 = vpop.eup %7005  ;;  %v6687_v61 = vld [vmem:[%s10450_s11 + $0x30] sm:$0xff] }
 0x618   : > { %v1664_v3 = vmul.f32 32.0, %v7006_v2  ;;  %vm1668_vm10 = vweird.f32 %v7006_v2  ;;  %7007 = vpow2.f32 %v1616_v18 }
 0x619   : > { %v7880_v63 = vsel %vm1589_vm9, %v1576_v53, %v6674_v62  ;;  %v1871_v62 = vld [vmem:[%s10450_s11 + $0x8] sm:$0xff] }
 0x61a   : > { %v1657_v15 = vsel %vm794_vm0, %v7880_v63, 0.0  ;;  %v1665_v4 = vsub.f32 1.0, %v1664_v3  ;;  %1915 = vmatpush.msrb.mxu1 %v1871_v62  ;;  %v6685_v3 = vld [vmem:[%s10450_s11 + $0x20] sm:$0xff] }
 0x61b   : > { %1658 = vadd.xlane.f32.xlu1 %v1657_v15 }
 0x61c   : > { %v1666_v5 = vmul.f32 %v7006_v2, %v1665_v4 }
 0x61e   : > { %v1667_v6 = vadd.f32 %v7006_v2, %v1666_v5  ;;  %v7008_v23 = vpop.eup %7007 }
 0x61f   : > { %v6675_v30 = vadd.f32 -1.0, %v7008_v23 }
 0x620   : > { %v7884_v8 = vsel %vm1668_vm10, %v7006_v2, %v1667_v6  ;;  %v1870_v2 = vld [vmem:[%s10450_s11] sm:$0xff] }
 0x621   : > { %v7904_v33 = vsel %vm1590_vm1, %v1579_v7, %v6675_v30  ;;  %1916 = vmatpush.msrb.mxu1 %v1870_v2 }
 0x622   : > { %v1660_v41 = vsel %vm794_vm0, %v7904_v33, 0.0 }
 0x656   : > { %v1638_v11 = vpop.xlane.xlu1 %1637 }
 0x657   : > { %v1670_v17 = vmul.f32 %v7884_v8, %v1638_v11 }
 0x659   : > { %v7888_v19 = vsub.f32 %v7852_v21, %v1670_v17 }
 0x65b   : > { %v1688_v24 = vmul.f32 %v7888_v19, %v7888_v19 }
 0x65d   : > { %v1697_v16 = vsel %vm794_vm0, %v1688_v24, 0.0 }
 0x65e   : > { %v1641_v25 = vpop.xlane.xlu1 %1640  ;;  %1698 = vadd.xlane.f32.xlu1 %v1697_v16 }
 0x65f   : > { %v1671_v26 = vmul.f32 %v7884_v8, %v1641_v25 }
 0x661   : > { %v7895_v27 = vsub.f32 %v7856_v22, %v1671_v26 }
 0x663   : > { %v1689_v28 = vmul.f32 %v7895_v27, %v7895_v27 }
 0x665   : > { %v1700_v21 = vsel %vm794_vm0, %v1689_v28, 0.0  ;;  %v776_v28 = vld [vmem:[%s10456_s17] sm:$0xf] }
 0x666   : > { %v1644_v29 = vpop.xlane.xlu1 %1643  ;;  %1701 = vadd.xlane.f32.xlu1 %v1700_v21 }
 0x667   : > { %v1672_v31 = vmul.f32 %v7884_v8, %v1644_v29 }
 0x669   : > { %v7902_v20 = vsub.f32 %v7860_v32, %v1672_v31 }
 0x66b   : > { %v1690_v22 = vmul.f32 %v7902_v20, %v7902_v20 }
 0x66d   : > { %v1703_v34 = vsel %vm794_vm0, %v1690_v22, 0.0 }
 0x66e   : > { %1704 = vadd.xlane.f32.xlu2 %v1703_v34  ;;  %v1647_v35 = vpop.xlane.xlu1 %1646  ;;  %1661 = vadd.xlane.f32.xlu1 %v1660_v41  ;;  %v777_v34 = vld [vmem:[%s10457_s18] sm:$0xf] }
 0x66f   : > { %v1673_v43 = vmul.f32 %v7884_v8, %v1647_v35  ;;  %v7985_v35 = vperm.slane %v776_v28, 0 }
 0x671   : > { %v7913_v52 = vsub.f32 %v7864_v36, %v1673_v43 }
 0x673   : > { %v1691_v32 = vmul.f32 %v7913_v52, %v7913_v52 }
 0x675   : > { %v1706_v56 = vsel %vm794_vm0, %v1691_v32, 0.0 }
 0x676   : > { %v1650_v1 = vpop.xlane.xlu1 %1649  ;;  %1707 = vadd.xlane.f32.xlu1 %v1706_v56 }
 0x677   : > { %v1674_v10 = vmul.f32 %v7884_v8, %v1650_v1  ;;  %v7989_v1 = vperm.slane %v777_v34, 0 }
 0x679   : > { %v7920_v37 = vsub.f32 %v7868_v40, %v1674_v10 }
 0x67b   : > { %v1692_v38 = vmul.f32 %v7920_v37, %v7920_v37 }
 0x67d   : > { %v1709_v39 = vsel %vm794_vm0, %v1692_v38, 0.0 }
 0x67e   : > { %v1653_v50 = vpop.xlane.xlu1 %1652  ;;  %1710 = vadd.xlane.f32.xlu1 %v1709_v39 }
 0x67f   : > { %v1675_v36 = vmul.f32 %v7884_v8, %v1653_v50 }
 0x681   : > { %v7927_v42 = vsub.f32 %v7872_v49, %v1675_v36 }
 0x683   : > { %v1693_v44 = vmul.f32 %v7927_v42, %v7927_v42 }
 0x685   : > { %v1712_v45 = vsel %vm794_vm0, %v1693_v44, 0.0 }
 0x686   : > { %v1656_v46 = vpop.xlane.xlu0 %1655  ;;  %1713 = vadd.xlane.f32.xlu1 %v1712_v45 }
 0x687   : > { %v1676_v40 = vmul.f32 %v7884_v8, %v1656_v46 }
 0x689   : > { %v7934_v47 = vsub.f32 %v7876_v59, %v1676_v40  ;;  %v6688_v59 = vld [vmem:[%s10450_s11 + $0x38] sm:$0xff] }
 0x68a   : > { %1962 = vmatpush.msrb.mxu0 %v6688_v59 }
 0x68b   : > { %v1694_v48 = vmul.f32 %v7934_v47, %v7934_v47 }
 0x68c   : > { %1963 = vmatpush.msrb.mxu0 %v6687_v61 }
 0x68d   : > { %v1715_v51 = vsel %vm794_vm0, %v1694_v48, 0.0 }
 0x68e   : > { %v1659_v53 = vpop.xlane.xlu1 %1658  ;;  %1716 = vadd.xlane.f32.xlu1 %v1715_v51 }
 0x68f   : > { %v1677_v49 = vmul.f32 %v7884_v8, %v1659_v53 }
 0x691   : > { %v7941_v54 = vsub.f32 %v7880_v63, %v1677_v49  ;;  %v6686_v63 = vld [vmem:[%s10450_s11 + $0x28] sm:$0xff] }
 0x692   : > { %1964 = vmatpush.msrb.mxu0 %v6686_v63 }
 0x693   : > { %v1695_v55 = vmul.f32 %v7941_v54, %v7941_v54 }
 0x694   : > { %1965 = vmatpush.msrb.mxu0 %v6685_v3 }
 0x695   : > { %v1718_v57 = vsel %vm794_vm0, %v1695_v55, 0.0 }
 0x696   : > { %1719 = vadd.xlane.f32.xlu1 %v1718_v57 }
 0x6d1   : > { %v1699_v15 = vpop.xlane.xlu1 %1698 }
 0x6d2   : > { %v1724_v0 = vmul.f32 %v1699_v15, %v7884_v8 }
 0x6d4   : > { %v1733_v4 = vadd.f32 2.5e-06, %v1724_v0 }
 0x6d6   : > { %7009 = vrsqrt.f32 %v1733_v4  ;;  %vm1748_vm13 = vweird.f32 %v1733_v4 }
 0x6d9   : > { %v1702_v5 = vpop.xlane.xlu1 %1701 }
 0x6da   : > { %v1725_v6 = vmul.f32 %v1702_v5, %v7884_v8 }
 0x6dc   : > { %v7010_v7 = vpop.eup %7009  ;;  %v1734_v9 = vadd.f32 2.5e-06, %v1725_v6 }
 0x6dd   : > { %v1743_v11 = vmul.f32 %v7010_v7, %v1733_v4  ;;  %vm1749_vm11 = vweird.f32 %v7010_v7 }
 0x6de   : > { %7011 = vrsqrt.f32 %v1734_v9  ;;  %vm1750_vm14 = vmor %vm1748_vm13, %vm1749_vm11  ;;  %vm1758_vm7 = vweird.f32 %v1734_v9 }
 0x6df   : > { %v1744_v17 = vmul.f32 %v7010_v7, %v1743_v11 }
 0x6e1   : > { %v1745_v18 = vmul.f32 0.5, %v1744_v17  ;;  %v1662_v24 = vpop.xlane.xlu1 %1661  ;;  %v1705_v16 = vpop.xlane.xlu2 %1704 }
 0x6e2   : > { %v1678_v25 = vmul.f32 %v7884_v8, %v1662_v24  ;;  %v1726_v26 = vmul.f32 %v1705_v16, %v7884_v8 }
 0x6e3   : > { %v1746_v23 = vsub.f32 1.5, %v1745_v18 }
 0x6e4   : > { %v7012_v21 = vpop.eup %7011  ;;  %v7978_v29 = vsub.f32 %v7904_v33, %v1678_v25  ;;  %v1735_v30 = vadd.f32 2.5e-06, %v1726_v26 }
 0x6e5   : > { %v1747_v31 = vmul.f32 %v7010_v7, %v1746_v23  ;;  %v1753_v22 = vmul.f32 %v7012_v21, %v1734_v9  ;;  %vm1759_vm15 = vweird.f32 %v7012_v21 }
 0x6e6   : > { %7013 = vrsqrt.f32 %v1735_v30  ;;  %v1696_v41 = vmul.f32 %v7978_v29, %v7978_v29  ;;  %vm1760_vm8 = vmor %vm1758_vm7, %vm1759_vm15  ;;  %vm1768_vm5 = vweird.f32 %v1735_v30 }
 0x6e7   : > { %v1751_v43 = vsel %vm1750_vm14, %v7010_v7, %v1747_v31  ;;  %v1754_v32 = vmul.f32 %v7012_v21, %v1753_v22 }
 0x6e8   : > { %v1832_v33 = vmul.f32 %v1751_v43, %v7888_v19  ;;  %v1721_v56 = vsel %vm794_vm0, %v1696_v41, 0.0 }
 0x6e9   : > { %v1755_v10 = vmul.f32 0.5, %v1754_v32  ;;  %1722 = vadd.xlane.f32.xlu1 %v1721_v56  ;;  %v1708_v38 = vpop.xlane.xlu1 %1707 }
 0x6ea   : > { %v1727_v39 = vmul.f32 %v1708_v38, %v7884_v8  ;;  %v1842_v50 = vmul.f32 %v7985_v35, %v1832_v33 }
 0x6eb   : > { %v1756_v36 = vsub.f32 1.5, %v1755_v10 }
 0x6ec   : > { %v7014_v44 = vpop.eup %7013  ;;  %v1736_v45 = vadd.f32 2.5e-06, %v1727_v39  ;;  %v7994_v46 = vadd.f32 %v7989_v1, %v1842_v50 }
 0x6ed   : > { %v1757_v40 = vmul.f32 %v7012_v21, %v1756_v36  ;;  %v1763_v19 = vmul.f32 %v7014_v44, %v1735_v30  ;;  %vm1769_vm6 = vweird.f32 %v7014_v44 }
 0x6ee   : > { %7015 = vrsqrt.f32 %v1736_v45  ;;  %6676 = vmatmul.msk.f32.vlgmr.msrb.gmra.mxu1 %vm794_vm0, %v7994_v46  ;;  %6689 = vmatmul.msk.f32.vlgmr.msrb.gmra.mxu0 %vm794_vm0, %v7994_v46  ;;  %vm1770_vm3 = vmor %vm1768_vm5, %vm1769_vm6  ;;  %vm1778_vm9 = vweird.f32 %v1736_v45 }
 0x6ef   : > { %v1764_v48 = vmul.f32 %v7014_v44, %v1763_v19  ;;  %v1761_v51 = vsel %vm1760_vm8, %v7012_v21, %v1757_v40 }
 0x6f0   : > { %v1833_v53 = vmul.f32 %v1761_v51, %v7895_v27 }
 0x6f1   : > { %v1765_v49 = vmul.f32 0.5, %v1764_v48  ;;  %v1711_v55 = vpop.xlane.xlu1 %1710 }
 0x6f2   : > { %v1728_v57 = vmul.f32 %v1711_v55, %v7884_v8  ;;  %v1843_v58 = vmul.f32 %v7985_v35, %v1833_v53 }
 0x6f3   : > { %v1766_v59 = vsub.f32 1.5, %v1765_v49 }
 0x6f4   : > { %v7016_v60 = vpop.eup %7015  ;;  %v1737_v61 = vadd.f32 2.5e-06, %v1728_v57  ;;  %v8004_v62 = vadd.f32 %v7989_v1, %v1843_v58 }
 0x6f5   : > { %v1767_v63 = vmul.f32 %v7014_v44, %v1766_v59  ;;  %v1773_v15 = vmul.f32 %v7016_v60, %v1736_v45  ;;  %vm1779_vm4 = vweird.f32 %v7016_v60 }
 0x6f6   : > { %7017 = vrsqrt.f32 %v1737_v61  ;;  %6677 = vmatmul.msk.f32.gmra.mxu1 %vm794_vm0, %v8004_v62  ;;  %6690 = vmatmul.msk.f32.gmra.mxu0 %vm794_vm0, %v8004_v62  ;;  %vm1780_vm10 = vmor %vm1778_vm9, %vm1779_vm4  ;;  %vm1788_vm11 = vweird.f32 %v1737_v61 }
 0x6f7   : > { %v1774_v27 = vmul.f32 %v7016_v60, %v1773_v15  ;;  %v1771_v0 = vsel %vm1770_vm3, %v7014_v44, %v1767_v63 }
 0x6f8   : > { %v1834_v2 = vmul.f32 %v1771_v0, %v7902_v20 }
 0x6f9   : > { %v1775_v3 = vmul.f32 0.5, %v1774_v27  ;;  %v1714_v4 = vpop.xlane.xlu1 %1713 }
 0x6fa   : > { %v1729_v5 = vmul.f32 %v1714_v4, %v7884_v8  ;;  %v1844_v6 = vmul.f32 %v7985_v35, %v1834_v2 }
 0x6fb   : > { %v1776_v7 = vsub.f32 1.5, %v1775_v3 }
 0x6fc   : > { %v7018_v9 = vpop.eup %7017  ;;  %v1738_v11 = vadd.f32 2.5e-06, %v1729_v5  ;;  %v8014_v17 = vadd.f32 %v7989_v1, %v1844_v6 }
 0x6fd   : > { %v1777_v18 = vmul.f32 %v7016_v60, %v1776_v7  ;;  %v1783_v24 = vmul.f32 %v7018_v9, %v1737_v61  ;;  %vm1789_vm1 = vweird.f32 %v7018_v9  ;;  %v6701_v7 = vld [vmem:[%s10450_s11 + $0x58] sm:$0xff] }
 0x6fe   : > { %7019 = vrsqrt.f32 %v1738_v11  ;;  %6678 = vmatmul.msk.f32.gmra.mxu1 %vm794_vm0, %v8014_v17  ;;  %6691 = vmatmul.msk.f32.gmra.mxu0 %vm794_vm0, %v8014_v17  ;;  %vm1790_vm13 = vmor %vm1788_vm11, %vm1789_vm1  ;;  %vm1798_vm15 = vweird.f32 %v1738_v11 }
 0x6ff   : > { %v1784_v20 = vmul.f32 %v7018_v9, %v1783_v24  ;;  %v1781_v16 = vsel %vm1780_vm10, %v7016_v60, %v1777_v18  ;;  %6950 = vmatpush.msra.mxu2 %v6701_v7  ;;  %2011 = vmatpush.msra.mxu1 %v6701_v7 }
 0x700   : > { %v1835_v25 = vmul.f32 %v1781_v16, %v7913_v52 }
 0x701   : > { %v1785_v26 = vmul.f32 0.5, %v1784_v20  ;;  %v1717_v23 = vpop.xlane.xlu1 %1716 }
 0x702   : > { %v1730_v28 = vmul.f32 %v1717_v23, %v7884_v8  ;;  %v1845_v21 = vmul.f32 %v7985_v35, %v1835_v25 }
 0x703   : > { %v1786_v30 = vsub.f32 1.5, %v1785_v26 }
 0x704   : > { %v7020_v31 = vpop.eup %7019  ;;  %v1739_v22 = vadd.f32 2.5e-06, %v1730_v28  ;;  %v8024_v34 = vadd.f32 %v7989_v1, %v1845_v21 }
 0x705   : > { %v1787_v41 = vmul.f32 %v7018_v9, %v1786_v30  ;;  %v1793_v43 = vmul.f32 %v7020_v31, %v1738_v11  ;;  %vm1799_vm14 = vweird.f32 %v7020_v31  ;;  %v6698_v11 = vld [vmem:[%s10450_s11 + $0x40] sm:$0xff] }
 0x706   : > { %7021 = vrsqrt.f32 %v1739_v22  ;;  %6679 = vmatmul.msk.f32.gmra.mxu1 %vm794_vm0, %v8024_v34  ;;  %6692 = vmatmul.msk.f32.gmra.mxu0 %vm794_vm0, %v8024_v34  ;;  %vm1800_vm7 = vmor %vm1798_vm15, %vm1799_vm14  ;;  %vm1808_vm6 = vweird.f32 %v1739_v22 }
 0x707   : > { %v1794_v52 = vmul.f32 %v7020_v31, %v1793_v43  ;;  %v1791_v32 = vsel %vm1790_vm13, %v7018_v9, %v1787_v41  ;;  %v6700_v9 = vld [vmem:[%s10450_s11 + $0x50] sm:$0xff] }
 0x708   : > { %v1836_v33 = vmul.f32 %v1791_v32, %v7920_v37  ;;  %6951 = vmatpush.msra.mxu2 %v6700_v9  ;;  %2012 = vmatpush.msra.mxu1 %v6700_v9 }
 0x709   : > { %v1795_v56 = vmul.f32 0.5, %v1794_v52  ;;  %v1720_v10 = vpop.xlane.xlu1 %1719 }
 0x70a   : > { %v1731_v38 = vmul.f32 %v1720_v10, %v7884_v8  ;;  %v1846_v39 = vmul.f32 %v7985_v35, %v1836_v33 }
 0x70b   : > { %v1796_v50 = vsub.f32 1.5, %v1795_v56 }
 0x70c   : > { %v7022_v36 = vpop.eup %7021  ;;  %v1740_v44 = vadd.f32 2.5e-06, %v1731_v38  ;;  %v8034_v45 = vadd.f32 %v7989_v1, %v1846_v39 }
 0x70d   : > { %v1797_v40 = vmul.f32 %v7020_v31, %v1796_v50  ;;  %v1803_v19 = vmul.f32 %v7022_v36, %v1739_v22  ;;  %vm1809_vm8 = vweird.f32 %v7022_v36 }
 0x70e   : > { %7023 = vrsqrt.f32 %v1740_v44  ;;  %6680 = vmatmul.msk.f32.gmra.mxu1 %vm794_vm0, %v8034_v45  ;;  %6693 = vmatmul.msk.f32.gmra.mxu0 %vm794_vm0, %v8034_v45  ;;  %vm1810_vm5 = vmor %vm1808_vm6, %vm1809_vm8  ;;  %vm1818_vm4 = vweird.f32 %v1740_v44 }
 0x70f   : > { %v1804_v37 = vmul.f32 %v7022_v36, %v1803_v19  ;;  %v1801_v48 = vsel %vm1800_vm7, %v7020_v31, %v1797_v40  ;;  %v784_v19 = vadd.s32 1, %v7587_v14 }
 0x710   : > { %v1837_v51 = vmul.f32 %v1801_v48, %v7927_v42  ;;  %v782_v48 = vmul.u32 8, %v7587_v14 }
 0x711   : > { %v1805_v53 = vmul.f32 0.5, %v1804_v37 }
 0x712   : > { %v1847_v49 = vmul.f32 %v7985_v35, %v1837_v51  ;;  %v785_v51 = vmul.u32 8, %v784_v19  ;;  %vm783_vm13 = vcmp.ge.s32.totalorder %v7659_v12, %v782_v48 }
 0x713   : > { %v1806_v55 = vsub.f32 1.5, %v1805_v53 }
 0x714   : > { %v7024_v57 = vpop.eup %7023  ;;  %v8043_v58 = vadd.f32 %v7989_v1, %v1847_v49  ;;  %vm786_vm14 = vcmp.lt.s32.totalorder %v7659_v12, %v785_v51 }
 0x715   : > { %v1807_v59 = vmul.f32 %v7022_v36, %v1806_v55  ;;  %v1813_v60 = vmul.f32 %v7024_v57, %v1740_v44  ;;  %vm1819_vm3 = vweird.f32 %v7024_v57  ;;  %vm787_vm15 = vmand %vm783_vm13, %vm786_vm14 }
 0x716   : > { %6681 = vmatmul.msk.f32.gmra.mxu1 %vm794_vm0, %v8043_v58  ;;  %6694 = vmatmul.msk.f32.gmra.mxu0 %vm794_vm0, %v8043_v58  ;;  %vm1820_vm9 = vmor %vm1818_vm4, %vm1819_vm3  ;;  %v8122_v49 = vsel %vm787_vm15, 1.0, %v7437_v13 }
 0x717   : > { %v1814_v42 = vmul.f32 %v7024_v57, %v1813_v60  ;;  %v1811_v61 = vsel %vm1810_vm5, %v7022_v36, %v1807_v59  ;;  %v8126_v14 = vperm.slane %v8122_v49, 0 }
 0x718   : > { %v1838_v63 = vmul.f32 %v1811_v61, %v7934_v47 }
 0x719   : > { %v1815_v15 = vmul.f32 0.5, %v1814_v42 }
 0x71a   : > { %v1848_v27 = vmul.f32 %v7985_v35, %v1838_v63 }
 0x71b   : > { %v1816_v0 = vsub.f32 1.5, %v1815_v15 }
 0x71c   : > { %v1858_v2 = vadd.f32 %v7989_v1, %v1848_v27 }
 0x71d   : > { %v1817_v3 = vmul.f32 %v7024_v57, %v1816_v0 }
 0x71e   : > { %6682 = vmatmul.msk.f32.gmra.mxu1 %vm794_vm0, %v1858_v2  ;;  %6695 = vmatmul.msk.f32.gmra.mxu0 %vm794_vm0, %v1858_v2 }
 0x71f   : > { %v1821_v4 = vsel %vm1820_vm9, %v7024_v57, %v1817_v3  ;;  %v8157_v3 = vperm.slane %v8122_v49, 1 }
 0x720   : > { %v1839_v5 = vmul.f32 %v1821_v4, %v7941_v54  ;;  %v6699_v54 = vld [vmem:[%s10450_s11 + $0x48] sm:$0xff] }
 0x721   : > { %6952 = vmatpush.msra.mxu2 %v6699_v54  ;;  %2013 = vmatpush.msra.mxu1 %v6699_v54 }
 0x722   : > { %v1849_v6 = vmul.f32 %v7985_v35, %v1839_v5 }
 0x723   : > { %6953 = vmatpush.msra.mxu2 %v6698_v11  ;;  %2014 = vmatpush.msra.mxu1 %v6698_v11 }
 0x724   : > { %v1859_v47 = vadd.f32 %v7989_v1, %v1849_v6 }
 0x726   : > { %6683 = vmatmul.msk.f32.gmra.mxu1 %vm794_vm0, %v1859_v47  ;;  %6696 = vmatmul.msk.f32.gmra.mxu0 %vm794_vm0, %v1859_v47 }
 0x75c   : > { %v1723_v18 = vpop.xlane.xlu1 %1722 }
 0x75d   : > { %v1732_v24 = vmul.f32 %v1723_v18, %v7884_v8  ;;  %v8192_v18 = vld [vmem:[%s8186_s21] sm:$0xff] }
 0x75e   : > { %vm2379_vm7 = vcmp.lt.f32.partialorder %v8192_v18, -0.5 }
 0x75f   : > { %v1741_v20 = vadd.f32 2.5e-06, %v1732_v24 }
 0x761   : > { %7025 = vrsqrt.f32 %v1741_v20  ;;  %vm1828_vm1 = vweird.f32 %v1741_v20 }
 0x767   : > { %v7026_v16 = vpop.eup %7025 }
 0x768   : > { %v1823_v25 = vmul.f32 %v7026_v16, %v1741_v20  ;;  %vm1829_vm10 = vweird.f32 %v7026_v16 }
 0x769   : > { %vm1830_vm11 = vmor %vm1828_vm1, %vm1829_vm10 }
 0x76a   : > { %v1824_v26 = vmul.f32 %v7026_v16, %v1823_v25 }
 0x76c   : > { %v1825_v23 = vmul.f32 0.5, %v1824_v26 }
 0x76e   : > { %v1826_v28 = vsub.f32 1.5, %v1825_v23  ;;  %v8206_v23 = vld [vmem:[%s8186_s21 + $0x8] sm:$0xff] }
 0x76f   : > { %vm2380_vm8 = vcmp.lt.f32.partialorder %v8206_v23, -0.5 }
 0x770   : > { %v1827_v21 = vmul.f32 %v7026_v16, %v1826_v28  ;;  %v8209_v28 = vperm.slane %v8122_v49, 2 }
 0x772   : > { %v1831_v30 = vsel %vm1830_vm11, %v7026_v16, %v1827_v21 }
 0x773   : > { %v1840_v31 = vmul.f32 %v1831_v30, %v7978_v29  ;;  %v8088_v29 = vpop.f32.mrf.mxu1 }
 0x774   : > { %v2044_v12 = vmul.f32 %v8126_v14, %v8088_v29  ;;  %v2054_v4 = vmul.f32 %v8157_v3, %v8088_v29 }
 0x775   : > { %v1850_v22 = vmul.f32 %v7985_v35, %v1840_v31  ;;  %v1967_v35 = vpop.f32.mrf.mxu0 }
 0x777   : > { %v1860_v41 = vadd.f32 %v7989_v1, %v1850_v22  ;;  %v2064_v22 = vmul.f32 %v8209_v28, %v8088_v29 }
 0x779   : > { %6684 = vmatmul.msk.f32.gmra.mxu1 %vm794_vm0, %v1860_v41  ;;  %6697 = vmatmul.msk.f32.gmra.mxu0 %vm794_vm0, %v1860_v41 }
 0x77a   : > { %6710 = vmatmul.msk.f32.vlgmr.msra.gmra.mxu2 %vm794_vm0, %v1860_v41 }
 0x77b   : > { %v8093_v1 = vpop.f32.mrf.mxu1 }
 0x77c   : > { %v2055_v5 = vmul.f32 %v8157_v3, %v8093_v1 }
 0x781   : > { %6702 = vmatmul.msk.f32.vlgmr.msra.gmra.mxu1 %vm794_vm0, %v7994_v46  ;;  %v1970_v46 = vpop.f32.mrf.mxu0 }
 0x789   : > { %6703 = vmatmul.msk.f32.gmra.mxu1 %vm794_vm0, %v8004_v62  ;;  %v8096_v62 = vpop.f32.mrf.mxu1 }
 0x78a   : > { %v2046_v59 = vmul.f32 %v8126_v14, %v8096_v62  ;;  %v2056_v6 = vmul.f32 %v8157_v3, %v8096_v62 }
 0x791   : > { %6704 = vmatmul.msk.f32.gmra.mxu1 %vm794_vm0, %v8014_v17  ;;  %v1973_v17 = vpop.f32.mrf.mxu0 }
 0x799   : > { %6705 = vmatmul.msk.f32.gmra.mxu1 %vm794_vm0, %v8024_v34  ;;  %v8098_v34 = vpop.f32.mrf.mxu1  ;;  %v1976_v43 = vpop.f32.mrf.mxu0 }
 0x79a   : > { %v2047_v42 = vmul.f32 %v8126_v14, %v8098_v34 }
 0x7a1   : > { %6706 = vmatmul.msk.f32.gmra.mxu1 %vm794_vm0, %v8034_v45  ;;  %v8100_v52 = vpop.f32.mrf.mxu1  ;;  %v1979_v32 = vpop.f32.mrf.mxu0 }
 0x7a2   : > { %v2048_v63 = vmul.f32 %v8126_v14, %v8100_v52  ;;  %v2058_v7 = vmul.f32 %v8157_v3, %v8100_v52 }
 0x7a9   : > { %6707 = vmatmul.msk.f32.gmra.mxu1 %vm794_vm0, %v8043_v58  ;;  %v8102_v33 = vpop.f32.mrf.mxu1  ;;  %v1982_v56 = vpop.f32.mrf.mxu0  ;;  %v2045_v58 = vmul.f32 %v8126_v14, %v8093_v1 }
 0x7aa   : > { %v2049_v15 = vmul.f32 %v8126_v14, %v8102_v33  ;;  %v2059_v9 = vmul.f32 %v8157_v3, %v8102_v33 }
 0x7b1   : > { %6708 = vmatmul.msk.f32.gmra.mxu1 %vm794_vm0, %v1858_v2  ;;  %v8104_v10 = vpop.f32.mrf.mxu1  ;;  %v1985_v38 = vpop.f32.mrf.mxu0 }
 0x7b2   : > { %v2050_v27 = vmul.f32 %v8126_v14, %v8104_v10  ;;  %v2060_v54 = vmul.f32 %v8157_v3, %v8104_v10 }
 0x7b9   : > { %6709 = vmatmul.msk.f32.gmra.mxu1 %vm794_vm0, %v1859_v47  ;;  %v8106_v39 = vpop.f32.mrf.mxu1  ;;  %v1988_v50 = vpop.f32.mrf.mxu0  ;;  %v2057_v47 = vmul.f32 %v8157_v3, %v8098_v34 }
 0x7ba   : > { %v2051_v0 = vmul.f32 %v8126_v14, %v8106_v39  ;;  %v2061_v11 = vmul.f32 %v8157_v3, %v8106_v39 }
 0x7f6   : > { %v8108_v36 = vpop.f32.mrf.mxu1  ;;  %v1991_v44 = vpop.f32.mrf.mxu0 }
 0x7f7   : > { %6711 = vmatpush.xpose.msk.msra.mxu3 %vm794_vm0, %v1991_v44  ;;  %v2052_v2 = vmul.f32 %v8126_v14, %v8108_v36  ;;  %v2062_v25 = vmul.f32 %v8157_v3, %v8108_v36 }
 0x7fb   : > { %6712 = vmatpush.xpose.msk.msra.mxu3 %vm794_vm0, %v1988_v50 }
 0x7fd   : > { %v2040_v45 = vpop.f32.mrf.mxu2 }
 0x7fe   : > { %3421 = vmatpush.msrb.mxu1 %v2040_v45  ;;  %v2016_v40 = vpop.f32.mrf.mxu1 }
 0x7ff   : > { %6713 = vmatpush.xpose.msk.msra.mxu3 %vm794_vm0, %v1985_v38  ;;  %v8237_v38 = vld [vmem:[%s8186_s21 + $0x18] sm:$0xff] }
 0x800   : > { %vm2382_vm5 = vcmp.lt.f32.partialorder %v8237_v38, -0.5 }
 0x803   : > { %6714 = vmatpush.xpose.msk.msra.mxu3 %vm794_vm0, %v1982_v56 }
 0x806   : > { %v2019_v37 = vpop.f32.mrf.mxu1 }
 0x807   : > { %6715 = vmatpush.xpose.msk.msra.mxu3 %vm794_vm0, %v1979_v32  ;;  %v2065_v32 = vmul.f32 %v8209_v28, %v8093_v1 }
 0x80b   : > { %6716 = vmatpush.xpose.msk.msra.mxu3 %vm794_vm0, %v1976_v43 }
 0x80e   : > { %v2022_v53 = vpop.f32.mrf.mxu1 }
 0x80f   : > { %6717 = vmatpush.xpose.msk.msra.mxu3 %vm794_vm0, %v1973_v17 }
 0x813   : > { %6718 = vmatpush.xpose.msk.msra.mxu3 %vm794_vm0, %v1970_v46 }
 0x816   : > { %v2025_v55 = vpop.f32.mrf.mxu1 }
 0x817   : > { %6719 = vmatpush.xpose.msk.msra.mxu3 %vm794_vm0, %v1967_v35  ;;  %v8223_v35 = vld [vmem:[%s8186_s21 + $0x10] sm:$0xff] }
 0x818   : > { %vm2381_vm6 = vcmp.lt.f32.partialorder %v8223_v35, -0.5 }
 0x81a   : > { %6720 = vmatmul.msk.f32.vlgmr.msra.gmra.mxu3 %vm794_vm0, %v2044_v12 }
 0x81e   : > { %v2028_v57 = vpop.f32.mrf.mxu1 }
 0x822   : > { %6721 = vmatmul.msk.f32.gmra.mxu3 %vm794_vm0, %v2045_v58 }
 0x826   : > { %v2031_v13 = vpop.f32.mrf.mxu1 }
 0x82a   : > { %6722 = vmatmul.msk.f32.gmra.mxu3 %vm794_vm0, %v2046_v59 }
 0x82e   : > { %v2034_v60 = vpop.f32.mrf.mxu1 }
 0x832   : > { %6723 = vmatmul.msk.f32.gmra.mxu3 %vm794_vm0, %v2047_v42 }
 0x836   : > { %v2037_v61 = vpop.f32.mrf.mxu1 }
 0x837   : > { %3422 = vmatpush.msrb.mxu1 %v2037_v61  ;;  %v8279_v61 = vld [vmem:[%s8186_s21 + $0x30] sm:$0xff] }
 0x838   : > { %vm2385_vm9 = vcmp.lt.f32.partialorder %v8279_v61, -0.5 }
 0x839   : > { %3423 = vmatpush.msrb.mxu1 %v2034_v60  ;;  %v2068_v60 = vmul.f32 %v8209_v28, %v8100_v52 }
 0x83a   : > { %6724 = vmatmul.msk.f32.gmra.mxu3 %vm794_vm0, %v2048_v63 }
 0x83b   : > { %3424 = vmatpush.msrb.mxu1 %v2031_v13 }
 0x83d   : > { %3425 = vmatpush.msrb.mxu1 %v2028_v57  ;;  %v8265_v57 = vld [vmem:[%s8186_s21 + $0x28] sm:$0xff] }
 0x83e   : > { %vm2384_vm4 = vcmp.lt.f32.partialorder %v8265_v57, -0.5 }
 0x83f   : > { %3426 = vmatpush.msrb.mxu1 %v2025_v55  ;;  %v2067_v55 = vmul.f32 %v8209_v28, %v8098_v34 }
 0x841   : > { %3427 = vmatpush.msrb.mxu1 %v2022_v53 }
 0x842   : > { %6725 = vmatmul.msk.f32.gmra.mxu3 %vm794_vm0, %v2049_v15 }
 0x843   : > { %3428 = vmatpush.msrb.mxu1 %v2019_v37  ;;  %v8251_v37 = vld [vmem:[%s8186_s21 + $0x20] sm:$0xff] }
 0x844   : > { %vm2383_vm3 = vcmp.lt.f32.partialorder %v8251_v37, -0.5 }
 0x845   : > { %3429 = vmatpush.msrb.mxu1 %v2016_v40  ;;  %v2066_v40 = vmul.f32 %v8209_v28, %v8096_v62 }
 0x84a   : > { %6726 = vmatmul.msk.f32.gmra.mxu3 %vm794_vm0, %v2050_v27 }
 0x852   : > { %6727 = vmatmul.msk.f32.gmra.mxu3 %vm794_vm0, %v2051_v0  ;;  %v2069_v0 = vmul.f32 %v8209_v28, %v8102_v33 }
 0x85a   : > { %6728 = vmatmul.msk.f32.gmra.mxu3 %vm794_vm0, %v2052_v2 }
 0x862   : > { %6729 = vmatmul.msk.f32.gmra.mxu3 %vm794_vm0, %v2054_v4  ;;  %v8293_v4 = vld [vmem:[%s8186_s21 + $0x38] sm:$0xff] }
 0x863   : > { %vm2386_vm10 = vcmp.lt.f32.partialorder %v8293_v4, -0.5 }
 0x86a   : > { %6730 = vmatmul.msk.f32.gmra.mxu3 %vm794_vm0, %v2055_v5 }
 0x872   : > { %6731 = vmatmul.msk.f32.gmra.mxu3 %vm794_vm0, %v2056_v6 }
 0x87a   : > { %6732 = vmatmul.msk.f32.gmra.mxu3 %vm794_vm0, %v2057_v47 }
 0x882   : > { %6733 = vmatmul.msk.f32.gmra.mxu3 %vm794_vm0, %v2058_v7  ;;  %v2070_v7 = vmul.f32 %v8209_v28, %v8104_v10 }
 0x88a   : > { %6734 = vmatmul.msk.f32.gmra.mxu3 %vm794_vm0, %v2059_v9 }
 0x892   : > { %6735 = vmatmul.msk.f32.gmra.mxu3 %vm794_vm0, %v2060_v54  ;;  %v2071_v54 = vmul.f32 %v8209_v28, %v8106_v39 }
 0x89a   : > { %6736 = vmatmul.msk.f32.gmra.mxu3 %vm794_vm0, %v2061_v11  ;;  %v2072_v11 = vmul.f32 %v8209_v28, %v8108_v36 }
 0x89d   : > { %v2235_v24 = vpop.f32.mrf.mxu3 }
 0x89e   : > { %v2343_v20 = vmul.f32 0.35355338, %v2235_v24  ;;  %v8313_v24 = vperm.slane %v8122_v49, 3 }
 0x8a0   : > { %v8198_v16 = vsel %vm2379_vm7, %v8192_v18, %v2343_v20  ;;  %v2074_v20 = vmul.f32 %v8313_v24, %v8088_v29  ;;  %v2078_v29 = vmul.f32 %v8313_v24, %v8100_v52 }
 0x8a1   : > { %v2442_v26 = vsel %vm1095_vm12, %v8198_v16, -inf }
 0x8a2   : > { %2443 = vmax.xlane.f32.xlu1 %v2442_v26  ;;  %6737 = vmatmul.msk.f32.gmra.mxu3 %vm794_vm0, %v2062_v25  ;;  %v2075_v25 = vmul.f32 %v8313_v24, %v8093_v1  ;;  %v2076_v26 = vmul.f32 %v8313_v24, %v8096_v62  ;;  %v2079_v62 = vmul.f32 %v8313_v24, %v8102_v33 }
 0x8a5   : > { %v2238_v21 = vpop.f32.mrf.mxu3 }
 0x8a6   : > { %v2344_v30 = vmul.f32 0.35355338, %v2238_v21  ;;  %v2077_v21 = vmul.f32 %v8313_v24, %v8098_v34 }
 0x8a8   : > { %v8215_v31 = vsel %vm2380_vm8, %v8206_v23, %v2344_v30 }
 0x8a9   : > { %v2445_v41 = vsel %vm1095_vm12, %v8215_v31, -inf }
 0x8aa   : > { %2446 = vmax.xlane.f32.xlu1 %v2445_v41  ;;  %6738 = vmatmul.msk.f32.gmra.mxu3 %vm794_vm0, %v2064_v22 }
 0x8ad   : > { %v2241_v46 = vpop.f32.mrf.mxu3 }
 0x8ae   : > { %v2345_v17 = vmul.f32 0.35355338, %v2241_v46 }
 0x8b0   : > { %v8229_v43 = vsel %vm2381_vm6, %v8223_v35, %v2345_v17 }
 0x8b1   : > { %v2448_v56 = vsel %vm1095_vm12, %v8229_v43, -inf }
 0x8b2   : > { %2449 = vmax.xlane.f32.xlu1 %v2448_v56  ;;  %6739 = vmatmul.msk.f32.gmra.mxu3 %vm794_vm0, %v2065_v32  ;;  %v2080_v56 = vmul.f32 %v8313_v24, %v8104_v10 }
 0x8b5   : > { %v2244_v50 = vpop.f32.mrf.mxu3 }
 0x8b6   : > { %v2346_v44 = vmul.f32 0.35355338, %v2244_v50  ;;  %v8340_v50 = vld [vmem:[%s8186_s21 + $0x40] sm:$0xff] }
 0x8b7   : > { %vm2387_vm1 = vcmp.lt.f32.partialorder %v8340_v50, -0.5 }
 0x8b8   : > { %v8243_v45 = vsel %vm2382_vm5, %v8237_v38, %v2346_v44 }
 0x8b9   : > { %v2451_v19 = vsel %vm1095_vm12, %v8243_v45, -inf }
 0x8ba   : > { %2452 = vmax.xlane.f32.xlu1 %v2451_v19  ;;  %6740 = vmatmul.msk.f32.gmra.mxu3 %vm794_vm0, %v2066_v40 }
 0x8bd   : > { %v2247_v48 = vpop.f32.mrf.mxu3 }
 0x8be   : > { %v2347_v51 = vmul.f32 0.35355338, %v2247_v48 }
 0x8c0   : > { %v8257_v53 = vsel %vm2383_vm3, %v8251_v37, %v2347_v51 }
 0x8c1   : > { %v2454_v12 = vsel %vm1095_vm12, %v8257_v53, -inf }
 0x8c2   : > { %2455 = vmax.xlane.f32.xlu1 %v2454_v12  ;;  %6741 = vmatmul.msk.f32.gmra.mxu3 %vm794_vm0, %v2067_v55  ;;  %v2081_v12 = vmul.f32 %v8313_v24, %v8106_v39 }
 0x8c5   : > { %v2250_v58 = vpop.f32.mrf.mxu3 }
 0x8c6   : > { %v2348_v13 = vmul.f32 0.35355338, %v2250_v58 }
 0x8c8   : > { %v8271_v59 = vsel %vm2384_vm4, %v8265_v57, %v2348_v13 }
 0x8c9   : > { %v2457_v42 = vsel %vm1095_vm12, %v8271_v59, -inf }
 0x8ca   : > { %2458 = vmax.xlane.f32.xlu1 %v2457_v42  ;;  %6742 = vmatmul.msk.f32.gmra.mxu3 %vm794_vm0, %v2068_v60 }
 0x8cd   : > { %v2253_v63 = vpop.f32.mrf.mxu3 }
 0x8ce   : > { %v2349_v15 = vmul.f32 0.35355338, %v2253_v63 }
 0x8d0   : > { %v8285_v27 = vsel %vm2385_vm9, %v8279_v61, %v2349_v15 }
 0x8d1   : > { %v2460_v2 = vsel %vm1095_vm12, %v8285_v27, -inf }
 0x8d2   : > { %2461 = vmax.xlane.f32.xlu0 %v2460_v2  ;;  %6743 = vmatmul.msk.f32.gmra.mxu3 %vm794_vm0, %v2069_v0  ;;  %v2082_v2 = vmul.f32 %v8313_v24, %v8108_v36 }
 0x8d5   : > { %v2256_v5 = vpop.f32.mrf.mxu3 }
 0x8d6   : > { %v2350_v6 = vmul.f32 0.35355338, %v2256_v5 }
 0x8d8   : > { %v8299_v47 = vsel %vm2386_vm10, %v8293_v4, %v2350_v6 }
 0x8d9   : > { %v2463_v9 = vsel %vm1095_vm12, %v8299_v47, -inf }
 0x8da   : > { %2464 = vmax.xlane.f32.xlu2 %v2463_v9  ;;  %6744 = vmatmul.msk.f32.gmra.mxu3 %vm794_vm0, %v2070_v7 }
 0x8dd   : > { %v2259_v30 = vpop.f32.mrf.mxu3 }
 0x8de   : > { %v2351_v44 = vmul.f32 0.35355338, %v2259_v30 }
 0x8e0   : > { %v8350_v10 = vsel %vm2387_vm1, %v8340_v50, %v2351_v44 }
 0x8e1   : > { %v2466_v55 = vsel %vm1095_vm12, %v8350_v10, -inf }
 0x8e2   : > { %6745 = vmatmul.msk.f32.gmra.mxu3 %vm794_vm0, %v2071_v54 }
 0x8e5   : > { %v2262_v34 = vpop.f32.mrf.mxu3 }
 0x8e6   : > { %v2352_v58 = vmul.f32 0.35355338, %v2262_v34 }
 0x8e8   : > { %v8365_v60 = vsel %vm2379_vm7, %v8192_v18, %v2352_v58 }
 0x8e9   : > { %v2469_v0 = vsel %vm1095_vm12, %v8365_v60, -inf }
 0x8ea   : > { %6746 = vmatmul.msk.f32.gmra.mxu3 %vm794_vm0, %v2072_v11 }
 0x8ed   : > { %v2265_v33 = vpop.f32.mrf.mxu3 }
 0x8ee   : > { %v2353_v5 = vmul.f32 0.35355338, %v2265_v33 }
 0x8f0   : > { %v8380_v7 = vsel %vm2380_vm8, %v8206_v23, %v2353_v5 }
 0x8f2   : > { %6747 = vmatmul.msk.f32.gmra.mxu3 %vm794_vm0, %v2074_v20  ;;  %v2472_v20 = vsel %vm1095_vm12, %v8380_v7, -inf }
 0x8f5   : > { %v2268_v42 = vpop.f32.mrf.mxu3 }
 0x8fa   : > { %6748 = vmatmul.msk.f32.gmra.mxu3 %vm794_vm0, %v2075_v25  ;;  %v2354_v25 = vmul.f32 0.35355338, %v2268_v42 }
 0x8fd   : > { %v2271_v11 = vpop.f32.mrf.mxu3 }
 0x902   : > { %6749 = vmatmul.msk.f32.gmra.mxu3 %vm794_vm0, %v2076_v26 }
 0x90a   : > { %6750 = vmatmul.msk.f32.gmra.mxu3 %vm794_vm0, %v2077_v21  ;;  %v8392_v21 = vsel %vm2381_vm6, %v8223_v35, %v2354_v25 }
 0x912   : > { %6751 = vmatmul.msk.f32.gmra.mxu3 %vm794_vm0, %v2078_v29 }
 0x915   : > { %v2444_v1 = vpop.xlane.xlu1 %2443 }
 0x916   : > { %v2550_v22 = vsub.f32 %v8198_v16, %v2444_v1 }
 0x918   : > { %v2586_v41 = vmul.f32 1.442695, %v2550_v22  ;;  %v2475_v22 = vsel %vm1095_vm12, %v8392_v21, -inf }
 0x91a   : > { %7027 = vpow2.f32 %v2586_v41  ;;  %6752 = vmatmul.msk.f32.gmra.mxu3 %vm794_vm0, %v2079_v62  ;;  %v2355_v41 = vmul.f32 0.35355338, %v2271_v11  ;;  %v2274_v62 = vpop.f32.mrf.mxu3 }
 0x91b   : > { %v2356_v44 = vmul.f32 0.35355338, %v2274_v62 }
 0x91d   : > { %v2447_v46 = vpop.xlane.xlu1 %2446 }
 0x91e   : > { %v2551_v17 = vsub.f32 %v8215_v31, %v2447_v46  ;;  %v8404_v46 = vsel %vm2382_vm5, %v8237_v38, %v2355_v41 }
 0x920   : > { %v8335_v32 = vpop.eup %7027  ;;  %v2588_v52 = vmul.f32 1.442695, %v2551_v17 }
 0x921   : > { %v2658_v16 = vsel %vm1095_vm12, %v8335_v32, 0.0 }
 0x922   : > { %7029 = vpow2.f32 %v2588_v52  ;;  %2659 = vadd.xlane.f32.xlu1 %v2658_v16  ;;  %6753 = vmatmul.msk.f32.gmra.mxu3 %vm794_vm0, %v2080_v56  ;;  %v2478_v16 = vsel %vm1095_vm12, %v8404_v46, -inf  ;;  %v2277_v33 = vpop.f32.mrf.mxu3 }
 0x923   : > { %v2357_v58 = vmul.f32 0.35355338, %v2277_v33 }
 0x925   : > { %v2450_v31 = vpop.xlane.xlu1 %2449 }
 0x926   : > { %v2552_v40 = vsub.f32 %v8229_v43, %v2450_v31 }
 0x928   : > { %v8352_v19 = vpop.eup %7029  ;;  %v2590_v48 = vmul.f32 1.442695, %v2552_v40  ;;  %v8416_v40 = vsel %vm2383_vm3, %v8251_v37, %v2356_v44 }
 0x929   : > { %v2661_v51 = vsel %vm1095_vm12, %v8352_v19, 0.0 }
 0x92a   : > { %7031 = vpow2.f32 %v2590_v48  ;;  %2662 = vadd.xlane.f32.xlu0 %v2661_v51  ;;  %2467 = vmax.xlane.f32.xlu1 %v2466_v55 }
 0x92b   : > { %6754 = vmatmul.msk.f32.gmra.mxu3 %vm794_vm0, %v2081_v12  ;;  %v2481_v12 = vsel %vm1095_vm12, %v8416_v40, -inf }
 0x92d   : > { %v2453_v43 = vpop.xlane.xlu1 %2452 }
 0x92e   : > { %v2553_v13 = vsub.f32 %v8243_v45, %v2453_v43  ;;  %v2280_v43 = vpop.f32.mrf.mxu3 }
 0x930   : > { %v8367_v63 = vpop.eup %7031  ;;  %v2592_v15 = vmul.f32 1.442695, %v2553_v13 }
 0x931   : > { %v2664_v39 = vsel %vm1095_vm12, %v8367_v63, 0.0 }
 0x932   : > { %7033 = vpow2.f32 %v2592_v15  ;;  %2665 = vadd.xlane.f32.xlu2 %v2664_v39  ;;  %2470 = vmax.xlane.f32.xlu0 %v2469_v0  ;;  %v2358_v39 = vmul.f32 0.35355338, %v2280_v43 }
 0x933   : > { %6755 = vmatmul.msk.f32.gmra.mxu3 %vm794_vm0, %v2082_v2 }
 0x934   : > { %v8438_v0 = vsel %vm2385_vm9, %v8279_v61, %v2358_v39 }
 0x935   : > { %v2456_v45 = vpop.xlane.xlu1 %2455  ;;  %v2487_v2 = vsel %vm1095_vm12, %v8438_v0, -inf }
 0x936   : > { %v2554_v6 = vsub.f32 %v8257_v53, %v2456_v45  ;;  %v2283_v45 = vpop.f32.mrf.mxu3 }
 0x938   : > { %v8382_v9 = vpop.eup %7033  ;;  %v2594_v54 = vmul.f32 1.442695, %v2554_v6 }
 0x939   : > { %v2667_v36 = vsel %vm1095_vm12, %v8382_v9, 0.0 }
 0x93a   : > { %7035 = vpow2.f32 %v2594_v54  ;;  %2668 = vadd.xlane.f32.xlu1 %v2667_v36  ;;  %2473 = vmax.xlane.f32.xlu2 %v2472_v20 }
 0x93d   : > { %v2459_v53 = vpop.xlane.xlu1 %2458 }
 0x93e   : > { %v2555_v26 = vsub.f32 %v8271_v59, %v2459_v53 }
 0x940   : > { %v8394_v29 = vpop.eup %7035  ;;  %v2596_v30 = vmul.f32 1.442695, %v2555_v26 }
 0x941   : > { %v2670_v1 = vsel %vm1095_vm12, %v8394_v29, 0.0 }
 0x942   : > { %7037 = vpow2.f32 %v2596_v30  ;;  %2671 = vadd.xlane.f32.xlu0 %v2670_v1  ;;  %2476 = vmax.xlane.f32.xlu1 %v2475_v22  ;;  %v2286_v22 = vpop.f32.mrf.mxu3 }
 0x945   : > { %v2462_v59 = vpop.xlane.xlu0 %2461 }
 0x946   : > { %v2556_v34 = vsub.f32 %v8285_v27, %v2462_v59 }
 0x948   : > { %v8406_v17 = vpop.eup %7037  ;;  %v2598_v52 = vmul.f32 1.442695, %v2556_v34 }
 0x949   : > { %v2673_v56 = vsel %vm1095_vm12, %v8406_v17, 0.0 }
 0x94a   : > { %7039 = vpow2.f32 %v2598_v52  ;;  %2674 = vadd.xlane.f32.xlu2 %v2673_v56  ;;  %2479 = vmax.xlane.f32.xlu0 %v2478_v16  ;;  %v2289_v39 = vpop.f32.mrf.mxu3 }
 0x94d   : > { %v2465_v27 = vpop.xlane.xlu2 %2464 }
 0x94e   : > { %v2557_v31 = vsub.f32 %v8299_v47, %v2465_v27  ;;  %v8427_v47 = vsel %vm2384_vm4, %v8265_v57, %v2357_v58 }
 0x94f   : > { %v2484_v15 = vsel %vm1095_vm12, %v8427_v47, -inf }
 0x950   : > { %v8418_v48 = vpop.eup %7039  ;;  %v2600_v51 = vmul.f32 1.442695, %v2557_v31 }
 0x951   : > { %v2676_v55 = vsel %vm1095_vm12, %v8418_v48, 0.0 }
 0x952   : > { %7041 = vpow2.f32 %v2600_v51  ;;  %2677 = vadd.xlane.f32.xlu1 %v2676_v55  ;;  %2482 = vmax.xlane.f32.xlu2 %v2481_v12  ;;  %v2359_v51 = vmul.f32 0.35355338, %v2283_v45 }
 0x958   : > { %v8429_v13 = vpop.eup %7041 }
 0x959   : > { %v2679_v42 = vsel %vm1095_vm12, %v8429_v13, 0.0 }
 0x95a   : > { %2680 = vadd.xlane.f32.xlu0 %v2679_v42  ;;  %2485 = vmax.xlane.f32.xlu1 %v2484_v15 }
 0x962   : > { %2488 = vmax.xlane.f32.xlu0 %v2487_v2 }
 0x995   : > { %v2660_v5 = vpop.xlane.xlu1 %2659 }
 0x996   : > { %7043 = vrcp.f32 %v2660_v5  ;;  %v2777_v53 = vand.u32 2147483648, %v2660_v5  ;;  %v2775_v1 = vand.u32 2147483647, %v2660_v5  ;;  %vm2771_vm13 = vweird.f32 %v2660_v5 }
 0x998   : > { %v2778_v59 = vor.u32 1.1754944e-38, %v2777_v53  ;;  %vm2776_vm15 = vcmp.eq.f32.partialorder %v2775_v1, 8.507059e+37 }
 0x99c   : > { %v7044_v6 = vpop.eup %7043 }
 0x99d   : > { %v2767_v54 = vmul.f32 %v7044_v6, %v2660_v5  ;;  %v2663_v11 = vpop.xlane.xlu0 %2662  ;;  %v2468_v36 = vpop.xlane.xlu1 %2467  ;;  %vm2772_vm11 = vweird.f32 %v7044_v6 }
 0x99e   : > { %7045 = vrcp.f32 %v2663_v11  ;;  %v2558_v20 = vsub.f32 %v8350_v10, %v2468_v36  ;;  %vm2773_vm14 = vmor %vm2771_vm13, %vm2772_vm11  ;;  %v2792_v12 = vand.u32 2147483648, %v2663_v11  ;;  %v2790_v42 = vand.u32 2147483647, %v2663_v11 }
 0x99f   : > { %v2768_v25 = vsub.f32 1.0, %v2767_v54  ;;  %vm2786_vm13 = vweird.f32 %v2663_v11  ;;  %v8455_v54 = vsel %vm2386_vm10, %v8293_v4, %v2359_v51  ;;  %v2292_v51 = vpop.f32.mrf.mxu3 }
 0x9a0   : > { %v2602_v26 = vmul.f32 1.442695, %v2558_v20  ;;  %v2490_v1 = vsel %vm1095_vm12, %v8455_v54, -inf }
 0x9a1   : > { %v2769_v30 = vmul.f32 %v7044_v6, %v2768_v25 }
 0x9a2   : > { %7047 = vpow2.f32 %v2602_v26  ;;  %v2360_v26 = vmul.f32 0.35355338, %v2286_v22 }
 0x9a3   : > { %v2770_v41 = vadd.f32 %v7044_v6, %v2769_v30 }
 0x9a4   : > { %v7046_v62 = vpop.eup %7045 }
 0x9a5   : > { %v2774_v34 = vsel %vm2773_vm14, %v7044_v6, %v2770_v41  ;;  %v2782_v52 = vmul.f32 %v7046_v62, %v2663_v11  ;;  %v2666_v56 = vpop.xlane.xlu2 %2665  ;;  %v2471_v16 = vpop.xlane.xlu0 %2470  ;;  %vm2787_vm11 = vweird.f32 %v7046_v62 }
 0x9a6   : > { %7049 = vrcp.f32 %v2666_v56  ;;  %v2559_v10 = vsub.f32 %v8365_v60, %v2471_v16  ;;  %v2779_v44 = vsel %vm2776_vm15, %v2778_v59, %v2774_v34  ;;  %vm2788_vm14 = vmor %vm2786_vm13, %vm2787_vm11  ;;  %vm2791_vm15 = vcmp.eq.f32.partialorder %v2790_v42, 8.507059e+37 }
 0x9a7   : > { %v2783_v33 = vsub.f32 1.0, %v2782_v52  ;;  %v2780_v27 = vmul.f32 %v8335_v32, %v2779_v44  ;;  %v2793_v32 = vor.u32 1.1754944e-38, %v2792_v12  ;;  %v2807_v41 = vand.u32 2147483648, %v2666_v56 }
 0x9a8   : > { %v8445_v31 = vpop.eup %7047  ;;  %v2604_v55 = vmul.f32 1.442695, %v2559_v10  ;;  %vm2801_vm13 = vweird.f32 %v2666_v56 }
 0x9a9   : > { %6756 = vmatmul.msk.f32.vlgmr.msrb.gmra.mxu1 %vm1095_vm12, %v2780_v27  ;;  %v2682_v58 = vsel %vm1095_vm12, %v8445_v31, 0.0  ;;  %v2784_v43 = vmul.f32 %v7046_v62, %v2783_v33  ;;  %v2808_v22 = vor.u32 1.1754944e-38, %v2807_v41  ;;  %v8473_v33 = vsel %vm2387_vm1, %v8340_v50, %v2360_v26 }
 0x9aa   : > { %7051 = vpow2.f32 %v2604_v55  ;;  %2683 = vadd.xlane.f32.xlu2 %v2682_v58 }
 0x9ab   : > { %v2785_v60 = vadd.f32 %v7046_v62, %v2784_v43  ;;  %v2361_v43 = vmul.f32 0.35355338, %v2289_v39 }
 0x9ac   : > { %v7050_v15 = vpop.eup %7049 }
 0x9ad   : > { %v2797_v2 = vmul.f32 %v7050_v15, %v2666_v56  ;;  %v8450_v5 = vpop.xlane.xlu1 %2668  ;;  %v2474_v45 = vpop.xlane.xlu2 %2473  ;;  %v2789_v6 = vsel %vm2788_vm14, %v7046_v62, %v2785_v60  ;;  %vm2802_vm11 = vweird.f32 %v7050_v15  ;;  %v2493_v60 = vsel %vm1095_vm12, %v8473_v33, -inf }
 0x9ae   : > { %7053 = vrcp.f32 %v8450_v5  ;;  %v2560_v36 = vsub.f32 %v8380_v7, %v2474_v45  ;;  %v2794_v11 = vsel %vm2791_vm15, %v2793_v32, %v2789_v6  ;;  %v2805_v7 = vand.u32 2147483647, %v2666_v56  ;;  %vm2803_vm14 = vmor %vm2801_vm13, %vm2802_vm11 }
 0x9af   : > { %v2798_v20 = vsub.f32 1.0, %v2797_v2  ;;  %v2795_v25 = vmul.f32 %v8352_v19, %v2794_v11  ;;  %v2820_v2 = vand.u32 2147483647, %v8450_v5  ;;  %vm2816_vm13 = vweird.f32 %v8450_v5 }
 0x9b0   : > { %v8460_v53 = vpop.eup %7051  ;;  %v2606_v30 = vmul.f32 1.442695, %v2560_v36  ;;  %vm2806_vm15 = vcmp.eq.f32.partialorder %v2805_v7, 8.507059e+37  ;;  %v2295_v7 = vpop.f32.mrf.mxu3 }
 0x9b1   : > { %6757 = vmatmul.msk.f32.gmra.mxu1 %vm1095_vm12, %v2795_v25  ;;  %v2685_v62 = vsel %vm1095_vm12, %v8460_v53, 0.0  ;;  %v2799_v59 = vmul.f32 %v7050_v15, %v2798_v20  ;;  %v8494_v25 = vsel %vm2379_vm7, %v8192_v18, %v2361_v43 }
 0x9b2   : > { %7055 = vpow2.f32 %v2606_v30  ;;  %2686 = vadd.xlane.f32.xlu1 %v2685_v62  ;;  %2491 = vmax.xlane.f32.xlu2 %v2490_v1 }
 0x9b3   : > { %v2800_v19 = vadd.f32 %v7050_v15, %v2799_v59  ;;  %v2496_v59 = vsel %vm1095_vm12, %v8494_v25, -inf }
 0x9b4   : > { %v7054_v34 = vpop.eup %7053 }
 0x9b5   : > { %v2812_v52 = vmul.f32 %v7054_v34, %v8450_v5  ;;  %v8468_v16 = vpop.xlane.xlu0 %2671  ;;  %v2477_v10 = vpop.xlane.xlu1 %2476  ;;  %v2804_v44 = vsel %vm2803_vm14, %v7050_v15, %v2800_v19  ;;  %v2822_v15 = vand.u32 2147483648, %v8450_v5  ;;  %vm2817_vm11 = vweird.f32 %v7054_v34 }
 0x9b6   : > { %7057 = vrcp.f32 %v8468_v16  ;;  %v2561_v27 = vsub.f32 %v8392_v21, %v2477_v10  ;;  %v2809_v56 = vsel %vm2806_vm15, %v2808_v22, %v2804_v44  ;;  %vm2818_vm14 = vmor %vm2816_vm13, %vm2817_vm11  ;;  %vm2821_vm15 = vcmp.eq.f32.partialorder %v2820_v2, 8.507059e+37 }
 0x9b7   : > { %v2813_v55 = vsub.f32 1.0, %v2812_v52  ;;  %v2810_v12 = vmul.f32 %v8367_v63, %v2809_v56  ;;  %v2823_v45 = vor.u32 1.1754944e-38, %v2822_v15  ;;  %v2362_v22 = vmul.f32 0.35355338, %v2292_v51 }
 0x9b8   : > { %v8478_v58 = vpop.eup %7055  ;;  %v2608_v42 = vmul.f32 1.442695, %v2561_v27  ;;  %vm2831_vm13 = vweird.f32 %v8468_v16 }
 0x9b9   : > { %6758 = vmatmul.msk.f32.gmra.mxu1 %vm1095_vm12, %v2810_v12  ;;  %v2688_v32 = vsel %vm1095_vm12, %v8478_v58, 0.0  ;;  %v2814_v21 = vmul.f32 %v7054_v34, %v2813_v55 }
 0x9ba   : > { %7059 = vpow2.f32 %v2608_v42  ;;  %2689 = vadd.xlane.f32.xlu0 %v2688_v32  ;;  %2494 = vmax.xlane.f32.xlu1 %v2493_v60 }
 0x9bb   : > { %v2815_v63 = vadd.f32 %v7054_v34, %v2814_v21 }
 0x9bc   : > { %v7058_v39 = vpop.eup %7057 }
 0x9bd   : > { %v2827_v6 = vmul.f32 %v7058_v39, %v8468_v16  ;;  %v8489_v36 = vpop.xlane.xlu2 %2674  ;;  %v2480_v11 = vpop.xlane.xlu0 %2479  ;;  %v2819_v20 = vsel %vm2818_vm14, %v7054_v34, %v2815_v63  ;;  %vm2832_vm11 = vweird.f32 %v7058_v39 }
 0x9be   : > { %7061 = vrcp.f32 %v8489_v36  ;;  %v2562_v26 = vsub.f32 %v8404_v46, %v2480_v11  ;;  %v2824_v5 = vsel %vm2821_vm15, %v2823_v45, %v2819_v20  ;;  %v2837_v46 = vand.u32 2147483648, %v8468_v16  ;;  %vm2833_vm14 = vmor %vm2831_vm13, %vm2832_vm11 }
 0x9bf   : > { %v2828_v30 = vsub.f32 1.0, %v2827_v6  ;;  %v2825_v1 = vmul.f32 %v8382_v9, %v2824_v5  ;;  %v2835_v9 = vand.u32 2147483647, %v8468_v16  ;;  %v8517_v16 = vsel %vm2380_vm8, %v8206_v23, %v2362_v22  ;;  %v2298_v6 = vpop.f32.mrf.mxu3 }
 0x9c0   : > { %v8499_v41 = vpop.eup %7059  ;;  %v2610_v62 = vmul.f32 1.442695, %v2562_v26  ;;  %v2838_v12 = vor.u32 1.1754944e-38, %v2837_v46  ;;  %v2499_v63 = vsel %vm1095_vm12, %v8517_v16, -inf  ;;  %v2363_v45 = vmul.f32 0.35355338, %v2295_v7 }
 0x9c1   : > { %6759 = vmatmul.msk.f32.gmra.mxu1 %vm1095_vm12, %v2825_v1  ;;  %v2691_v19 = vsel %vm1095_vm12, %v8499_v41, 0.0  ;;  %v2829_v34 = vmul.f32 %v7058_v39, %v2828_v30  ;;  %vm2836_vm15 = vcmp.eq.f32.partialorder %v2835_v9, 8.507059e+37  ;;  %vm2846_vm13 = vweird.f32 %v8489_v36 }
 0x9c2   : > { %7063 = vpow2.f32 %v2610_v62  ;;  %2692 = vadd.xlane.f32.xlu2 %v2691_v19  ;;  %2497 = vmax.xlane.f32.xlu0 %v2496_v59  ;;  %v8535_v7 = vsel %vm2381_vm6, %v8223_v35, %v2363_v45 }
 0x9c3   : > { %v2830_v52 = vadd.f32 %v7058_v39, %v2829_v34 }
 0x9c4   : > { %v7062_v10 = vpop.eup %7061 }
 0x9c5   : > { %v2842_v44 = vmul.f32 %v7062_v10, %v8489_v36  ;;  %v8510_v27 = vpop.xlane.xlu1 %2677  ;;  %v2483_v56 = vpop.xlane.xlu2 %2482  ;;  %v2834_v55 = vsel %vm2833_vm14, %v7058_v39, %v2830_v52  ;;  %vm2847_vm11 = vweird.f32 %v7062_v10  ;;  %v2850_v39 = vand.u32 2147483647, %v8489_v36 }
 0x9c6   : > { %7065 = vrcp.f32 %v8510_v27  ;;  %v2563_v43 = vsub.f32 %v8416_v40, %v2483_v56  ;;  %v2839_v60 = vsel %vm2836_vm15, %v2838_v12, %v2834_v55  ;;  %v2852_v40 = vand.u32 2147483648, %v8489_v36  ;;  %vm2848_vm14 = vmor %vm2846_vm13, %vm2847_vm11 }
 0x9c7   : > { %v2843_v42 = vsub.f32 1.0, %v2842_v44  ;;  %v2840_v32 = vmul.f32 %v8394_v29, %v2839_v60  ;;  %vm2851_vm15 = vcmp.eq.f32.partialorder %v2850_v39, 8.507059e+37  ;;  %v2867_v34 = vand.u32 2147483648, %v8510_v27  ;;  %v2301_v12 = vpop.f32.mrf.mxu3 }
 0x9c8   : > { %v8519_v51 = vpop.eup %7063  ;;  %v2612_v15 = vmul.f32 1.442695, %v2563_v43  ;;  %v2853_v1 = vor.u32 1.1754944e-38, %v2852_v40  ;;  %v2865_v52 = vand.u32 2147483647, %v8510_v27  ;;  %vm2861_vm13 = vweird.f32 %v8510_v27 }
 0x9c9   : > { %v2694_v21 = vsel %vm1095_vm12, %v8519_v51, 0.0  ;;  %v2844_v2 = vmul.f32 %v7062_v10, %v2843_v42  ;;  %6760 = vmatmul.msk.f32.gmra.mxu1 %vm1095_vm12, %v2840_v32  ;;  %v2364_v44 = vmul.f32 0.35355338, %v2298_v6  ;;  %v2868_v55 = vor.u32 1.1754944e-38, %v2867_v34 }
 0x9ca   : > { %7067 = vpow2.f32 %v2612_v15  ;;  %2695 = vadd.xlane.f32.xlu1 %v2694_v21  ;;  %2500 = vmax.xlane.f32.xlu2 %v2499_v63 }
 0x9cb   : > { %v2845_v29 = vadd.f32 %v7062_v10, %v2844_v2 }
 0x9cc   : > { %v7066_v11 = vpop.eup %7065 }
 0x9cd   : > { %v2857_v20 = vmul.f32 %v7066_v11, %v8510_v27  ;;  %v2681_v26 = vpop.xlane.xlu0 %2680  ;;  %v2486_v5 = vpop.xlane.xlu1 %2485  ;;  %v2849_v30 = vsel %vm2848_vm14, %v7062_v10, %v2845_v29  ;;  %vm2862_vm11 = vweird.f32 %v7066_v11  ;;  %v2502_v10 = vsel %vm1095_vm12, %v8535_v7, -inf }
 0x9ce   : > { %7069 = vrcp.f32 %v2681_v26  ;;  %v2564_v62 = vsub.f32 %v8427_v47, %v2486_v5  ;;  %v2854_v19 = vsel %vm2851_vm15, %v2853_v1, %v2849_v30  ;;  %vm2863_vm14 = vmor %vm2861_vm13, %vm2862_vm11  ;;  %vm2866_vm15 = vcmp.eq.f32.partialorder %v2865_v52, 8.507059e+37 }
 0x9cf   : > { %v2858_v59 = vsub.f32 1.0, %v2857_v20  ;;  %v2855_v9 = vmul.f32 %v8406_v17, %v2854_v19  ;;  %v8553_v27 = vsel %vm2382_vm5, %v8237_v38, %v2364_v44  ;;  %v2882_v63 = vand.u32 2147483648, %v2681_v26  ;;  %v2304_v1 = vpop.f32.mrf.mxu3 }
 0x9d0   : > { %v8537_v36 = vpop.eup %7067  ;;  %v2614_v46 = vmul.f32 1.442695, %v2564_v62  ;;  %v2880_v29 = vand.u32 2147483647, %v2681_v26  ;;  %vm2876_vm13 = vweird.f32 %v2681_v26  ;;  %v2366_v34 = vmul.f32 0.35355338, %v2304_v1 }
 0x9d1   : > { %v2859_v22 = vmul.f32 %v7066_v11, %v2858_v59  ;;  %v2697_v47 = vsel %vm1095_vm12, %v8537_v36, 0.0  ;;  %6761 = vmatmul.msk.f32.gmra.mxu1 %vm1095_vm12, %v2855_v9  ;;  %v2883_v20 = vor.u32 1.1754944e-38, %v2882_v63 }
 0x9d2   : > { %7071 = vpow2.f32 %v2614_v46  ;;  %2698 = vadd.xlane.f32.xlu0 %v2697_v47  ;;  %2503 = vmax.xlane.f32.xlu1 %v2502_v10 }
 0x9d3   : > { %v2860_v56 = vadd.f32 %v7066_v11, %v2859_v22 }
 0x9d4   : > { %v7070_v17 = vpop.eup %7069 }
 0x9d5   : > { %v2872_v43 = vmul.f32 %v7070_v17, %v2681_v26  ;;  %v2489_v42 = vpop.xlane.xlu0 %2488  ;;  %v2864_v60 = vsel %vm2863_vm14, %v7066_v11, %v2860_v56  ;;  %vm2877_vm11 = vweird.f32 %v7070_v17 }
 0x9d6   : > { %v2565_v15 = vsub.f32 %v8438_v0, %v2489_v42  ;;  %v2869_v32 = vsel %vm2866_vm15, %v2868_v55, %v2864_v60  ;;  %v2365_v0 = vmul.f32 0.35355338, %v2301_v12  ;;  %vm2878_vm14 = vmor %vm2876_vm13, %vm2877_vm11  ;;  %vm2881_vm15 = vcmp.eq.f32.partialorder %v2880_v29, 8.507059e+37 }
 0x9d7   : > { %v2873_v21 = vsub.f32 1.0, %v2872_v43  ;;  %v2870_v2 = vmul.f32 %v8418_v48, %v2869_v32  ;;  %v2505_v48 = vsel %vm1095_vm12, %v8553_v27, -inf  ;;  %v2307_v47 = vpop.f32.mrf.mxu3 }
 0x9d8   : > { %v8555_v40 = vpop.eup %7071  ;;  %v2616_v39 = vmul.f32 1.442695, %v2565_v15  ;;  %v8566_v59 = vsel %vm2383_vm3, %v8251_v37, %v2365_v0 }
 0x9d9   : > { %v2874_v45 = vmul.f32 %v7070_v17, %v2873_v21  ;;  %v2700_v6 = vsel %vm1095_vm12, %v8555_v40, 0.0  ;;  %6762 = vmatmul.msk.f32.gmra.mxu1 %vm1095_vm12, %v2870_v2  ;;  %v2508_v46 = vsel %vm1095_vm12, %v8566_v59, -inf }
 0x9da   : > { %7073 = vpow2.f32 %v2616_v39  ;;  %2701 = vadd.xlane.f32.xlu2 %v2700_v6  ;;  %2506 = vmax.xlane.f32.xlu0 %v2505_v48 }
 0x9db   : > { %v2875_v11 = vadd.f32 %v7070_v17, %v2874_v45 }
 0x9dd   : > { %v2879_v5 = vsel %vm2878_vm14, %v7070_v17, %v2875_v11 }
 0x9de   : > { %v2884_v30 = vsel %vm2881_vm15, %v2883_v20, %v2879_v5 }
 0x9df   : > { %v2885_v62 = vmul.f32 %v8429_v13, %v2884_v30  ;;  %v8578_v13 = vsel %vm2384_vm4, %v8265_v57, %v2366_v34  ;;  %v2310_v60 = vpop.f32.mrf.mxu3 }
 0x9e0   : > { %v8568_v19 = vpop.eup %7073  ;;  %v2511_v9 = vsel %vm1095_vm12, %v8578_v13, -inf }
 0x9e1   : > { %v2703_v26 = vsel %vm1095_vm12, %v8568_v19, 0.0  ;;  %6763 = vmatmul.msk.f32.gmra.mxu1 %vm1095_vm12, %v2885_v62 }
 0x9e2   : > { %2704 = vadd.xlane.f32.xlu1 %v2703_v26  ;;  %2509 = vmax.xlane.f32.xlu2 %v2508_v46 }
 0x9e7   : > { %v2313_v46 = vpop.f32.mrf.mxu3 }
 0x9ea   : > { %2512 = vmax.xlane.f32.xlu1 %v2511_v9 }
 0xa1d   : > { %v2684_v22 = vpop.xlane.xlu2 %2683 }
 0xa1e   : > { %7075 = vrcp.f32 %v2684_v22  ;;  %v2897_v42 = vand.u32 2147483648, %v2684_v22  ;;  %v2895_v15 = vand.u32 2147483647, %v2684_v22  ;;  %vm2891_vm13 = vweird.f32 %v2684_v22 }
 0xa20   : > { %v2898_v2 = vor.u32 1.1754944e-38, %v2897_v42  ;;  %vm2896_vm15 = vcmp.eq.f32.partialorder %v2895_v15, 8.507059e+37 }
 0xa24   : > { %v7076_v52 = vpop.eup %7075 }
 0xa25   : > { %v2887_v10 = vmul.f32 %v7076_v52, %v2684_v22  ;;  %v2687_v44 = vpop.xlane.xlu1 %2686  ;;  %v2492_v56 = vpop.xlane.xlu2 %2491  ;;  %vm2892_vm11 = vweird.f32 %v7076_v52 }
 0xa26   : > { %7077 = vrcp.f32 %v2687_v44  ;;  %v2566_v17 = vsub.f32 %v8455_v54, %v2492_v56  ;;  %vm2893_vm14 = vmor %vm2891_vm13, %vm2892_vm11  ;;  %v2912_v30 = vand.u32 2147483648, %v2687_v44  ;;  %v2910_v62 = vand.u32 2147483647, %v2687_v44 }
 0xa27   : > { %v2888_v55 = vsub.f32 1.0, %v2887_v10  ;;  %vm2906_vm11 = vweird.f32 %v2687_v44 }
 0xa28   : > { %v2618_v12 = vmul.f32 1.442695, %v2566_v17  ;;  %v2913_v9 = vor.u32 1.1754944e-38, %v2912_v30 }
 0xa29   : > { %v2889_v43 = vmul.f32 %v7076_v52, %v2888_v55 }
 0xa2a   : > { %7079 = vpow2.f32 %v2618_v12 }
 0xa2b   : > { %v2890_v32 = vadd.f32 %v7076_v52, %v2889_v43 }
 0xa2c   : > { %v7078_v21 = vpop.eup %7077 }
 0xa2d   : > { %v2902_v63 = vmul.f32 %v7078_v21, %v2687_v44  ;;  %v2690_v39 = vpop.xlane.xlu0 %2689  ;;  %v2495_v45 = vpop.xlane.xlu1 %2494  ;;  %v2894_v6 = vsel %vm2893_vm14, %v7076_v52, %v2890_v32  ;;  %vm2907_vm2 = vweird.f32 %v7078_v21  ;;  %vm2911_vm14 = vcmp.eq.f32.partialorder %v2910_v62, 8.507059e+37 }
 0xa2e   : > { %7081 = vrcp.f32 %v2690_v39  ;;  %v2567_v54 = vsub.f32 %v8473_v33, %v2495_v45  ;;  %v2899_v48 = vsel %vm2896_vm15, %v2898_v2, %v2894_v6  ;;  %v2367_v33 = vmul.f32 0.35355338, %v2307_v47  ;;  %vm2908_vm13 = vmor %vm2906_vm11, %vm2907_vm2 }
 0xa2f   : > { %v2903_v29 = vsub.f32 1.0, %v2902_v63  ;;  %v2900_v20 = vmul.f32 %v8445_v31, %v2899_v48  ;;  %v2927_v12 = vand.u32 2147483648, %v2690_v39  ;;  %v2368_v2 = vmul.f32 0.35355338, %v2310_v60 }
 0xa30   : > { %v8584_v0 = vpop.eup %7079  ;;  %v2620_v11 = vmul.f32 1.442695, %v2567_v54  ;;  %v8594_v47 = vsel %vm2385_vm9, %v8279_v61, %v2367_v33  ;;  %vm2921_vm15 = vweird.f32 %v2690_v39  ;;  %v2369_v62 = vmul.f32 0.35355338, %v2313_v46 }
 0xa31   : > { %v2904_v5 = vmul.f32 %v7078_v21, %v2903_v29  ;;  %v2706_v1 = vsel %vm1095_vm12, %v8584_v0, 0.0  ;;  %6764 = vmatmul.msk.f32.gmra.mxu1 %vm1095_vm12, %v2900_v20  ;;  %v2316_v20 = vpop.f32.mrf.mxu3 }
 0xa32   : > { %7083 = vpow2.f32 %v2620_v11  ;;  %2707 = vadd.xlane.f32.xlu0 %v2706_v1 }
 0xa33   : > { %v2905_v26 = vadd.f32 %v7078_v21, %v2904_v5 }
 0xa34   : > { %v7082_v34 = vpop.eup %7081 }
 0xa35   : > { %v2917_v22 = vmul.f32 %v7082_v34, %v2690_v39  ;;  %v2693_v31 = vpop.xlane.xlu2 %2692  ;;  %v2498_v52 = vpop.xlane.xlu0 %2497  ;;  %v2909_v10 = vsel %vm2908_vm13, %v7078_v21, %v2905_v26  ;;  %vm2922_vm2 = vweird.f32 %v7082_v34  ;;  %v2514_v21 = vsel %vm1095_vm12, %v8594_v47, -inf }
 0xa36   : > { %7085 = vrcp.f32 %v2693_v31  ;;  %v2568_v56 = vsub.f32 %v8494_v25, %v2498_v52  ;;  %v2914_v55 = vsel %vm2911_vm14, %v2913_v9, %v2909_v10  ;;  %v2925_v25 = vand.u32 2147483647, %v2690_v39  ;;  %vm2923_vm11 = vmor %vm2921_vm15, %vm2922_vm2 }
 0xa37   : > { %v2918_v17 = vsub.f32 1.0, %v2917_v22  ;;  %v2915_v42 = vmul.f32 %v8460_v53, %v2914_v55  ;;  %v2928_v53 = vor.u32 1.1754944e-38, %v2927_v12  ;;  %v8612_v39 = vsel %vm2386_vm10, %v8293_v4, %v2368_v2 }
 0xa38   : > { %v8596_v44 = vpop.eup %7083  ;;  %v2622_v43 = vmul.f32 1.442695, %v2568_v56  ;;  %vm2926_vm13 = vcmp.eq.f32.partialorder %v2925_v25, 8.507059e+37  ;;  %v2942_v33 = vand.u32 2147483648, %v2693_v31  ;;  %v2940_v26 = vand.u32 2147483647, %v2693_v31 }
 0xa39   : > { %v2919_v15 = vmul.f32 %v7082_v34, %v2918_v17  ;;  %v2709_v32 = vsel %vm1095_vm12, %v8596_v44, 0.0  ;;  %6765 = vmatmul.msk.f32.gmra.mxu1 %vm1095_vm12, %v2915_v42  ;;  %vm2936_vm2 = vweird.f32 %v2693_v31  ;;  %v8627_v55 = vsel %vm2387_vm1, %v8340_v50, %v2369_v62  ;;  %v2319_v2 = vpop.f32.mrf.mxu3 }
 0xa3a   : > { %7087 = vpow2.f32 %v2622_v43  ;;  %2710 = vadd.xlane.f32.xlu2 %v2709_v32  ;;  %2515 = vmax.xlane.f32.xlu0 %v2514_v21  ;;  %v2943_v46 = vor.u32 1.1754944e-38, %v2942_v33  ;;  %v2520_v25 = vsel %vm1095_vm12, %v8627_v55, -inf  ;;  %v2371_v18 = vmul.f32 0.35355338, %v2319_v2 }
 0xa3b   : > { %v2920_v63 = vadd.f32 %v7082_v34, %v2919_v15 }
 0xa3c   : > { %v7086_v45 = vpop.eup %7085 }
 0xa3d   : > { %v2932_v6 = vmul.f32 %v7086_v45, %v2693_v31  ;;  %v8604_v54 = vpop.xlane.xlu1 %2695  ;;  %v2924_v29 = vsel %vm2923_vm11, %v7082_v34, %v2920_v63  ;;  %v2501_v48 = vpop.xlane.xlu2 %2500  ;;  %vm2937_vm14 = vweird.f32 %v7086_v45  ;;  %vm2941_vm11 = vcmp.eq.f32.partialorder %v2940_v26, 8.507059e+37  ;;  %v7369_v26 = vld [vmem:[%s8186_s21] sm:$0xff] }
 0xa3e   : > { %7089 = vrcp.f32 %v8604_v54  ;;  %v2929_v11 = vsel %vm2926_vm13, %v2928_v53, %v2924_v29  ;;  %v2569_v30 = vsub.f32 %v8517_v16, %v2501_v48  ;;  %vm2938_vm15 = vmor %vm2936_vm2, %vm2937_vm14  ;;  %v2957_v32 = vand.u32 2147483648, %v8604_v54 }
 0xa3f   : > { %v2933_v5 = vsub.f32 1.0, %v2932_v6  ;;  %v2930_v60 = vmul.f32 %v8478_v58, %v2929_v11  ;;  %v2517_v58 = vsel %vm1095_vm12, %v8612_v39, -inf  ;;  %v2955_v53 = vand.u32 2147483647, %v8604_v54 }
 0xa40   : > { %v8614_v1 = vpop.eup %7087  ;;  %v2624_v9 = vmul.f32 1.442695, %v2569_v30  ;;  %vm2951_vm14 = vweird.f32 %v8604_v54  ;;  %v2958_v48 = vor.u32 1.1754944e-38, %v2957_v32 }
 0xa41   : > { %v2934_v34 = vmul.f32 %v7086_v45, %v2933_v5  ;;  %v2712_v22 = vsel %vm1095_vm12, %v8614_v1, 0.0  ;;  %6766 = vmatmul.msk.f32.gmra.mxu1 %vm1095_vm12, %v2930_v60 }
 0xa42   : > { %2713 = vadd.xlane.f32.xlu1 %v2712_v22  ;;  %7091 = vpow2.f32 %v2624_v9  ;;  %2518 = vmax.xlane.f32.xlu2 %v2517_v58 }
 0xa43   : > { %v2935_v16 = vadd.f32 %v7086_v45, %v2934_v34 }
 0xa44   : > { %v7090_v52 = vpop.eup %7089 }
 0xa45   : > { %v2947_v10 = vmul.f32 %v7090_v52, %v8604_v54  ;;  %v8622_v56 = vpop.xlane.xlu0 %2698  ;;  %v2939_v17 = vsel %vm2938_vm15, %v7086_v45, %v2935_v16  ;;  %v2504_v31 = vpop.xlane.xlu1 %2503  ;;  %vm2952_vm13 = vweird.f32 %v7090_v52  ;;  %vm2956_vm15 = vcmp.eq.f32.partialorder %v2955_v53, 8.507059e+37 }
 0xa46   : > { %7093 = vrcp.f32 %v8622_v56  ;;  %v2944_v12 = vsel %vm2941_vm11, %v2943_v46, %v2939_v17  ;;  %v2570_v42 = vsub.f32 %v8535_v7, %v2504_v31  ;;  %vm2953_vm2 = vmor %vm2951_vm14, %vm2952_vm13  ;;  %v2972_v9 = vand.u32 2147483648, %v8622_v56  ;;  %v2322_v46 = vpop.f32.mrf.mxu3 }
 0xa47   : > { %v2948_v43 = vsub.f32 1.0, %v2947_v10  ;;  %v2945_v15 = vmul.f32 %v8499_v41, %v2944_v12  ;;  %v2370_v41 = vmul.f32 0.35355338, %v2316_v20  ;;  %v2372_v23 = vmul.f32 0.35355338, %v2322_v46 }
 0xa48   : > { %v8635_v21 = vpop.eup %7091  ;;  %v2626_v45 = vmul.f32 1.442695, %v2570_v42  ;;  %v2973_v31 = vor.u32 1.1754944e-38, %v2972_v9 }
 0xa49   : > { %v2949_v63 = vmul.f32 %v7090_v52, %v2948_v43  ;;  %6767 = vmatmul.msk.f32.gmra.mxu1 %vm1095_vm12, %v2945_v15  ;;  %v2715_v7 = vsel %vm1095_vm12, %v8635_v21, 0.0  ;;  %v8651_v34 = vsel %vm2379_vm7, %v7369_v26, %v2370_v41  ;;  %vm2966_vm7 = vweird.f32 %v8622_v56 }
 0xa4a   : > { %2521 = vmax.xlane.f32.xlu1 %v2520_v25  ;;  %7095 = vpow2.f32 %v2626_v45  ;;  %2716 = vadd.xlane.f32.xlu0 %v2715_v7 }
 0xa4b   : > { %v2950_v6 = vadd.f32 %v7090_v52, %v2949_v63  ;;  %v7370_v63 = vld [vmem:[%s8186_s21 + $0x8] sm:$0xff] }
 0xa4c   : > { %v7094_v29 = vpop.eup %7093  ;;  %v8669_v45 = vsel %vm2380_vm8, %v7370_v63, %v2371_v18 }
 0xa4d   : > { %v2962_v11 = vmul.f32 %v7094_v29, %v8622_v56  ;;  %v8643_v5 = vpop.xlane.xlu2 %2701  ;;  %v2954_v30 = vsel %vm2953_vm2, %v7090_v52, %v2950_v6  ;;  %v2507_v60 = vpop.xlane.xlu0 %2506  ;;  %vm2967_vm11 = vweird.f32 %v7094_v29  ;;  %v2970_v52 = vand.u32 2147483647, %v8622_v56 }
 0xa4e   : > { %7097 = vrcp.f32 %v8643_v5  ;;  %v2959_v62 = vsel %vm2956_vm15, %v2958_v48, %v2954_v30  ;;  %v2571_v54 = vsub.f32 %v8553_v27, %v2507_v60  ;;  %vm2968_vm13 = vmor %vm2966_vm7, %vm2967_vm11  ;;  %v2987_v53 = vand.u32 2147483648, %v8643_v5  ;;  %v2325_v60 = vpop.f32.mrf.mxu3 }
 0xa4f   : > { %v2963_v20 = vsub.f32 1.0, %v2962_v11  ;;  %v2960_v33 = vmul.f32 %v8519_v51, %v2959_v62  ;;  %v2523_v51 = vsel %vm1095_vm12, %v8651_v34, -inf  ;;  %vm2971_vm14 = vcmp.eq.f32.partialorder %v2970_v52, 8.507059e+37 }
 0xa50   : > { %v8654_v22 = vpop.eup %7095  ;;  %v2628_v16 = vmul.f32 1.442695, %v2571_v54  ;;  %vm2981_vm8 = vweird.f32 %v8643_v5  ;;  %v2988_v30 = vor.u32 1.1754944e-38, %v2987_v53  ;;  %v2373_v35 = vmul.f32 0.35355338, %v2325_v60  ;;  %v7373_v53 = vld [vmem:[%s8186_s21 + $0x20] sm:$0xff] }
 0xa51   : > { %v2964_v58 = vmul.f32 %v7094_v29, %v2963_v20  ;;  %6768 = vmatmul.msk.f32.gmra.mxu1 %vm1095_vm12, %v2960_v33  ;;  %v2718_v27 = vsel %vm1095_vm12, %v8654_v22, 0.0 }
 0xa52   : > { %7099 = vpow2.f32 %v2628_v16  ;;  %2719 = vadd.xlane.f32.xlu2 %v2718_v27  ;;  %2524 = vmax.xlane.f32.xlu0 %v2523_v51 }
 0xa53   : > { %v2965_v10 = vadd.f32 %v7094_v29, %v2964_v58 }
 0xa54   : > { %v7098_v17 = vpop.eup %7097 }
 0xa55   : > { %v2977_v12 = vmul.f32 %v7098_v17, %v8643_v5  ;;  %v2705_v43 = vpop.xlane.xlu1 %2704  ;;  %v2969_v42 = vsel %vm2968_vm13, %v7094_v29, %v2965_v10  ;;  %v2510_v15 = vpop.xlane.xlu2 %2509  ;;  %vm2982_vm2 = vweird.f32 %v7098_v17  ;;  %v2985_v29 = vand.u32 2147483647, %v8643_v5  ;;  %v7371_v5 = vld [vmem:[%s8186_s21 + $0x10] sm:$0xff] }
 0xa56   : > { %7101 = vrcp.f32 %v2705_v43  ;;  %v2974_v32 = vsel %vm2971_vm14, %v2973_v31, %v2969_v42  ;;  %v2572_v2 = vsub.f32 %v8566_v59, %v2510_v15  ;;  %vm2983_vm15 = vmor %vm2981_vm8, %vm2982_vm2  ;;  %v8686_v16 = vsel %vm2381_vm6, %v7371_v5, %v2372_v23  ;;  %v2328_v42 = vpop.f32.mrf.mxu3 }
 0xa57   : > { %v2978_v25 = vsub.f32 1.0, %v2977_v12  ;;  %v2975_v56 = vmul.f32 %v8537_v36, %v2974_v32  ;;  %v2526_v36 = vsel %vm1095_vm12, %v8669_v45, -inf  ;;  %vm2986_vm11 = vcmp.eq.f32.partialorder %v2985_v29, 8.507059e+37  ;;  %v7372_v32 = vld [vmem:[%s8186_s21 + $0x18] sm:$0xff] }
 0xa58   : > { %v8672_v7 = vpop.eup %7099  ;;  %v2630_v6 = vmul.f32 1.442695, %v2572_v2  ;;  %v3002_v52 = vand.u32 2147483648, %v2705_v43  ;;  %v3000_v46 = vand.u32 2147483647, %v2705_v43  ;;  %vm2996_vm6 = vweird.f32 %v2705_v43 }
 0xa59   : > { %v2979_v41 = vmul.f32 %v7098_v17, %v2978_v25  ;;  %6769 = vmatmul.msk.f32.gmra.mxu1 %vm1095_vm12, %v2975_v56  ;;  %v2721_v59 = vsel %vm1095_vm12, %v8672_v7, 0.0  ;;  %v8699_v25 = vsel %vm2382_vm5, %v7372_v32, %v2373_v35  ;;  %v2374_v56 = vmul.f32 0.35355338, %v2328_v42 }
 0xa5a   : > { %7103 = vpow2.f32 %v2630_v6  ;;  %2722 = vadd.xlane.f32.xlu1 %v2721_v59  ;;  %2527 = vmax.xlane.f32.xlu2 %v2526_v36  ;;  %vm3001_vm14 = vcmp.eq.f32.partialorder %v3000_v46, 8.507059e+37  ;;  %v2532_v63 = vsel %vm1095_vm12, %v8699_v25, -inf }
 0xa5b   : > { %v2980_v48 = vadd.f32 %v7098_v17, %v2979_v41 }
 0xa5c   : > { %v7102_v11 = vpop.eup %7101 }
 0xa5d   : > { %v2992_v62 = vmul.f32 %v7102_v11, %v2705_v43  ;;  %v2513_v20 = vpop.xlane.xlu1 %2512  ;;  %v2984_v54 = vsel %vm2983_vm15, %v7098_v17, %v2980_v48  ;;  %vm2997_vm7 = vweird.f32 %v7102_v11  ;;  %v3003_v17 = vor.u32 1.1754944e-38, %v3002_v52 }
 0xa5e   : > { %v2573_v33 = vsub.f32 %v8578_v13, %v2513_v20  ;;  %v2989_v26 = vsel %vm2986_vm11, %v2988_v30, %v2984_v54  ;;  %vm2998_vm13 = vmor %vm2996_vm6, %vm2997_vm7 }
 0xa5f   : > { %v2993_v9 = vsub.f32 1.0, %v2992_v62  ;;  %v2990_v58 = vmul.f32 %v8555_v40, %v2989_v26  ;;  %v2529_v40 = vsel %vm1095_vm12, %v8686_v16, -inf  ;;  %v2331_v62 = vpop.f32.mrf.mxu3 }
 0xa60   : > { %v2632_v27 = vmul.f32 1.442695, %v2573_v33  ;;  %v8688_v51 = vpop.eup %7103 }
 0xa61   : > { %v2994_v18 = vmul.f32 %v7102_v11, %v2993_v9  ;;  %6770 = vmatmul.msk.f32.gmra.mxu1 %vm1095_vm12, %v2990_v58  ;;  %v2724_v13 = vsel %vm1095_vm12, %v8688_v51, 0.0 }
 0xa62   : > { %7105 = vpow2.f32 %v2632_v27  ;;  %2725 = vadd.xlane.f32.xlu0 %v2724_v13  ;;  %2530 = vmax.xlane.f32.xlu1 %v2529_v40 }
 0xa63   : > { %v2995_v10 = vadd.f32 %v7102_v11, %v2994_v18 }
 0xa65   : > { %v2999_v31 = vsel %vm2998_vm13, %v7102_v11, %v2995_v10 }
 0xa66   : > { %v3004_v12 = vsel %vm3001_vm14, %v3003_v17, %v2999_v31  ;;  %v2375_v31 = vmul.f32 0.35355338, %v2331_v62 }
 0xa67   : > { %v3005_v15 = vmul.f32 %v8568_v19, %v3004_v12  ;;  %v8711_v19 = vsel %vm2383_vm3, %v7373_v53, %v2374_v56  ;;  %v2334_v42 = vpop.f32.mrf.mxu3 }
 0xa68   : > { %v8701_v2 = vpop.eup %7105  ;;  %v2535_v38 = vsel %vm1095_vm12, %v8711_v19, -inf }
 0xa69   : > { %v2727_v43 = vsel %vm1095_vm12, %v8701_v2, 0.0  ;;  %6771 = vmatmul.msk.f32.gmra.mxu1 %vm1095_vm12, %v3005_v15 }
 0xa6a   : > { %2728 = vadd.xlane.f32.xlu2 %v2727_v43  ;;  %2533 = vmax.xlane.f32.xlu0 %v2532_v63 }
 0xa72   : > { %2536 = vmax.xlane.f32.xlu2 %v2535_v38 }
 0xaa5   : > { %v2708_v41 = vpop.xlane.xlu0 %2707 }
 0xaa6   : > { %7107 = vrcp.f32 %v2708_v41  ;;  %v3017_v11 = vand.u32 2147483648, %v2708_v41  ;;  %v3015_v60 = vand.u32 2147483647, %v2708_v41  ;;  %vm3011_vm3 = vweird.f32 %v2708_v41 }
 0xaa8   : > { %v3018_v33 = vor.u32 1.1754944e-38, %v3017_v11  ;;  %vm3016_vm8 = vcmp.eq.f32.partialorder %v3015_v60, 8.507059e+37 }
 0xaac   : > { %v7108_v6 = vpop.eup %7107 }
 0xaad   : > { %v3007_v29 = vmul.f32 %v7108_v6, %v2708_v41  ;;  %v2711_v59 = vpop.xlane.xlu2 %2710  ;;  %v2516_v36 = vpop.xlane.xlu0 %2515  ;;  %vm3012_vm5 = vweird.f32 %v7108_v6  ;;  %v7374_v41 = vld [vmem:[%s8186_s21 + $0x28] sm:$0xff] }
 0xaae   : > { %7109 = vrcp.f32 %v2711_v59  ;;  %v2574_v48 = vsub.f32 %v8594_v47, %v2516_v36  ;;  %vm3013_vm2 = vmor %vm3011_vm3, %vm3012_vm5  ;;  %v3032_v46 = vand.u32 2147483648, %v2711_v59  ;;  %v3030_v10 = vand.u32 2147483647, %v2711_v59 }
 0xaaf   : > { %v3008_v23 = vsub.f32 1.0, %v3007_v29  ;;  %vm3026_vm11 = vweird.f32 %v2711_v59 }
 0xab0   : > { %v2634_v37 = vmul.f32 1.442695, %v2574_v48  ;;  %vm3031_vm6 = vcmp.eq.f32.partialorder %v3030_v10, 8.507059e+37 }
 0xab1   : > { %v3009_v30 = vmul.f32 %v7108_v6, %v3008_v23 }
 0xab2   : > { %7111 = vpow2.f32 %v2634_v37 }
 0xab3   : > { %v3010_v20 = vadd.f32 %v7108_v6, %v3009_v30  ;;  %v2376_v30 = vmul.f32 0.35355338, %v2334_v42 }
 0xab4   : > { %v7110_v54 = vpop.eup %7109 }
 0xab5   : > { %v3022_v26 = vmul.f32 %v7110_v54, %v2711_v59  ;;  %v2714_v9 = vpop.xlane.xlu1 %2713  ;;  %v3014_v58 = vsel %vm3013_vm2, %v7108_v6, %v3010_v20  ;;  %v2519_v5 = vpop.xlane.xlu2 %2518  ;;  %vm3027_vm15 = vweird.f32 %v7110_v54  ;;  %v8730_v6 = vsel %vm2384_vm4, %v7374_v41, %v2375_v31 }
 0xab6   : > { %7113 = vrcp.f32 %v2714_v9  ;;  %v3019_v52 = vsel %vm3016_vm8, %v3018_v33, %v3014_v58  ;;  %v2575_v27 = vsub.f32 %v8612_v39, %v2519_v5  ;;  %vm3028_vm7 = vmor %vm3026_vm11, %vm3027_vm15  ;;  %v3047_v29 = vand.u32 2147483648, %v2714_v9  ;;  %v7375_v58 = vld [vmem:[%s8186_s21 + $0x30] sm:$0xff] }
 0xab7   : > { %v3023_v47 = vsub.f32 1.0, %v3022_v26  ;;  %v3020_v18 = vmul.f32 %v8584_v0, %v3019_v52  ;;  %v3033_v0 = vor.u32 1.1754944e-38, %v3032_v46  ;;  %v3045_v11 = vand.u32 2147483647, %v2714_v9 }
 0xab8   : > { %v8718_v13 = vpop.eup %7111  ;;  %v2636_v35 = vmul.f32 1.442695, %v2575_v27  ;;  %v2538_v57 = vsel %vm1095_vm12, %v8730_v6, -inf  ;;  %vm3041_vm4 = vweird.f32 %v2714_v9  ;;  %v3048_v37 = vor.u32 1.1754944e-38, %v3047_v29 }
 0xab9   : > { %v3024_v40 = vmul.f32 %v7110_v54, %v3023_v47  ;;  %6772 = vmatmul.msk.f32.gmra.mxu1 %vm1095_vm12, %v3020_v18  ;;  %v2730_v17 = vsel %vm1095_vm12, %v8718_v13, 0.0  ;;  %vm3046_vm5 = vcmp.eq.f32.partialorder %v3045_v11, 8.507059e+37  ;;  %v8746_v5 = vsel %vm2385_vm9, %v7375_v58, %v2376_v30 }
 0xaba   : > { %7115 = vpow2.f32 %v2636_v35  ;;  %2731 = vadd.xlane.f32.xlu1 %v2730_v17  ;;  %v2541_v35 = vsel %vm1095_vm12, %v8746_v5, -inf }
 0xabb   : > { %v3025_v39 = vadd.f32 %v7110_v54, %v3024_v40 }
 0xabc   : > { %v7114_v12 = vpop.eup %7113 }
 0xabd   : > { %v3037_v15 = vmul.f32 %v7114_v12, %v2714_v9  ;;  %v2522_v32 = vpop.xlane.xlu1 %2521  ;;  %v3029_v43 = vsel %vm3028_vm7, %v7110_v54, %v3025_v39  ;;  %v8723_v56 = vpop.xlane.xlu0 %2716  ;;  %vm3042_vm13 = vweird.f32 %v7114_v12 }
 0xabe   : > { %v2576_v63 = vsub.f32 %v8627_v55, %v2522_v32  ;;  %v3034_v53 = vsel %vm3031_vm6, %v3033_v0, %v3029_v43  ;;  %7117 = vrcp.f32 %v8723_v56  ;;  %vm3043_vm14 = vmor %vm3041_vm4, %vm3042_vm13  ;;  %v2337_v9 = vpop.f32.mrf.mxu3  ;;  %v3062_v17 = vand.u32 2147483648, %v8723_v56  ;;  %v7376_v32 = vld [vmem:[%s8186_s21 + $0x38] sm:$0xff] }
 0xabf   : > { %v3038_v38 = vsub.f32 1.0, %v3037_v15  ;;  %v3035_v36 = vmul.f32 %v8596_v44, %v3034_v53  ;;  %v2377_v61 = vmul.f32 0.35355338, %v2337_v9  ;;  %vm3056_vm3 = vweird.f32 %v8723_v56  ;;  %v7377_v9 = vld [vmem:[%s8186_s21 + $0x40] sm:$0xff]  ;;  %s10467_s21 = sld [smem:[#allocation6_spill]] }
 0xac0   : > { %v2638_v59 = vmul.f32 1.442695, %v2576_v63  ;;  %v8733_v23 = vpop.eup %7115  ;;  %v3063_v39 = vor.u32 1.1754944e-38, %v3062_v17 }
 0xac1   : > { %v3039_v48 = vmul.f32 %v7114_v12, %v3038_v38  ;;  %6773 = vmatmul.msk.f32.gmra.mxu1 %vm1095_vm12, %v3035_v36  ;;  %v2733_v55 = vsel %vm1095_vm12, %v8733_v23, 0.0  ;;  %v8767_v43 = vsel %vm2386_vm10, %v7376_v32, %v2377_v61 }
 0xac2   : > { %7119 = vpow2.f32 %v2638_v59  ;;  %2734 = vadd.xlane.f32.xlu0 %v2733_v55  ;;  %2539 = vmax.xlane.f32.xlu1 %v2538_v57  ;;  %v2544_v36 = vsel %vm1095_vm12, %v8767_v43, -inf  ;;  %v8782_v57 = vpop.f32.mrf.mxu1 }
 0xac3   : > { %v3040_v44 = vadd.f32 %v7114_v12, %v3039_v48 }
 0xac4   : > { %v7118_v60 = vpop.eup %7117 }
 0xac5   : > { %v3044_v62 = vsel %vm3043_vm14, %v7114_v12, %v3040_v44  ;;  %v3052_v20 = vmul.f32 %v7118_v60, %v8723_v56  ;;  %v8741_v54 = vpop.xlane.xlu2 %2719  ;;  %v2525_v33 = vpop.xlane.xlu0 %2524  ;;  %vm3057_vm9 = vweird.f32 %v7118_v60  ;;  %s9053_s22 = scalar_lea.vmem %s10467_s21, %s7554_s3 }
 0xac6   : > { %v3049_v26 = vsel %vm3046_vm5, %v3048_v37, %v3044_v62  ;;  %7121 = vrcp.f32 %v8741_v54  ;;  %v2577_v52 = vsub.f32 %v8651_v34, %v2525_v33  ;;  %vm3058_vm2 = vmor %vm3056_vm3, %vm3057_vm9  ;;  %v2340_v41 = vpop.f32.mrf.mxu3  ;;  %v3077_v4 = vand.u32 2147483648, %v8741_v54 }
 0xac7   : > { %v3053_v27 = vsub.f32 1.0, %v3052_v20  ;;  %v3050_v18 = vmul.f32 %v8614_v1, %v3049_v26  ;;  %v3060_v1 = vand.u32 2147483647, %v8723_v56  ;;  %v2378_v30 = vmul.f32 0.35355338, %v2340_v41 }
 0xac8   : > { %v8750_v47 = vpop.eup %7119  ;;  %v2640_v46 = vmul.f32 1.442695, %v2577_v52  ;;  %vm3071_vm10 = vweird.f32 %v8741_v54  ;;  %v3078_v44 = vor.u32 1.1754944e-38, %v3077_v4 }
 0xac9   : > { %v2736_v40 = vsel %vm1095_vm12, %v8750_v47, 0.0  ;;  %v3054_v10 = vmul.f32 %v7118_v60, %v3053_v27  ;;  %6774 = vmatmul.msk.f32.gmra.mxu1 %vm1095_vm12, %v3050_v18  ;;  %vm3061_vm8 = vcmp.eq.f32.partialorder %v3060_v1, 8.507059e+37 }
 0xaca   : > { %2737 = vadd.xlane.f32.xlu2 %v2736_v40  ;;  %7123 = vpow2.f32 %v2640_v46  ;;  %2542 = vmax.xlane.f32.xlu0 %v2541_v35 }
 0xacb   : > { %v3055_v34 = vadd.f32 %v7118_v60, %v3054_v10 }
 0xacc   : > { %v7122_v31 = vpop.eup %7121 }
 0xacd   : > { %v3067_v12 = vmul.f32 %v7122_v31, %v8741_v54  ;;  %v8762_v0 = vpop.xlane.xlu1 %2722  ;;  %v2528_v42 = vpop.xlane.xlu2 %2527  ;;  %v3059_v15 = vsel %vm3058_vm2, %v7118_v60, %v3055_v34  ;;  %vm3072_vm15 = vweird.f32 %v7122_v31 }
 0xace   : > { %7125 = vrcp.f32 %v8762_v0  ;;  %v2578_v63 = vsub.f32 %v8669_v45, %v2528_v42  ;;  %v3064_v53 = vsel %vm3061_vm8, %v3063_v39, %v3059_v15  ;;  %v3075_v45 = vand.u32 2147483647, %v8741_v54  ;;  %vm3073_vm11 = vmor %vm3071_vm10, %vm3072_vm15 }
 0xacf   : > { %v3068_v56 = vsub.f32 1.0, %v3067_v12  ;;  %v3065_v59 = vmul.f32 %v8635_v21, %v3064_v53  ;;  %v8789_v54 = vsel %vm2387_vm1, %v7377_v9, %v2378_v30  ;;  %v3092_v46 = vand.u32 2147483648, %v8762_v0  ;;  %v8803_v12 = vpop.f32.mrf.mxu1 }
 0xad0   : > { %v8771_v38 = vpop.eup %7123  ;;  %v2642_v29 = vmul.f32 1.442695, %v2578_v63  ;;  %vm3076_vm7 = vcmp.eq.f32.partialorder %v3075_v45, 8.507059e+37  ;;  %v2547_v50 = vsel %vm1095_vm12, %v8789_v54, -inf  ;;  %vm3086_vm1 = vweird.f32 %v8762_v0 }
 0xad1   : > { %v3069_v48 = vmul.f32 %v7122_v31, %v3068_v56  ;;  %v2739_v11 = vsel %vm1095_vm12, %v8771_v38, 0.0  ;;  %6775 = vmatmul.msk.f32.gmra.mxu1 %vm1095_vm12, %v3065_v59  ;;  %v3093_v17 = vor.u32 1.1754944e-38, %v3092_v46 }
 0xad2   : > { %2545 = vmax.xlane.f32.xlu2 %v2544_v36  ;;  %7127 = vpow2.f32 %v2642_v29  ;;  %2740 = vadd.xlane.f32.xlu1 %v2739_v11 }
 0xad3   : > { %v3070_v21 = vadd.f32 %v7122_v31, %v3069_v48 }
 0xad4   : > { %v7126_v55 = vpop.eup %7125 }
 0xad5   : > { %v3082_v37 = vmul.f32 %v7126_v55, %v8762_v0  ;;  %v2726_v60 = vpop.xlane.xlu0 %2725  ;;  %v2531_v62 = vpop.xlane.xlu1 %2530  ;;  %v3074_v20 = vsel %vm3073_vm11, %v7122_v31, %v3070_v21  ;;  %vm3087_vm6 = vweird.f32 %v7126_v55 }
 0xad6   : > { %7129 = vrcp.f32 %v2726_v60  ;;  %v2579_v26 = vsub.f32 %v8686_v16, %v2531_v62  ;;  %v3079_v58 = vsel %vm3076_vm7, %v3078_v44, %v3074_v20  ;;  %v3090_v16 = vand.u32 2147483647, %v8762_v0  ;;  %vm3088_vm13 = vmor %vm3086_vm1, %vm3087_vm6 }
 0xad7   : > { %v3083_v33 = vsub.f32 1.0, %v3082_v37  ;;  %v3080_v27 = vmul.f32 %v8654_v22, %v3079_v58  ;;  %v3107_v32 = vand.u32 2147483648, %v2726_v60  ;;  %v3105_v41 = vand.u32 2147483647, %v2726_v60  ;;  %v8815_v20 = vpop.f32.mrf.mxu1 }
 0xad8   : > { %v8791_v52 = vpop.eup %7127  ;;  %v2644_v40 = vmul.f32 1.442695, %v2579_v26  ;;  %vm3091_vm4 = vcmp.eq.f32.partialorder %v3090_v16, 8.507059e+37  ;;  %vm3101_vm5 = vweird.f32 %v2726_v60 }
 0xad9   : > { %v3084_v18 = vmul.f32 %v7126_v55, %v3083_v33  ;;  %v2742_v35 = vsel %vm1095_vm12, %v8791_v52, 0.0  ;;  %6776 = vmatmul.msk.f32.gmra.mxu1 %vm1095_vm12, %v3080_v27  ;;  %v3108_v36 = vor.u32 1.1754944e-38, %v3107_v32  ;;  %vm3106_vm3 = vcmp.eq.f32.partialorder %v3105_v41, 8.507059e+37 }
 0xada   : > { %2743 = vadd.xlane.f32.xlu0 %v2742_v35  ;;  %7131 = vpow2.f32 %v2644_v40  ;;  %2548 = vmax.xlane.f32.xlu1 %v2547_v50 }
 0xadb   : > { %v3085_v61 = vadd.f32 %v7126_v55, %v3084_v18 }
 0xadc   : > { %v7130_v22 = vpop.eup %7129 }
 0xadd   : > { %v2729_v10 = vpop.xlane.xlu2 %2728  ;;  %v3097_v1 = vmul.f32 %v7130_v22, %v2726_v60  ;;  %v2534_v34 = vpop.xlane.xlu0 %2533  ;;  %v3089_v39 = vsel %vm3088_vm13, %v7126_v55, %v3085_v61  ;;  %vm3102_vm14 = vweird.f32 %v7130_v22 }
 0xade   : > { %7133 = vrcp.f32 %v2729_v10  ;;  %v2580_v31 = vsub.f32 %v8699_v25, %v2534_v34  ;;  %v3094_v15 = vsel %vm3091_vm4, %v3093_v17, %v3089_v39  ;;  %vm3103_vm9 = vmor %vm3101_vm5, %vm3102_vm14  ;;  %v3122_v21 = vand.u32 2147483648, %v2729_v10 }
 0xadf   : > { %v3098_v42 = vsub.f32 1.0, %v3097_v1  ;;  %v3095_v56 = vmul.f32 %v8672_v7, %v3094_v15  ;;  %v3120_v60 = vand.u32 2147483647, %v2729_v10  ;;  %vm3116_vm8 = vweird.f32 %v2729_v10  ;;  %v8826_v46 = vpop.f32.mrf.mxu1 }
 0xae0   : > { %v2646_v63 = vmul.f32 1.442695, %v2580_v31  ;;  %v8806_v53 = vpop.eup %7131 }
 0xae1   : > { %v3099_v0 = vmul.f32 %v7130_v22, %v3098_v42  ;;  %6777 = vmatmul.msk.f32.gmra.mxu1 %vm1095_vm12, %v3095_v56  ;;  %v2745_v25 = vsel %vm1095_vm12, %v8806_v53, 0.0  ;;  %vm3121_vm10 = vcmp.eq.f32.partialorder %v3120_v60, 8.507059e+37 }
 0xae2   : > { %7135 = vpow2.f32 %v2646_v63  ;;  %2746 = vadd.xlane.f32.xlu2 %v2745_v25 }
 0xae3   : > { %v3100_v59 = vadd.f32 %v7130_v22, %v3099_v0 }
 0xae4   : > { %v7134_v29 = vpop.eup %7133 }
 0xae5   : > { %v3112_v48 = vmul.f32 %v7134_v29, %v2729_v10  ;;  %v2537_v4 = vpop.xlane.xlu2 %2536  ;;  %v3104_v11 = vsel %vm3103_vm9, %v7130_v22, %v3100_v59  ;;  %vm3117_vm2 = vweird.f32 %v7134_v29 }
 0xae6   : > { %v2581_v7 = vsub.f32 %v8711_v19, %v2537_v4  ;;  %v3109_v30 = vsel %vm3106_vm3, %v3108_v36, %v3104_v11  ;;  %vm3118_vm15 = vmor %vm3116_vm8, %vm3117_vm2  ;;  %v3123_v19 = vor.u32 1.1754944e-38, %v3122_v21 }
 0xae7   : > { %v3113_v45 = vsub.f32 1.0, %v3112_v48  ;;  %v3110_v44 = vmul.f32 %v8688_v51, %v3109_v30  ;;  %v8828_v40 = vpop.f32.mrf.mxu1 }
 0xae8   : > { %v2648_v55 = vmul.f32 1.442695, %v2581_v7  ;;  %v8813_v37 = vpop.eup %7135 }
 0xae9   : > { %v3114_v62 = vmul.f32 %v7134_v29, %v3113_v45  ;;  %v2748_v33 = vsel %vm1095_vm12, %v8813_v37, 0.0  ;;  %6778 = vmatmul.msk.f32.gmra.mxu1 %vm1095_vm12, %v3110_v44 }
 0xaea   : > { %7137 = vpow2.f32 %v2648_v55  ;;  %2749 = vadd.xlane.f32.xlu0 %v2748_v33 }
 0xaeb   : > { %v3115_v26 = vadd.f32 %v7134_v29, %v3114_v62 }
 0xaed   : > { %v3119_v51 = vsel %vm3118_vm15, %v7134_v29, %v3115_v26 }
 0xaee   : > { %v3124_v58 = vsel %vm3121_vm10, %v3123_v19, %v3119_v51 }
 0xaef   : > { %v3125_v9 = vmul.f32 %v8701_v2, %v3124_v58  ;;  %v8830_v35 = vpop.f32.mrf.mxu1 }
 0xaf0   : > { %v8821_v27 = vpop.eup %7137 }
 0xaf1   : > { %v2751_v18 = vsel %vm1095_vm12, %v8821_v27, 0.0  ;;  %6779 = vmatmul.msk.f32.gmra.mxu1 %vm1095_vm12, %v3125_v9 }
 0xaf2   : > { %2752 = vadd.xlane.f32.xlu1 %v2751_v18 }
 0xaf7   : > { %v8832_v50 = vpop.f32.mrf.mxu1 }
 0xaff   : > { %v8834_v16 = vpop.f32.mrf.mxu1 }
 0xb07   : > { %v8836_v61 = vpop.f32.mrf.mxu1 }
 0xb0f   : > { %v8838_v2 = vpop.f32.mrf.mxu1 }
 0xb17   : > { %v8840_v31 = vpop.f32.mrf.mxu1 }
 0xb1f   : > { %v8847_v21 = vpop.f32.mrf.mxu1 }
 0xb2d   : > { %v2732_v22 = vpop.xlane.xlu1 %2731 }
 0xb2e   : > { %7139 = vrcp.f32 %v2732_v22  ;;  %v3137_v32 = vand.u32 2147483648, %v2732_v22  ;;  %v3135_v56 = vand.u32 2147483647, %v2732_v22  ;;  %vm3131_vm7 = vweird.f32 %v2732_v22 }
 0xb30   : > { %v3138_v29 = vor.u32 1.1754944e-38, %v3137_v32  ;;  %vm3136_vm1 = vcmp.eq.f32.partialorder %v3135_v56, 8.507059e+37 }
 0xb34   : > { %v7140_v10 = vpop.eup %7139 }
 0xb35   : > { %v3127_v17 = vmul.f32 %v7140_v10, %v2732_v22  ;;  %v2735_v1 = vpop.xlane.xlu0 %2734  ;;  %v2540_v34 = vpop.xlane.xlu1 %2539  ;;  %vm3132_vm11 = vweird.f32 %v7140_v10 }
 0xb36   : > { %7141 = vrcp.f32 %v2735_v1  ;;  %v2582_v42 = vsub.f32 %v8730_v6, %v2540_v34  ;;  %vm3133_vm6 = vmor %vm3131_vm7, %vm3132_vm11  ;;  %v3152_v44 = vand.u32 2147483648, %v2735_v1  ;;  %v3150_v62 = vand.u32 2147483647, %v2735_v1 }
 0xb37   : > { %v3128_v39 = vsub.f32 1.0, %v3127_v17  ;;  %vm3146_vm4 = vweird.f32 %v2735_v1 }
 0xb38   : > { %v2650_v63 = vmul.f32 1.442695, %v2582_v42  ;;  %v3153_v19 = vor.u32 1.1754944e-38, %v3152_v44  ;;  %vm3151_vm5 = vcmp.eq.f32.partialorder %v3150_v62, 8.507059e+37 }
 0xb39   : > { %v3129_v15 = vmul.f32 %v7140_v10, %v3128_v39 }
 0xb3a   : > { %7143 = vpow2.f32 %v2650_v63 }
 0xb3b   : > { %v3130_v0 = vadd.f32 %v7140_v10, %v3129_v15 }
 0xb3c   : > { %v7142_v41 = vpop.eup %7141 }
 0xb3d   : > { %v2738_v25 = vpop.xlane.xlu2 %2737  ;;  %v3142_v59 = vmul.f32 %v7142_v41, %v2735_v1  ;;  %v2543_v36 = vpop.xlane.xlu0 %2542  ;;  %v3134_v4 = vsel %vm3133_vm6, %v7140_v10, %v3130_v0  ;;  %vm3147_vm13 = vweird.f32 %v7142_v41 }
 0xb3e   : > { %7145 = vrcp.f32 %v2738_v25  ;;  %v2583_v48 = vsub.f32 %v8746_v5, %v2543_v36  ;;  %v3139_v7 = vsel %vm3136_vm1, %v3138_v29, %v3134_v4  ;;  %vm3148_vm14 = vmor %vm3146_vm4, %vm3147_vm13  ;;  %v3167_v22 = vand.u32 2147483648, %v2738_v25 }
 0xb3f   : > { %v3143_v6 = vsub.f32 1.0, %v3142_v59  ;;  %v3140_v45 = vmul.f32 %v8718_v13, %v3139_v7  ;;  %v3165_v1 = vand.u32 2147483647, %v2738_v25  ;;  %vm3161_vm3 = vweird.f32 %v2738_v25 }
 0xb40   : > { %v2652_v11 = vmul.f32 1.442695, %v2583_v48  ;;  %v8845_v30 = vpop.eup %7143  ;;  %v3168_v63 = vor.u32 1.1754944e-38, %v3167_v22 }
 0xb41   : > { %v3144_v55 = vmul.f32 %v7142_v41, %v3143_v6  ;;  %6780 = vmatmul.msk.f32.gmra.mxu1 %vm1095_vm12, %v3140_v45  ;;  %v2754_v5 = vsel %vm1095_vm12, %v8845_v30, 0.0  ;;  %vm3166_vm8 = vcmp.eq.f32.partialorder %v3165_v1, 8.507059e+37 }
 0xb42   : > { %7147 = vpow2.f32 %v2652_v11  ;;  %2755 = vadd.xlane.f32.xlu2 %v2754_v5 }
 0xb43   : > { %v3145_v33 = vadd.f32 %v7142_v41, %v3144_v55 }
 0xb44   : > { %v7146_v60 = vpop.eup %7145 }
 0xb45   : > { %v3157_v13 = vmul.f32 %v7146_v60, %v2738_v25  ;;  %v2546_v26 = vpop.xlane.xlu2 %2545  ;;  %v2741_v51 = vpop.xlane.xlu1 %2740  ;;  %v3149_v9 = vsel %vm3148_vm14, %v7142_v41, %v3145_v33  ;;  %vm3162_vm9 = vweird.f32 %v7146_v60 }
 0xb46   : > { %v2584_v58 = vsub.f32 %v8767_v43, %v2546_v26  ;;  %7149 = vrcp.f32 %v2741_v51  ;;  %v3154_v17 = vsel %vm3151_vm5, %v3153_v19, %v3149_v9  ;;  %v8859_v43 = vpop.f32.mrf.mxu1  ;;  %vm3163_vm2 = vmor %vm3161_vm3, %vm3162_vm9  ;;  %v3182_v6 = vand.u32 2147483648, %v2741_v51 }
 0xb47   : > { %v3158_v18 = vsub.f32 1.0, %v3157_v13  ;;  %v3155_v42 = vmul.f32 %v8733_v23, %v3154_v17  ;;  %v3180_v45 = vand.u32 2147483647, %v2741_v51  ;;  %vm3176_vm10 = vweird.f32 %v2741_v51 }
 0xb48   : > { %v2654_v10 = vmul.f32 1.442695, %v2584_v58  ;;  %v8853_v34 = vpop.eup %7147  ;;  %v3183_v5 = vor.u32 1.1754944e-38, %v3182_v6 }
 0xb49   : > { %v3159_v39 = vmul.f32 %v7146_v60, %v3158_v18  ;;  %v2757_v15 = vsel %vm1095_vm12, %v8853_v34, 0.0  ;;  %6781 = vmatmul.msk.f32.gmra.mxu1 %vm1095_vm12, %v3155_v42  ;;  %vm3181_vm7 = vcmp.eq.f32.partialorder %v3180_v45, 8.507059e+37 }
 0xb4a   : > { %7151 = vpow2.f32 %v2654_v10  ;;  %2758 = vadd.xlane.f32.xlu0 %v2757_v15 }
 0xb4b   : > { %v3160_v32 = vadd.f32 %v7146_v60, %v3159_v39 }
 0xb4c   : > { %v7150_v56 = vpop.eup %7149 }
 0xb4d   : > { %v3164_v0 = vsel %vm3163_vm2, %v7146_v60, %v3160_v32  ;;  %v3172_v41 = vmul.f32 %v7150_v56, %v2741_v51  ;;  %v2744_v29 = vpop.xlane.xlu0 %2743  ;;  %v2549_v23 = vpop.xlane.xlu1 %2548  ;;  %vm3177_vm15 = vweird.f32 %v7150_v56 }
 0xb4e   : > { %v3169_v59 = vsel %vm3166_vm8, %v3168_v63, %v3164_v0  ;;  %7153 = vrcp.f32 %v2744_v29  ;;  %v2585_v25 = vsub.f32 %v8789_v54, %v2549_v23  ;;  %vm3178_vm11 = vmor %vm3176_vm10, %vm3177_vm15  ;;  %v8868_v54 = vpop.f32.mrf.mxu1  ;;  %v3197_v51 = vand.u32 2147483648, %v2744_v29 }
 0xb4f   : > { %v3173_v48 = vsub.f32 1.0, %v3172_v41  ;;  %v3170_v4 = vmul.f32 %v8750_v47, %v3169_v59  ;;  %v3195_v18 = vand.u32 2147483647, %v2744_v29  ;;  %vm3191_vm1 = vweird.f32 %v2744_v29 }
 0xb50   : > { %v8861_v36 = vpop.eup %7151  ;;  %v2656_v55 = vmul.f32 1.442695, %v2585_v25  ;;  %v3198_v39 = vor.u32 1.1754944e-38, %v3197_v51 }
 0xb51   : > { %v2760_v7 = vsel %vm1095_vm12, %v8861_v36, 0.0  ;;  %v3174_v11 = vmul.f32 %v7150_v56, %v3173_v48  ;;  %6782 = vmatmul.msk.f32.gmra.mxu1 %vm1095_vm12, %v3170_v4  ;;  %vm3196_vm4 = vcmp.eq.f32.partialorder %v3195_v18, 8.507059e+37 }
 0xb52   : > { %2761 = vadd.xlane.f32.xlu1 %v2760_v7  ;;  %7155 = vpow2.f32 %v2656_v55 }
 0xb53   : > { %v3175_v44 = vadd.f32 %v7150_v56, %v3174_v11 }
 0xb54   : > { %v7154_v62 = vpop.eup %7153 }
 0xb55   : > { %v3187_v47 = vmul.f32 %v7154_v62, %v2744_v29  ;;  %v3179_v60 = vsel %vm3178_vm11, %v7150_v56, %v3175_v44  ;;  %v2747_v33 = vpop.xlane.xlu2 %2746  ;;  %vm3192_vm6 = vweird.f32 %v7154_v62 }
 0xb56   : > { %v3184_v13 = vsel %vm3181_vm7, %v3183_v5, %v3179_v60  ;;  %7157 = vrcp.f32 %v2747_v33  ;;  %vm3193_vm13 = vmor %vm3191_vm1, %vm3192_vm6  ;;  %v8876_v15 = vpop.f32.mrf.mxu1  ;;  %v3212_v0 = vand.u32 2147483648, %v2747_v33  ;;  %v3210_v59 = vand.u32 2147483647, %v2747_v33 }
 0xb57   : > { %v3188_v26 = vsub.f32 1.0, %v3187_v47  ;;  %v3185_v19 = vmul.f32 %v8771_v38, %v3184_v13  ;;  %vm3206_vm5 = vweird.f32 %v2747_v33 }
 0xb58   : > { %v8871_v58 = vpop.eup %7155  ;;  %v3213_v25 = vor.u32 1.1754944e-38, %v3212_v0  ;;  %vm3211_vm3 = vcmp.eq.f32.partialorder %v3210_v59, 8.507059e+37  ;;  %v6795_v0 = vld [vmem:[%s10450_s11 + $0x78] sm:$0xff] }
 0xb59   : > { %v3189_v9 = vmul.f32 %v7154_v62, %v3188_v26  ;;  %6783 = vmatmul.msk.f32.gmra.mxu1 %vm1095_vm12, %v3185_v19  ;;  %v2763_v22 = vsel %vm1095_vm12, %v8871_v58, 0.0  ;;  %3694 = vmatpush.msra.mxu0 %v6795_v0 }
 0xb5a   : > { %2764 = vadd.xlane.f32.xlu2 %v2763_v22 }
 0xb5b   : > { %v3190_v10 = vadd.f32 %v7154_v62, %v3189_v9 }
 0xb5c   : > { %v7158_v17 = vpop.eup %7157 }
 0xb5d   : > { %v2750_v1 = vpop.xlane.xlu0 %2749  ;;  %v3194_v42 = vsel %vm3193_vm13, %v7154_v62, %v3190_v10  ;;  %v3202_v38 = vmul.f32 %v7158_v17, %v2747_v33  ;;  %vm3207_vm14 = vweird.f32 %v7158_v17 }
 0xb5e   : > { %7159 = vrcp.f32 %v2750_v1  ;;  %v3199_v32 = vsel %vm3196_vm4, %v3198_v39, %v3194_v42  ;;  %vm3208_vm9 = vmor %vm3206_vm5, %vm3207_vm14  ;;  %v3227_v45 = vand.u32 2147483648, %v2750_v1  ;;  %v8881_v55 = vpop.f32.mrf.mxu1  ;;  %v3225_v62 = vand.u32 2147483647, %v2750_v1 }
 0xb5f   : > { %v3203_v63 = vsub.f32 1.0, %v3202_v38  ;;  %v3200_v56 = vmul.f32 %v8791_v52, %v3199_v32  ;;  %vm3221_vm8 = vweird.f32 %v2750_v1 }
 0xb60   : > { %v3228_v60 = vor.u32 1.1754944e-38, %v3227_v45  ;;  %vm3226_vm10 = vcmp.eq.f32.partialorder %v3225_v62, 8.507059e+37 }
 0xb61   : > { %v3204_v41 = vmul.f32 %v7158_v17, %v3203_v63  ;;  %6784 = vmatmul.msk.f32.gmra.mxu1 %vm1095_vm12, %v3200_v56 }
 0xb63   : > { %v3205_v23 = vadd.f32 %v7158_v17, %v3204_v41 }
 0xb64   : > { %v7160_v29 = vpop.eup %7159 }
 0xb65   : > { %v2753_v48 = vpop.xlane.xlu1 %2752  ;;  %v3217_v4 = vmul.f32 %v7160_v29, %v2750_v1  ;;  %v3209_v6 = vsel %vm3208_vm9, %v7158_v17, %v3205_v23  ;;  %vm3222_vm2 = vweird.f32 %v7160_v29  ;;  %v6793_v23 = vld [vmem:[%s10450_s11 + $0x68] sm:$0xff] }
 0xb66   : > { %7161 = vrcp.f32 %v2753_v48  ;;  %v3214_v11 = vsel %vm3211_vm3, %v3213_v25, %v3209_v6  ;;  %vm3223_vm15 = vmor %vm3221_vm8, %vm3222_vm2  ;;  %v3242_v9 = vand.u32 2147483648, %v2753_v48  ;;  %v3240_v18 = vand.u32 2147483647, %v2753_v48  ;;  %v8885_v22 = vpop.f32.mrf.mxu1 }
 0xb67   : > { %v3218_v7 = vsub.f32 1.0, %v3217_v4  ;;  %v3215_v52 = vmul.f32 %v8806_v53, %v3214_v11  ;;  %vm3236_vm7 = vweird.f32 %v2753_v48 }
 0xb68   : > { %v3243_v17 = vor.u32 1.1754944e-38, %v3242_v9  ;;  %vm3241_vm1 = vcmp.eq.f32.partialorder %v3240_v18, 8.507059e+37 }
 0xb69   : > { %v3219_v44 = vmul.f32 %v7160_v29, %v3218_v7  ;;  %6785 = vmatmul.msk.f32.gmra.mxu1 %vm1095_vm12, %v3215_v52 }
 0xb6b   : > { %v3220_v47 = vadd.f32 %v7160_v29, %v3219_v44 }
 0xb6c   : > { %v7162_v5 = vpop.eup %7161 }
 0xb6d   : > { %v3232_v33 = vmul.f32 %v7162_v5, %v2753_v48  ;;  %v3224_v13 = vsel %vm3223_vm15, %v7160_v29, %v3220_v47  ;;  %vm3237_vm11 = vweird.f32 %v7162_v5  ;;  %v6792_v48 = vld [vmem:[%s10450_s11 + $0x60] sm:$0xff] }
 0xb6e   : > { %v3229_v19 = vsel %vm3226_vm10, %v3228_v60, %v3224_v13  ;;  %vm3238_vm6 = vmor %vm3236_vm7, %vm3237_vm11  ;;  %v8890_v38 = vpop.f32.mrf.mxu1 }
 0xb6f   : > { %v3233_v26 = vsub.f32 1.0, %v3232_v33  ;;  %v3230_v53 = vmul.f32 %v8813_v37, %v3229_v19 }
 0xb71   : > { %v3234_v51 = vmul.f32 %v7162_v5, %v3233_v26  ;;  %6786 = vmatmul.msk.f32.gmra.mxu1 %vm1095_vm12, %v3230_v53  ;;  %v3540_v26 = vrot.slane %v8122_v49, 1 }
 0xb73   : > { %v3235_v10 = vadd.f32 %v7162_v5, %v3234_v51 }
 0xb75   : > { %v3239_v39 = vsel %vm3238_vm6, %v7162_v5, %v3235_v10 }
 0xb76   : > { %v3244_v1 = vsel %vm3241_vm1, %v3243_v17, %v3239_v39  ;;  %v8892_v37 = vpop.f32.mrf.mxu1  ;;  %v3541_v39 = vrot.slane %v8122_v49, 2 }
 0xb77   : > { %v3245_v42 = vmul.f32 %v8821_v27, %v3244_v1  ;;  %v6794_v27 = vld [vmem:[%s10450_s11 + $0x70] sm:$0xff] }
 0xb78   : > { %3695 = vmatpush.msra.mxu0 %v6794_v27 }
 0xb79   : > { %6787 = vmatmul.msk.f32.gmra.mxu1 %vm1095_vm12, %v3245_v42  ;;  %v8924_v42 = vperm.slane %v3540_v26, 0 }
 0xb7a   : > { %3696 = vmatpush.msra.mxu0 %v6793_v23 }
 0xb7c   : > { %3697 = vmatpush.msra.mxu0 %v6792_v48  ;;  %v8926_v48 = vperm.slane %v3541_v39, 0 }
 0xb7e   : > { %v8894_v32 = vpop.f32.mrf.mxu1 }
 0xb86   : > { %v8896_v63 = vpop.f32.mrf.mxu1 }
 0xb8e   : > { %v8898_v56 = vpop.f32.mrf.mxu1 }
 0xb96   : > { %v8903_v41 = vpop.f32.mrf.mxu1 }
 0xb9e   : > { %v8908_v29 = vpop.f32.mrf.mxu1 }
 0xbb5   : > { %v2756_v59 = vpop.xlane.xlu2 %2755 }
 0xbb6   : > { %7163 = vrcp.f32 %v2756_v59  ;;  %v3257_v45 = vand.u32 2147483648, %v2756_v59  ;;  %v3255_v44 = vand.u32 2147483647, %v2756_v59  ;;  %vm3251_vm4 = vweird.f32 %v2756_v59 }
 0xbb8   : > { %v3258_v60 = vor.u32 1.1754944e-38, %v3257_v45  ;;  %vm3256_vm5 = vcmp.eq.f32.partialorder %v3255_v44, 8.507059e+37  ;;  %v3560_v45 = vmul.f32 %v8924_v42, %v8838_v2 }
 0xbba   : > { %v3588_v26 = vsel %vm794_vm0, %v3560_v45, 0.0 }
 0xbbc   : > { %v7164_v25 = vpop.eup %7163 }
 0xbbd   : > { %v2759_v4 = vpop.xlane.xlu0 %2758  ;;  %v3247_v6 = vmul.f32 %v7164_v25, %v2756_v59  ;;  %vm3252_vm13 = vweird.f32 %v7164_v25 }
 0xbbe   : > { %7165 = vrcp.f32 %v2759_v4  ;;  %v8916_v7 = vpop.f32.mrf.mxu1  ;;  %vm3253_vm14 = vmor %vm3251_vm4, %vm3252_vm13  ;;  %v3272_v51 = vand.u32 2147483648, %v2759_v4  ;;  %v3270_v17 = vand.u32 2147483647, %v2759_v4  ;;  %vm3266_vm3 = vweird.f32 %v2759_v4 }
 0xbbf   : > { %v3248_v11 = vsub.f32 1.0, %v3247_v6 }
 0xbc0   : > { %v3273_v27 = vor.u32 1.1754944e-38, %v3272_v51  ;;  %vm3271_vm8 = vcmp.eq.f32.partialorder %v3270_v17, 8.507059e+37  ;;  %v3561_v17 = vmul.f32 %v8924_v42, %v8840_v31 }
 0xbc1   : > { %v3249_v52 = vmul.f32 %v7164_v25, %v3248_v11  ;;  %v3542_v11 = vrot.slane %v8122_v49, 3 }
 0xbc2   : > { %v3595_v31 = vsel %vm794_vm0, %v3561_v17, 0.0 }
 0xbc3   : > { %v3250_v5 = vadd.f32 %v7164_v25, %v3249_v52  ;;  %v8939_v2 = vperm.slane %v3542_v11, 0 }
 0xbc4   : > { %v7166_v62 = vpop.eup %7165 }
 0xbc5   : > { %v2762_v47 = vpop.xlane.xlu1 %2761  ;;  %v3262_v33 = vmul.f32 %v7166_v62, %v2759_v4  ;;  %v3254_v13 = vsel %vm3253_vm14, %v7164_v25, %v3250_v5  ;;  %vm3267_vm9 = vweird.f32 %v7166_v62 }
 0xbc6   : > { %7167 = vrcp.f32 %v2762_v47  ;;  %v8919_v9 = vpop.f32.mrf.mxu1  ;;  %v3259_v53 = vsel %vm3256_vm5, %v3258_v60, %v3254_v13  ;;  %vm3268_vm2 = vmor %vm3266_vm3, %vm3267_vm9  ;;  %v3287_v52 = vand.u32 2147483648, %v2762_v47  ;;  %v3285_v5 = vand.u32 2147483647, %v2762_v47 }
 0xbc7   : > { %v3263_v19 = vsub.f32 1.0, %v3262_v33  ;;  %v3260_v18 = vmul.f32 %v8845_v30, %v3259_v53  ;;  %v3569_v33 = vmul.f32 %v8926_v48, %v8892_v37  ;;  %vm3281_vm10 = vweird.f32 %v2762_v47 }
 0xbc8   : > { %v3288_v49 = vor.u32 1.1754944e-38, %v3287_v52  ;;  %vm3286_vm7 = vcmp.eq.f32.partialorder %v3285_v5, 8.507059e+37 }
 0xbc9   : > { %v3264_v10 = vmul.f32 %v7166_v62, %v3263_v19  ;;  %6788 = vmatmul.msk.f32.gmra.mxu1 %vm1095_vm12, %v3260_v18 }
 0xbcb   : > { %v3265_v0 = vadd.f32 %v7166_v62, %v3264_v10 }
 0xbcc   : > { %v7168_v1 = vpop.eup %7167 }
 0xbcd   : > { %v3277_v59 = vmul.f32 %v7168_v1, %v2762_v47  ;;  %v3269_v23 = vsel %vm3268_vm2, %v7166_v62, %v3265_v0  ;;  %v2765_v25 = vpop.xlane.xlu2 %2764  ;;  %vm3282_vm15 = vweird.f32 %v7168_v1  ;;  %v3551_v62 = vmul.f32 %v8782_v57, %v8126_v14 }
 0xbce   : > { %v3274_v6 = vsel %vm3271_vm8, %v3273_v27, %v3269_v23  ;;  %7169 = vrcp.f32 %v2765_v25  ;;  %v8931_v44 = vpop.f32.mrf.mxu1  ;;  %vm3283_vm11 = vmor %vm3281_vm10, %vm3282_vm15  ;;  %v3590_v57 = vsel %vm794_vm0, %v3569_v33, 0.0  ;;  %v3302_v23 = vand.u32 2147483648, %v2765_v25 }
 0xbcf   : > { %v3278_v30 = vsub.f32 1.0, %v3277_v59  ;;  %v3275_v60 = vmul.f32 %v8853_v34, %v3274_v6  ;;  %v3587_v51 = vsel %vm794_vm0, %v3551_v62, 0.0  ;;  %v3570_v59 = vmul.f32 %v8926_v48, %v8894_v32 }
 0xbd0   : > { %v3589_v47 = vadd.f32 %v3588_v26, %v3587_v51  ;;  %v3300_v6 = vand.u32 2147483647, %v2765_v25  ;;  %vm3296_vm1 = vweird.f32 %v2765_v25  ;;  %v3303_v52 = vor.u32 1.1754944e-38, %v3302_v23 }
 0xbd1   : > { %v3279_v4 = vmul.f32 %v7168_v1, %v3278_v30  ;;  %6789 = vmatmul.msk.f32.gmra.mxu1 %vm1095_vm12, %v3275_v60  ;;  %v3597_v32 = vsel %vm794_vm0, %v3570_v59, 0.0  ;;  %v3562_v33 = vmul.f32 %v8924_v42, %v8847_v21  ;;  %v3553_v26 = vmul.f32 %v8815_v20, %v8126_v14 }
 0xbd2   : > { %v3591_v27 = vadd.f32 %v3590_v57, %v3589_v47  ;;  %vm3301_vm4 = vcmp.eq.f32.partialorder %v3300_v6, 8.507059e+37  ;;  %v3563_v20 = vmul.f32 %v8924_v42, %v8859_v43  ;;  %v3554_v47 = vmul.f32 %v8826_v46, %v8126_v14 }
 0xbd3   : > { %v3280_v13 = vadd.f32 %v7168_v1, %v3279_v4  ;;  %v3602_v51 = vsel %vm794_vm0, %v3562_v33, 0.0  ;;  %v3601_v21 = vsel %vm794_vm0, %v3553_v26, 0.0  ;;  %v3564_v23 = vmul.f32 %v8924_v42, %v8868_v54 }
 0xbd4   : > { %v7170_v53 = vpop.eup %7169  ;;  %v3603_v57 = vadd.f32 %v3602_v51, %v3601_v21  ;;  %v3573_v6 = vmul.f32 %v8926_v48, %v8903_v41  ;;  %v3565_v41 = vmul.f32 %v8924_v42, %v8876_v15 }
 0xbd5   : > { %v3284_v19 = vsel %vm3283_vm11, %v7168_v1, %v3280_v13  ;;  %v3292_v18 = vmul.f32 %v7170_v53, %v2765_v25  ;;  %v3552_v1 = vmul.f32 %v8803_v12, %v8126_v14  ;;  %vm3297_vm6 = vweird.f32 %v7170_v53 }
 0xbd6   : > { %v3289_v34 = vsel %vm3286_vm7, %v3288_v49, %v3284_v19  ;;  %v3512_v10 = vpop.f32.mrf.mxu1  ;;  %vm3298_vm13 = vmor %vm3296_vm1, %vm3297_vm6  ;;  %v3571_v19 = vmul.f32 %v8926_v48, %v8896_v63  ;;  %v3618_v54 = vsel %vm794_vm0, %v3573_v6, 0.0  ;;  %v3623_v33 = vsel %vm794_vm0, %v3565_v41, 0.0 }
 0xbd7   : > { %v3290_v37 = vmul.f32 %v8861_v36, %v3289_v34  ;;  %v3293_v39 = vsub.f32 1.0, %v3292_v18  ;;  %v3578_v0 = vmul.f32 %v8939_v2, %v3512_v10  ;;  %v3594_v12 = vsel %vm794_vm0, %v3552_v1, 0.0 }
 0xbd8   : > { %v3596_v5 = vadd.f32 %v3595_v31, %v3594_v12  ;;  %v3572_v10 = vmul.f32 %v8926_v48, %v8898_v56  ;;  %v3608_v1 = vsel %vm794_vm0, %v3554_v47, 0.0  ;;  %v3555_v56 = vmul.f32 %v8828_v40, %v8126_v14 }
 0xbd9   : > { %v3294_v30 = vmul.f32 %v7170_v53, %v3293_v39  ;;  %v3592_v36 = vsel %vm794_vm0, %v3578_v0, 0.0  ;;  %6790 = vmatmul.msk.f32.gmra.mxu1 %vm1095_vm12, %v3290_v37  ;;  %v3609_v0 = vsel %vm794_vm0, %v3563_v20, 0.0  ;;  %v3616_v31 = vsel %vm794_vm0, %v3564_v23, 0.0 }
 0xbda   : > { %v3593_v11 = vadd.f32 %v3592_v36, %v3591_v27  ;;  %v3598_v49 = vadd.f32 %v3597_v32, %v3596_v5  ;;  %v3611_v43 = vsel %vm794_vm0, %v3572_v10, 0.0  ;;  %v3610_v27 = vadd.f32 %v3609_v0, %v3608_v1 }
 0xbdb   : > { %v3295_v45 = vadd.f32 %v7170_v53, %v3294_v30  ;;  %v3567_v20 = vmul.f32 %v8924_v42, %v8885_v22 }
 0xbdc   : > { %6796 = vmatmul.msk.f32.vlgmr.msra.gmra.mxu0 %vm794_vm0, %v3593_v11  ;;  %v3612_v30 = vadd.f32 %v3611_v43, %v3610_v27  ;;  %v3568_v43 = vmul.f32 %v8924_v42, %v8890_v38  ;;  %v4031_v38 = vld [vmem:[#allocation2 + $0x30] sm:$0xff] }
 0xbdd   : > { %v3299_v4 = vsel %vm3298_vm13, %v7170_v53, %v3295_v45  ;;  %v3615_v45 = vsel %vm794_vm0, %v3555_v56, 0.0 }
 0xbde   : > { %v3515_v60 = vpop.f32.mrf.mxu1  ;;  %v3304_v62 = vsel %vm3301_vm4, %v3303_v52, %v3299_v4  ;;  %v3617_v52 = vadd.f32 %v3616_v31, %v3615_v45  ;;  %v3644_v6 = vsel %vm794_vm0, %v3568_v43, 0.0  ;;  %v4030_v45 = vld [vmem:[#allocation2 + $0x28] sm:$0xff] }
 0xbdf   : > { %v3579_v13 = vmul.f32 %v8939_v2, %v3515_v60  ;;  %v3305_v25 = vmul.f32 %v8871_v58, %v3304_v62  ;;  %v3604_v58 = vsel %vm794_vm0, %v3571_v19, 0.0  ;;  %v3556_v60 = vmul.f32 %v8830_v35, %v8126_v14 }
 0xbe0   : > { %v3605_v37 = vadd.f32 %v3604_v58, %v3603_v57  ;;  %v3619_v4 = vadd.f32 %v3618_v54, %v3617_v52  ;;  %v3574_v62 = vmul.f32 %v8926_v48, %v8908_v29  ;;  %v3566_v19 = vmul.f32 %v8924_v42, %v8881_v55 }
 0xbe1   : > { %v3599_v34 = vsel %vm794_vm0, %v3579_v13, 0.0  ;;  %6791 = vmatmul.msk.f32.gmra.mxu1 %vm1095_vm12, %v3305_v25  ;;  %v3622_v13 = vsel %vm794_vm0, %v3556_v60, 0.0  ;;  %v3557_v35 = vmul.f32 %v8832_v50, %v8126_v14  ;;  %v3575_v29 = vmul.f32 %v8926_v48, %v8916_v7  ;;  %v9056_v60 = vld [vmem:[%s9053_s22] sm:$0xff] }
 0xbe2   : > { %v3600_v53 = vadd.f32 %v3599_v34, %v3598_v49  ;;  %v3625_v25 = vsel %vm794_vm0, %v3574_v62, 0.0  ;;  %v3624_v49 = vadd.f32 %v3623_v33, %v3622_v13  ;;  %v3630_v21 = vsel %vm794_vm0, %v3566_v19, 0.0  ;;  %v9062_v13 = vld [vmem:[%s9053_s22 + $0x8] sm:$0xff] }
 0xbe3   : > { %v3629_v58 = vsel %vm794_vm0, %v3557_v35, 0.0  ;;  %v3632_v55 = vsel %vm794_vm0, %v3575_v29, 0.0  ;;  %v3558_v7 = vmul.f32 %v8834_v16, %v8126_v14  ;;  %v9084_v35 = vld [vmem:[%s9053_s22 + $0x28] sm:$0xff]  ;;  %v9089_v29 = vld [vmem:[%s9053_s22 + $0x30] sm:$0xff] }
 0xbe4   : > { %6797 = vmatmul.msk.f32.gmra.mxu0 %vm794_vm0, %v3600_v53  ;;  %v3626_v15 = vadd.f32 %v3625_v25, %v3624_v49  ;;  %v3631_v57 = vadd.f32 %v3630_v21, %v3629_v58 }
 0xbe6   : > { %v3518_v18 = vpop.f32.mrf.mxu1 }
 0xbe7   : > { %v3580_v63 = vmul.f32 %v8939_v2, %v3518_v18 }
 0xbe9   : > { %v3606_v17 = vsel %vm794_vm0, %v3580_v63, 0.0  ;;  %v3633_v63 = vadd.f32 %v3632_v55, %v3631_v57 }
 0xbea   : > { %v3607_v39 = vadd.f32 %v3606_v17, %v3605_v37  ;;  %v3576_v37 = vmul.f32 %v8926_v48, %v8919_v9  ;;  %v3637_v17 = vsel %vm794_vm0, %v3567_v20, 0.0  ;;  %v3559_v9 = vmul.f32 %v8836_v61, %v8126_v14  ;;  %v9103_v20 = vld [vmem:[%s9053_s22 + $0x40] sm:$0xff] }
 0xbec   : > { %6798 = vmatmul.msk.f32.gmra.mxu0 %vm794_vm0, %v3607_v39  ;;  %v3636_v39 = vsel %vm794_vm0, %v3558_v7, 0.0  ;;  %v3639_v22 = vsel %vm794_vm0, %v3576_v37, 0.0 }
 0xbed   : > { %v3638_v0 = vadd.f32 %v3637_v17, %v3636_v39 }
 0xbee   : > { %v3521_v59 = vpop.f32.mrf.mxu1 }
 0xbef   : > { %v3581_v46 = vmul.f32 %v8939_v2, %v3521_v59  ;;  %v3640_v27 = vadd.f32 %v3639_v22, %v3638_v0  ;;  %v3577_v59 = vmul.f32 %v8926_v48, %v8931_v44 }
 0xbf1   : > { %v3613_v36 = vsel %vm794_vm0, %v3581_v46, 0.0  ;;  %v3646_v61 = vsel %vm794_vm0, %v3577_v59, 0.0 }
 0xbf2   : > { %v3614_v11 = vadd.f32 %v3613_v36, %v3612_v30  ;;  %v4032_v36 = vld [vmem:[#allocation2 + $0x38] sm:$0xff] }
 0xbf3   : > { %4072 = vmatpush.msrb.mxu0 %v4032_v36 }
 0xbf4   : > { %6799 = vmatmul.msk.f32.gmra.mxu0 %vm794_vm0, %v3614_v11  ;;  %v3643_v11 = vsel %vm794_vm0, %v3559_v9, 0.0 }
 0xbf5   : > { %v3645_v44 = vadd.f32 %v3644_v6, %v3643_v11  ;;  %4073 = vmatpush.msrb.mxu0 %v4031_v38 }
 0xbf6   : > { %v3524_v12 = vpop.f32.mrf.mxu1 }
 0xbf7   : > { %v3582_v32 = vmul.f32 %v8939_v2, %v3524_v12  ;;  %v3647_v52 = vadd.f32 %v3646_v61, %v3645_v44  ;;  %v4029_v12 = vld [vmem:[#allocation2 + $0x20] sm:$0xff]  ;;  %4074 = vmatpush.msrb.mxu0 %v4030_v45 }
 0xbf9   : > { %v3620_v40 = vsel %vm794_vm0, %v3582_v32, 0.0  ;;  %4075 = vmatpush.msrb.mxu0 %v4029_v12 }
 0xbfa   : > { %v3621_v5 = vadd.f32 %v3620_v40, %v3619_v4 }
 0xbfc   : > { %6800 = vmatmul.msk.f32.gmra.mxu0 %vm794_vm0, %v3621_v5 }
 0xc46   : > { %v3527_v26 = vpop.f32.mrf.mxu1 }
 0xc47   : > { %v3583_v34 = vmul.f32 %v8939_v2, %v3527_v26  ;;  %v9068_v26 = vld [vmem:[%s9053_s22 + $0x10] sm:$0xff] }
 0xc49   : > { %v3627_v53 = vsel %vm794_vm0, %v3583_v34, 0.0  ;;  %v9074_v34 = vld [vmem:[%s9053_s22 + $0x18] sm:$0xff] }
 0xc4a   : > { %v3628_v51 = vadd.f32 %v3627_v53, %v3626_v15  ;;  %v9079_v15 = vld [vmem:[%s9053_s22 + $0x20] sm:$0xff] }
 0xc4c   : > { %6801 = vmatmul.msk.f32.gmra.mxu0 %vm794_vm0, %v3628_v51  ;;  %v9094_v51 = vld [vmem:[%s9053_s22 + $0x38] sm:$0xff] }
 0xc4e   : > { %v3530_v18 = vpop.f32.mrf.mxu1 }
 0xc4f   : > { %v3584_v50 = vmul.f32 %v8939_v2, %v3530_v18 }
 0xc51   : > { %v3634_v47 = vsel %vm794_vm0, %v3584_v50, 0.0 }
 0xc52   : > { %v3635_v10 = vadd.f32 %v3634_v47, %v3633_v63 }
 0xc54   : > { %6802 = vmatmul.msk.f32.gmra.mxu0 %vm794_vm0, %v3635_v10 }
 0xc56   : > { %v3533_v1 = vpop.f32.mrf.mxu1 }
 0xc57   : > { %v3585_v16 = vmul.f32 %v8939_v2, %v3533_v1 }
 0xc59   : > { %v3641_v23 = vsel %vm794_vm0, %v3585_v16, 0.0  ;;  %v3699_v46 = vpop.f32.mrf.mxu0 }
 0xc5a   : > { %v3642_v30 = vadd.f32 %v3641_v23, %v3640_v27  ;;  %v3726_v56 = vsel %vm794_vm0, %v3699_v46, 0.0 }
 0xc5b   : > { %3727 = vadd.xlane.f32.xlu0 %v3726_v56 }
 0xc5c   : > { %6803 = vmatmul.msk.f32.gmra.mxu0 %vm794_vm0, %v3642_v30 }
 0xc5e   : > { %v3536_v31 = vpop.f32.mrf.mxu1 }
 0xc5f   : > { %v3586_v54 = vmul.f32 %v8939_v2, %v3536_v31 }
 0xc61   : > { %v3648_v32 = vsel %vm794_vm0, %v3586_v54, 0.0  ;;  %v3702_v4 = vpop.f32.mrf.mxu0 }
 0xc62   : > { %v3649_v40 = vadd.f32 %v3648_v32, %v3647_v52  ;;  %v3729_v5 = vsel %vm794_vm0, %v3702_v4, 0.0 }
 0xc63   : > { %3730 = vadd.xlane.f32.xlu1 %v3729_v5 }
 0xc64   : > { %6804 = vmatmul.msk.f32.gmra.mxu0 %vm794_vm0, %v3649_v40 }
 0xc69   : > { %v3705_v41 = vpop.f32.mrf.mxu0 }
 0xc6a   : > { %v3732_v62 = vsel %vm794_vm0, %v3705_v41, 0.0 }
 0xc6b   : > { %3733 = vadd.xlane.f32.xlu2 %v3732_v62 }
 0xc6c   : > { %6814 = vmatmul.msk.f32.vlgmr.msrb.gmra.mxu0 %vm794_vm0, %v9056_v60 }
 0xc71   : > { %v3708_v33 = vpop.f32.mrf.mxu0 }
 0xc72   : > { %v3735_v25 = vsel %vm794_vm0, %v3708_v33, 0.0 }
 0xc73   : > { %3736 = vadd.xlane.f32.xlu0 %v3735_v25 }
 0xc74   : > { %6815 = vmatmul.msk.f32.gmra.mxu0 %vm794_vm0, %v9062_v13 }
 0xc79   : > { %v3711_v49 = vpop.f32.mrf.mxu0 }
 0xc7a   : > { %v3738_v19 = vsel %vm794_vm0, %v3711_v49, 0.0 }
 0xc7b   : > { %3739 = vadd.xlane.f32.xlu1 %v3738_v19 }
 0xc7c   : > { %6816 = vmatmul.msk.f32.gmra.mxu0 %vm794_vm0, %v9068_v26 }
 0xc84   : > { %6817 = vmatmul.msk.f32.gmra.mxu0 %vm794_vm0, %v9074_v34 }
 0xc8c   : > { %6818 = vmatmul.msk.f32.gmra.mxu0 %vm794_vm0, %v9079_v15 }
 0xc94   : > { %6819 = vmatmul.msk.f32.gmra.mxu0 %vm794_vm0, %v9084_v35 }
 0xc9c   : > { %6820 = vmatmul.msk.f32.gmra.mxu0 %vm794_vm0, %v9089_v29 }
 0xca4   : > { %6821 = vmatmul.msk.f32.gmra.mxu0 %vm794_vm0, %v9094_v51 }
 0xcac   : > { %6822 = vmatmul.msk.f32.gmra.mxu0 %vm794_vm0, %v9103_v20 }
 0xcc9   : > { %v3714_v53 = vpop.f32.mrf.mxu0 }
 0xcca   : > { %v3741_v21 = vsel %vm794_vm0, %v3714_v53, 0.0 }
 0xccb   : > { %3742 = vadd.xlane.f32.xlu2 %v3741_v21 }
 0xcce   : > { %v3728_v58 = vpop.xlane.xlu0 %3727 }
 0xccf   : > { %v3753_v55 = vmul.f32 %v3728_v58, %v7884_v8  ;;  %v3954_v58 = vld [vmem:[#allocation2 + $0x8] sm:$0xff] }
 0xcd1   : > { %v9100_v57 = vsub.f32 %v3699_v46, %v3753_v55  ;;  %v3717_v18 = vpop.f32.mrf.mxu0 }
 0xcd2   : > { %v3744_v50 = vsel %vm794_vm0, %v3717_v18, 0.0 }
 0xcd3   : > { %3745 = vadd.xlane.f32.xlu1 %v3744_v50  ;;  %v3771_v63 = vmul.f32 %v9100_v57, %v9100_v57 }
 0xcd5   : > { %v3780_v7 = vsel %vm794_vm0, %v3771_v63, 0.0  ;;  %v3953_v63 = vld [vmem:[#allocation2] sm:$0xff] }
 0xcd6   : > { %v3731_v37 = vpop.xlane.xlu1 %3730  ;;  %3781 = vadd.xlane.f32.xlu0 %v3780_v7 }
 0xcd7   : > { %v3754_v47 = vmul.f32 %v3731_v37, %v7884_v8 }
 0xcd9   : > { %v9112_v10 = vsub.f32 %v3702_v4, %v3754_v47  ;;  %v9114_v17 = vpop.f32.mrf.mxu0 }
 0xcda   : > { %v3747_v0 = vsel %vm794_vm0, %v9114_v17, 0.0 }
 0xcdb   : > { %v3772_v39 = vmul.f32 %v9112_v10, %v9112_v10 }
 0xcdd   : > { %v3783_v22 = vsel %vm794_vm0, %v3772_v39, 0.0 }
 0xcde   : > { %v3734_v1 = vpop.xlane.xlu2 %3733  ;;  %3784 = vadd.xlane.f32.xlu2 %v3783_v22  ;;  %3748 = vadd.xlane.f32.xlu0 %v3747_v0 }
 0xcdf   : > { %v3755_v43 = vmul.f32 %v3734_v1, %v7884_v8 }
 0xce1   : > { %v9122_v16 = vsub.f32 %v3705_v41, %v3755_v43  ;;  %v9124_v27 = vpop.f32.mrf.mxu0 }
 0xce2   : > { %v3750_v23 = vsel %vm794_vm0, %v9124_v27, 0.0 }
 0xce3   : > { %v3773_v9 = vmul.f32 %v9122_v16, %v9122_v16 }
 0xce5   : > { %v3786_v59 = vsel %vm794_vm0, %v3773_v9, 0.0 }
 0xce6   : > { %v3737_v46 = vpop.xlane.xlu0 %3736  ;;  %3787 = vadd.xlane.f32.xlu1 %v3786_v59  ;;  %3751 = vadd.xlane.f32.xlu2 %v3750_v23 }
 0xce7   : > { %v3756_v30 = vmul.f32 %v3737_v46, %v7884_v8 }
 0xce9   : > { %v9132_v56 = vsub.f32 %v3708_v33, %v3756_v30  ;;  %v9143_v45 = vpop.f32.mrf.mxu0  ;;  %v3956_v33 = vld [vmem:[#allocation2 + $0x18] sm:$0xff] }
 0xcea   : > { %3996 = vmatpush.msrb.mxu2 %v3956_v33 }
 0xceb   : > { %v3774_v6 = vmul.f32 %v9132_v56, %v9132_v56 }
 0xced   : > { %v3789_v36 = vsel %vm794_vm0, %v3774_v6, 0.0 }
 0xcee   : > { %v3740_v38 = vpop.xlane.xlu1 %3739  ;;  %3790 = vadd.xlane.f32.xlu0 %v3789_v36 }
 0xcef   : > { %v3757_v11 = vmul.f32 %v3740_v38, %v7884_v8 }
 0xcf1   : > { %v9138_v61 = vsub.f32 %v3711_v49, %v3757_v11  ;;  %v9145_v54 = vpop.f32.mrf.mxu0  ;;  %v3955_v49 = vld [vmem:[#allocation2 + $0x10] sm:$0xff] }
 0xcf2   : > { %3997 = vmatpush.msrb.mxu2 %v3955_v49 }
 0xcf3   : > { %v3775_v44 = vmul.f32 %v9138_v61, %v9138_v61 }
 0xcf4   : > { %3998 = vmatpush.msrb.mxu2 %v3954_v58 }
 0xcf5   : > { %v3792_v31 = vsel %vm794_vm0, %v3775_v44, 0.0 }
 0xcf6   : > { %3793 = vadd.xlane.f32.xlu1 %v3792_v31  ;;  %3999 = vmatpush.msrb.mxu2 %v3953_v63 }
 0xcf9   : > { %v9147_v52 = vpop.f32.mrf.mxu0 }
 0xd01   : > { %v9149_v12 = vpop.f32.mrf.mxu0 }
 0xd09   : > { %v9151_v32 = vpop.f32.mrf.mxu0 }
 0xd11   : > { %v4092_v4 = vpop.f32.mrf.mxu0 }
 0xd19   : > { %v4095_v41 = vpop.f32.mrf.mxu0 }
 0xd21   : > { %v4098_v50 = vpop.f32.mrf.mxu0 }
 0xd29   : > { %v4101_v0 = vpop.f32.mrf.mxu0 }
 0xd2a   : > { %6832 = vmatpush.xpose.msk.msra.mxu0 %vm794_vm0, %v4101_v0 }
 0xd2e   : > { %6833 = vmatpush.xpose.msk.msra.mxu0 %vm794_vm0, %v4098_v50 }
 0xd32   : > { %6834 = vmatpush.xpose.msk.msra.mxu0 %vm794_vm0, %v4095_v41 }
 0xd36   : > { %6835 = vmatpush.xpose.msk.msra.mxu0 %vm794_vm0, %v4092_v4 }
 0xd3a   : > { %6836 = vmatpush.xpose.msk.msra.mxu0 %vm794_vm0, %v9151_v32 }
 0xd3e   : > { %v3743_v40 = vpop.xlane.xlu2 %3742  ;;  %6837 = vmatpush.xpose.msk.msra.mxu0 %vm794_vm0, %v9149_v12 }
 0xd3f   : > { %v3758_v5 = vmul.f32 %v3743_v40, %v7884_v8 }
 0xd41   : > { %v9154_v62 = vsub.f32 %v3714_v53, %v3758_v5 }
 0xd42   : > { %6838 = vmatpush.xpose.msk.msra.mxu0 %vm794_vm0, %v9147_v52 }
 0xd43   : > { %v3776_v25 = vmul.f32 %v9154_v62, %v9154_v62 }
 0xd45   : > { %v3795_v19 = vsel %vm794_vm0, %v3776_v25, 0.0 }
 0xd46   : > { %v3746_v21 = vpop.xlane.xlu1 %3745  ;;  %3796 = vadd.xlane.f32.xlu2 %v3795_v19  ;;  %6839 = vmatpush.xpose.msk.msra.mxu0 %vm794_vm0, %v9145_v54 }
 0xd47   : > { %v3759_v55 = vmul.f32 %v3746_v21, %v7884_v8  ;;  %v7378_v21 = vld [vmem:[%s10456_s17] sm:$0xf] }
 0xd48   : > { %v9186_v58 = vperm.slane %v7378_v21, 1 }
 0xd49   : > { %v9160_v7 = vsub.f32 %v3717_v18, %v3759_v55  ;;  %v3782_v53 = vpop.xlane.xlu0 %3781 }
 0xd4a   : > { %v3807_v37 = vmul.f32 %v3782_v53, %v7884_v8  ;;  %v7379_v53 = vld [vmem:[%s10457_s18] sm:$0xf]  ;;  %6840 = vmatpush.xpose.msk.msra.mxu0 %vm794_vm0, %v9143_v45 }
 0xd4b   : > { %v3777_v47 = vmul.f32 %v9160_v7, %v9160_v7 }
 0xd4c   : > { %v3816_v39 = vadd.f32 2.5e-06, %v3807_v37  ;;  %v9195_v37 = vperm.slane %v7379_v53, 1 }
 0xd4d   : > { %v3798_v22 = vsel %vm794_vm0, %v3777_v47, 0.0 }
 0xd4e   : > { %7171 = vrsqrt.f32 %v3816_v39  ;;  %3799 = vadd.xlane.f32.xlu0 %v3798_v22  ;;  %vm3831_vm5 = vweird.f32 %v3816_v39 }
 0xd51   : > { %v3785_v1 = vpop.xlane.xlu2 %3784  ;;  %v3749_v43 = vpop.xlane.xlu0 %3748 }
 0xd52   : > { %v3808_v18 = vmul.f32 %v3785_v1, %v7884_v8  ;;  %v3760_v9 = vmul.f32 %v3749_v43, %v7884_v8 }
 0xd54   : > { %v7172_v59 = vpop.eup %7171  ;;  %v3817_v23 = vadd.f32 2.5e-06, %v3808_v18  ;;  %v9170_v46 = vsub.f32 %v9114_v17, %v3760_v9 }
 0xd55   : > { %v3826_v30 = vmul.f32 %v7172_v59, %v3816_v39  ;;  %vm3832_vm14 = vweird.f32 %v7172_v59 }
 0xd56   : > { %7173 = vrsqrt.f32 %v3817_v23  ;;  %v3778_v6 = vmul.f32 %v9170_v46, %v9170_v46  ;;  %vm3833_vm9 = vmor %vm3831_vm5, %vm3832_vm14  ;;  %vm3841_vm2 = vweird.f32 %v3817_v23 }
 0xd57   : > { %v3827_v36 = vmul.f32 %v7172_v59, %v3826_v30 }
 0xd58   : > { %v3801_v38 = vsel %vm794_vm0, %v3778_v6, 0.0 }
 0xd59   : > { %v3828_v11 = vmul.f32 0.5, %v3827_v36  ;;  %v3788_v44 = vpop.xlane.xlu1 %3787  ;;  %3802 = vadd.xlane.f32.xlu1 %v3801_v38  ;;  %v3752_v31 = vpop.xlane.xlu2 %3751 }
 0xd5a   : > { %v3809_v40 = vmul.f32 %v3788_v44, %v7884_v8  ;;  %v3761_v17 = vmul.f32 %v3752_v31, %v7884_v8 }
 0xd5b   : > { %v3829_v5 = vsub.f32 1.5, %v3828_v11 }
 0xd5c   : > { %v7174_v33 = vpop.eup %7173  ;;  %v3818_v25 = vadd.f32 2.5e-06, %v3809_v40  ;;  %v9180_v49 = vsub.f32 %v9124_v27, %v3761_v17 }
 0xd5d   : > { %v3830_v19 = vmul.f32 %v7172_v59, %v3829_v5  ;;  %v3836_v41 = vmul.f32 %v7174_v33, %v3817_v23  ;;  %vm3842_vm3 = vweird.f32 %v7174_v33 }
 0xd5e   : > { %7175 = vrsqrt.f32 %v3818_v25  ;;  %v3779_v55 = vmul.f32 %v9180_v49, %v9180_v49  ;;  %vm3843_vm8 = vmor %vm3841_vm2, %vm3842_vm3  ;;  %vm3851_vm10 = vweird.f32 %v3818_v25 }
 0xd5f   : > { %v3834_v50 = vsel %vm3833_vm9, %v7172_v59, %v3830_v19  ;;  %v3837_v63 = vmul.f32 %v7174_v33, %v3836_v41 }
 0xd60   : > { %v3915_v27 = vmul.f32 %v3834_v50, %v9100_v57  ;;  %v3804_v4 = vsel %vm794_vm0, %v3779_v55, 0.0 }
 0xd61   : > { %v3838_v47 = vmul.f32 0.5, %v3837_v63  ;;  %v3791_v39 = vpop.xlane.xlu0 %3790  ;;  %3805 = vadd.xlane.f32.xlu2 %v3804_v4 }
 0xd62   : > { %v3925_v22 = vmul.f32 %v9186_v58, %v3915_v27  ;;  %v3810_v0 = vmul.f32 %v3791_v39, %v7884_v8 }
 0xd63   : > { %v3839_v1 = vsub.f32 1.5, %v3838_v47 }
 0xd64   : > { %v7176_v57 = vpop.eup %7175  ;;  %v3819_v43 = vadd.f32 2.5e-06, %v3810_v0  ;;  %v3935_v18 = vadd.f32 %v9195_v37, %v3925_v22 }
 0xd65   : > { %v3840_v9 = vmul.f32 %v7174_v33, %v3839_v1  ;;  %v3846_v59 = vmul.f32 %v7176_v57, %v3818_v25  ;;  %vm3852_vm15 = vweird.f32 %v7176_v57 }
 0xd66   : > { %7177 = vrsqrt.f32 %v3819_v43  ;;  %6805 = vmatmul.msk.f32.vlgmr.msrb.gmra.mxu2 %vm794_vm0, %v3935_v18  ;;  %vm3853_vm11 = vmor %vm3851_vm10, %vm3852_vm15  ;;  %vm3861_vm6 = vweird.f32 %v3819_v43 }
 0xd67   : > { %v3844_v32 = vsel %vm3843_vm8, %v7174_v33, %v3840_v9  ;;  %v3847_v30 = vmul.f32 %v7176_v57, %v3846_v59 }
 0xd68   : > { %v3916_v6 = vmul.f32 %v3844_v32, %v9112_v10 }
 0xd69   : > { %v3848_v36 = vmul.f32 0.5, %v3847_v30  ;;  %v3794_v38 = vpop.xlane.xlu1 %3793 }
 0xd6a   : > { %v3811_v11 = vmul.f32 %v3794_v38, %v7884_v8  ;;  %v3926_v12 = vmul.f32 %v9186_v58, %v3916_v6 }
 0xd6b   : > { %v3849_v44 = vsub.f32 1.5, %v3848_v36 }
 0xd6c   : > { %v7178_v23 = vpop.eup %7177  ;;  %v3820_v31 = vadd.f32 2.5e-06, %v3811_v11  ;;  %v3936_v40 = vadd.f32 %v9195_v37, %v3926_v12 }
 0xd6d   : > { %v3850_v17 = vmul.f32 %v7176_v57, %v3849_v44  ;;  %v3856_v10 = vmul.f32 %v7178_v23, %v3819_v43  ;;  %vm3862_vm7 = vweird.f32 %v7178_v23 }
 0xd6e   : > { %7179 = vrsqrt.f32 %v3820_v31  ;;  %6806 = vmatmul.msk.f32.gmra.mxu2 %vm794_vm0, %v3936_v40  ;;  %vm3863_vm1 = vmor %vm3861_vm6, %vm3862_vm7  ;;  %vm3871_vm4 = vweird.f32 %v3820_v31 }
 0xd6f   : > { %v3854_v52 = vsel %vm3853_vm11, %v7176_v57, %v3850_v17  ;;  %v3857_v5 = vmul.f32 %v7178_v23, %v3856_v10 }
 0xd70   : > { %v3917_v33 = vmul.f32 %v3854_v52, %v9122_v16 }
 0xd71   : > { %v3858_v19 = vmul.f32 0.5, %v3857_v5 }
 0xd72   : > { %v3927_v41 = vmul.f32 %v9186_v58, %v3917_v33 }
 0xd73   : > { %v3859_v21 = vsub.f32 1.5, %v3858_v19 }
 0xd74   : > { %v7180_v54 = vpop.eup %7179  ;;  %v3937_v25 = vadd.f32 %v9195_v37, %v3927_v41 }
 0xd75   : > { %v3860_v55 = vmul.f32 %v7178_v23, %v3859_v21  ;;  %v3866_v50 = vmul.f32 %v7180_v54, %v3820_v31  ;;  %vm3872_vm13 = vweird.f32 %v7180_v54 }
 0xd76   : > { %6807 = vmatmul.msk.f32.gmra.mxu2 %vm794_vm0, %v3937_v25  ;;  %vm3873_vm14 = vmor %vm3871_vm4, %vm3872_vm13 }
 0xd77   : > { %v3864_v63 = vsel %vm3863_vm1, %v7178_v23, %v3860_v55  ;;  %v3867_v27 = vmul.f32 %v7180_v54, %v3866_v50 }
 0xd78   : > { %v3918_v16 = vmul.f32 %v3864_v63, %v9132_v56 }
 0xd79   : > { %v3868_v4 = vmul.f32 0.5, %v3867_v27 }
 0xd7a   : > { %v3928_v45 = vmul.f32 %v9186_v58, %v3918_v16 }
 0xd7b   : > { %v3869_v53 = vsub.f32 1.5, %v3868_v4 }
 0xd7c   : > { %v3938_v47 = vadd.f32 %v9195_v37, %v3928_v45 }
 0xd7d   : > { %v3870_v39 = vmul.f32 %v7180_v54, %v3869_v53 }
 0xd7e   : > { %6808 = vmatmul.msk.f32.gmra.mxu2 %vm794_vm0, %v3938_v47 }
 0xd7f   : > { %v3874_v22 = vsel %vm3873_vm14, %v7180_v54, %v3870_v39 }
 0xd80   : > { %v3919_v0 = vmul.f32 %v3874_v22, %v9138_v61 }
 0xd82   : > { %v3929_v1 = vmul.f32 %v9186_v58, %v3919_v0 }
 0xd84   : > { %v3939_v57 = vadd.f32 %v9195_v37, %v3929_v1 }
 0xd86   : > { %6809 = vmatmul.msk.f32.gmra.mxu2 %vm794_vm0, %v3939_v57 }
 0xdb9   : > { %v3797_v56 = vpop.xlane.xlu2 %3796 }
 0xdba   : > { %v3812_v43 = vmul.f32 %v3797_v56, %v7884_v8 }
 0xdbc   : > { %v3821_v18 = vadd.f32 2.5e-06, %v3812_v43 }
 0xdbe   : > { %7181 = vrsqrt.f32 %v3821_v18  ;;  %vm3881_vm9 = vweird.f32 %v3821_v18 }
 0xdc1   : > { %v3800_v9 = vpop.xlane.xlu0 %3799 }
 0xdc2   : > { %v3813_v59 = vmul.f32 %v3800_v9, %v7884_v8 }
 0xdc4   : > { %v7182_v32 = vpop.eup %7181  ;;  %v3822_v30 = vadd.f32 2.5e-06, %v3813_v59 }
 0xdc5   : > { %v3876_v6 = vmul.f32 %v7182_v32, %v3821_v18  ;;  %vm3882_vm5 = vweird.f32 %v7182_v32 }
 0xdc6   : > { %7183 = vrsqrt.f32 %v3822_v30  ;;  %vm3883_vm3 = vmor %vm3881_vm9, %vm3882_vm5  ;;  %vm3891_vm8 = vweird.f32 %v3822_v30 }
 0xdc7   : > { %v3877_v36 = vmul.f32 %v7182_v32, %v3876_v6 }
 0xdc9   : > { %v3878_v61 = vmul.f32 0.5, %v3877_v36 }
 0xdcb   : > { %v3879_v38 = vsub.f32 1.5, %v3878_v61 }
 0xdcc   : > { %v7184_v11 = vpop.eup %7183  ;;  %v3803_v12 = vpop.xlane.xlu1 %3802 }
 0xdcd   : > { %v3880_v44 = vmul.f32 %v7182_v32, %v3879_v38  ;;  %v3886_v23 = vmul.f32 %v7184_v11, %v3822_v30  ;;  %v3814_v31 = vmul.f32 %v3803_v12, %v7884_v8  ;;  %vm3892_vm2 = vweird.f32 %v7184_v11 }
 0xdce   : > { %vm3893_vm15 = vmor %vm3891_vm8, %vm3892_vm2 }
 0xdcf   : > { %v3884_v40 = vsel %vm3883_vm3, %v7182_v32, %v3880_v44  ;;  %v3887_v17 = vmul.f32 %v7184_v11, %v3886_v23  ;;  %v3823_v10 = vadd.f32 2.5e-06, %v3814_v31 }
 0xdd0   : > { %v3920_v52 = vmul.f32 %v3884_v40, %v9154_v62 }
 0xdd1   : > { %v3888_v5 = vmul.f32 0.5, %v3887_v17  ;;  %7185 = vrsqrt.f32 %v3823_v10  ;;  %vm3901_vm11 = vweird.f32 %v3823_v10 }
 0xdd2   : > { %v3930_v33 = vmul.f32 %v9186_v58, %v3920_v52  ;;  %v9291_v52 = vld [vmem:[%s9287_s28] sm:$0xff] }
 0xdd3   : > { %v3889_v19 = vsub.f32 1.5, %v3888_v5  ;;  %vm4485_vm4 = vcmp.lt.f32.partialorder %v9291_v52, -0.5 }
 0xdd4   : > { %v3806_v41 = vpop.xlane.xlu2 %3805  ;;  %v3940_v21 = vadd.f32 %v9195_v37, %v3930_v33 }
 0xdd5   : > { %v3890_v54 = vmul.f32 %v7184_v11, %v3889_v19  ;;  %v3815_v25 = vmul.f32 %v3806_v41, %v7884_v8 }
 0xdd6   : > { %6810 = vmatmul.msk.f32.gmra.mxu2 %vm794_vm0, %v3940_v21 }
 0xdd7   : > { %v7186_v55 = vpop.eup %7185  ;;  %v3894_v50 = vsel %vm3893_vm15, %v7184_v11, %v3890_v54  ;;  %v3824_v63 = vadd.f32 2.5e-06, %v3815_v25  ;;  %v9306_v25 = vld [vmem:[%s9287_s28 + $0x8] sm:$0xff] }
 0xdd8   : > { %v3896_v62 = vmul.f32 %v7186_v55, %v3823_v10  ;;  %v3921_v27 = vmul.f32 %v3894_v50, %v9160_v7  ;;  %vm3902_vm10 = vweird.f32 %v7186_v55  ;;  %vm4486_vm14 = vcmp.lt.f32.partialorder %v9306_v25, -0.5 }
 0xdd9   : > { %7187 = vrsqrt.f32 %v3824_v63  ;;  %vm3903_vm7 = vmor %vm3901_vm11, %vm3902_vm10  ;;  %vm3911_vm1 = vweird.f32 %v3824_v63 }
 0xdda   : > { %v3897_v16 = vmul.f32 %v7186_v55, %v3896_v62  ;;  %v3931_v4 = vmul.f32 %v9186_v58, %v3921_v27 }
 0xddc   : > { %v3898_v45 = vmul.f32 0.5, %v3897_v16  ;;  %v3941_v53 = vadd.f32 %v9195_v37, %v3931_v4  ;;  %v9322_v4 = vld [vmem:[%s9287_s28 + $0x10] sm:$0xff] }
 0xddd   : > { %vm4487_vm5 = vcmp.lt.f32.partialorder %v9322_v4, -0.5 }
 0xdde   : > { %v3899_v47 = vsub.f32 1.5, %v3898_v45  ;;  %6811 = vmatmul.msk.f32.gmra.mxu2 %vm794_vm0, %v3941_v53  ;;  %v4108_v45 = vld [vmem:[#allocation2 + $0x58] sm:$0xff]  ;;  %v4107_v53 = vld [vmem:[#allocation2 + $0x50] sm:$0xff] }
 0xddf   : > { %v7188_v39 = vpop.eup %7187  ;;  %4121 = vmatpush.msra.mxu2 %v4108_v45 }
 0xde0   : > { %v3900_v22 = vmul.f32 %v7186_v55, %v3899_v47  ;;  %v3906_v0 = vmul.f32 %v7188_v39, %v3824_v63  ;;  %vm3912_vm6 = vweird.f32 %v7188_v39 }
 0xde1   : > { %vm3913_vm13 = vmor %vm3911_vm1, %vm3912_vm6  ;;  %4122 = vmatpush.msra.mxu2 %v4107_v53 }
 0xde2   : > { %v3904_v1 = vsel %vm3903_vm7, %v7186_v55, %v3900_v22  ;;  %v3907_v57 = vmul.f32 %v7188_v39, %v3906_v0  ;;  %v4105_v0 = vld [vmem:[#allocation2 + $0x40] sm:$0xff] }
 0xde3   : > { %v3922_v7 = vmul.f32 %v3904_v1, %v9170_v46 }
 0xde4   : > { %v3908_v56 = vmul.f32 0.5, %v3907_v57 }
 0xde5   : > { %v3932_v43 = vmul.f32 %v9186_v58, %v3922_v7 }
 0xde6   : > { %v3909_v18 = vsub.f32 1.5, %v3908_v56  ;;  %v9336_v56 = vld [vmem:[%s9287_s28 + $0x18] sm:$0xff] }
 0xde7   : > { %v3942_v9 = vadd.f32 %v9195_v37, %v3932_v43  ;;  %vm4488_vm9 = vcmp.lt.f32.partialorder %v9336_v56, -0.5 }
 0xde8   : > { %v3910_v59 = vmul.f32 %v7188_v39, %v3909_v18 }
 0xde9   : > { %v9243_v32 = vpop.f32.mrf.mxu2  ;;  %6812 = vmatmul.msk.f32.gmra.mxu2 %vm794_vm0, %v3942_v9 }
 0xdea   : > { %v3914_v30 = vsel %vm3913_vm13, %v7188_v39, %v3910_v59  ;;  %v4153_v6 = vmul.f32 %v9243_v32, %v8126_v14  ;;  %v4106_v39 = vld [vmem:[#allocation2 + $0x48] sm:$0xff]  ;;  %v4162_v7 = vmul.f32 %v9243_v32, %v8157_v3 }
 0xdeb   : > { %v3923_v46 = vmul.f32 %v3914_v30, %v9180_v49  ;;  %4123 = vmatpush.msra.mxu2 %v4106_v39  ;;  %v9439_v39 = vld [vmem:[%s9287_s28 + $0x38] sm:$0xff] }
 0xdec   : > { %6841 = vmatmul.msk.f32.vlgmr.msra.gmra.mxu0 %vm794_vm0, %v4153_v6  ;;  %v9352_v6 = vld [vmem:[%s9287_s28 + $0x20] sm:$0xff]  ;;  %vm4492_vm15 = vcmp.lt.f32.partialorder %v9439_v39, -0.5 }
 0xded   : > { %v3933_v36 = vmul.f32 %v9186_v58, %v3923_v46  ;;  %4124 = vmatpush.msra.mxu2 %v4105_v0  ;;  %vm4489_vm3 = vcmp.lt.f32.partialorder %v9352_v6, -0.5 }
 0xdef   : > { %v3943_v61 = vadd.f32 %v9195_v37, %v3933_v36 }
 0xdf1   : > { %v9252_v38 = vpop.f32.mrf.mxu2  ;;  %6813 = vmatmul.msk.f32.gmra.mxu2 %vm794_vm0, %v3943_v61 }
 0xdf2   : > { %v4154_v11 = vmul.f32 %v9252_v38, %v8126_v14  ;;  %v4163_v30 = vmul.f32 %v9252_v38, %v8157_v3 }
 0xdf4   : > { %6842 = vmatmul.msk.f32.gmra.mxu0 %vm794_vm0, %v4154_v11 }
 0xdf9   : > { %v9258_v12 = vpop.f32.mrf.mxu2  ;;  %6823 = vmatmul.msk.f32.vlgmr.msra.gmra.mxu2 %vm794_vm0, %v9056_v60 }
 0xdfa   : > { %v4155_v49 = vmul.f32 %v9258_v12, %v8126_v14  ;;  %v4164_v11 = vmul.f32 %v9258_v12, %v8157_v3 }
 0xdfc   : > { %6843 = vmatmul.msk.f32.gmra.mxu0 %vm794_vm0, %v4155_v49 }
 0xe01   : > { %v9263_v58 = vpop.f32.mrf.mxu2  ;;  %6824 = vmatmul.msk.f32.gmra.mxu2 %vm794_vm0, %v9062_v13 }
 0xe02   : > { %v4156_v37 = vmul.f32 %v9263_v58, %v8126_v14  ;;  %v4165_v13 = vmul.f32 %v9263_v58, %v8157_v3 }
 0xe04   : > { %6844 = vmatmul.msk.f32.gmra.mxu0 %vm794_vm0, %v4156_v37 }
 0xe09   : > { %v9268_v44 = vpop.f32.mrf.mxu2  ;;  %6825 = vmatmul.msk.f32.gmra.mxu2 %vm794_vm0, %v9068_v26 }
 0xe0a   : > { %v4157_v23 = vmul.f32 %v9268_v44, %v8126_v14  ;;  %v4166_v49 = vmul.f32 %v9268_v44, %v8157_v3  ;;  %v4175_v53 = vmul.f32 %v9268_v44, %v8209_v28 }
 0xe0c   : > { %6845 = vmatmul.msk.f32.gmra.mxu0 %vm794_vm0, %v4157_v23 }
 0xe11   : > { %6826 = vmatmul.msk.f32.gmra.mxu2 %vm794_vm0, %v9074_v34 }
 0xe19   : > { %6827 = vmatmul.msk.f32.gmra.mxu2 %vm794_vm0, %v9079_v15 }
 0xe21   : > { %6828 = vmatmul.msk.f32.gmra.mxu2 %vm794_vm0, %v9084_v35  ;;  %v4171_v35 = vmul.f32 %v9243_v32, %v8209_v28 }
 0xe29   : > { %6829 = vmatmul.msk.f32.gmra.mxu2 %vm794_vm0, %v9089_v29  ;;  %v4172_v29 = vmul.f32 %v9252_v38, %v8209_v28 }
 0xe31   : > { %6830 = vmatmul.msk.f32.gmra.mxu2 %vm794_vm0, %v9094_v51  ;;  %v4173_v51 = vmul.f32 %v9258_v12, %v8209_v28 }
 0xe39   : > { %6831 = vmatmul.msk.f32.gmra.mxu2 %vm794_vm0, %v9103_v20 }
 0xe59   : > { %v9273_v31 = vpop.f32.mrf.mxu2 }
 0xe5a   : > { %v4158_v40 = vmul.f32 %v9273_v31, %v8126_v14  ;;  %v4167_v37 = vmul.f32 %v9273_v31, %v8157_v3 }
 0xe5c   : > { %6846 = vmatmul.msk.f32.gmra.mxu0 %vm794_vm0, %v4158_v40 }
 0xe61   : > { %v9278_v17 = vpop.f32.mrf.mxu2 }
 0xe62   : > { %v4159_v10 = vmul.f32 %v9278_v17, %v8126_v14  ;;  %v4168_v26 = vmul.f32 %v9278_v17, %v8157_v3 }
 0xe64   : > { %6847 = vmatmul.msk.f32.gmra.mxu0 %vm794_vm0, %v4159_v10 }
 0xe69   : > { %v4341_v5 = vpop.f32.mrf.mxu0 }
 0xe6a   : > { %v4449_v33 = vmul.f32 0.35355338, %v4341_v5  ;;  %v4174_v5 = vmul.f32 %v9263_v58, %v8209_v28 }
 0xe6c   : > { %v9294_v19 = vpop.f32.mrf.mxu2  ;;  %v9299_v41 = vsel %vm4485_vm4, %v9291_v52, %v4449_v33  ;;  %v9423_v33 = vld [vmem:[%s9287_s28 + $0x30] sm:$0xff] }
 0xe6d   : > { %v4548_v21 = vsel %vm1095_vm12, %v9299_v41, -inf  ;;  %v4160_v54 = vmul.f32 %v9294_v19, %v8126_v14  ;;  %v4169_v34 = vmul.f32 %v9294_v19, %v8157_v3  ;;  %vm4491_vm8 = vcmp.lt.f32.partialorder %v9423_v33, -0.5 }
 0xe6e   : > { %4549 = vmax.xlane.f32.xlu0 %v4548_v21 }
 0xe6f   : > { %6848 = vmatmul.msk.f32.gmra.mxu0 %vm794_vm0, %v4160_v54 }
 0xe71   : > { %v4344_v55 = vpop.f32.mrf.mxu0 }
 0xe72   : > { %v4450_v50 = vmul.f32 0.35355338, %v4344_v55 }
 0xe74   : > { %v9310_v63 = vpop.f32.mrf.mxu2  ;;  %v9315_v62 = vsel %vm4486_vm14, %v9306_v25, %v4450_v50 }
 0xe75   : > { %v4551_v27 = vsel %vm1095_vm12, %v9315_v62, -inf  ;;  %v4161_v16 = vmul.f32 %v9310_v63, %v8126_v14  ;;  %v4170_v15 = vmul.f32 %v9310_v63, %v8157_v3  ;;  %v9409_v3 = vld [vmem:[%s9287_s28 + $0x28] sm:$0xff] }
 0xe76   : > { %4552 = vmax.xlane.f32.xlu1 %v4551_v27  ;;  %vm4490_vm2 = vcmp.lt.f32.partialorder %v9409_v3, -0.5 }
 0xe77   : > { %6849 = vmatmul.msk.f32.gmra.mxu0 %vm794_vm0, %v4161_v16 }
 0xe79   : > { %v4347_v47 = vpop.f32.mrf.mxu0 }
 0xe7a   : > { %v4451_v22 = vmul.f32 0.35355338, %v4347_v47 }
 0xe7c   : > { %v9329_v1 = vsel %vm4487_vm5, %v9322_v4, %v4451_v22 }
 0xe7d   : > { %v4554_v57 = vsel %vm1095_vm12, %v9329_v1, -inf }
 0xe7e   : > { %4555 = vmax.xlane.f32.xlu2 %v4554_v57 }
 0xe7f   : > { %6850 = vmatmul.msk.f32.gmra.mxu0 %vm794_vm0, %v4162_v7 }
 0xe81   : > { %v4350_v43 = vpop.f32.mrf.mxu0 }
 0xe82   : > { %v4452_v18 = vmul.f32 0.35355338, %v4350_v43 }
 0xe84   : > { %v9345_v9 = vsel %vm4488_vm9, %v9336_v56, %v4452_v18  ;;  %v4176_v18 = vmul.f32 %v9273_v31, %v8209_v28 }
 0xe85   : > { %v4557_v59 = vsel %vm1095_vm12, %v9345_v9, -inf }
 0xe86   : > { %4558 = vmax.xlane.f32.xlu0 %v4557_v59 }
 0xe87   : > { %6851 = vmatmul.msk.f32.gmra.mxu0 %vm794_vm0, %v4163_v30 }
 0xe89   : > { %v4353_v60 = vpop.f32.mrf.mxu0 }
 0xe8a   : > { %v4453_v46 = vmul.f32 0.35355338, %v4353_v60  ;;  %v9458_v60 = vld [vmem:[%s9287_s28 + $0x40] sm:$0xff] }
 0xe8b   : > { %vm4493_vm10 = vcmp.lt.f32.partialorder %v9458_v60, -0.5 }
 0xe8c   : > { %v9361_v36 = vsel %vm4489_vm3, %v9352_v6, %v4453_v46 }
 0xe8d   : > { %v4560_v61 = vsel %vm1095_vm12, %v9361_v36, -inf }
 0xe8e   : > { %4561 = vmax.xlane.f32.xlu1 %v4560_v61 }
 0xe8f   : > { %6852 = vmatmul.msk.f32.gmra.mxu0 %vm794_vm0, %v4164_v11 }
 0xe97   : > { %6853 = vmatmul.msk.f32.gmra.mxu0 %vm794_vm0, %v4165_v13 }
 0xe9f   : > { %6854 = vmatmul.msk.f32.gmra.mxu0 %vm794_vm0, %v4166_v49 }
 0xea7   : > { %6855 = vmatmul.msk.f32.gmra.mxu0 %vm794_vm0, %v4167_v37 }
 0xeaf   : > { %6856 = vmatmul.msk.f32.gmra.mxu0 %vm794_vm0, %v4168_v26  ;;  %v4177_v26 = vmul.f32 %v9278_v17, %v8209_v28 }
 0xeb7   : > { %6857 = vmatmul.msk.f32.gmra.mxu0 %vm794_vm0, %v4169_v34 }
 0xebf   : > { %6858 = vmatmul.msk.f32.gmra.mxu0 %vm794_vm0, %v4170_v15 }
 0xec7   : > { %6859 = vmatmul.msk.f32.gmra.mxu0 %vm794_vm0, %v4171_v35 }
 0xecf   : > { %6860 = vmatmul.msk.f32.gmra.mxu0 %vm794_vm0, %v4172_v29 }
 0xed7   : > { %6861 = vmatmul.msk.f32.gmra.mxu0 %vm794_vm0, %v4173_v51 }
 0xed9   : > { %v4356_v23 = vpop.f32.mrf.mxu0 }
 0xeda   : > { %v4454_v20 = vmul.f32 0.35355338, %v4356_v23 }
 0xedc   : > { %v9416_v40 = vsel %vm4490_vm2, %v9409_v3, %v4454_v20 }
 0xedd   : > { %v4563_v10 = vsel %vm1095_vm12, %v9416_v40, -inf }
 0xede   : > { %4564 = vmax.xlane.f32.xlu2 %v4563_v10 }
 0xedf   : > { %6862 = vmatmul.msk.f32.gmra.mxu0 %vm794_vm0, %v4174_v5  ;;  %v4178_v5 = vmul.f32 %v9294_v19, %v8209_v28 }
 0xee1   : > { %v4550_v21 = vpop.xlane.xlu0 %4549  ;;  %v4359_v54 = vpop.f32.mrf.mxu0 }
 0xee2   : > { %v4656_v55 = vsub.f32 %v9299_v41, %v4550_v21  ;;  %v4455_v50 = vmul.f32 0.35355338, %v4359_v54 }
 0xee4   : > { %v4692_v27 = vmul.f32 1.442695, %v4656_v55  ;;  %v9431_v16 = vsel %vm4491_vm8, %v9423_v33, %v4455_v50  ;;  %v9492_v50 = vpop.f32.mrf.mxu2 }
 0xee5   : > { %v4566_v45 = vsel %vm1095_vm12, %v9431_v16, -inf }
 0xee6   : > { %7189 = vpow2.f32 %v4692_v27  ;;  %4567 = vmax.xlane.f32.xlu0 %v4566_v45 }
 0xee7   : > { %6863 = vmatmul.msk.f32.gmra.mxu0 %vm794_vm0, %v4175_v53 }
 0xee9   : > { %v4553_v47 = vpop.xlane.xlu1 %4552 }
 0xeea   : > { %v4657_v41 = vsub.f32 %v9315_v62, %v4553_v47 }
 0xeec   : > { %v9442_v22 = vpop.eup %7189  ;;  %v4694_v0 = vmul.f32 1.442695, %v4657_v41  ;;  %v4362_v57 = vpop.f32.mrf.mxu0 }
 0xeed   : > { %v4456_v7 = vmul.f32 0.35355338, %v4362_v57  ;;  %v4764_v43 = vsel %vm1095_vm12, %v9442_v22, 0.0 }
 0xeee   : > { %7191 = vpow2.f32 %v4694_v0  ;;  %4765 = vadd.xlane.f32.xlu1 %v4764_v43  ;;  %v4179_v0 = vmul.f32 %v9310_v63, %v8209_v28 }
 0xeef   : > { %6864 = vmatmul.msk.f32.gmra.mxu0 %vm794_vm0, %v4176_v18  ;;  %v9453_v62 = vsel %vm4492_vm15, %v9439_v39, %v4456_v7  ;;  %v4129_v7 = vpop.f32.mrf.mxu2 }
 0xef0   : > { %v4569_v59 = vsel %vm1095_vm12, %v9453_v62, -inf }
 0xef1   : > { %4570 = vmax.xlane.f32.xlu2 %v4569_v59  ;;  %v4556_v30 = vpop.xlane.xlu2 %4555 }
 0xef2   : > { %v4658_v46 = vsub.f32 %v9329_v1, %v4556_v30  ;;  %v4180_v30 = vmul.f32 %v9243_v32, %v8313_v24 }
 0xef4   : > { %v9461_v61 = vpop.eup %7191  ;;  %v4696_v11 = vmul.f32 1.442695, %v4658_v46  ;;  %v4365_v13 = vpop.f32.mrf.mxu0 }
 0xef5   : > { %v4457_v49 = vmul.f32 0.35355338, %v4365_v13  ;;  %v4767_v37 = vsel %vm1095_vm12, %v9461_v61, 0.0 }
 0xef6   : > { %7193 = vpow2.f32 %v4696_v11  ;;  %4768 = vadd.xlane.f32.xlu0 %v4767_v37 }
 0xef7   : > { %6865 = vmatmul.msk.f32.gmra.mxu0 %vm794_vm0, %v4177_v26  ;;  %v9472_v1 = vsel %vm4493_vm10, %v9458_v60, %v4457_v49  ;;  %v4132_v13 = vpop.f32.mrf.mxu2  ;;  %v4181_v26 = vmul.f32 %v9252_v38, %v8313_v24  ;;  %v4183_v38 = vmul.f32 %v9263_v58, %v8313_v24  ;;  %v4187_v58 = vmul.f32 %v9294_v19, %v8313_v24 }
 0xef8   : > { %v4572_v34 = vsel %vm1095_vm12, %v9472_v1, -inf }
 0xef9   : > { %v4559_v15 = vpop.xlane.xlu0 %4558  ;;  %4573 = vmax.xlane.f32.xlu1 %v4572_v34 }
 0xefa   : > { %v4659_v35 = vsub.f32 %v9345_v9, %v4559_v15 }
 0xefc   : > { %v9477_v29 = vpop.eup %7193  ;;  %v4698_v51 = vmul.f32 1.442695, %v4659_v35  ;;  %v4368_v23 = vpop.f32.mrf.mxu0  ;;  %v4182_v35 = vmul.f32 %v9258_v12, %v8313_v24  ;;  %v4186_v12 = vmul.f32 %v9278_v17, %v8313_v24 }
 0xefd   : > { %v4458_v20 = vmul.f32 0.35355338, %v4368_v23  ;;  %v4770_v10 = vsel %vm1095_vm12, %v9477_v29, 0.0 }
 0xefe   : > { %7195 = vpow2.f32 %v4698_v51  ;;  %4771 = vadd.xlane.f32.xlu2 %v4770_v10  ;;  %v4185_v10 = vmul.f32 %v9273_v31, %v8313_v24  ;;  %v4188_v31 = vmul.f32 %v9310_v63, %v8313_v24 }
 0xeff   : > { %6866 = vmatmul.msk.f32.gmra.mxu0 %vm794_vm0, %v4178_v5  ;;  %v9487_v21 = vsel %vm4485_vm4, %v9291_v52, %v4458_v20  ;;  %v4135_v15 = vpop.f32.mrf.mxu2  ;;  %v4184_v20 = vmul.f32 %v9268_v44, %v8313_v24 }
 0xf00   : > { %v4575_v9 = vsel %vm1095_vm12, %v9487_v21, -inf }
 0xf01   : > { %v4562_v54 = vpop.xlane.xlu1 %4561  ;;  %4576 = vmax.xlane.f32.xlu0 %v4575_v9 }
 0xf02   : > { %v4660_v55 = vsub.f32 %v9361_v36, %v4562_v54 }
 0xf04   : > { %v9494_v27 = vpop.eup %7195  ;;  %v4700_v45 = vmul.f32 1.442695, %v4660_v55  ;;  %v4371_v53 = vpop.f32.mrf.mxu0 }
 0xf05   : > { %v4459_v47 = vmul.f32 0.35355338, %v4371_v53  ;;  %v4773_v41 = vsel %vm1095_vm12, %v9494_v27, 0.0 }
 0xf06   : > { %7197 = vpow2.f32 %v4700_v45  ;;  %4774 = vadd.xlane.f32.xlu1 %v4773_v41 }
 0xf07   : > { %6867 = vmatmul.msk.f32.gmra.mxu0 %vm794_vm0, %v4179_v0  ;;  %v9504_v36 = vsel %vm4486_vm14, %v9306_v25, %v4459_v47  ;;  %v4138_v51 = vpop.f32.mrf.mxu2 }
 0xf08   : > { %v4578_v57 = vsel %vm1095_vm12, %v9504_v36, -inf }
 0xf09   : > { %4579 = vmax.xlane.f32.xlu2 %v4578_v57 }
 0xf0c   : > { %v9508_v43 = vpop.eup %7197  ;;  %v4374_v18 = vpop.f32.mrf.mxu0 }
 0xf0d   : > { %v4460_v59 = vmul.f32 0.35355338, %v4374_v18  ;;  %v4776_v28 = vsel %vm1095_vm12, %v9508_v43, 0.0 }
 0xf0e   : > { %4777 = vadd.xlane.f32.xlu0 %v4776_v28 }
 0xf0f   : > { %6868 = vmatmul.msk.f32.gmra.mxu0 %vm794_vm0, %v4180_v30  ;;  %v9518_v46 = vsel %vm4487_vm5, %v9322_v4, %v4460_v59  ;;  %v4141_v23 = vpop.f32.mrf.mxu2 }
 0xf10   : > { %v4581_v11 = vsel %vm1095_vm12, %v9518_v46, -inf }
 0xf11   : > { %4582 = vmax.xlane.f32.xlu1 %v4581_v11 }
 0xf14   : > { %v4377_v49 = vpop.f32.mrf.mxu0 }
 0xf15   : > { %v4461_v37 = vmul.f32 0.35355338, %v4377_v49 }
 0xf17   : > { %6869 = vmatmul.msk.f32.gmra.mxu0 %vm794_vm0, %v4181_v26  ;;  %v9528_v32 = vsel %vm4488_vm9, %v9336_v56, %v4461_v37  ;;  %v4144_v5 = vpop.f32.mrf.mxu2 }
 0xf18   : > { %v4584_v34 = vsel %vm1095_vm12, %v9528_v32, -inf }
 0xf19   : > { %4585 = vmax.xlane.f32.xlu0 %v4584_v34 }
 0xf1c   : > { %v4380_v54 = vpop.f32.mrf.mxu0 }
 0xf1d   : > { %v4462_v0 = vmul.f32 0.35355338, %v4380_v54 }
 0xf1f   : > { %6870 = vmatmul.msk.f32.gmra.mxu0 %vm794_vm0, %v4182_v35  ;;  %v4147_v9 = vpop.f32.mrf.mxu2  ;;  %v9563_v57 = vsel %vm4489_vm3, %v9352_v6, %v4462_v0 }
 0xf20   : > { %v4587_v30 = vsel %vm1095_vm12, %v9563_v57, -inf }
 0xf24   : > { %v4383_v53 = vpop.f32.mrf.mxu0 }
 0xf25   : > { %v4463_v18 = vmul.f32 0.35355338, %v4383_v53 }
 0xf27   : > { %6871 = vmatmul.msk.f32.gmra.mxu0 %vm794_vm0, %v4183_v38  ;;  %v4150_v44 = vpop.f32.mrf.mxu2  ;;  %v9575_v26 = vsel %vm4490_vm2, %v9409_v3, %v4463_v18 }
 0xf28   : > { %5527 = vmatpush.msrb.mxu2 %v4150_v44  ;;  %v4590_v35 = vsel %vm1095_vm12, %v9575_v26, -inf }
 0xf2a   : > { %5528 = vmatpush.msrb.mxu2 %v4147_v9 }
 0xf2c   : > { %5529 = vmatpush.msrb.mxu2 %v4144_v5 }
 0xf2e   : > { %5530 = vmatpush.msrb.mxu2 %v4141_v23 }
 0xf2f   : > { %6872 = vmatmul.msk.f32.gmra.mxu0 %vm794_vm0, %v4184_v20 }
 0xf30   : > { %5531 = vmatpush.msrb.mxu2 %v4138_v51 }
 0xf32   : > { %5532 = vmatpush.msrb.mxu2 %v4135_v15 }
 0xf34   : > { %5533 = vmatpush.msrb.mxu2 %v4132_v13 }
 0xf36   : > { %5534 = vmatpush.msrb.mxu2 %v4129_v7  ;;  %v4386_v7 = vpop.f32.mrf.mxu0 }
 0xf37   : > { %6873 = vmatmul.msk.f32.gmra.mxu0 %vm794_vm0, %v4185_v10 }
 0xf38   : > { %5535 = vmatpush.msrb.mxu2 %v9492_v50 }
 0xf3e   : > { %v4389_v20 = vpop.f32.mrf.mxu0 }
 0xf3f   : > { %6874 = vmatmul.msk.f32.gmra.mxu0 %vm794_vm0, %v4186_v12 }
 0xf47   : > { %6875 = vmatmul.msk.f32.gmra.mxu0 %vm794_vm0, %v4187_v58  ;;  %v4464_v58 = vmul.f32 0.35355338, %v4386_v7 }
 0xf4f   : > { %6876 = vmatmul.msk.f32.gmra.mxu0 %vm794_vm0, %v4188_v31 }
 0xf51   : > { %v4565_v17 = vpop.xlane.xlu2 %4564 }
 0xf52   : > { %v4661_v55 = vsub.f32 %v9416_v40, %v4565_v17 }
 0xf54   : > { %v4702_v45 = vmul.f32 1.442695, %v4661_v55 }
 0xf56   : > { %7199 = vpow2.f32 %v4702_v45 }
 0xf59   : > { %v4568_v19 = vpop.xlane.xlu0 %4567 }
 0xf5a   : > { %v4662_v47 = vsub.f32 %v9431_v16, %v4568_v19 }
 0xf5c   : > { %v9556_v24 = vpop.eup %7199  ;;  %v4704_v63 = vmul.f32 1.442695, %v4662_v47  ;;  %v9588_v47 = vsel %vm4491_vm8, %v9423_v33, %v4464_v58 }
 0xf5d   : > { %v4779_v41 = vsel %vm1095_vm12, %v9556_v24, 0.0 }
 0xf5e   : > { %7201 = vpow2.f32 %v4704_v63  ;;  %4780 = vadd.xlane.f32.xlu2 %v4779_v41 }
 0xf61   : > { %v4766_v40 = vpop.xlane.xlu1 %4765 }
 0xf62   : > { %7203 = vrcp.f32 %v4766_v40  ;;  %v4883_v34 = vand.u32 2147483648, %v4766_v40  ;;  %v4881_v38 = vand.u32 2147483647, %v4766_v40  ;;  %vm4877_vm7 = vweird.f32 %v4766_v40 }
 0xf64   : > { %v9565_v50 = vpop.eup %7201  ;;  %v4571_v16 = vpop.xlane.xlu2 %4570  ;;  %v4884_v44 = vor.u32 1.1754944e-38, %v4883_v34  ;;  %vm4882_vm1 = vcmp.eq.f32.partialorder %v4881_v38, 8.507059e+37 }
 0xf65   : > { %v4663_v59 = vsub.f32 %v9453_v62, %v4571_v16  ;;  %v4782_v28 = vsel %vm1095_vm12, %v9565_v50, 0.0 }
 0xf66   : > { %4783 = vadd.xlane.f32.xlu1 %v4782_v28  ;;  %4588 = vmax.xlane.f32.xlu2 %v4587_v30  ;;  %v4392_v28 = vpop.f32.mrf.mxu0 }
 0xf67   : > { %v4706_v11 = vmul.f32 1.442695, %v4663_v59  ;;  %v4465_v59 = vmul.f32 0.35355338, %v4389_v20 }
 0xf68   : > { %v7204_v13 = vpop.eup %7203 }
 0xf69   : > { %v4873_v49 = vmul.f32 %v7204_v13, %v4766_v40  ;;  %7205 = vpow2.f32 %v4706_v11  ;;  %v4769_v37 = vpop.xlane.xlu0 %4768  ;;  %vm4878_vm11 = vweird.f32 %v7204_v13  ;;  %v4593_v11 = vsel %vm1095_vm12, %v9588_v47, -inf }
 0xf6a   : > { %7207 = vrcp.f32 %v4769_v37  ;;  %vm4879_vm6 = vmor %vm4877_vm7, %vm4878_vm11  ;;  %v4898_v41 = vand.u32 2147483648, %v4769_v37  ;;  %v4896_v40 = vand.u32 2147483647, %v4769_v37  ;;  %vm4892_vm11 = vweird.f32 %v4769_v37 }
 0xf6b   : > { %v4874_v62 = vsub.f32 1.0, %v4873_v49 }
 0xf6c   : > { %v4574_v15 = vpop.xlane.xlu1 %4573 }
 0xf6d   : > { %v4875_v51 = vmul.f32 %v7204_v13, %v4874_v62  ;;  %v4664_v23 = vsub.f32 %v9472_v1, %v4574_v15 }
 0xf6e   : > { %4591 = vmax.xlane.f32.xlu1 %v4590_v35 }
 0xf6f   : > { %v9580_v10 = vpop.eup %7205  ;;  %v4876_v5 = vadd.f32 %v7204_v13, %v4875_v51  ;;  %v4708_v12 = vmul.f32 1.442695, %v4664_v23  ;;  %v9602_v51 = vsel %vm4492_vm15, %v9439_v39, %v4465_v59 }
 0xf70   : > { %v7208_v9 = vpop.eup %7207  ;;  %v4785_v31 = vsel %vm1095_vm12, %v9580_v10, 0.0 }
 0xf71   : > { %v4880_v54 = vsel %vm4879_vm6, %v7204_v13, %v4876_v5  ;;  %v4888_v17 = vmul.f32 %v7208_v9, %v4769_v37  ;;  %7209 = vpow2.f32 %v4708_v12  ;;  %4786 = vadd.xlane.f32.xlu0 %v4785_v31  ;;  %v4772_v1 = vpop.xlane.xlu2 %4771  ;;  %vm4893_vm13 = vweird.f32 %v7208_v9 }
 0xf72   : > { %v4885_v55 = vsel %vm4882_vm1, %v4884_v44, %v4880_v54  ;;  %7211 = vrcp.f32 %v4772_v1  ;;  %vm4894_vm7 = vmor %vm4892_vm11, %vm4893_vm13  ;;  %v4899_v13 = vor.u32 1.1754944e-38, %v4898_v41  ;;  %vm4897_vm6 = vcmp.eq.f32.partialorder %v4896_v40, 8.507059e+37 }
 0xf73   : > { %v4886_v45 = vmul.f32 %v9442_v22, %v4885_v55  ;;  %v4889_v19 = vsub.f32 1.0, %v4888_v17  ;;  %v4913_v23 = vand.u32 2147483648, %v4772_v1  ;;  %v4911_v5 = vand.u32 2147483647, %v4772_v1 }
 0xf74   : > { %v4577_v53 = vpop.xlane.xlu0 %4576  ;;  %vm4907_vm13 = vweird.f32 %v4772_v1  ;;  %v4596_v54 = vsel %vm1095_vm12, %v9602_v51, -inf }
 0xf75   : > { %v4890_v63 = vmul.f32 %v7208_v9, %v4889_v19  ;;  %v4665_v0 = vsub.f32 %v9487_v21, %v4577_v53  ;;  %6877 = vmatmul.msk.f32.vlgmr.msrb.gmra.mxu2 %vm1095_vm12, %v4886_v45  ;;  %v4914_v17 = vor.u32 1.1754944e-38, %v4913_v23  ;;  %v4395_v19 = vpop.f32.mrf.mxu0 }
 0xf77   : > { %v9592_v7 = vpop.eup %7209  ;;  %v4891_v16 = vadd.f32 %v7208_v9, %v4890_v63  ;;  %v4710_v22 = vmul.f32 1.442695, %v4665_v0 }
 0xf78   : > { %v7212_v18 = vpop.eup %7211  ;;  %v4788_v30 = vsel %vm1095_vm12, %v9592_v7, 0.0 }
 0xf79   : > { %v4903_v21 = vmul.f32 %v7212_v18, %v4772_v1  ;;  %7213 = vpow2.f32 %v4710_v22  ;;  %v4775_v49 = vpop.xlane.xlu1 %4774  ;;  %4789 = vadd.xlane.f32.xlu2 %v4788_v30  ;;  %4594 = vmax.xlane.f32.xlu0 %v4593_v11  ;;  %v4895_v62 = vsel %vm4894_vm7, %v7208_v9, %v4891_v16  ;;  %vm4908_vm1 = vweird.f32 %v7212_v18 }
 0xf7a   : > { %7215 = vrcp.f32 %v4775_v49  ;;  %v4900_v34 = vsel %vm4897_vm6, %v4899_v13, %v4895_v62  ;;  %vm4909_vm11 = vmor %vm4907_vm13, %vm4908_vm1  ;;  %vm4912_vm7 = vcmp.eq.f32.partialorder %v4911_v5, 8.507059e+37  ;;  %v4928_v63 = vand.u32 2147483648, %v4775_v49 }
 0xf7b   : > { %v4904_v37 = vsub.f32 1.0, %v4903_v21  ;;  %v4901_v35 = vmul.f32 %v9461_v61, %v4900_v34  ;;  %v4466_v61 = vmul.f32 0.35355338, %v4392_v28  ;;  %v4926_v22 = vand.u32 2147483647, %v4775_v49 }
 0xf7c   : > { %v4580_v15 = vpop.xlane.xlu2 %4579  ;;  %vm4922_vm1 = vweird.f32 %v4775_v49  ;;  %v4467_v13 = vmul.f32 0.35355338, %v4395_v19 }
 0xf7d   : > { %v4905_v38 = vmul.f32 %v7212_v18, %v4904_v37  ;;  %v4666_v20 = vsub.f32 %v9504_v36, %v4580_v15  ;;  %6878 = vmatmul.msk.f32.gmra.mxu2 %vm1095_vm12, %v4901_v35  ;;  %v9616_v40 = vsel %vm4493_vm10, %v9458_v60, %v4466_v61  ;;  %v4398_v35 = vpop.f32.mrf.mxu0 }
 0xf7e   : > { %v4599_v21 = vsel %vm1095_vm12, %v9616_v40, -inf }
 0xf7f   : > { %v9606_v12 = vpop.eup %7213  ;;  %v4906_v9 = vadd.f32 %v7212_v18, %v4905_v38  ;;  %v4712_v58 = vmul.f32 1.442695, %v4666_v20  ;;  %v9630_v20 = vsel %vm4485_vm4, %v9291_v52, %v4467_v13 }
 0xf80   : > { %v7216_v44 = vpop.eup %7215  ;;  %v4791_v31 = vsel %vm1095_vm12, %v9606_v12, 0.0 }
 0xf81   : > { %v4918_v55 = vmul.f32 %v7216_v44, %v4775_v49  ;;  %7217 = vpow2.f32 %v4712_v58  ;;  %v4778_v36 = vpop.xlane.xlu0 %4777  ;;  %4792 = vadd.xlane.f32.xlu1 %v4791_v31  ;;  %4597 = vmax.xlane.f32.xlu2 %v4596_v54  ;;  %v4910_v45 = vsel %vm4909_vm11, %v7212_v18, %v4906_v9  ;;  %vm4923_vm6 = vweird.f32 %v7216_v44 }
 0xf82   : > { %7219 = vrcp.f32 %v4778_v36  ;;  %v4915_v53 = vsel %vm4912_vm7, %v4914_v17, %v4910_v45  ;;  %vm4924_vm13 = vmor %vm4922_vm1, %vm4923_vm6  ;;  %vm4927_vm11 = vcmp.eq.f32.partialorder %v4926_v22, 8.507059e+37  ;;  %v4943_v38 = vand.u32 2147483648, %v4778_v36 }
 0xf83   : > { %v4919_v1 = vsub.f32 1.0, %v4918_v55  ;;  %v4916_v0 = vmul.f32 %v9477_v29, %v4915_v53  ;;  %v4929_v29 = vor.u32 1.1754944e-38, %v4928_v63  ;;  %v4941_v9 = vand.u32 2147483647, %v4778_v36 }
 0xf84   : > { %v4583_v41 = vpop.xlane.xlu1 %4582  ;;  %vm4937_vm6 = vweird.f32 %v4778_v36  ;;  %v4944_v31 = vor.u32 1.1754944e-38, %v4943_v38  ;;  %v4602_v17 = vsel %vm1095_vm12, %v9630_v20, -inf  ;;  %v4468_v55 = vmul.f32 0.35355338, %v4398_v35 }
 0xf85   : > { %v4920_v16 = vmul.f32 %v7216_v44, %v4919_v1  ;;  %v4667_v59 = vsub.f32 %v9518_v46, %v4583_v41  ;;  %6879 = vmatmul.msk.f32.gmra.mxu2 %vm1095_vm12, %v4916_v0  ;;  %v4401_v1 = vpop.f32.mrf.mxu0 }
 0xf86   : > { %v4469_v0 = vmul.f32 0.35355338, %v4401_v1 }
 0xf87   : > { %v9620_v18 = vpop.eup %7217  ;;  %v4921_v28 = vadd.f32 %v7216_v44, %v4920_v16  ;;  %v4714_v30 = vmul.f32 1.442695, %v4667_v59 }
 0xf88   : > { %v7220_v11 = vpop.eup %7219  ;;  %v4794_v62 = vsel %vm1095_vm12, %v9620_v18, 0.0 }
 0xf89   : > { %v4933_v37 = vmul.f32 %v7220_v11, %v4778_v36  ;;  %7221 = vpow2.f32 %v4714_v30  ;;  %4600 = vmax.xlane.f32.xlu1 %v4599_v21  ;;  %4795 = vadd.xlane.f32.xlu0 %v4794_v62  ;;  %v4925_v46 = vsel %vm4924_vm13, %v7216_v44, %v4921_v28  ;;  %vm4938_vm7 = vweird.f32 %v7220_v11 }
 0xf8a   : > { %v4930_v34 = vsel %vm4927_vm11, %v4929_v29, %v4925_v46  ;;  %vm4939_vm1 = vmor %vm4937_vm6, %vm4938_vm7  ;;  %vm4942_vm13 = vcmp.eq.f32.partialorder %v4941_v9, 8.507059e+37  ;;  %v9644_v36 = vsel %vm4486_vm14, %v9306_v25, %v4468_v55 }
 0xf8b   : > { %v4934_v15 = vsub.f32 1.0, %v4933_v37  ;;  %v4931_v49 = vmul.f32 %v9494_v27, %v4930_v34  ;;  %v4605_v41 = vsel %vm1095_vm12, %v9644_v36, -inf }
 0xf8c   : > { %v4586_v23 = vpop.xlane.xlu0 %4585 }
 0xf8d   : > { %v4935_v5 = vmul.f32 %v7220_v11, %v4934_v15  ;;  %v4668_v58 = vsub.f32 %v9528_v32, %v4586_v23  ;;  %6880 = vmatmul.msk.f32.gmra.mxu2 %vm1095_vm12, %v4931_v49  ;;  %v4404_v59 = vpop.f32.mrf.mxu0 }
 0xf8f   : > { %v9634_v44 = vpop.eup %7221  ;;  %v4936_v61 = vadd.f32 %v7220_v11, %v4935_v5  ;;  %v4716_v27 = vmul.f32 1.442695, %v4668_v58 }
 0xf90   : > { %v4797_v54 = vsel %vm1095_vm12, %v9634_v44, 0.0 }
 0xf91   : > { %7223 = vpow2.f32 %v4716_v27  ;;  %4798 = vadd.xlane.f32.xlu2 %v4797_v54  ;;  %4603 = vmax.xlane.f32.xlu0 %v4602_v17  ;;  %v4940_v32 = vsel %vm4939_vm1, %v7220_v11, %v4936_v61 }
 0xf92   : > { %v4945_v45 = vsel %vm4942_vm13, %v4944_v31, %v4940_v32 }
 0xf93   : > { %v4946_v19 = vmul.f32 %v9508_v43, %v4945_v45  ;;  %v9656_v43 = vsel %vm4487_vm5, %v9322_v4, %v4469_v0 }
 0xf94   : > { %v4608_v16 = vsel %vm1095_vm12, %v9656_v43, -inf }
 0xf95   : > { %6881 = vmatmul.msk.f32.gmra.mxu2 %vm1095_vm12, %v4946_v19  ;;  %v4407_v38 = vpop.f32.mrf.mxu0 }
 0xf97   : > { %v9647_v53 = vpop.eup %7223 }
 0xf98   : > { %v4800_v63 = vsel %vm1095_vm12, %v9647_v53, 0.0 }
 0xf99   : > { %4801 = vadd.xlane.f32.xlu1 %v4800_v63  ;;  %4606 = vmax.xlane.f32.xlu2 %v4605_v41 }
 0xfa1   : > { %4609 = vmax.xlane.f32.xlu1 %v4608_v16  ;;  %v4410_v16 = vpop.f32.mrf.mxu0 }
 0xfd1   : > { %v4781_v22 = vpop.xlane.xlu2 %4780 }
 0xfd2   : > { %7225 = vrcp.f32 %v4781_v22  ;;  %v4958_v62 = vand.u32 2147483648, %v4781_v22  ;;  %v4956_v46 = vand.u32 2147483647, %v4781_v22  ;;  %vm4952_vm7 = vweird.f32 %v4781_v22 }
 0xfd4   : > { %v4959_v35 = vor.u32 1.1754944e-38, %v4958_v62  ;;  %vm4957_vm1 = vcmp.eq.f32.partialorder %v4956_v46, 8.507059e+37 }
 0xfd8   : > { %v7226_v28 = vpop.eup %7225 }
 0xfd9   : > { %v4948_v30 = vmul.f32 %v7226_v28, %v4781_v22  ;;  %v4784_v11 = vpop.xlane.xlu1 %4783  ;;  %v4589_v13 = vpop.xlane.xlu2 %4588  ;;  %vm4953_vm11 = vweird.f32 %v7226_v28 }
 0xfda   : > { %7227 = vrcp.f32 %v4784_v11  ;;  %v4669_v21 = vsub.f32 %v9563_v57, %v4589_v13  ;;  %vm4954_vm6 = vmor %vm4952_vm7, %vm4953_vm11  ;;  %v4973_v31 = vand.u32 2147483648, %v4784_v11  ;;  %v4971_v45 = vand.u32 2147483647, %v4784_v11 }
 0xfdb   : > { %v4949_v29 = vsub.f32 1.0, %v4948_v30  ;;  %vm4967_vm11 = vweird.f32 %v4784_v11 }
 0xfdc   : > { %v4718_v34 = vmul.f32 1.442695, %v4669_v21 }
 0xfdd   : > { %v4950_v37 = vmul.f32 %v7226_v28, %v4949_v29 }
 0xfde   : > { %7229 = vpow2.f32 %v4718_v34 }
 0xfdf   : > { %v4951_v15 = vadd.f32 %v7226_v28, %v4950_v37  ;;  %v4471_v37 = vmul.f32 0.35355338, %v4407_v38 }
 0xfe0   : > { %v7228_v49 = vpop.eup %7227 }
 0xfe1   : > { %v4963_v23 = vmul.f32 %v7228_v49, %v4784_v11  ;;  %v4592_v5 = vpop.xlane.xlu1 %4591  ;;  %v4955_v9 = vsel %vm4954_vm6, %v7226_v28, %v4951_v15  ;;  %vm4968_vm13 = vweird.f32 %v7228_v49  ;;  %vm4972_vm6 = vcmp.eq.f32.partialorder %v4971_v45, 8.507059e+37 }
 0xfe2   : > { %v4670_v58 = vsub.f32 %v9575_v26, %v4592_v5  ;;  %v4960_v61 = vsel %vm4957_vm1, %v4959_v35, %v4955_v9  ;;  %v4470_v26 = vmul.f32 0.35355338, %v4404_v59  ;;  %vm4969_vm7 = vmor %vm4967_vm11, %vm4968_vm13 }
 0xfe3   : > { %v4964_v57 = vsub.f32 1.0, %v4963_v23  ;;  %v4961_v27 = vmul.f32 %v9556_v24, %v4960_v61  ;;  %v4974_v24 = vor.u32 1.1754944e-38, %v4973_v31  ;;  %v9685_v23 = vsel %vm4489_vm3, %v9352_v6, %v4471_v37 }
 0xfe4   : > { %v4720_v54 = vmul.f32 1.442695, %v4670_v58  ;;  %v4787_v17 = vpop.xlane.xlu0 %4786  ;;  %v9663_v55 = vpop.eup %7229  ;;  %v9672_v28 = vsel %vm4488_vm9, %v9336_v56, %v4470_v26 }
 0xfe5   : > { %v4965_v32 = vmul.f32 %v7228_v49, %v4964_v57  ;;  %7231 = vrcp.f32 %v4787_v17  ;;  %6882 = vmatmul.msk.f32.gmra.mxu2 %vm1095_vm12, %v4961_v27  ;;  %v4803_v19 = vsel %vm1095_vm12, %v9663_v55, 0.0  ;;  %v4988_v15 = vand.u32 2147483648, %v4787_v17  ;;  %v4413_v57 = vpop.f32.mrf.mxu0 }
 0xfe6   : > { %7233 = vpow2.f32 %v4720_v54  ;;  %4804 = vadd.xlane.f32.xlu0 %v4803_v19  ;;  %vm4982_vm13 = vweird.f32 %v4787_v17  ;;  %v4614_v54 = vsel %vm1095_vm12, %v9685_v23, -inf }
 0xfe7   : > { %v4966_v1 = vadd.f32 %v7228_v49, %v4965_v32  ;;  %v4989_v5 = vor.u32 1.1754944e-38, %v4988_v15 }
 0xfe9   : > { %v4970_v63 = vsel %vm4969_vm7, %v7228_v49, %v4966_v1  ;;  %v4986_v49 = vand.u32 2147483647, %v4787_v17 }
 0xfea   : > { %v4975_v41 = vsel %vm4972_vm6, %v4974_v24, %v4970_v63  ;;  %v4472_v63 = vmul.f32 0.35355338, %v4410_v16 }
 0xfeb   : > { %v7232_v0 = vpop.eup %7231  ;;  %v4976_v22 = vmul.f32 %v9565_v50, %v4975_v41  ;;  %v4611_v50 = vsel %vm1095_vm12, %v9672_v28, -inf  ;;  %vm4987_vm7 = vcmp.eq.f32.partialorder %v4986_v49, 8.507059e+37 }
 0xfec   : > { %v9674_v30 = vpop.eup %7233  ;;  %v4978_v59 = vmul.f32 %v7232_v0, %v4787_v17  ;;  %v4595_v13 = vpop.xlane.xlu0 %4594  ;;  %vm4983_vm1 = vweird.f32 %v7232_v0  ;;  %v9707_v16 = vsel %vm4490_vm2, %v9409_v3, %v4472_v63 }
 0xfed   : > { %v4790_v11 = vpop.xlane.xlu2 %4789  ;;  %v4671_v29 = vsub.f32 %v9588_v47, %v4595_v13  ;;  %6883 = vmatmul.msk.f32.gmra.mxu2 %vm1095_vm12, %v4976_v22  ;;  %v4806_v62 = vsel %vm1095_vm12, %v9674_v30, 0.0  ;;  %vm4984_vm11 = vmor %vm4982_vm13, %vm4983_vm1 }
 0xfee   : > { %7235 = vrcp.f32 %v4790_v11  ;;  %v4979_v21 = vsub.f32 1.0, %v4978_v59  ;;  %4807 = vadd.xlane.f32.xlu2 %v4806_v62  ;;  %4612 = vmax.xlane.f32.xlu0 %v4611_v50  ;;  %v5003_v45 = vand.u32 2147483648, %v4790_v11  ;;  %v5001_v41 = vand.u32 2147483647, %v4790_v11 }
 0xfef   : > { %v4722_v46 = vmul.f32 1.442695, %v4671_v29  ;;  %vm4997_vm1 = vweird.f32 %v4790_v11 }
 0xff0   : > { %v4980_v34 = vmul.f32 %v7232_v0, %v4979_v21  ;;  %v5004_v22 = vor.u32 1.1754944e-38, %v5003_v45 }
 0xff1   : > { %7237 = vpow2.f32 %v4722_v46 }
 0xff2   : > { %v4981_v47 = vadd.f32 %v7232_v0, %v4980_v34  ;;  %v4416_v34 = vpop.f32.mrf.mxu0 }
 0xff4   : > { %v7236_v35 = vpop.eup %7235  ;;  %v9687_v38 = vpop.xlane.xlu1 %4792  ;;  %v4985_v61 = vsel %vm4984_vm11, %v7232_v0, %v4981_v47  ;;  %vm5002_vm11 = vcmp.eq.f32.partialorder %v5001_v41, 8.507059e+37 }
 0xff5   : > { %v4993_v9 = vmul.f32 %v7236_v35, %v4790_v11  ;;  %v4598_v58 = vpop.xlane.xlu2 %4597  ;;  %7239 = vrcp.f32 %v9687_v38  ;;  %v4990_v17 = vsel %vm4987_vm7, %v4989_v5, %v4985_v61  ;;  %vm4998_vm6 = vweird.f32 %v7236_v35 }
 0xff6   : > { %v4672_v31 = vsub.f32 %v9602_v51, %v4598_v58  ;;  %4615 = vmax.xlane.f32.xlu2 %v4614_v54  ;;  %v4991_v19 = vmul.f32 %v9580_v10, %v4990_v17  ;;  %vm4999_vm13 = vmor %vm4997_vm1, %vm4998_vm6  ;;  %v5018_v49 = vand.u32 2147483648, %v9687_v38  ;;  %v5016_v47 = vand.u32 2147483647, %v9687_v38 }
 0xff7   : > { %v4994_v27 = vsub.f32 1.0, %v4993_v9  ;;  %v9693_v32 = vpop.eup %7237  ;;  %vm5012_vm6 = vweird.f32 %v9687_v38 }
 0xff8   : > { %v4724_v1 = vmul.f32 1.442695, %v4672_v31  ;;  %v4809_v24 = vsel %vm1095_vm12, %v9693_v32, 0.0  ;;  %6884 = vmatmul.msk.f32.gmra.mxu2 %vm1095_vm12, %v4991_v19  ;;  %v5019_v58 = vor.u32 1.1754944e-38, %v5018_v49 }
 0xff9   : > { %v4995_v26 = vmul.f32 %v7236_v35, %v4994_v27  ;;  %4810 = vadd.xlane.f32.xlu1 %v4809_v24 }
 0xffa   : > { %7241 = vpow2.f32 %v4724_v1 }
 0xffb   : > { %v4996_v51 = vadd.f32 %v7236_v35, %v4995_v26  ;;  %v7240_v0 = vpop.eup %7239  ;;  %v4474_v26 = vmul.f32 0.35355338, %v4416_v34 }
 0xffc   : > { %v5008_v59 = vmul.f32 %v7240_v0, %v9687_v38  ;;  %v4601_v10 = vpop.xlane.xlu1 %4600  ;;  %v9700_v13 = vpop.xlane.xlu0 %4795  ;;  %vm5013_vm7 = vweird.f32 %v7240_v0 }
 0xffd   : > { %v5000_v29 = vsel %vm4999_vm13, %v7236_v35, %v4996_v51  ;;  %v4673_v21 = vsub.f32 %v9616_v40, %v4601_v10  ;;  %7243 = vrcp.f32 %v9700_v13  ;;  %v4617_v40 = vsel %vm1095_vm12, %v9707_v16, -inf  ;;  %vm5014_vm1 = vmor %vm5012_vm6, %vm5013_vm7 }
 0xffe   : > { %v5009_v11 = vsub.f32 1.0, %v5008_v59  ;;  %v5005_v62 = vsel %vm5002_vm11, %v5004_v22, %v5000_v29  ;;  %vm5017_vm13 = vcmp.eq.f32.partialorder %v5016_v47, 8.507059e+37  ;;  %v5033_v41 = vand.u32 2147483648, %v9700_v13  ;;  %v4419_v22 = vpop.f32.mrf.mxu0 }
 0xfff   : > { %v4726_v50 = vmul.f32 1.442695, %v4673_v21  ;;  %v5006_v37 = vmul.f32 %v9592_v7, %v5005_v62  ;;  %v4473_v7 = vmul.f32 0.35355338, %v4413_v57  ;;  %v5031_v51 = vand.u32 2147483647, %v9700_v13 }
0x1000   : > { %v9710_v46 = vpop.eup %7241  ;;  %v5010_v15 = vmul.f32 %v7240_v0, %v5009_v11  ;;  %vm5027_vm7 = vweird.f32 %v9700_v13  ;;  %v5034_v10 = vor.u32 1.1754944e-38, %v5033_v41 }
0x1001   : > { %7245 = vpow2.f32 %v4726_v50  ;;  %6885 = vmatmul.msk.f32.gmra.mxu2 %vm1095_vm12, %v5006_v37  ;;  %4618 = vmax.xlane.f32.xlu1 %v4617_v40  ;;  %v4812_v35 = vsel %vm1095_vm12, %v9710_v46, 0.0  ;;  %v9725_v57 = vsel %vm4491_vm8, %v9423_v33, %v4473_v7  ;;  %v9741_v50 = vsel %vm4492_vm15, %v9439_v39, %v4474_v26 }
0x1002   : > { %v5011_v5 = vadd.f32 %v7240_v0, %v5010_v15  ;;  %4813 = vadd.xlane.f32.xlu0 %v4812_v35  ;;  %v4623_v35 = vsel %vm1095_vm12, %v9741_v50, -inf }
0x1003   : > { %v7244_v9 = vpop.eup %7243 }
0x1004   : > { %v5023_v61 = vmul.f32 %v7244_v9, %v9700_v13  ;;  %v4604_v27 = vpop.xlane.xlu0 %4603  ;;  %v4799_v31 = vpop.xlane.xlu2 %4798  ;;  %v5015_v54 = vsel %vm5014_vm1, %v7240_v0, %v5011_v5  ;;  %vm5028_vm11 = vweird.f32 %v7244_v9  ;;  %v4620_v0 = vsel %vm1095_vm12, %v9725_v57, -inf }
0x1005   : > { %v4674_v17 = vsub.f32 %v9630_v20, %v4604_v27  ;;  %7247 = vrcp.f32 %v4799_v31  ;;  %v5020_v19 = vsel %vm5017_vm13, %v5019_v58, %v5015_v54  ;;  %vm5029_vm6 = vmor %vm5027_vm7, %vm5028_vm11  ;;  %vm5032_vm1 = vcmp.eq.f32.partialorder %v5031_v51, 8.507059e+37 }
0x1006   : > { %v5024_v45 = vsub.f32 1.0, %v5023_v61  ;;  %v5021_v24 = vmul.f32 %v9606_v12, %v5020_v19  ;;  %v5046_v49 = vand.u32 2147483647, %v4799_v31  ;;  %v5048_v40 = vand.u32 2147483648, %v4799_v31  ;;  %v4422_v27 = vpop.f32.mrf.mxu0 }
0x1007   : > { %v9727_v38 = vpop.eup %7245  ;;  %v4728_v1 = vmul.f32 1.442695, %v4674_v17  ;;  %vm5042_vm11 = vweird.f32 %v4799_v31 }
0x1008   : > { %v5025_v63 = vmul.f32 %v7244_v9, %v5024_v45  ;;  %v4815_v20 = vsel %vm1095_vm12, %v9727_v38, 0.0 }
0x1009   : > { %7249 = vpow2.f32 %v4728_v1  ;;  %6886 = vmatmul.msk.f32.gmra.mxu2 %vm1095_vm12, %v5021_v24  ;;  %4816 = vadd.xlane.f32.xlu2 %v4815_v20 }
0x100a   : > { %v5026_v59 = vadd.f32 %v7244_v9, %v5025_v63  ;;  %4621 = vmax.xlane.f32.xlu0 %v4620_v0 }
0x100b   : > { %v7248_v12 = vpop.eup %7247 }
0x100c   : > { %v5038_v29 = vmul.f32 %v7248_v12, %v4799_v31  ;;  %v4802_v21 = vpop.xlane.xlu1 %4801  ;;  %v4607_v11 = vpop.xlane.xlu2 %4606  ;;  %v5030_v62 = vsel %vm5029_vm6, %v7244_v9, %v5026_v59  ;;  %vm5043_vm13 = vweird.f32 %v7248_v12  ;;  %vm5047_vm6 = vcmp.eq.f32.partialorder %v5046_v49, 8.507059e+37 }
0x100d   : > { %7251 = vrcp.f32 %v4802_v21  ;;  %v4675_v34 = vsub.f32 %v9644_v36, %v4607_v11  ;;  %v5035_v15 = vsel %vm5032_vm1, %v5034_v10, %v5030_v62  ;;  %v4475_v36 = vmul.f32 0.35355338, %v4419_v22  ;;  %vm5044_vm7 = vmor %vm5042_vm11, %vm5043_vm13 }
0x100e   : > { %v5039_v37 = vsub.f32 1.0, %v5038_v29  ;;  %v5036_v47 = vmul.f32 %v9620_v18, %v5035_v15  ;;  %v5049_v18 = vor.u32 1.1754944e-38, %v5048_v40  ;;  %v5063_v63 = vand.u32 2147483648, %v4802_v21  ;;  %v4425_v11 = vpop.f32.mrf.mxu0 }
0x100f   : > { %v9744_v13 = vpop.eup %7249  ;;  %v4730_v5 = vmul.f32 1.442695, %v4675_v34  ;;  %v9757_v31 = vsel %vm4493_vm10, %v9458_v60, %v4475_v36  ;;  %v5061_v0 = vand.u32 2147483647, %v4802_v21  ;;  %v4476_v22 = vmul.f32 0.35355338, %v4422_v27 }
0x1010   : > { %v5040_v7 = vmul.f32 %v7248_v12, %v5039_v37  ;;  %v4818_v9 = vsel %vm1095_vm12, %v9744_v13, 0.0  ;;  %vm5057_vm13 = vweird.f32 %v4802_v21  ;;  %v7380_v37 = vld [vmem:[%s9287_s28] sm:$0xff]  ;;  %v4477_v49 = vmul.f32 0.35355338, %v4425_v11 }
0x1011   : > { %6887 = vmatmul.msk.f32.gmra.mxu2 %vm1095_vm12, %v5036_v47  ;;  %4624 = vmax.xlane.f32.xlu2 %v4623_v35  ;;  %7253 = vpow2.f32 %v4730_v5  ;;  %v9770_v34 = vsel %vm4485_vm4, %v7380_v37, %v4476_v22  ;;  %v7381_v47 = vld [vmem:[%s9287_s28 + $0x8] sm:$0xff] }
0x1012   : > { %v5041_v58 = vadd.f32 %v7248_v12, %v5040_v7  ;;  %4819 = vadd.xlane.f32.xlu1 %v4818_v9  ;;  %v4629_v40 = vsel %vm1095_vm12, %v9770_v34, -inf }
0x1013   : > { %v7252_v61 = vpop.eup %7251 }
0x1014   : > { %v5053_v54 = vmul.f32 %v7252_v61, %v4802_v21  ;;  %v4610_v17 = vpop.xlane.xlu1 %4609  ;;  %v5045_v45 = vsel %vm5044_vm7, %v7248_v12, %v5041_v58  ;;  %vm5058_vm1 = vweird.f32 %v7252_v61  ;;  %v5064_v12 = vor.u32 1.1754944e-38, %v5063_v63 }
0x1015   : > { %v4676_v19 = vsub.f32 %v9656_v43, %v4610_v17  ;;  %v5050_v26 = vsel %vm5047_vm6, %v5049_v18, %v5045_v45  ;;  %v4626_v43 = vsel %vm1095_vm12, %v9757_v31, -inf  ;;  %vm5059_vm11 = vmor %vm5057_vm13, %vm5058_vm1  ;;  %vm5062_vm7 = vcmp.eq.f32.partialorder %v5061_v0, 8.507059e+37 }
0x1016   : > { %v5054_v1 = vsub.f32 1.0, %v5053_v54  ;;  %v5051_v24 = vmul.f32 %v9634_v44, %v5050_v26  ;;  %v4428_v58 = vpop.f32.mrf.mxu0 }
0x1017   : > { %v4732_v41 = vmul.f32 1.442695, %v4676_v19  ;;  %v9759_v20 = vpop.eup %7253  ;;  %v4478_v11 = vmul.f32 0.35355338, %v4428_v58 }
0x1018   : > { %v5055_v51 = vmul.f32 %v7252_v61, %v5054_v1  ;;  %v4821_v44 = vsel %vm1095_vm12, %v9759_v20, 0.0 }
0x1019   : > { %7255 = vpow2.f32 %v4732_v41  ;;  %6888 = vmatmul.msk.f32.gmra.mxu2 %vm1095_vm12, %v5051_v24  ;;  %4822 = vadd.xlane.f32.xlu0 %v4821_v44 }
0x101a   : > { %v5056_v59 = vadd.f32 %v7252_v61, %v5055_v51  ;;  %4627 = vmax.xlane.f32.xlu1 %v4626_v43 }
0x101c   : > { %v5060_v10 = vsel %vm5059_vm11, %v7252_v61, %v5056_v59 }
0x101d   : > { %v5065_v29 = vsel %vm5062_vm7, %v5064_v12, %v5060_v10 }
0x101e   : > { %v5066_v62 = vmul.f32 %v9647_v53, %v5065_v29  ;;  %v9782_v53 = vsel %vm4486_vm14, %v7381_v47, %v4477_v49  ;;  %v4431_v22 = vpop.f32.mrf.mxu0 }
0x101f   : > { %v9772_v15 = vpop.eup %7255  ;;  %v4632_v52 = vsel %vm1095_vm12, %v9782_v53, -inf }
0x1020   : > { %v4824_v21 = vsel %vm1095_vm12, %v9772_v15, 0.0 }
0x1021   : > { %6889 = vmatmul.msk.f32.gmra.mxu2 %vm1095_vm12, %v5066_v62  ;;  %4825 = vadd.xlane.f32.xlu2 %v4824_v21 }
0x1022   : > { %4630 = vmax.xlane.f32.xlu0 %v4629_v40  ;;  %v7382_v40 = vld [vmem:[%s9287_s28 + $0x10] sm:$0xff] }
0x1023   : > { %v9797_v47 = vsel %vm4487_vm5, %v7382_v40, %v4478_v11 }
0x1029   : > { %4633 = vmax.xlane.f32.xlu2 %v4632_v52 }
0x1059   : > { %v4805_v35 = vpop.xlane.xlu0 %4804 }
0x105a   : > { %7257 = vrcp.f32 %v4805_v35  ;;  %v5078_v27 = vand.u32 2147483648, %v4805_v35  ;;  %v5076_v17 = vand.u32 2147483647, %v4805_v35  ;;  %vm5072_vm14 = vweird.f32 %v4805_v35 }
0x105c   : > { %v5079_v26 = vor.u32 1.1754944e-38, %v5078_v27  ;;  %vm5077_vm1 = vcmp.eq.f32.partialorder %v5076_v17, 8.507059e+37 }
0x1060   : > { %v7258_v7 = vpop.eup %7257 }
0x1061   : > { %v5068_v5 = vmul.f32 %v7258_v7, %v4805_v35  ;;  %v4613_v9 = vpop.xlane.xlu0 %4612  ;;  %v4808_v36 = vpop.xlane.xlu2 %4807  ;;  %vm5073_vm4 = vweird.f32 %v7258_v7 }
0x1062   : > { %v4677_v61 = vsub.f32 %v9672_v28, %v4613_v9  ;;  %7259 = vrcp.f32 %v4808_v36  ;;  %vm5074_vm6 = vmor %vm5072_vm14, %vm5073_vm4  ;;  %v5093_v59 = vand.u32 2147483648, %v4808_v36  ;;  %v5091_v29 = vand.u32 2147483647, %v4808_v36 }
0x1063   : > { %v5069_v18 = vsub.f32 1.0, %v5068_v5  ;;  %vm5087_vm11 = vweird.f32 %v4808_v36 }
0x1064   : > { %v4734_v54 = vmul.f32 1.442695, %v4677_v61  ;;  %vm5092_vm4 = vcmp.eq.f32.partialorder %v5091_v29, 8.507059e+37  ;;  %v4635_v61 = vsel %vm1095_vm12, %v9797_v47, -inf }
0x1065   : > { %v5070_v25 = vmul.f32 %v7258_v7, %v5069_v18  ;;  %v4434_v18 = vpop.f32.mrf.mxu0 }
0x1066   : > { %7261 = vpow2.f32 %v4734_v54 }
0x1067   : > { %v5071_v45 = vadd.f32 %v7258_v7, %v5070_v25 }
0x1068   : > { %v7260_v19 = vpop.eup %7259 }
0x1069   : > { %v5083_v1 = vmul.f32 %v7260_v19, %v4808_v36  ;;  %v4616_v24 = vpop.xlane.xlu2 %4615  ;;  %v5075_v63 = vsel %vm5074_vm6, %v7258_v7, %v5071_v45  ;;  %vm5088_vm13 = vweird.f32 %v7260_v19 }
0x106a   : > { %v4678_v41 = vsub.f32 %v9685_v23, %v4616_v24  ;;  %v5080_v28 = vsel %vm5077_vm1, %v5079_v26, %v5075_v63  ;;  %vm5089_vm7 = vmor %vm5087_vm11, %vm5088_vm13 }
0x106b   : > { %v5084_v51 = vsub.f32 1.0, %v5083_v1  ;;  %v5081_v43 = vmul.f32 %v9663_v55, %v5080_v28  ;;  %v5094_v55 = vor.u32 1.1754944e-38, %v5093_v59  ;;  %v7383_v1 = vld [vmem:[%s9287_s28 + $0x18] sm:$0xff] }
0x106c   : > { %v4811_v0 = vpop.xlane.xlu1 %4810  ;;  %v9789_v44 = vpop.eup %7261  ;;  %v4736_v12 = vmul.f32 1.442695, %v4678_v41 }
0x106d   : > { %7263 = vrcp.f32 %v4811_v0  ;;  %v5085_v10 = vmul.f32 %v7260_v19, %v5084_v51  ;;  %6890 = vmatmul.msk.f32.gmra.mxu2 %vm1095_vm12, %v5081_v43  ;;  %v4827_v23 = vsel %vm1095_vm12, %v9789_v44, 0.0  ;;  %vm5102_vm14 = vweird.f32 %v4811_v0  ;;  %v4437_v29 = vpop.f32.mrf.mxu0 }
0x106e   : > { %7265 = vpow2.f32 %v4736_v12  ;;  %4828 = vadd.xlane.f32.xlu1 %v4827_v23  ;;  %v5106_v17 = vand.u32 2147483647, %v4811_v0 }
0x106f   : > { %v5086_v62 = vadd.f32 %v7260_v19, %v5085_v10 }
0x1070   : > { %vm5107_vm1 = vcmp.eq.f32.partialorder %v5106_v17, 8.507059e+37  ;;  %v4481_v17 = vmul.f32 0.35355338, %v4437_v29 }
0x1071   : > { %v5090_v37 = vsel %vm5089_vm7, %v7260_v19, %v5086_v62 }
0x1072   : > { %v5095_v49 = vsel %vm5092_vm4, %v5094_v55, %v5090_v37  ;;  %v4480_v55 = vmul.f32 0.35355338, %v4434_v18 }
0x1073   : > { %v7264_v21 = vpop.eup %7263  ;;  %v5096_v7 = vmul.f32 %v9674_v30, %v5095_v49  ;;  %v4479_v30 = vmul.f32 0.35355338, %v4431_v22 }
0x1074   : > { %v5098_v52 = vmul.f32 %v7264_v21, %v4811_v0  ;;  %v4619_v35 = vpop.xlane.xlu1 %4618  ;;  %v9800_v5 = vpop.eup %7265  ;;  %vm5103_vm5 = vweird.f32 %v7264_v21 }
0x1075   : > { %v4679_v9 = vsub.f32 %v9707_v16, %v4619_v35  ;;  %v4814_v36 = vpop.xlane.xlu0 %4813  ;;  %6891 = vmatmul.msk.f32.gmra.mxu2 %vm1095_vm12, %v5096_v7  ;;  %v4830_v27 = vsel %vm1095_vm12, %v9800_v5, 0.0  ;;  %v5108_v16 = vand.u32 2147483648, %v4811_v0  ;;  %vm9808_vm6 = vmor %vm5102_vm14, %vm5103_vm5  ;;  %v9817_v24 = vsel %vm4488_vm9, %v7383_v1, %v4479_v30  ;;  %v4440_v45 = vpop.f32.mrf.mxu0 }
0x1076   : > { %v5099_v58 = vsub.f32 1.0, %v5098_v52  ;;  %7267 = vrcp.f32 %v4814_v36  ;;  %4636 = vmax.xlane.f32.xlu1 %v4635_v61  ;;  %4831 = vadd.xlane.f32.xlu0 %v4830_v27  ;;  %v4638_v59 = vsel %vm1095_vm12, %v9817_v24, -inf  ;;  %v5123_v11 = vand.u32 2147483648, %v4814_v36 }
0x1077   : > { %v4738_v4 = vmul.f32 1.442695, %v4679_v9  ;;  %v5109_v41 = vor.u32 1.1754944e-38, %v5108_v16  ;;  %vm5117_vm13 = vweird.f32 %v4814_v36  ;;  %v4482_v29 = vmul.f32 0.35355338, %v4440_v45 }
0x1078   : > { %v5100_v54 = vmul.f32 %v7264_v21, %v5099_v58  ;;  %v5124_v40 = vor.u32 1.1754944e-38, %v5123_v11  ;;  %v7384_v58 = vld [vmem:[%s9287_s28 + $0x20] sm:$0xff] }
0x1079   : > { %7269 = vpow2.f32 %v4738_v4  ;;  %v9839_v61 = vsel %vm4489_vm3, %v7384_v58, %v4480_v55 }
0x107a   : > { %v5101_v25 = vadd.f32 %v7264_v21, %v5100_v54  ;;  %v4641_v16 = vsel %vm1095_vm12, %v9839_v61, -inf }
0x107c   : > { %v7268_v19 = vpop.eup %7267  ;;  %v9812_v26 = vpop.xlane.xlu2 %4816  ;;  %v5105_v63 = vsel %vm9808_vm6, %v7264_v21, %v5101_v25 }
0x107d   : > { %v5113_v28 = vmul.f32 %v7268_v19, %v4814_v36  ;;  %v4622_v51 = vpop.xlane.xlu0 %4621  ;;  %7271 = vrcp.f32 %v9812_v26  ;;  %v5110_v56 = vsel %vm5107_vm1, %v5109_v41, %v5105_v63  ;;  %vm5118_vm9 = vweird.f32 %v7268_v19  ;;  %v5748_v63 = vld [vmem:[#allocation2 + $0x78] sm:$0xff] }
0x107e   : > { %v4680_v0 = vsub.f32 %v9725_v57, %v4622_v51  ;;  %4639 = vmax.xlane.f32.xlu0 %v4638_v59  ;;  %v5111_v10 = vmul.f32 %v9693_v32, %v5110_v56  ;;  %v5121_v57 = vand.u32 2147483647, %v4814_v36  ;;  %vm5119_vm11 = vmor %vm5117_vm13, %vm5118_vm9  ;;  %v5138_v36 = vand.u32 2147483648, %v9812_v26  ;;  %5788 = vmatpush.msrb.mxu3 %v5748_v63 }
0x107f   : > { %v9823_v43 = vpop.eup %7269  ;;  %v5114_v22 = vsub.f32 1.0, %v5113_v28  ;;  %vm5132_vm3 = vweird.f32 %v9812_v26 }
0x1080   : > { %v4740_v12 = vmul.f32 1.442695, %v4680_v0  ;;  %v4833_v62 = vsel %vm1095_vm12, %v9823_v43, 0.0  ;;  %6892 = vmatmul.msk.f32.gmra.mxu2 %vm1095_vm12, %v5111_v10  ;;  %vm5122_vm7 = vcmp.eq.f32.partialorder %v5121_v57, 8.507059e+37 }
0x1081   : > { %v5115_v23 = vmul.f32 %v7268_v19, %v5114_v22  ;;  %4834 = vadd.xlane.f32.xlu2 %v4833_v62 }
0x1082   : > { %7273 = vpow2.f32 %v4740_v12  ;;  %v7385_v12 = vld [vmem:[%s9287_s28 + $0x28] sm:$0xff] }
0x1083   : > { %v7272_v37 = vpop.eup %7271  ;;  %v5116_v21 = vadd.f32 %v7268_v19, %v5115_v23  ;;  %v9860_v10 = vsel %vm4490_vm2, %v7385_v12, %v4481_v17 }
0x1084   : > { %v5128_v32 = vmul.f32 %v7272_v37, %v9812_v26  ;;  %v4625_v49 = vpop.xlane.xlu2 %4624  ;;  %vm5133_vm4 = vweird.f32 %v7272_v37 }
0x1085   : > { %v9832_v52 = vpop.xlane.xlu1 %4819  ;;  %v4681_v35 = vsub.f32 %v9741_v50, %v4625_v49  ;;  %v5120_v7 = vsel %vm5119_vm11, %v7268_v19, %v5116_v21  ;;  %v5136_v50 = vand.u32 2147483647, %v9812_v26  ;;  %vm5134_vm5 = vmor %vm5132_vm3, %vm5133_vm4  ;;  %v5139_v19 = vor.u32 1.1754944e-38, %v5138_v36  ;;  %v7386_v21 = vld [vmem:[%s9287_s28 + $0x30] sm:$0xff]  ;;  %v4443_v49 = vpop.f32.mrf.mxu0 }
0x1086   : > { %v5129_v9 = vsub.f32 1.0, %v5128_v32  ;;  %7275 = vrcp.f32 %v9832_v52  ;;  %v5125_v4 = vsel %vm5122_vm7, %v5124_v40, %v5120_v7  ;;  %v5153_v3 = vand.u32 2147483648, %v9832_v52 }
0x1087   : > { %v4742_v18 = vmul.f32 1.442695, %v4681_v35  ;;  %v5126_v54 = vmul.f32 %v9710_v46, %v5125_v4  ;;  %vm5137_vm14 = vcmp.eq.f32.partialorder %v5136_v50, 8.507059e+37  ;;  %v5151_v57 = vand.u32 2147483647, %v9832_v52 }
0x1088   : > { %v9842_v27 = vpop.eup %7273  ;;  %v5130_v30 = vmul.f32 %v7272_v37, %v5129_v9  ;;  %v9872_v32 = vsel %vm4491_vm8, %v7386_v21, %v4482_v29  ;;  %vm5147_vm2 = vweird.f32 %v9832_v52  ;;  %v5154_v9 = vor.u32 1.1754944e-38, %v5153_v3 }
0x1089   : > { %7277 = vpow2.f32 %v4742_v18  ;;  %v4836_v6 = vsel %vm1095_vm12, %v9842_v27, 0.0  ;;  %6893 = vmatmul.msk.f32.gmra.mxu2 %vm1095_vm12, %v5126_v54  ;;  %4642 = vmax.xlane.f32.xlu2 %v4641_v16  ;;  %v4647_v18 = vsel %vm1095_vm12, %v9872_v32, -inf  ;;  %vm5152_vm9 = vcmp.eq.f32.partialorder %v5151_v57, 8.507059e+37 }
0x108a   : > { %v5131_v25 = vadd.f32 %v7272_v37, %v5130_v30  ;;  %4837 = vadd.xlane.f32.xlu1 %v4836_v6 }
0x108c   : > { %v7276_v46 = vpop.eup %7275  ;;  %v5135_v1 = vsel %vm5134_vm5, %v7272_v37, %v5131_v25  ;;  %v4823_v51 = vpop.xlane.xlu0 %4822 }
0x108d   : > { %v5143_v41 = vmul.f32 %v7276_v46, %v9832_v52  ;;  %v4628_v28 = vpop.xlane.xlu1 %4627  ;;  %v5140_v0 = vsel %vm5137_vm14, %v5139_v19, %v5135_v1  ;;  %7279 = vrcp.f32 %v4823_v51  ;;  %vm5148_vm6 = vweird.f32 %v7276_v46 }
0x108e   : > { %v4682_v26 = vsub.f32 %v9757_v31, %v4628_v28  ;;  %v5141_v56 = vmul.f32 %v9727_v38, %v5140_v0  ;;  %v4644_v31 = vsel %vm1095_vm12, %v9860_v10, -inf  ;;  %vm5149_vm1 = vmor %vm5147_vm2, %vm5148_vm6  ;;  %v5166_v33 = vand.u32 2147483647, %v4823_v51  ;;  %v7387_v0 = vld [vmem:[%s9287_s28 + $0x38] sm:$0xff] }
0x108f   : > { %v9854_v22 = vpop.eup %7277  ;;  %v5144_v59 = vsub.f32 1.0, %v5143_v41  ;;  %v5168_v30 = vand.u32 2147483648, %v4823_v51  ;;  %vm5162_vm13 = vweird.f32 %v4823_v51 }
0x1090   : > { %v4744_v23 = vmul.f32 1.442695, %v4682_v26  ;;  %v4839_v11 = vsel %vm1095_vm12, %v9854_v22, 0.0  ;;  %vm5167_vm7 = vcmp.eq.f32.partialorder %v5166_v33, 8.507059e+37  ;;  %v4446_v26 = vpop.f32.mrf.mxu0 }
0x1091   : > { %v5145_v62 = vmul.f32 %v7276_v46, %v5144_v59  ;;  %4840 = vadd.xlane.f32.xlu0 %v4839_v11  ;;  %6894 = vmatmul.msk.f32.gmra.mxu2 %vm1095_vm12, %v5141_v56  ;;  %v5169_v45 = vor.u32 1.1754944e-38, %v5168_v30  ;;  %v4484_v11 = vmul.f32 0.35355338, %v4446_v26 }
0x1092   : > { %7281 = vpow2.f32 %v4744_v23  ;;  %4645 = vmax.xlane.f32.xlu1 %v4644_v31 }
0x1093   : > { %v5146_v38 = vadd.f32 %v7276_v46, %v5145_v62  ;;  %v7280_v55 = vpop.eup %7279 }
0x1094   : > { %v4826_v37 = vpop.xlane.xlu2 %4825  ;;  %v5158_v40 = vmul.f32 %v7280_v55, %v4823_v51  ;;  %vm5163_vm8 = vweird.f32 %v7280_v55 }
0x1095   : > { %v4631_v35 = vpop.xlane.xlu0 %4630  ;;  %7283 = vrcp.f32 %v4826_v37  ;;  %v5150_v36 = vsel %vm5149_vm1, %v7276_v46, %v5146_v38  ;;  %vm5164_vm11 = vmor %vm5162_vm13, %vm5163_vm8  ;;  %v5183_v59 = vand.u32 2147483648, %v4826_v37  ;;  %v5181_v29 = vand.u32 2147483647, %v4826_v37 }
0x1096   : > { %v4683_v7 = vsub.f32 %v9770_v34, %v4631_v35  ;;  %v5159_v58 = vsub.f32 1.0, %v5158_v40  ;;  %v5155_v52 = vsel %vm5152_vm9, %v5154_v9, %v5150_v36  ;;  %v4483_v34 = vmul.f32 0.35355338, %v4443_v49  ;;  %v9911_v40 = vpop.f32.mrf.mxu2 }
0x1097   : > { %v5156_v6 = vmul.f32 %v9744_v13, %v5155_v52  ;;  %v5184_v31 = vor.u32 1.1754944e-38, %v5183_v59  ;;  %vm5182_vm5 = vcmp.eq.f32.partialorder %v5181_v29, 8.507059e+37 }
0x1098   : > { %v9878_v4 = vpop.eup %7281  ;;  %v4746_v50 = vmul.f32 1.442695, %v4683_v7  ;;  %v5160_v54 = vmul.f32 %v7280_v55, %v5159_v58  ;;  %v9888_v13 = vsel %vm4492_vm15, %v7387_v0, %v4483_v34  ;;  %vm5177_vm15 = vweird.f32 %v4826_v37 }
0x1099   : > { %v4842_v16 = vsel %vm1095_vm12, %v9878_v4, 0.0  ;;  %4648 = vmax.xlane.f32.xlu0 %v4647_v18  ;;  %6895 = vmatmul.msk.f32.gmra.mxu2 %vm1095_vm12, %v5156_v6 }
0x109a   : > { %7285 = vpow2.f32 %v4746_v50  ;;  %4843 = vadd.xlane.f32.xlu2 %v4842_v16  ;;  %v5161_v17 = vadd.f32 %v7280_v55, %v5160_v54  ;;  %v5747_v16 = vld [vmem:[#allocation2 + $0x70] sm:$0xff] }
0x109b   : > { %v7284_v25 = vpop.eup %7283  ;;  %5789 = vmatpush.msrb.mxu3 %v5747_v16 }
0x109c   : > { %v5173_v19 = vmul.f32 %v7284_v25, %v4826_v37  ;;  %v4634_v46 = vpop.xlane.xlu2 %4633  ;;  %v5165_v63 = vsel %vm5164_vm11, %v7280_v55, %v5161_v17  ;;  %vm5178_vm4 = vweird.f32 %v7284_v25 }
0x109d   : > { %v4684_v1 = vsub.f32 %v9782_v53, %v4634_v46  ;;  %v5170_v28 = vsel %vm5167_vm7, %v5169_v45, %v5165_v63  ;;  %v4650_v53 = vsel %vm1095_vm12, %v9888_v13, -inf  ;;  %vm5179_vm3 = vmor %vm5177_vm15, %vm5178_vm4 }
0x109e   : > { %v5174_v41 = vsub.f32 1.0, %v5173_v19  ;;  %v5171_v23 = vmul.f32 %v9759_v20, %v5170_v28  ;;  %v7388_v20 = vld [vmem:[%s9287_s28 + $0x40] sm:$0xff]  ;;  %v9913_v35 = vpop.f32.mrf.mxu2 }
0x109f   : > { %v4748_v51 = vmul.f32 1.442695, %v4684_v1  ;;  %v9901_v55 = vsel %vm4493_vm10, %v7388_v20, %v4484_v11 }
0x10a0   : > { %v9890_v56 = vpop.eup %7285  ;;  %v5175_v12 = vmul.f32 %v7284_v25, %v5174_v41  ;;  %v4653_v49 = vsel %vm1095_vm12, %v9901_v55, -inf }
0x10a1   : > { %7287 = vpow2.f32 %v4748_v51  ;;  %v4845_v39 = vsel %vm1095_vm12, %v9890_v56, 0.0  ;;  %6896 = vmatmul.msk.f32.gmra.mxu2 %vm1095_vm12, %v5171_v23 }
0x10a2   : > { %v5176_v62 = vadd.f32 %v7284_v25, %v5175_v12  ;;  %4651 = vmax.xlane.f32.xlu2 %v4650_v53  ;;  %4846 = vadd.xlane.f32.xlu1 %v4845_v39 }
0x10a4   : > { %v5180_v38 = vsel %vm5179_vm3, %v7284_v25, %v5176_v62 }
0x10a5   : > { %v5185_v3 = vsel %vm5182_vm5, %v5184_v31, %v5180_v38 }
0x10a6   : > { %v5186_v21 = vmul.f32 %v9772_v15, %v5185_v3  ;;  %v9915_v60 = vpop.f32.mrf.mxu2 }
0x10a7   : > { %v9903_v57 = vpop.eup %7287 }
0x10a8   : > { %v4848_v37 = vsel %vm1095_vm12, %v9903_v57, 0.0 }
0x10a9   : > { %4849 = vadd.xlane.f32.xlu0 %v4848_v37  ;;  %6897 = vmatmul.msk.f32.gmra.mxu2 %vm1095_vm12, %v5186_v21 }
0x10aa   : > { %4654 = vmax.xlane.f32.xlu1 %v4653_v49 }
0x10ae   : > { %v9917_v7 = vpop.f32.mrf.mxu2 }
0x10b6   : > { %v9919_v9 = vpop.f32.mrf.mxu2 }
0x10be   : > { %v9921_v15 = vpop.f32.mrf.mxu2 }
0x10c6   : > { %v9923_v30 = vpop.f32.mrf.mxu2 }
0x10ce   : > { %v9926_v63 = vpop.f32.mrf.mxu2 }
0x10d6   : > { %v9935_v3 = vpop.f32.mrf.mxu2 }
0x10e1   : > { %v4829_v58 = vpop.xlane.xlu1 %4828 }
0x10e2   : > { %7289 = vrcp.f32 %v4829_v58  ;;  %v5198_v34 = vand.u32 2147483648, %v4829_v58  ;;  %v5196_v17 = vand.u32 2147483647, %v4829_v58  ;;  %vm5192_vm14 = vweird.f32 %v4829_v58 }
0x10e4   : > { %v5199_v19 = vor.u32 1.1754944e-38, %v5198_v34  ;;  %vm5197_vm2 = vcmp.eq.f32.partialorder %v5196_v17, 8.507059e+37 }
0x10e8   : > { %v7290_v36 = vpop.eup %7289 }
0x10e9   : > { %v5188_v18 = vmul.f32 %v7290_v36, %v4829_v58  ;;  %v4637_v33 = vpop.xlane.xlu1 %4636  ;;  %v4832_v54 = vpop.xlane.xlu0 %4831  ;;  %vm5193_vm10 = vweird.f32 %v7290_v36 }
0x10ea   : > { %v4685_v50 = vsub.f32 %v9797_v47, %v4637_v33  ;;  %7291 = vrcp.f32 %v4832_v54  ;;  %vm5194_vm6 = vmor %vm5192_vm14, %vm5193_vm10  ;;  %v5213_v29 = vand.u32 2147483648, %v4832_v54  ;;  %v5211_v39 = vand.u32 2147483647, %v4832_v54 }
0x10eb   : > { %v5189_v52 = vsub.f32 1.0, %v5188_v18  ;;  %vm5207_vm9 = vweird.f32 %v4832_v54 }
0x10ec   : > { %v4750_v6 = vmul.f32 1.442695, %v4685_v50  ;;  %vm5212_vm13 = vcmp.eq.f32.partialorder %v5211_v39, 8.507059e+37 }
0x10ed   : > { %v5190_v25 = vmul.f32 %v7290_v36, %v5189_v52 }
0x10ee   : > { %7293 = vpow2.f32 %v4750_v6 }
0x10ef   : > { %v5191_v45 = vadd.f32 %v7290_v36, %v5190_v25 }
0x10f0   : > { %v7292_v46 = vpop.eup %7291 }
0x10f1   : > { %v5195_v1 = vsel %vm5194_vm6, %v7290_v36, %v5191_v45  ;;  %v5203_v47 = vmul.f32 %v7292_v46, %v4832_v54  ;;  %v4640_v41 = vpop.xlane.xlu0 %4639  ;;  %vm5208_vm1 = vweird.f32 %v7292_v46 }
0x10f2   : > { %v5200_v28 = vsel %vm5197_vm2, %v5199_v19, %v5195_v1  ;;  %v4686_v0 = vsub.f32 %v9817_v24, %v4640_v41  ;;  %vm5209_vm8 = vmor %vm5207_vm9, %vm5208_vm1  ;;  %v9944_v19 = vpop.f32.mrf.mxu2 }
0x10f3   : > { %v5201_v26 = vmul.f32 %v9789_v44, %v5200_v28  ;;  %v5204_v51 = vsub.f32 1.0, %v5203_v47  ;;  %v5214_v44 = vor.u32 1.1754944e-38, %v5213_v29 }
0x10f4   : > { %v9930_v59 = vpop.eup %7293  ;;  %v4835_v12 = vpop.xlane.xlu2 %4834  ;;  %v4752_v23 = vmul.f32 1.442695, %v4686_v0 }
0x10f5   : > { %7295 = vrcp.f32 %v4835_v12  ;;  %6898 = vmatmul.msk.f32.gmra.mxu2 %vm1095_vm12, %v5201_v26  ;;  %v5205_v53 = vmul.f32 %v7292_v46, %v5204_v51  ;;  %v4851_v11 = vsel %vm1095_vm12, %v9930_v59, 0.0  ;;  %v5228_v52 = vand.u32 2147483648, %v4835_v12 }
0x10f6   : > { %7297 = vpow2.f32 %v4752_v23  ;;  %4852 = vadd.xlane.f32.xlu2 %v4851_v11  ;;  %v5226_v16 = vand.u32 2147483647, %v4835_v12  ;;  %vm5222_vm7 = vweird.f32 %v4835_v12 }
0x10f7   : > { %v5206_v24 = vadd.f32 %v7292_v46, %v5205_v53 }
0x10f8   : > { %vm5227_vm15 = vcmp.eq.f32.partialorder %v5226_v16, 8.507059e+37  ;;  %v5746_v16 = vld [vmem:[#allocation2 + $0x68] sm:$0xff] }
0x10f9   : > { %v5210_v62 = vsel %vm5209_vm8, %v7292_v46, %v5206_v24  ;;  %5790 = vmatpush.msrb.mxu3 %v5746_v16 }
0x10fa   : > { %v5215_v38 = vsel %vm5212_vm13, %v5214_v44, %v5210_v62 }
0x10fb   : > { %v7296_v31 = vpop.eup %7295  ;;  %v5216_v37 = vmul.f32 %v9800_v5, %v5215_v38 }
0x10fc   : > { %v5218_v20 = vmul.f32 %v7296_v31, %v4835_v12  ;;  %v4643_v21 = vpop.xlane.xlu2 %4642  ;;  %v9938_v49 = vpop.eup %7297  ;;  %vm5223_vm11 = vweird.f32 %v7296_v31 }
0x10fd   : > { %v4838_v58 = vpop.xlane.xlu1 %4837  ;;  %v4687_v36 = vsub.f32 %v9839_v61, %v4643_v21  ;;  %6899 = vmatmul.msk.f32.gmra.mxu2 %vm1095_vm12, %v5216_v37  ;;  %v4854_v50 = vsel %vm1095_vm12, %v9938_v49, 0.0  ;;  %vm5224_vm4 = vmor %vm5222_vm7, %vm5223_vm11  ;;  %v5229_v61 = vor.u32 1.1754944e-38, %v5228_v52 }
0x10fe   : > { %v5219_v18 = vsub.f32 1.0, %v5218_v20  ;;  %7299 = vrcp.f32 %v4838_v58  ;;  %4855 = vadd.xlane.f32.xlu0 %v4854_v50  ;;  %v5243_v12 = vand.u32 2147483648, %v4838_v58  ;;  %v5241_v23 = vand.u32 2147483647, %v4838_v58 }
0x10ff   : > { %v4754_v33 = vmul.f32 1.442695, %v4687_v36  ;;  %vm5237_vm5 = vweird.f32 %v4838_v58 }
0x1100   : > { %v5220_v54 = vmul.f32 %v7296_v31, %v5219_v18  ;;  %v5244_v24 = vor.u32 1.1754944e-38, %v5243_v12  ;;  %vm5242_vm14 = vcmp.eq.f32.partialorder %v5241_v23, 8.507059e+37  ;;  %v9956_v18 = vpop.f32.mrf.mxu2 }
0x1101   : > { %7301 = vpow2.f32 %v4754_v33 }
0x1102   : > { %v5221_v5 = vadd.f32 %v7296_v31, %v5220_v54 }
0x1104   : > { %v4841_v34 = vpop.xlane.xlu0 %4840  ;;  %v7300_v6 = vpop.eup %7299  ;;  %v5225_v45 = vsel %vm5224_vm4, %v7296_v31, %v5221_v5 }
0x1105   : > { %7303 = vrcp.f32 %v4841_v34  ;;  %v5233_v25 = vmul.f32 %v7300_v6, %v4838_v58  ;;  %v4646_v17 = vpop.xlane.xlu1 %4645  ;;  %v5230_v1 = vsel %vm5227_vm15, %v5229_v61, %v5225_v45  ;;  %vm5238_vm3 = vweird.f32 %v7300_v6 }
0x1106   : > { %v4688_v46 = vsub.f32 %v9860_v10, %v4646_v17  ;;  %v5231_v28 = vmul.f32 %v9823_v43, %v5230_v1  ;;  %vm5239_vm10 = vmor %vm5237_vm5, %vm5238_vm3  ;;  %v5258_v62 = vand.u32 2147483648, %v4841_v34  ;;  %v5256_v21 = vand.u32 2147483647, %v4841_v34 }
0x1107   : > { %v9947_v47 = vpop.eup %7301  ;;  %v5234_v41 = vsub.f32 1.0, %v5233_v25  ;;  %vm5252_vm2 = vweird.f32 %v4841_v34 }
0x1108   : > { %v4756_v0 = vmul.f32 1.442695, %v4688_v46  ;;  %v4857_v26 = vsel %vm1095_vm12, %v9947_v47, 0.0  ;;  %6900 = vmatmul.msk.f32.gmra.mxu2 %vm1095_vm12, %v5231_v28  ;;  %v5259_v50 = vor.u32 1.1754944e-38, %v5258_v62  ;;  %vm5257_vm9 = vcmp.eq.f32.partialorder %v5256_v21, 8.507059e+37 }
0x1109   : > { %v5235_v51 = vmul.f32 %v7300_v6, %v5234_v41  ;;  %4858 = vadd.xlane.f32.xlu1 %v4857_v26  ;;  %v9968_v26 = vpop.f32.mrf.mxu2 }
0x110a   : > { %7305 = vpow2.f32 %v4756_v0 }
0x110b   : > { %v7304_v29 = vpop.eup %7303  ;;  %v5236_v10 = vadd.f32 %v7300_v6, %v5235_v51 }
0x110c   : > { %v5248_v53 = vmul.f32 %v7304_v29, %v4841_v34  ;;  %v4649_v39 = vpop.xlane.xlu0 %4648  ;;  %vm5253_vm6 = vweird.f32 %v7304_v29 }
0x110d   : > { %v4689_v11 = vsub.f32 %v9872_v32, %v4649_v39  ;;  %v4844_v43 = vpop.xlane.xlu2 %4843  ;;  %v5240_v38 = vsel %vm5239_vm10, %v7300_v6, %v5236_v10  ;;  %vm5254_vm1 = vmor %vm5252_vm2, %vm5253_vm6 }
0x110e   : > { %v5249_v44 = vsub.f32 1.0, %v5248_v53  ;;  %7307 = vrcp.f32 %v4844_v43  ;;  %v5245_v37 = vsel %vm5242_vm14, %v5244_v24, %v5240_v38  ;;  %v5273_v41 = vand.u32 2147483648, %v4844_v43 }
0x110f   : > { %v4758_v31 = vmul.f32 1.442695, %v4689_v11  ;;  %v5246_v32 = vmul.f32 %v9842_v27, %v5245_v37  ;;  %v5271_v0 = vand.u32 2147483647, %v4844_v43  ;;  %vm5267_vm13 = vweird.f32 %v4844_v43 }
0x1110   : > { %v5250_v20 = vmul.f32 %v7304_v29, %v5249_v44  ;;  %v9954_v36 = vpop.eup %7305 }
0x1111   : > { %7309 = vpow2.f32 %v4758_v31  ;;  %v4860_v33 = vsel %vm1095_vm12, %v9954_v36, 0.0  ;;  %6901 = vmatmul.msk.f32.gmra.mxu2 %vm1095_vm12, %v5246_v32  ;;  %vm5272_vm7 = vcmp.eq.f32.partialorder %v5271_v0, 8.507059e+37  ;;  %v9978_v32 = vpop.f32.mrf.mxu2 }
0x1112   : > { %v5251_v58 = vadd.f32 %v7304_v29, %v5250_v20  ;;  %4861 = vadd.xlane.f32.xlu2 %v4860_v33 }
0x1114   : > { %v7308_v54 = vpop.eup %7307  ;;  %v5255_v52 = vsel %vm5254_vm1, %v7304_v29, %v5251_v58 }
0x1115   : > { %v5263_v5 = vmul.f32 %v7308_v54, %v4844_v43  ;;  %v4847_v6 = vpop.xlane.xlu1 %4846  ;;  %v5260_v61 = vsel %vm5257_vm9, %v5259_v50, %v5255_v52  ;;  %v4652_v34 = vpop.xlane.xlu2 %4651  ;;  %vm5268_vm8 = vweird.f32 %v7308_v54 }
0x1116   : > { %7311 = vrcp.f32 %v4847_v6  ;;  %v4690_v17 = vsub.f32 %v9888_v13, %v4652_v34  ;;  %v5261_v45 = vmul.f32 %v9854_v22, %v5260_v61  ;;  %vm5269_vm11 = vmor %vm5267_vm13, %vm5268_vm8  ;;  %v5274_v22 = vor.u32 1.1754944e-38, %v5273_v41 }
0x1117   : > { %v9962_v25 = vpop.eup %7309  ;;  %v5264_v27 = vsub.f32 1.0, %v5263_v5  ;;  %v5288_v24 = vand.u32 2147483648, %v4847_v6  ;;  %v5286_v43 = vand.u32 2147483647, %v4847_v6  ;;  %vm5282_vm15 = vweird.f32 %v4847_v6 }
0x1118   : > { %v4863_v46 = vsel %vm1095_vm12, %v9962_v25, 0.0  ;;  %v4760_v28 = vmul.f32 1.442695, %v4690_v17 }
0x1119   : > { %v5265_v1 = vmul.f32 %v7308_v54, %v5264_v27  ;;  %4864 = vadd.xlane.f32.xlu0 %v4863_v46  ;;  %6902 = vmatmul.msk.f32.gmra.mxu2 %vm1095_vm12, %v5261_v45  ;;  %vm5287_vm5 = vcmp.eq.f32.partialorder %v5286_v43, 8.507059e+37  ;;  %v5576_v45 = vpop.f32.mrf.mxu2  ;;  %v5745_v43 = vld [vmem:[#allocation2 + $0x60] sm:$0xff] }
0x111a   : > { %7313 = vpow2.f32 %v4760_v28  ;;  %5791 = vmatpush.msrb.mxu3 %v5745_v43 }
0x111b   : > { %v5266_v51 = vadd.f32 %v7308_v54, %v5265_v1 }
0x111c   : > { %v7312_v12 = vpop.eup %7311  ;;  %v4850_v13 = vpop.xlane.xlu0 %4849 }
0x111d   : > { %v5278_v29 = vmul.f32 %v7312_v12, %v4847_v6  ;;  %v4655_v23 = vpop.xlane.xlu1 %4654  ;;  %7315 = vrcp.f32 %v4850_v13  ;;  %v5270_v53 = vsel %vm5269_vm11, %v7308_v54, %v5266_v51  ;;  %vm5283_vm4 = vweird.f32 %v7312_v12 }
0x111e   : > { %v4691_v10 = vsub.f32 %v9901_v55, %v4655_v23  ;;  %v5275_v11 = vsel %vm5272_vm7, %v5274_v22, %v5270_v53  ;;  %vm5284_vm3 = vmor %vm5282_vm15, %vm5283_vm4  ;;  %v5289_v55 = vor.u32 1.1754944e-38, %v5288_v24  ;;  %v5301_v5 = vand.u32 2147483647, %v4850_v13 }
0x111f   : > { %v5279_v39 = vsub.f32 1.0, %v5278_v29  ;;  %v5276_v38 = vmul.f32 %v9878_v4, %v5275_v11  ;;  %v5303_v4 = vand.u32 2147483648, %v4850_v13  ;;  %vm5297_vm14 = vweird.f32 %v4850_v13 }
0x1120   : > { %v4762_v44 = vmul.f32 1.442695, %v4691_v10  ;;  %v9972_v62 = vpop.eup %7313  ;;  %vm5302_vm2 = vcmp.eq.f32.partialorder %v5301_v5, 8.507059e+37 }
0x1121   : > { %v5280_v31 = vmul.f32 %v7312_v12, %v5279_v39  ;;  %v4866_v20 = vsel %vm1095_vm12, %v9972_v62, 0.0  ;;  %6903 = vmatmul.msk.f32.gmra.mxu2 %vm1095_vm12, %v5276_v38  ;;  %v5304_v27 = vor.u32 1.1754944e-38, %v5303_v4  ;;  %v5579_v41 = vpop.f32.mrf.mxu2 }
0x1122   : > { %7317 = vpow2.f32 %v4762_v44  ;;  %4867 = vadd.xlane.f32.xlu1 %v4866_v20 }
0x1123   : > { %v7316_v21 = vpop.eup %7315  ;;  %v5281_v37 = vadd.f32 %v7312_v12, %v5280_v31 }
0x1124   : > { %v5293_v58 = vmul.f32 %v7316_v21, %v4850_v13  ;;  %vm5298_vm10 = vweird.f32 %v7316_v21 }
0x1125   : > { %v5285_v33 = vsel %vm5284_vm3, %v7312_v12, %v5281_v37  ;;  %vm5299_vm6 = vmor %vm5297_vm14, %vm5298_vm10 }
0x1126   : > { %v5294_v50 = vsub.f32 1.0, %v5293_v58  ;;  %v5290_v54 = vsel %vm5287_vm5, %v5289_v55, %v5285_v33  ;;  %v5658_v55 = vmul.f32 %v5576_v45, %v8924_v42 }
0x1127   : > { %v5291_v6 = vmul.f32 %v9890_v56, %v5290_v54  ;;  %v5649_v54 = vmul.f32 %v9919_v9, %v8126_v14 }
0x1128   : > { %v9980_v52 = vpop.eup %7317  ;;  %v5295_v16 = vmul.f32 %v7316_v21, %v5294_v50 }
0x1129   : > { %v4869_v61 = vsel %vm1095_vm12, %v9980_v52, 0.0  ;;  %6904 = vmatmul.msk.f32.gmra.mxu2 %vm1095_vm12, %v5291_v6  ;;  %v9988_v56 = vpop.f32.mrf.mxu2  ;;  %v5710_v6 = vsel %vm794_vm0, %v5658_v55, 0.0 }
0x112a   : > { %v5296_v34 = vadd.f32 %v7316_v21, %v5295_v16  ;;  %4870 = vadd.xlane.f32.xlu2 %v4869_v61 }
0x112c   : > { %v5300_v17 = vsel %vm5299_vm6, %v7316_v21, %v5296_v34 }
0x112d   : > { %v5305_v46 = vsel %vm5302_vm2, %v5304_v27, %v5300_v17  ;;  %v5709_v27 = vsel %vm794_vm0, %v5649_v54, 0.0 }
0x112e   : > { %v5306_v1 = vmul.f32 %v9903_v57, %v5305_v46  ;;  %v5711_v46 = vadd.f32 %v5710_v6, %v5709_v27  ;;  %v5651_v6 = vmul.f32 %v9923_v30, %v8126_v14 }
0x1131   : > { %6905 = vmatmul.msk.f32.gmra.mxu2 %vm1095_vm12, %v5306_v1  ;;  %v9990_v28 = vpop.f32.mrf.mxu2 }
0x1139   : > { %v9992_v0 = vpop.f32.mrf.mxu2 }
0x1141   : > { %v9994_v51 = vpop.f32.mrf.mxu2 }
0x1149   : > { %v9996_v12 = vpop.f32.mrf.mxu2 }
0x1151   : > { %v9998_v22 = vpop.f32.mrf.mxu2 }
0x1169   : > { %v4853_v13 = vpop.xlane.xlu2 %4852 }
0x116a   : > { %7319 = vrcp.f32 %v4853_v13  ;;  %v5318_v53 = vand.u32 2147483648, %v4853_v13  ;;  %v5316_v11 = vand.u32 2147483647, %v4853_v13  ;;  %vm5312_vm9 = vweird.f32 %v4853_v13 }
0x116c   : > { %v5319_v31 = vor.u32 1.1754944e-38, %v5318_v53  ;;  %vm5317_vm13 = vcmp.eq.f32.partialorder %v5316_v11, 8.507059e+37  ;;  %v5650_v11 = vmul.f32 %v9921_v15, %v8126_v14 }
0x1170   : > { %v7320_v29 = vpop.eup %7319 }
0x1171   : > { %v5308_v23 = vmul.f32 %v7320_v29, %v4853_v13  ;;  %v4856_v57 = vpop.xlane.xlu0 %4855  ;;  %vm5313_vm1 = vweird.f32 %v7320_v29 }
0x1172   : > { %7321 = vrcp.f32 %v4856_v57  ;;  %vm5314_vm8 = vmor %vm5312_vm9, %vm5313_vm1  ;;  %v5333_v4 = vand.u32 2147483648, %v4856_v57  ;;  %v5331_v5 = vand.u32 2147483647, %v4856_v57  ;;  %vm5327_vm7 = vweird.f32 %v4856_v57 }
0x1173   : > { %v5309_v10 = vsub.f32 1.0, %v5308_v23 }
0x1174   : > { %vm5332_vm15 = vcmp.eq.f32.partialorder %v5331_v5, 8.507059e+37 }
0x1175   : > { %v5310_v39 = vmul.f32 %v7320_v29, %v5309_v10 }
0x1177   : > { %v5311_v24 = vadd.f32 %v7320_v29, %v5310_v39  ;;  %v5659_v39 = vmul.f32 %v5579_v41, %v8924_v42 }
0x1178   : > { %v10000_v44 = vpop.f32.mrf.mxu2  ;;  %v7322_v38 = vpop.eup %7321 }
0x1179   : > { %v5315_v20 = vsel %vm5314_vm8, %v7320_v29, %v5311_v24  ;;  %v5323_v21 = vmul.f32 %v7322_v38, %v4856_v57  ;;  %vm5328_vm11 = vweird.f32 %v7322_v38 }
0x117a   : > { %v5320_v37 = vsel %vm5317_vm13, %v5319_v31, %v5315_v20  ;;  %vm5329_vm4 = vmor %vm5327_vm7, %vm5328_vm11  ;;  %v5717_v20 = vsel %vm794_vm0, %v5659_v39, 0.0 }
0x117b   : > { %v5321_v33 = vmul.f32 %v9930_v59, %v5320_v37  ;;  %v5324_v50 = vsub.f32 1.0, %v5323_v21  ;;  %v5334_v59 = vor.u32 1.1754944e-38, %v5333_v4 }
0x117c   : > { %v4859_v58 = vpop.xlane.xlu1 %4858 }
0x117d   : > { %7323 = vrcp.f32 %v4859_v58  ;;  %6906 = vmatmul.msk.f32.gmra.mxu2 %vm1095_vm12, %v5321_v33  ;;  %v5325_v16 = vmul.f32 %v7322_v38, %v5324_v50  ;;  %v5348_v31 = vand.u32 2147483648, %v4859_v58  ;;  %v5346_v43 = vand.u32 2147483647, %v4859_v58 }
0x117e   : > { %vm5342_vm5 = vweird.f32 %v4859_v58 }
0x117f   : > { %v5326_v61 = vadd.f32 %v7322_v38, %v5325_v16  ;;  %v5349_v55 = vor.u32 1.1754944e-38, %v5348_v31  ;;  %vm5347_vm14 = vcmp.eq.f32.partialorder %v5346_v43, 8.507059e+37 }
0x1180   : > { %v5603_v34 = vpop.f32.mrf.mxu2 }
0x1181   : > { %v5667_v17 = vmul.f32 %v5603_v34, %v8926_v48  ;;  %v5330_v9 = vsel %vm5329_vm4, %v7322_v38, %v5326_v61  ;;  %v5660_v34 = vmul.f32 %v9988_v56, %v8924_v42 }
0x1182   : > { %v5335_v29 = vsel %vm5332_vm15, %v5334_v59, %v5330_v9 }
0x1183   : > { %v7324_v45 = vpop.eup %7323  ;;  %v5712_v13 = vsel %vm794_vm0, %v5667_v17, 0.0  ;;  %v5336_v57 = vmul.f32 %v9938_v49, %v5335_v29  ;;  %v5716_v49 = vsel %vm794_vm0, %v5650_v11, 0.0  ;;  %v5724_v30 = vsel %vm794_vm0, %v5660_v34, 0.0 }
0x1184   : > { %v5338_v1 = vmul.f32 %v7324_v45, %v4859_v58  ;;  %v10011_v23 = vadd.f32 %v5712_v13, %v5711_v46  ;;  %vm5343_vm3 = vweird.f32 %v7324_v45  ;;  %v5718_v54 = vadd.f32 %v5717_v20, %v5716_v49 }
0x1185   : > { %v4862_v10 = vpop.xlane.xlu2 %4861  ;;  %6907 = vmatmul.msk.f32.gmra.mxu2 %vm1095_vm12, %v5336_v57  ;;  %vm5344_vm10 = vmor %vm5342_vm5, %vm5343_vm3 }
0x1186   : > { %v5339_v53 = vsub.f32 1.0, %v5338_v1  ;;  %7325 = vrcp.f32 %v4862_v10  ;;  %v5363_v59 = vand.u32 2147483648, %v4862_v10  ;;  %vm5357_vm2 = vweird.f32 %v4862_v10 }
0x1188   : > { %v5340_v24 = vmul.f32 %v7324_v45, %v5339_v53  ;;  %v5364_v1 = vor.u32 1.1754944e-38, %v5363_v59 }
0x118a   : > { %v5341_v38 = vadd.f32 %v7324_v45, %v5340_v24 }
0x118b   : > { %v5606_v41 = vpop.f32.mrf.mxu2 }
0x118c   : > { %v4865_v21 = vpop.xlane.xlu0 %4864  ;;  %v7326_v37 = vpop.eup %7325  ;;  %v5668_v15 = vmul.f32 %v5606_v41, %v8926_v48  ;;  %v5345_v50 = vsel %vm5344_vm10, %v7324_v45, %v5341_v38  ;;  %v5361_v45 = vand.u32 2147483647, %v4862_v10  ;;  %v5661_v38 = vmul.f32 %v9990_v28, %v8924_v42 }
0x118d   : > { %7327 = vrcp.f32 %v4865_v21  ;;  %v5353_v33 = vmul.f32 %v7326_v37, %v4862_v10  ;;  %v5350_v4 = vsel %vm5347_vm14, %v5349_v55, %v5345_v50  ;;  %vm5358_vm6 = vweird.f32 %v7326_v37 }
0x118e   : > { %v5719_v5 = vsel %vm794_vm0, %v5668_v15, 0.0  ;;  %v5351_v58 = vmul.f32 %v9947_v47, %v5350_v4  ;;  %v5723_v47 = vsel %vm794_vm0, %v5651_v6, 0.0  ;;  %vm5359_vm1 = vmor %vm5357_vm2, %vm5358_vm6  ;;  %vm5362_vm9 = vcmp.eq.f32.partialorder %v5361_v45, 8.507059e+37 }
0x118f   : > { %v5354_v16 = vsub.f32 1.0, %v5353_v33  ;;  %v10025_v61 = vadd.f32 %v5719_v5, %v5718_v54  ;;  %v5376_v56 = vand.u32 2147483647, %v4865_v21  ;;  %v5378_v53 = vand.u32 2147483648, %v4865_v21 }
0x1190   : > { %6908 = vmatmul.msk.f32.gmra.mxu2 %vm1095_vm12, %v5351_v58  ;;  %v5725_v31 = vadd.f32 %v5724_v30, %v5723_v47  ;;  %vm5372_vm13 = vweird.f32 %v4865_v21  ;;  %v5652_v41 = vmul.f32 %v9926_v63, %v8126_v14  ;;  %v5731_v28 = vsel %vm794_vm0, %v5661_v38, 0.0 }
0x1191   : > { %v5355_v27 = vmul.f32 %v7326_v37, %v5354_v16  ;;  %v5379_v49 = vor.u32 1.1754944e-38, %v5378_v53  ;;  %vm5377_vm7 = vcmp.eq.f32.partialorder %v5376_v56, 8.507059e+37  ;;  %v5662_v63 = vmul.f32 %v9992_v0, %v8924_v42 }
0x1192   : > { %v5730_v16 = vsel %vm794_vm0, %v5652_v41, 0.0  ;;  %v5653_v45 = vmul.f32 %v9935_v3, %v8126_v14  ;;  %v5654_v3 = vmul.f32 %v9944_v19, %v8924_v42  ;;  %v5663_v38 = vmul.f32 %v9994_v51, %v8926_v48 }
0x1193   : > { %v7328_v17 = vpop.eup %7327  ;;  %v5356_v46 = vadd.f32 %v7326_v37, %v5355_v27  ;;  %v5732_v6 = vadd.f32 %v5731_v28, %v5730_v16  ;;  %v5738_v0 = vsel %vm794_vm0, %v5662_v63, 0.0  ;;  %v5664_v16 = vmul.f32 %v9996_v12, %v8926_v48 }
0x1194   : > { %v5368_v9 = vmul.f32 %v7328_v17, %v4865_v21  ;;  %v5609_v39 = vpop.f32.mrf.mxu2  ;;  %vm5373_vm8 = vweird.f32 %v7328_v17 }
0x1195   : > { %v4868_v29 = vpop.xlane.xlu1 %4867  ;;  %v5360_v57 = vsel %vm5359_vm1, %v7326_v37, %v5356_v46  ;;  %v5669_v24 = vmul.f32 %v5609_v39, %v8926_v48  ;;  %vm5374_vm11 = vmor %vm5372_vm13, %vm5373_vm8 }
0x1196   : > { %v5369_v13 = vsub.f32 1.0, %v5368_v9  ;;  %7329 = vrcp.f32 %v4868_v29  ;;  %v5365_v10 = vsel %vm5362_vm9, %v5364_v1, %v5360_v57  ;;  %v5393_v34 = vand.u32 2147483648, %v4868_v29 }
0x1197   : > { %v5366_v43 = vmul.f32 %v9954_v36, %v5365_v10  ;;  %v5726_v37 = vsel %vm794_vm0, %v5669_v24, 0.0  ;;  %v5391_v59 = vand.u32 2147483647, %v4868_v29  ;;  %vm5387_vm15 = vweird.f32 %v4868_v29 }
0x1198   : > { %v5370_v11 = vmul.f32 %v7328_v17, %v5369_v13  ;;  %v10037_v55 = vadd.f32 %v5726_v37, %v5725_v31  ;;  %v5394_v47 = vor.u32 1.1754944e-38, %v5393_v34  ;;  %v5737_v13 = vsel %vm794_vm0, %v5653_v45, 0.0 }
0x1199   : > { %6909 = vmatmul.msk.f32.gmra.mxu2 %vm1095_vm12, %v5366_v43  ;;  %vm5392_vm5 = vcmp.eq.f32.partialorder %v5391_v59, 8.507059e+37  ;;  %v5739_v24 = vadd.f32 %v5738_v0, %v5737_v13  ;;  %v5645_v43 = vmul.f32 %v9911_v40, %v8126_v14  ;;  %v5684_v40 = vsel %vm794_vm0, %v5663_v38, 0.0 }
0x119a   : > { %v5371_v20 = vadd.f32 %v7328_v17, %v5370_v11  ;;  %v5647_v45 = vmul.f32 %v9915_v60, %v8126_v14  ;;  %v5648_v60 = vmul.f32 %v9917_v7, %v8126_v14 }
0x119c   : > { %v5375_v33 = vsel %vm5374_vm11, %v7328_v17, %v5371_v20  ;;  %v7330_v15 = vpop.eup %7329  ;;  %v5612_v21 = vpop.f32.mrf.mxu2 }
0x119d   : > { %v4871_v36 = vpop.xlane.xlu2 %4870  ;;  %v5380_v50 = vsel %vm5377_vm7, %v5379_v49, %v5375_v33  ;;  %v5383_v54 = vmul.f32 %v7330_v15, %v4868_v29  ;;  %v5670_v58 = vmul.f32 %v5612_v21, %v8926_v48  ;;  %vm5388_vm4 = vweird.f32 %v7330_v15 }
0x119e   : > { %7331 = vrcp.f32 %v4871_v36  ;;  %v5381_v4 = vmul.f32 %v9962_v25, %v5380_v50  ;;  %vm5389_vm3 = vmor %vm5387_vm15, %vm5388_vm4  ;;  %v5408_v39 = vand.u32 2147483648, %v4871_v36  ;;  %v5406_v31 = vand.u32 2147483647, %v4871_v36 }
0x119f   : > { %v5384_v5 = vsub.f32 1.0, %v5383_v54  ;;  %v5733_v17 = vsel %vm794_vm0, %v5670_v58, 0.0  ;;  %vm5402_vm14 = vweird.f32 %v4871_v36  ;;  %v5681_v33 = vsel %vm794_vm0, %v5645_v43, 0.0 }
0x11a0   : > { %v10051_v46 = vadd.f32 %v5733_v17, %v5732_v6  ;;  %v5409_v49 = vor.u32 1.1754944e-38, %v5408_v39  ;;  %vm5407_vm2 = vcmp.eq.f32.partialorder %v5406_v31, 8.507059e+37  ;;  %v5656_v17 = vmul.f32 %v9968_v26, %v8924_v42 }
0x11a1   : > { %v5385_v27 = vmul.f32 %v7330_v15, %v5384_v5  ;;  %6910 = vmatmul.msk.f32.gmra.mxu2 %vm1095_vm12, %v5381_v4  ;;  %v5646_v4 = vmul.f32 %v9913_v35, %v8126_v14  ;;  %v5702_v39 = vsel %vm794_vm0, %v5648_v60, 0.0 }
0x11a3   : > { %v5386_v9 = vadd.f32 %v7330_v15, %v5385_v27 }
0x11a4   : > { %v7332_v25 = vpop.eup %7331  ;;  %v5615_v56 = vpop.f32.mrf.mxu2 }
0x11a5   : > { %v5398_v30 = vmul.f32 %v7332_v25, %v4871_v36  ;;  %v5390_v1 = vsel %vm5389_vm3, %v7330_v15, %v5386_v9  ;;  %v5671_v11 = vmul.f32 %v5615_v56, %v8926_v48  ;;  %vm5403_vm10 = vweird.f32 %v7332_v25 }
0x11a6   : > { %v5395_v53 = vsel %vm5392_vm5, %v5394_v47, %v5390_v1  ;;  %vm5404_vm6 = vmor %vm5402_vm14, %vm5403_vm10  ;;  %v5655_v36 = vmul.f32 %v9956_v18, %v8924_v42  ;;  %v5688_v18 = vsel %vm794_vm0, %v5646_v4, 0.0  ;;  %v5696_v9 = vsel %vm794_vm0, %v5656_v17, 0.0 }
0x11a7   : > { %v5399_v57 = vsub.f32 1.0, %v5398_v30  ;;  %v5396_v29 = vmul.f32 %v9972_v62, %v5395_v53  ;;  %v5740_v20 = vsel %vm794_vm0, %v5671_v11, 0.0  ;;  %v5682_v62 = vsel %vm794_vm0, %v5654_v3, 0.0 }
0x11a8   : > { %v10065_v19 = vadd.f32 %v5740_v20, %v5739_v24  ;;  %v5683_v51 = vadd.f32 %v5682_v62, %v5681_v33  ;;  %v5689_v6 = vsel %vm794_vm0, %v5655_v36, 0.0  ;;  %v5695_v47 = vsel %vm794_vm0, %v5647_v45, 0.0 }
0x11a9   : > { %v5400_v10 = vmul.f32 %v7332_v25, %v5399_v57  ;;  %6911 = vmatmul.msk.f32.gmra.mxu2 %vm1095_vm12, %v5396_v29  ;;  %v5690_v63 = vadd.f32 %v5689_v6, %v5688_v18  ;;  %v5697_v0 = vadd.f32 %v5696_v9, %v5695_v47  ;;  %v5657_v57 = vmul.f32 %v9978_v32, %v8924_v42  ;;  %v6040_v18 = vld [vmem:[%s10452_s13 + $0x10] sm:$0xff] }
0x11aa   : > { %v5685_v21 = vadd.f32 %v5684_v40, %v5683_v51 }
0x11ab   : > { %v5401_v37 = vadd.f32 %v7332_v25, %v5400_v10  ;;  %v5703_v3 = vsel %vm794_vm0, %v5657_v57, 0.0 }
0x11ac   : > { %v5618_v50 = vpop.f32.mrf.mxu2  ;;  %v5704_v29 = vadd.f32 %v5703_v3, %v5702_v39 }
0x11ad   : > { %v5405_v41 = vsel %vm5404_vm6, %v7332_v25, %v5401_v37  ;;  %v5672_v54 = vmul.f32 %v5618_v50, %v8939_v2  ;;  %v5665_v25 = vmul.f32 %v9998_v22, %v8926_v48  ;;  %v5666_v22 = vmul.f32 %v10000_v44, %v8926_v48 }
0x11ae   : > { %v5410_v15 = vsel %vm5407_vm2, %v5409_v49, %v5405_v41 }
0x11af   : > { %v5411_v28 = vmul.f32 %v9980_v52, %v5410_v15  ;;  %v5686_v5 = vsel %vm794_vm0, %v5672_v54, 0.0  ;;  %v5691_v52 = vsel %vm794_vm0, %v5664_v16, 0.0  ;;  %v5698_v30 = vsel %vm794_vm0, %v5665_v25, 0.0 }
0x11b0   : > { %v5687_v58 = vadd.f32 %v5686_v5, %v5685_v21  ;;  %v5692_v27 = vadd.f32 %v5691_v52, %v5690_v63  ;;  %v5699_v26 = vadd.f32 %v5698_v30, %v5697_v0  ;;  %v5705_v11 = vsel %vm794_vm0, %v5666_v22, 0.0 }
0x11b1   : > { %6912 = vmatmul.msk.f32.gmra.mxu2 %vm1095_vm12, %v5411_v28  ;;  %v5706_v24 = vadd.f32 %v5705_v11, %v5704_v29 }
0x11b2   : > { %6913 = vmatmul.msk.f32.vlgmr.msrb.gmra.mxu3 %vm794_vm0, %v5687_v58 }
0x11b4   : > { %v5621_v34 = vpop.f32.mrf.mxu2 }
0x11b5   : > { %v5673_v35 = vmul.f32 %v5621_v34, %v8939_v2 }
0x11b7   : > { %v5693_v12 = vsel %vm794_vm0, %v5673_v35, 0.0 }
0x11b8   : > { %v5694_v59 = vadd.f32 %v5693_v12, %v5692_v27 }
0x11ba   : > { %6914 = vmatmul.msk.f32.gmra.mxu3 %vm794_vm0, %v5694_v59 }
0x1200   : > { %v5624_v1 = vpop.f32.mrf.mxu2 }
0x1201   : > { %v5674_v13 = vmul.f32 %v5624_v1, %v8939_v2 }
0x1203   : > { %v5700_v56 = vsel %vm794_vm0, %v5674_v13, 0.0 }
0x1204   : > { %v5701_v53 = vadd.f32 %v5700_v56, %v5699_v26  ;;  %v6039_v56 = vld [vmem:[%s10452_s13 + $0x8] sm:$0xff] }
0x1206   : > { %6915 = vmatmul.msk.f32.gmra.mxu3 %vm794_vm0, %v5701_v53 }
0x1208   : > { %v5627_v42 = vpop.f32.mrf.mxu2 }
0x1209   : > { %v5675_v32 = vmul.f32 %v5627_v42, %v8939_v2 }
0x120b   : > { %v5707_v10 = vsel %vm794_vm0, %v5675_v32, 0.0 }
0x120c   : > { %v5708_v14 = vadd.f32 %v5707_v10, %v5706_v24 }
0x120e   : > { %6916 = vmatmul.msk.f32.gmra.mxu3 %vm794_vm0, %v5708_v14 }
0x1213   : > { %v5630_v48 = vpop.f32.mrf.mxu2 }
0x1214   : > { %v5676_v7 = vmul.f32 %v5630_v48, %v8939_v2 }
0x1216   : > { %v5714_v44 = vsel %vm794_vm0, %v5676_v7, 0.0 }
0x1217   : > { %v5715_v31 = vadd.f32 %v5714_v44, %v10011_v23 }
0x1219   : > { %6917 = vmatmul.msk.f32.gmra.mxu3 %vm794_vm0, %v5715_v31 }
0x121c   : > { %v5633_v43 = vpop.f32.mrf.mxu2 }
0x121d   : > { %v5677_v38 = vmul.f32 %v5633_v43, %v8939_v2 }
0x121f   : > { %v5721_v20 = vsel %vm794_vm0, %v5677_v38, 0.0 }
0x1220   : > { %v5722_v37 = vadd.f32 %v5721_v20, %v10025_v61 }
0x1222   : > { %6918 = vmatmul.msk.f32.gmra.mxu3 %vm794_vm0, %v5722_v37 }
0x1224   : > { %v5636_v62 = vpop.f32.mrf.mxu2 }
0x1225   : > { %v5678_v49 = vmul.f32 %v5636_v62, %v8939_v2  ;;  %v6038_v62 = vld [vmem:[%s10452_s13] sm:$0xff] }
0x1227   : > { %v5728_v41 = vsel %vm794_vm0, %v5678_v49, 0.0 }
0x1228   : > { %v5729_v33 = vadd.f32 %v5728_v41, %v10037_v55 }
0x122a   : > { %6919 = vmatmul.msk.f32.gmra.mxu3 %vm794_vm0, %v5729_v33 }
0x122c   : > { %v5639_v23 = vpop.f32.mrf.mxu2 }
0x122d   : > { %v5679_v40 = vmul.f32 %v5639_v23, %v8939_v2 }
0x122f   : > { %v5735_v15 = vsel %vm794_vm0, %v5679_v40, 0.0 }
0x1230   : > { %v5736_v51 = vadd.f32 %v5735_v15, %v10051_v46  ;;  %v6041_v46 = vld [vmem:[%s10452_s13 + $0x18] sm:$0xff] }
0x1231   : > { %6085 = vmatpush.msra.mxu1 %v6041_v46 }
0x1232   : > { %6920 = vmatmul.msk.f32.gmra.mxu3 %vm794_vm0, %v5736_v51 }
0x1233   : > { %6086 = vmatpush.msra.mxu1 %v6040_v18 }
0x1234   : > { %v5642_v61 = vpop.f32.mrf.mxu2 }
0x1235   : > { %v5680_v50 = vmul.f32 %v5642_v61, %v8939_v2  ;;  %v5793_v28 = vpop.f32.mrf.mxu3  ;;  %6087 = vmatpush.msra.mxu1 %v6039_v56 }
0x1236   : > { %v5820_v54 = vsel %vm794_vm0, %v5793_v28, 0.0 }
0x1237   : > { %v5742_v36 = vsel %vm794_vm0, %v5680_v50, 0.0  ;;  %5821 = vadd.xlane.f32.xlu0 %v5820_v54  ;;  %6088 = vmatpush.msra.mxu1 %v6038_v62 }
0x1238   : > { %v5743_v55 = vadd.f32 %v5742_v36, %v10065_v19 }
0x123a   : > { %6921 = vmatmul.msk.f32.gmra.mxu3 %vm794_vm0, %v5743_v55 }
0x123d   : > { %v5796_v21 = vpop.f32.mrf.mxu3 }
0x123e   : > { %v5823_v4 = vsel %vm794_vm0, %v5796_v21, 0.0 }
0x123f   : > { %5824 = vadd.xlane.f32.xlu1 %v5823_v4 }
0x1289   : > { %v5799_v2 = vpop.f32.mrf.mxu3 }
0x128a   : > { %v5826_v16 = vsel %vm794_vm0, %v5799_v2, 0.0 }
0x128b   : > { %5827 = vadd.xlane.f32.xlu2 %v5826_v16 }
0x1291   : > { %v5802_v5 = vpop.f32.mrf.mxu3 }
0x1292   : > { %v5829_v58 = vsel %vm794_vm0, %v5802_v5, 0.0 }
0x1293   : > { %5830 = vadd.xlane.f32.xlu0 %v5829_v58 }
0x129c   : > { %v5805_v19 = vpop.f32.mrf.mxu3 }
0x129d   : > { %v5832_v6 = vsel %vm794_vm0, %v5805_v19, 0.0 }
0x129e   : > { %5833 = vadd.xlane.f32.xlu1 %v5832_v6 }
0x12a5   : > { %v5808_v52 = vpop.f32.mrf.mxu3 }
0x12a6   : > { %v5835_v63 = vsel %vm794_vm0, %v5808_v52, 0.0 }
0x12a7   : > { %5836 = vadd.xlane.f32.xlu2 %v5835_v63 }
0x12aa   : > { %v5822_v34 = vpop.xlane.xlu0 %5821 }
0x12ab   : > { %v5847_v35 = vmul.f32 %v5822_v34, %v7884_v8 }
0x12ad   : > { %v5811_v27 = vpop.f32.mrf.mxu3  ;;  %v10145_v12 = vsub.f32 %v5793_v28, %v5847_v35 }
0x12ae   : > { %v5838_v59 = vsel %vm794_vm0, %v5811_v27, 0.0 }
0x12af   : > { %5839 = vadd.xlane.f32.xlu1 %v5838_v59  ;;  %v5865_v17 = vmul.f32 %v10145_v12, %v10145_v12 }
0x12b1   : > { %v5874_v45 = vsel %vm794_vm0, %v5865_v17, 0.0 }
0x12b2   : > { %v5825_v25 = vpop.xlane.xlu1 %5824  ;;  %5875 = vadd.xlane.f32.xlu0 %v5874_v45 }
0x12b3   : > { %v5848_v9 = vmul.f32 %v5825_v25, %v7884_v8 }
0x12b5   : > { %v5814_v47 = vpop.f32.mrf.mxu3  ;;  %v10152_v30 = vsub.f32 %v5796_v21, %v5848_v9  ;;  %v10219_v9 = vld [vmem:[%s10457_s18] sm:$0xf] }
0x12b6   : > { %v5841_v13 = vsel %vm794_vm0, %v5814_v47, 0.0 }
0x12b7   : > { %v5866_v0 = vmul.f32 %v10152_v30, %v10152_v30 }
0x12b9   : > { %v5877_v1 = vsel %vm794_vm0, %v5866_v0, 0.0 }
0x12ba   : > { %5878 = vadd.xlane.f32.xlu2 %v5877_v1  ;;  %5842 = vadd.xlane.f32.xlu0 %v5841_v13 }
0x12bd   : > { %v5817_v57 = vpop.f32.mrf.mxu3 }
0x12be   : > { %v5844_v26 = vsel %vm794_vm0, %v5817_v57, 0.0 }
0x12c2   : > { %5845 = vadd.xlane.f32.xlu2 %v5844_v26 }
0x12fe   : > { %v5828_v60 = vpop.xlane.xlu2 %5827 }
0x12ff   : > { %v5849_v22 = vmul.f32 %v5828_v60, %v7884_v8 }
0x1301   : > { %v10163_v53 = vsub.f32 %v5799_v2, %v5849_v22 }
0x1303   : > { %v5867_v3 = vmul.f32 %v10163_v53, %v10163_v53 }
0x1305   : > { %v5880_v39 = vsel %vm794_vm0, %v5867_v3, 0.0 }
0x1306   : > { %5881 = vadd.xlane.f32.xlu1 %v5880_v39  ;;  %v5831_v11 = vpop.xlane.xlu0 %5830 }
0x1307   : > { %v5850_v29 = vmul.f32 %v5831_v11, %v7884_v8 }
0x1309   : > { %v10169_v42 = vsub.f32 %v5802_v5, %v5850_v29 }
0x130b   : > { %v5868_v32 = vmul.f32 %v10169_v42, %v10169_v42 }
0x130d   : > { %v5883_v24 = vsel %vm794_vm0, %v5868_v32, 0.0 }
0x130e   : > { %5884 = vadd.xlane.f32.xlu0 %v5883_v24 }
0x1311   : > { %v5834_v10 = vpop.xlane.xlu1 %5833 }
0x1312   : > { %v5851_v14 = vmul.f32 %v5834_v10, %v7884_v8 }
0x1314   : > { %v10175_v48 = vsub.f32 %v5805_v19, %v5851_v14 }
0x1316   : > { %v5869_v7 = vmul.f32 %v10175_v48, %v10175_v48 }
0x1318   : > { %v5886_v44 = vsel %vm794_vm0, %v5869_v7, 0.0 }
0x1319   : > { %5887 = vadd.xlane.f32.xlu1 %v5886_v44 }
0x131a   : > { %v5837_v31 = vpop.xlane.xlu2 %5836 }
0x131b   : > { %v5852_v43 = vmul.f32 %v5837_v31, %v7884_v8 }
0x131d   : > { %v10181_v38 = vsub.f32 %v5808_v52, %v5852_v43 }
0x131f   : > { %v5870_v20 = vmul.f32 %v10181_v38, %v10181_v38 }
0x1321   : > { %v5889_v37 = vsel %vm794_vm0, %v5870_v20, 0.0 }
0x1322   : > { %v5840_v49 = vpop.xlane.xlu1 %5839  ;;  %5890 = vadd.xlane.f32.xlu2 %v5889_v37 }
0x1323   : > { %v5853_v41 = vmul.f32 %v5840_v49, %v7884_v8 }
0x1325   : > { %v10190_v33 = vsub.f32 %v5811_v27, %v5853_v41  ;;  %v5876_v23 = vpop.xlane.xlu0 %5875  ;;  %v10209_v27 = vld [vmem:[%s10456_s17] sm:$0xf] }
0x1326   : > { %v5901_v40 = vmul.f32 %v5876_v23, %v7884_v8  ;;  %v10212_v59 = vperm.slane %v10209_v27, 2 }
0x1327   : > { %v5871_v15 = vmul.f32 %v10190_v33, %v10190_v33 }
0x1328   : > { %v5910_v51 = vadd.f32 2.5e-06, %v5901_v40 }
0x1329   : > { %v5892_v61 = vsel %vm794_vm0, %v5871_v15, 0.0 }
0x132a   : > { %5893 = vadd.xlane.f32.xlu0 %v5892_v61  ;;  %7333 = vrsqrt.f32 %v5910_v51  ;;  %vm5925_vm1 = vweird.f32 %v5910_v51 }
0x132d   : > { %v5843_v50 = vpop.xlane.xlu0 %5842  ;;  %v5879_v28 = vpop.xlane.xlu2 %5878 }
0x132e   : > { %v5854_v36 = vmul.f32 %v5843_v50, %v7884_v8  ;;  %v5902_v54 = vmul.f32 %v5879_v28, %v7884_v8 }
0x1330   : > { %v7334_v55 = vpop.eup %7333  ;;  %v10198_v21 = vsub.f32 %v5814_v47, %v5854_v36  ;;  %v5911_v4 = vadd.f32 2.5e-06, %v5902_v54  ;;  %v10222_v47 = vperm.slane %v10219_v9, 2 }
0x1331   : > { %v5920_v46 = vmul.f32 %v7334_v55, %v5910_v51  ;;  %vm5926_vm12 = vweird.f32 %v7334_v55 }
0x1332   : > { %7335 = vrsqrt.f32 %v5911_v4  ;;  %v5872_v2 = vmul.f32 %v10198_v21, %v10198_v21  ;;  %vm5927_vm9 = vmor %vm5925_vm1, %vm5926_vm12  ;;  %vm5935_vm13 = vweird.f32 %v5911_v4 }
0x1333   : > { %v5921_v16 = vmul.f32 %v7334_v55, %v5920_v46 }
0x1334   : > { %v5895_v5 = vsel %vm794_vm0, %v5872_v2, 0.0  ;;  %v6132_v2 = vld [vmem:[%s10454_s15 + $0x30] sm:$0xff] }
0x1335   : > { %v5922_v58 = vmul.f32 0.5, %v5921_v16  ;;  %5896 = vadd.xlane.f32.xlu1 %v5895_v5  ;;  %v5846_v19 = vpop.xlane.xlu2 %5845 }
0x1336   : > { %v5855_v6 = vmul.f32 %v5846_v19, %v7884_v8 }
0x1337   : > { %v5923_v18 = vsub.f32 1.5, %v5922_v58 }
0x1338   : > { %v7336_v52 = vpop.eup %7335  ;;  %v10204_v63 = vsub.f32 %v5817_v57, %v5855_v6  ;;  %v6131_v6 = vld [vmem:[%s10454_s15 + $0x28] sm:$0xff] }
0x1339   : > { %v5924_v34 = vmul.f32 %v7334_v55, %v5923_v18  ;;  %v5930_v35 = vmul.f32 %v7336_v52, %v5911_v4  ;;  %vm5936_vm8 = vweird.f32 %v7336_v52 }
0x133a   : > { %v5873_v17 = vmul.f32 %v10204_v63, %v10204_v63  ;;  %vm5937_vm11 = vmor %vm5935_vm13, %vm5936_vm8 }
0x133b   : > { %v5928_v45 = vsel %vm5927_vm9, %v7334_v55, %v5924_v34  ;;  %v5931_v25 = vmul.f32 %v7336_v52, %v5930_v35  ;;  %v6133_v55 = vld [vmem:[%s10454_s15 + $0x38] sm:$0xff]  ;;  %v6130_v34 = vld [vmem:[%s10454_s15 + $0x20] sm:$0xff] }
0x133c   : > { %v6009_v0 = vmul.f32 %v5928_v45, %v10145_v12  ;;  %v5898_v1 = vsel %vm794_vm0, %v5873_v17, 0.0  ;;  %6173 = vmatpush.msra.mxu3 %v6133_v55 }
0x133d   : > { %v5932_v13 = vmul.f32 0.5, %v5931_v25  ;;  %5899 = vadd.xlane.f32.xlu2 %v5898_v1  ;;  %v6128_v1 = vld [vmem:[%s10454_s15 + $0x10] sm:$0xff] }
0x133e   : > { %v6019_v57 = vmul.f32 %v10212_v59, %v6009_v0  ;;  %6174 = vmatpush.msra.mxu3 %v6132_v2 }
0x133f   : > { %v5933_v26 = vsub.f32 1.5, %v5932_v13 }
0x1340   : > { %v6029_v56 = vadd.f32 %v10222_v47, %v6019_v57  ;;  %6175 = vmatpush.msra.mxu3 %v6131_v6 }
0x1341   : > { %v5934_v60 = vmul.f32 %v7336_v52, %v5933_v26 }
0x1342   : > { %6922 = vmatmul.msk.f32.vlgmr.msra.gmra.mxu1 %vm794_vm0, %v6029_v56  ;;  %6176 = vmatpush.msra.mxu3 %v6130_v34 }
0x1343   : > { %v5938_v22 = vsel %vm5937_vm11, %v7336_v52, %v5934_v60  ;;  %v6127_v60 = vld [vmem:[%s10454_s15 + $0x8] sm:$0xff] }
0x1344   : > { %v6010_v3 = vmul.f32 %v5938_v22, %v10152_v30 }
0x1346   : > { %v6020_v12 = vmul.f32 %v10212_v59, %v6010_v3 }
0x1348   : > { %v6030_v39 = vadd.f32 %v10222_v47, %v6020_v12 }
0x134a   : > { %6923 = vmatmul.msk.f32.gmra.mxu1 %vm794_vm0, %v6030_v39  ;;  %v6126_v39 = vld [vmem:[%s10454_s15] sm:$0xff] }
0x1379   : > { %v5882_v11 = vpop.xlane.xlu1 %5881 }
0x137a   : > { %v5903_v29 = vmul.f32 %v5882_v11, %v7884_v8 }
0x137c   : > { %v5912_v32 = vadd.f32 2.5e-06, %v5903_v29 }
0x137e   : > { %7337 = vrsqrt.f32 %v5912_v32  ;;  %vm5945_vm4 = vweird.f32 %v5912_v32 }
0x1381   : > { %v5885_v24 = vpop.xlane.xlu0 %5884 }
0x1382   : > { %v5904_v10 = vmul.f32 %v5885_v24, %v7884_v8 }
0x1384   : > { %v7338_v14 = vpop.eup %7337  ;;  %v5913_v44 = vadd.f32 2.5e-06, %v5904_v10 }
0x1385   : > { %v5940_v7 = vmul.f32 %v7338_v14, %v5912_v32  ;;  %vm5946_vm7 = vweird.f32 %v7338_v14 }
0x1386   : > { %7339 = vrsqrt.f32 %v5913_v44  ;;  %vm5947_vm15 = vmor %vm5945_vm4, %vm5946_vm7  ;;  %vm5955_vm5 = vweird.f32 %v5913_v44 }
0x1387   : > { %v5941_v31 = vmul.f32 %v7338_v14, %v5940_v7 }
0x1389   : > { %v5942_v30 = vmul.f32 0.5, %v5941_v31 }
0x138b   : > { %v5943_v43 = vsub.f32 1.5, %v5942_v30 }
0x138c   : > { %v5888_v20 = vpop.xlane.xlu1 %5887  ;;  %v7340_v37 = vpop.eup %7339 }
0x138d   : > { %v5944_v62 = vmul.f32 %v7338_v14, %v5943_v43  ;;  %v5905_v49 = vmul.f32 %v5888_v20, %v7884_v8  ;;  %v5950_v41 = vmul.f32 %v7340_v37, %v5913_v44  ;;  %vm5956_vm3 = vweird.f32 %v7340_v37 }
0x138e   : > { %vm5957_vm10 = vmor %vm5955_vm5, %vm5956_vm3 }
0x138f   : > { %v5948_v23 = vsel %vm5947_vm15, %v7338_v14, %v5944_v62  ;;  %v5914_v40 = vadd.f32 2.5e-06, %v5905_v49  ;;  %v5951_v51 = vmul.f32 %v7340_v37, %v5950_v41 }
0x1390   : > { %v6011_v15 = vmul.f32 %v5948_v23, %v10163_v53 }
0x1391   : > { %7341 = vrsqrt.f32 %v5914_v40  ;;  %v5952_v61 = vmul.f32 0.5, %v5951_v51  ;;  %vm5965_vm6 = vweird.f32 %v5914_v40 }
0x1392   : > { %v6021_v50 = vmul.f32 %v10212_v59, %v6011_v15 }
0x1393   : > { %v5953_v28 = vsub.f32 1.5, %v5952_v61 }
0x1394   : > { %v6031_v36 = vadd.f32 %v10222_v47, %v6021_v50 }
0x1395   : > { %v5891_v54 = vpop.xlane.xlu2 %5890  ;;  %v5954_v4 = vmul.f32 %v7340_v37, %v5953_v28 }
0x1396   : > { %v5906_v46 = vmul.f32 %v5891_v54, %v7884_v8  ;;  %6924 = vmatmul.msk.f32.gmra.mxu1 %vm794_vm0, %v6031_v36 }
0x1397   : > { %v7342_v53 = vpop.eup %7341  ;;  %v5958_v16 = vsel %vm5957_vm10, %v7340_v37, %v5954_v4  ;;  %vm10470_vm10 = vcmask 523264  }
0x1398   : > { %v5960_v5 = vmul.f32 %v7342_v53, %v5914_v40  ;;  %v5915_v58 = vadd.f32 2.5e-06, %v5906_v46  ;;  %v6012_v19 = vmul.f32 %v5958_v16, %v10169_v42  ;;  %v6129_v42 = vld [vmem:[%s10454_s15 + $0x18] sm:$0xff]  ;;  %vm5966_vm14 = vweird.f32 %v7342_v53 }
0x1399   : > { %6177 = vmatpush.msra.mxu3 %v6129_v42  ;;  %vm5967_vm2 = vmor %vm5965_vm6, %vm5966_vm14 }
0x139a   : > { %v5961_v18 = vmul.f32 %v7342_v53, %v5960_v5  ;;  %7343 = vrsqrt.f32 %v5915_v58  ;;  %v6022_v52 = vmul.f32 %v10212_v59, %v6012_v19  ;;  %vm5975_vm1 = vweird.f32 %v5915_v58  ;;  %vm10471_vm6 = vmmov %vm10470_vm10 }
0x139b   : > { %6178 = vmatpush.msra.mxu3 %v6128_v1 }
0x139c   : > { %v5962_v35 = vmul.f32 0.5, %v5961_v18  ;;  %v6032_v45 = vadd.f32 %v10222_v47, %v6022_v52 }
0x139d   : > { %v5894_v17 = vpop.xlane.xlu0 %5893  ;;  %6179 = vmatpush.msra.mxu3 %v6127_v60 }
0x139e   : > { %v5963_v25 = vsub.f32 1.5, %v5962_v35  ;;  %v5907_v0 = vmul.f32 %v5894_v17, %v7884_v8  ;;  %6925 = vmatmul.msk.f32.gmra.mxu1 %vm794_vm0, %v6032_v45 }
0x139f   : > { %6180 = vmatpush.msra.mxu3 %v6126_v39 }
0x13a0   : > { %v7344_v13 = vpop.eup %7343  ;;  %v5964_v57 = vmul.f32 %v7342_v53, %v5963_v25  ;;  %v5916_v26 = vadd.f32 2.5e-06, %v5907_v0 }
0x13a1   : > { %v5970_v56 = vmul.f32 %v7344_v13, %v5915_v58  ;;  %vm5976_vm12 = vweird.f32 %v7344_v13 }
0x13a2   : > { %v5968_v22 = vsel %vm5967_vm2, %v7342_v53, %v5964_v57  ;;  %7345 = vrsqrt.f32 %v5916_v26  ;;  %vm5977_vm9 = vmor %vm5975_vm1, %vm5976_vm12  ;;  %vm5985_vm13 = vweird.f32 %v5916_v26 }
0x13a3   : > { %v6013_v3 = vmul.f32 %v5968_v22, %v10175_v48  ;;  %v5971_v12 = vmul.f32 %v7344_v13, %v5970_v56  ;;  %vm10472_vm2 = vmmov %vm10471_vm6 }
0x13a4   : > { %vm10473_vm12 = vmmov %vm10472_vm2 }
0x13a5   : > { %v5972_v11 = vmul.f32 0.5, %v5971_v12  ;;  %v6023_v29 = vmul.f32 %v10212_v59, %v6013_v3  ;;  %vm10474_vm1 = vmmov %vm10472_vm2 }
0x13a7   : > { %v5973_v32 = vsub.f32 1.5, %v5972_v11  ;;  %v6033_v24 = vadd.f32 %v10222_v47, %v6023_v29 }
0x13a8   : > { %v7346_v10 = vpop.eup %7345  ;;  %v5897_v44 = vpop.xlane.xlu1 %5896 }
0x13a9   : > { %v5974_v14 = vmul.f32 %v7344_v13, %v5973_v32  ;;  %v5980_v7 = vmul.f32 %v7346_v10, %v5916_v26  ;;  %6926 = vmatmul.msk.f32.gmra.mxu1 %vm794_vm0, %v6033_v24  ;;  %v5908_v48 = vmul.f32 %v5897_v44, %v7884_v8  ;;  %vm5986_vm8 = vweird.f32 %v7346_v10 }
0x13aa   : > { %vm5987_vm11 = vmor %vm5985_vm13, %vm5986_vm8 }
0x13ab   : > { %v5978_v31 = vsel %vm5977_vm9, %v7344_v13, %v5974_v14  ;;  %v5981_v30 = vmul.f32 %v7346_v10, %v5980_v7  ;;  %v5917_v20 = vadd.f32 2.5e-06, %v5908_v48  ;;  %vm10475_vm9 = vmmov %vm10474_vm1  ;;  %v6984_v48 = vld [vmem:[%s10455_s16] ss:$0 sm:$0xff] }
0x13ac   : > { %v6014_v43 = vmul.f32 %v5978_v31, %v10181_v38  ;;  %vm10476_vm8 = vmmov %vm10474_vm1 }
0x13ad   : > { %v5982_v37 = vmul.f32 0.5, %v5981_v30  ;;  %7347 = vrsqrt.f32 %v5917_v20  ;;  %vm5995_vm4 = vweird.f32 %v5917_v20  ;;  %vm10477_vm13 = vmmov %vm10474_vm1 }
0x13ae   : > { %v6024_v62 = vmul.f32 %v10212_v59, %v6014_v43 }
0x13af   : > { %v5983_v49 = vsub.f32 1.5, %v5982_v37 }
0x13b0   : > { %v6034_v41 = vadd.f32 %v10222_v47, %v6024_v62  ;;  %v5900_v40 = vpop.xlane.xlu2 %5899 }
0x13b1   : > { %v5984_v23 = vmul.f32 %v7346_v10, %v5983_v49  ;;  %v5909_v15 = vmul.f32 %v5900_v40, %v7884_v8 }
0x13b2   : > { %6927 = vmatmul.msk.f32.gmra.mxu1 %vm794_vm0, %v6034_v41 }
0x13b3   : > { %v5988_v51 = vsel %vm5987_vm11, %v7346_v10, %v5984_v23  ;;  %v7348_v61 = vpop.eup %7347  ;;  %v5918_v50 = vadd.f32 2.5e-06, %v5909_v15  ;;  %vm10478_vm11 = vmmov %vm10474_vm1 }
0x13b4   : > { %v6015_v38 = vmul.f32 %v5988_v51, %v10190_v33  ;;  %v5990_v28 = vmul.f32 %v7348_v61, %v5917_v20  ;;  %vm5996_vm7 = vweird.f32 %v7348_v61  ;;  %v6983_v33 = vld [vmem:[%s10453_s14] ss:$0 sm:$0xff] }
0x13b5   : > { %7349 = vrsqrt.f32 %v5918_v50  ;;  %vm5997_vm15 = vmor %vm5995_vm4, %vm5996_vm7  ;;  %vm6005_vm5 = vweird.f32 %v5918_v50 }
0x13b6   : > { %v6025_v36 = vmul.f32 %v10212_v59, %v6015_v38  ;;  %v5991_v54 = vmul.f32 %v7348_v61, %v5990_v28 }
0x13b8   : > { %v6035_v55 = vadd.f32 %v10222_v47, %v6025_v36  ;;  %v5992_v4 = vmul.f32 0.5, %v5991_v54 }
0x13ba   : > { %6928 = vmatmul.msk.f32.gmra.mxu1 %vm794_vm0, %v6035_v55  ;;  %v5993_v46 = vsub.f32 1.5, %v5992_v4 }
0x13bb   : > { %v7350_v53 = vpop.eup %7349 }
0x13bc   : > { %v5994_v2 = vmul.f32 %v7348_v61, %v5993_v46  ;;  %v6000_v16 = vmul.f32 %v7350_v53, %v5918_v50  ;;  %vm6006_vm3 = vweird.f32 %v7350_v53 }
0x13bd   : > { %vm6007_vm14 = vmor %vm6005_vm5, %vm6006_vm3 }
0x13be   : > { %v5998_v5 = vsel %vm5997_vm15, %v7348_v61, %v5994_v2  ;;  %v6001_v58 = vmul.f32 %v7350_v53, %v6000_v16 }
0x13bf   : > { %v6016_v19 = vmul.f32 %v5998_v5, %v10198_v21  ;;  %v6090_v6 = vpop.f32.mrf.mxu1 }
0x13c0   : > { %v6002_v18 = vmul.f32 0.5, %v6001_v58  ;;  %v6091_v52 = vadd.f32 %v6983_v33, %v6090_v6 }
0x13c1   : > { %v6026_v34 = vmul.f32 %v10212_v59, %v6016_v19 }
0x13c2   : > { %v6003_v35 = vsub.f32 1.5, %v6002_v18  ;;  %v6117_v17 = vmax.f32 %v6091_v52, 0.0 }
0x13c3   : > { %v6036_v45 = vadd.f32 %v10222_v47, %v6026_v34 }
0x13c4   : > { %v6004_v42 = vmul.f32 %v7350_v53, %v6003_v35  ;;  %6931 = vmatmul.msk.f32.vlgmr.msra.gmra.mxu3 %vm10470_vm10, %v6117_v17 }
0x13c5   : > { %6929 = vmatmul.msk.f32.gmra.mxu1 %vm794_vm0, %v6036_v45 }
0x13c6   : > { %v6008_v25 = vsel %vm6007_vm14, %v7350_v53, %v6004_v42 }
0x13c7   : > { %v6017_v21 = vmul.f32 %v6008_v25, %v10204_v63  ;;  %v6093_v0 = vpop.f32.mrf.mxu1 }
0x13c8   : > { %v6094_v1 = vadd.f32 %v6983_v33, %v6093_v0 }
0x13c9   : > { %v6027_v13 = vmul.f32 %v10212_v59, %v6017_v21 }
0x13ca   : > { %v6118_v57 = vmax.f32 %v6094_v1, 0.0 }
0x13cb   : > { %v6037_v26 = vadd.f32 %v10222_v47, %v6027_v13 }
0x13cc   : > { %6932 = vmatmul.msk.f32.gmra.mxu3 %vm10471_vm6, %v6118_v57 }
0x13cd   : > { %6930 = vmatmul.msk.f32.gmra.mxu1 %vm794_vm0, %v6037_v26 }
0x1413   : > { %v6096_v56 = vpop.f32.mrf.mxu1 }
0x1414   : > { %v6097_v60 = vadd.f32 %v6983_v33, %v6096_v56 }
0x1416   : > { %v6119_v22 = vmax.f32 %v6097_v60, 0.0 }
0x1418   : > { %6933 = vmatmul.msk.f32.gmra.mxu3 %vm10472_vm2, %v6119_v22 }
0x141b   : > { %v6099_v3 = vpop.f32.mrf.mxu1 }
0x141c   : > { %v6100_v12 = vadd.f32 %v6983_v33, %v6099_v3 }
0x141e   : > { %v6120_v39 = vmax.f32 %v6100_v12, 0.0 }
0x1420   : > { %6934 = vmatmul.msk.f32.gmra.mxu3 %vm10473_vm12, %v6120_v39 }
0x1426   : > { %v6102_v63 = vpop.f32.mrf.mxu1 }
0x1427   : > { %v6103_v11 = vadd.f32 %v6983_v33, %v6102_v63 }
0x1429   : > { %v6121_v59 = vmax.f32 %v6103_v11, 0.0 }
0x142b   : > { %6935 = vmatmul.msk.f32.gmra.mxu3 %vm10474_vm1, %v6121_v59 }
0x142f   : > { %v6105_v47 = vpop.f32.mrf.mxu1 }
0x1430   : > { %v6106_v29 = vadd.f32 %v6983_v33, %v6105_v47 }
0x1432   : > { %v6122_v32 = vmax.f32 %v6106_v29, 0.0 }
0x1434   : > { %6936 = vmatmul.msk.f32.gmra.mxu3 %vm10475_vm9, %v6122_v32 }
0x1437   : > { %v6108_v24 = vpop.f32.mrf.mxu1 }
0x1438   : > { %v6109_v10 = vadd.f32 %v6983_v33, %v6108_v24 }
0x143a   : > { %v6123_v14 = vmax.f32 %v6109_v10, 0.0 }
0x143c   : > { %6937 = vmatmul.msk.f32.gmra.mxu3 %vm10476_vm8, %v6123_v14 }
0x1442   : > { %v6111_v7 = vpop.f32.mrf.mxu1 }
0x1443   : > { %v6112_v44 = vadd.f32 %v6983_v33, %v6111_v7 }
0x1445   : > { %v6124_v31 = vmax.f32 %v6112_v44, 0.0 }
0x1447   : > { %v6182_v30 = vpop.f32.mrf.mxu3  ;;  %6938 = vmatmul.msk.f32.gmra.mxu3 %vm10477_vm13, %v6124_v31 }
0x1448   : > { %v6183_v43 = vadd.f32 %v6984_v48, %v6182_v30 }
0x144a   : > { %v6114_v20 = vpop.f32.mrf.mxu1  ;;  %v6209_v37 = vsel %vm794_vm0, %v6183_v43, 0.0 }
0x144b   : > { %v6115_v62 = vadd.f32 %v6983_v33, %v6114_v20  ;;  %6210 = vadd.xlane.f32.xlu0 %v6209_v37 }
0x144d   : > { %v6125_v49 = vmax.f32 %v6115_v62, 0.0 }
0x144f   : > { %v6185_v41 = vpop.f32.mrf.mxu3  ;;  %6939 = vmatmul.msk.f32.gmra.mxu3 %vm10478_vm11, %v6125_v49 }
0x1450   : > { %v6186_v23 = vadd.f32 %v6984_v48, %v6185_v41 }
0x1452   : > { %v6212_v40 = vsel %vm794_vm0, %v6186_v23, 0.0 }
0x1453   : > { %6213 = vadd.xlane.f32.xlu1 %v6212_v40 }
0x149b   : > { %v6188_v15 = vpop.f32.mrf.mxu3 }
0x149c   : > { %v6189_v51 = vadd.f32 %v6984_v48, %v6188_v15 }
0x149e   : > { %v6215_v61 = vsel %vm794_vm0, %v6189_v51, 0.0 }
0x149f   : > { %6216 = vadd.xlane.f32.xlu2 %v6215_v61 }
0x14a3   : > { %v6191_v38 = vpop.f32.mrf.mxu3 }
0x14a4   : > { %v6192_v50 = vadd.f32 %v6984_v48, %v6191_v38 }
0x14a6   : > { %v6218_v28 = vsel %vm794_vm0, %v6192_v50, 0.0 }
0x14a7   : > { %6219 = vadd.xlane.f32.xlu0 %v6218_v28 }
0x14ae   : > { %v6194_v36 = vpop.f32.mrf.mxu3 }
0x14af   : > { %v6195_v54 = vadd.f32 %v6984_v48, %v6194_v36 }
0x14b1   : > { %v6221_v55 = vsel %vm794_vm0, %v6195_v54, 0.0 }
0x14b2   : > { %6222 = vadd.xlane.f32.xlu1 %v6221_v55 }
0x14b7   : > { %v6197_v4 = vpop.f32.mrf.mxu3 }
0x14b8   : > { %v6198_v46 = vadd.f32 %v6984_v48, %v6197_v4 }
0x14ba   : > { %v6224_v53 = vsel %vm794_vm0, %v6198_v46, 0.0 }
0x14bb   : > { %6225 = vadd.xlane.f32.xlu2 %v6224_v53 }
0x14be   : > { %v6211_v2 = vpop.xlane.xlu0 %6210 }
0x14bf   : > { %v6200_v16 = vpop.f32.mrf.mxu3  ;;  %v6236_v33 = vmul.f32 %v6211_v2, %v7884_v8 }
0x14c0   : > { %v6201_v5 = vadd.f32 %v6984_v48, %v6200_v16 }
0x14c1   : > { %v10314_v58 = vsub.f32 %v6183_v43, %v6236_v33 }
0x14c2   : > { %v6227_v19 = vsel %vm794_vm0, %v6201_v5, 0.0 }
0x14c3   : > { %6228 = vadd.xlane.f32.xlu0 %v6227_v19  ;;  %v6254_v6 = vmul.f32 %v10314_v58, %v10314_v58 }
0x14c5   : > { %v6263_v34 = vsel %vm794_vm0, %v6254_v6, 0.0  ;;  %v10373_v6 = vperm.slane %v10209_v27, 3 }
0x14c6   : > { %v6214_v18 = vpop.xlane.xlu1 %6213 }
0x14c7   : > { %v6237_v52 = vmul.f32 %v6214_v18, %v7884_v8 }
0x14c9   : > { %v10321_v45 = vsub.f32 %v6186_v23, %v6237_v52 }
0x14ca   : > { %v6203_v35 = vpop.f32.mrf.mxu3 }
0x14cb   : > { %6264 = vadd.xlane.f32.xlu0 %v6263_v34  ;;  %v6204_v17 = vadd.f32 %v6984_v48, %v6203_v35  ;;  %v6255_v25 = vmul.f32 %v10321_v45, %v10321_v45  ;;  %v10376_v34 = vperm.slane %v10219_v9, 3 }
0x14cd   : > { %v6230_v42 = vsel %vm794_vm0, %v6204_v17, 0.0  ;;  %v6266_v1 = vsel %vm794_vm0, %v6255_v25, 0.0 }
0x14ce   : > { %6231 = vadd.xlane.f32.xlu1 %v6230_v42 }
0x14d2   : > { %v6206_v21 = vpop.f32.mrf.mxu3 }
0x14d3   : > { %v6207_v0 = vadd.f32 %v6984_v48, %v6206_v21 }
0x14d5   : > { %v6233_v13 = vsel %vm794_vm0, %v6207_v0, 0.0 }
0x14d6   : > { %6267 = vadd.xlane.f32.xlu1 %v6266_v1  ;;  %6234 = vadd.xlane.f32.xlu2 %v6233_v13 }
0x1512   : > { %v6217_v57 = vpop.xlane.xlu2 %6216 }
0x1513   : > { %v6238_v26 = vmul.f32 %v6217_v57, %v7884_v8 }
0x1515   : > { %v10329_v56 = vsub.f32 %v6189_v51, %v6238_v26 }
0x1517   : > { %v6256_v60 = vmul.f32 %v10329_v56, %v10329_v56 }
0x1519   : > { %v6269_v22 = vsel %vm794_vm0, %v6256_v60, 0.0 }
0x151a   : > { %6270 = vadd.xlane.f32.xlu2 %v6269_v22  ;;  %v6220_v3 = vpop.xlane.xlu0 %6219 }
0x151b   : > { %v6239_v12 = vmul.f32 %v6220_v3, %v7884_v8 }
0x151d   : > { %v10335_v39 = vsub.f32 %v6192_v50, %v6239_v12 }
0x151f   : > { %v6257_v63 = vmul.f32 %v10335_v39, %v10335_v39 }
0x1521   : > { %v6272_v11 = vsel %vm794_vm0, %v6257_v63, 0.0 }
0x1522   : > { %6273 = vadd.xlane.f32.xlu0 %v6272_v11 }
0x1525   : > { %v6223_v59 = vpop.xlane.xlu1 %6222 }
0x1526   : > { %v6240_v47 = vmul.f32 %v6223_v59, %v7884_v8 }
0x1528   : > { %v10341_v29 = vsub.f32 %v6195_v54, %v6240_v47 }
0x152a   : > { %v6258_v32 = vmul.f32 %v10341_v29, %v10341_v29 }
0x152c   : > { %v6275_v24 = vsel %vm794_vm0, %v6258_v32, 0.0 }
0x152d   : > { %6276 = vadd.xlane.f32.xlu1 %v6275_v24 }
0x152e   : > { %v6226_v10 = vpop.xlane.xlu2 %6225 }
0x152f   : > { %v6241_v14 = vmul.f32 %v6226_v10, %v7884_v8 }
0x1531   : > { %v10347_v7 = vsub.f32 %v6198_v46, %v6241_v14 }
0x1533   : > { %v6259_v44 = vmul.f32 %v10347_v7, %v10347_v7 }
0x1535   : > { %v6278_v48 = vsel %vm794_vm0, %v6259_v44, 0.0 }
0x1536   : > { %v6229_v31 = vpop.xlane.xlu0 %6228  ;;  %6279 = vadd.xlane.f32.xlu2 %v6278_v48 }
0x1537   : > { %v6242_v30 = vmul.f32 %v6229_v31, %v7884_v8 }
0x1539   : > { %v10353_v43 = vsub.f32 %v6201_v5, %v6242_v30 }
0x153b   : > { %v6260_v20 = vmul.f32 %v10353_v43, %v10353_v43 }
0x153d   : > { %v6281_v37 = vsel %vm794_vm0, %v6260_v20, 0.0 }
0x153e   : > { %6282 = vadd.xlane.f32.xlu0 %v6281_v37  ;;  %v6265_v62 = vpop.xlane.xlu0 %6264 }
0x153f   : > { %v6290_v49 = vmul.f32 %v6265_v62, %v7884_v8 }
0x1541   : > { %v6299_v41 = vadd.f32 2.5e-06, %v6290_v49  ;;  %v6232_v23 = vpop.xlane.xlu1 %6231 }
0x1542   : > { %v6243_v40 = vmul.f32 %v6232_v23, %v7884_v8 }
0x1543   : > { %7351 = vrsqrt.f32 %v6299_v41  ;;  %vm6314_vm4 = vweird.f32 %v6299_v41 }
0x1544   : > { %v10360_v15 = vsub.f32 %v6204_v17, %v6243_v40 }
0x1546   : > { %v6261_v51 = vmul.f32 %v10360_v15, %v10360_v15 }
0x1548   : > { %v6284_v38 = vsel %vm794_vm0, %v6261_v51, 0.0 }
0x1549   : > { %v7352_v61 = vpop.eup %7351  ;;  %6285 = vadd.xlane.f32.xlu1 %v6284_v38  ;;  %v6268_v28 = vpop.xlane.xlu1 %6267 }
0x154a   : > { %v6309_v50 = vmul.f32 %v7352_v61, %v6299_v41  ;;  %v6235_v36 = vpop.xlane.xlu2 %6234  ;;  %v6291_v54 = vmul.f32 %v6268_v28, %v7884_v8  ;;  %vm6315_vm7 = vweird.f32 %v7352_v61 }
0x154b   : > { %v6244_v55 = vmul.f32 %v6235_v36, %v7884_v8  ;;  %vm6316_vm15 = vmor %vm6314_vm4, %vm6315_vm7 }
0x154c   : > { %v6310_v4 = vmul.f32 %v7352_v61, %v6309_v50  ;;  %v6300_v46 = vadd.f32 2.5e-06, %v6291_v54 }
0x154d   : > { %v10367_v53 = vsub.f32 %v6207_v0, %v6244_v55 }
0x154e   : > { %v6311_v2 = vmul.f32 0.5, %v6310_v4  ;;  %7353 = vrsqrt.f32 %v6300_v46  ;;  %vm6324_vm5 = vweird.f32 %v6300_v46 }
0x154f   : > { %v6262_v16 = vmul.f32 %v10367_v53, %v10367_v53 }
0x1550   : > { %v6312_v33 = vsub.f32 1.5, %v6311_v2 }
0x1551   : > { %v6287_v5 = vsel %vm794_vm0, %v6262_v16, 0.0 }
0x1552   : > { %v6313_v19 = vmul.f32 %v7352_v61, %v6312_v33  ;;  %6288 = vadd.xlane.f32.xlu2 %v6287_v5 }
0x1554   : > { %v6317_v18 = vsel %vm6316_vm15, %v7352_v61, %v6313_v19  ;;  %v7354_v52 = vpop.eup %7353 }
0x1555   : > { %v6398_v35 = vmul.f32 %v6317_v18, %v10314_v58  ;;  %v6319_v17 = vmul.f32 %v7354_v52, %v6300_v46  ;;  %vm6325_vm3 = vweird.f32 %v7354_v52 }
0x1556   : > { %vm6326_vm10 = vmor %vm6324_vm5, %vm6325_vm3 }
0x1557   : > { %v6408_v42 = vmul.f32 %v10373_v6, %v6398_v35  ;;  %v6320_v27 = vmul.f32 %v7354_v52, %v6319_v17 }
0x1559   : > { %v6418_v25 = vadd.f32 %v10376_v34, %v6408_v42  ;;  %v6321_v21 = vmul.f32 0.5, %v6320_v27 }
0x155b   : > { %6427 = vst.msk [vmem:[%s10384_s24] sm:$0xff] %vm794_vm0, %v6418_v25  ;;  %v6322_v9 = vsub.f32 1.5, %v6321_v21 }
0x155d   : > { %v6323_v0 = vmul.f32 %v7354_v52, %v6322_v9 }
0x155f   : > { %v6327_v58 = vsel %vm6326_vm10, %v7354_v52, %v6323_v0 }
0x1560   : > { %v6399_v1 = vmul.f32 %v6327_v58, %v10321_v45 }
0x1562   : > { %v6409_v13 = vmul.f32 %v10373_v6, %v6399_v1 }
0x1564   : > { %v6419_v57 = vadd.f32 %v10376_v34, %v6409_v13 }
0x1566   : > { %6428 = vst.msk [vmem:[%s10384_s24 + $0x8] sm:$0xff] %vm794_vm0, %v6419_v57 }
0x158d   : > { %v6271_v26 = vpop.xlane.xlu2 %6270 }
0x158e   : > { %v6292_v60 = vmul.f32 %v6271_v26, %v7884_v8 }
0x1590   : > { %v6301_v22 = vadd.f32 2.5e-06, %v6292_v60 }
0x1592   : > { %7355 = vrsqrt.f32 %v6301_v22  ;;  %vm6334_vm6 = vweird.f32 %v6301_v22 }
0x1595   : > { %v6274_v3 = vpop.xlane.xlu0 %6273 }
0x1596   : > { %v6293_v12 = vmul.f32 %v6274_v3, %v7884_v8 }
0x1598   : > { %v7356_v63 = vpop.eup %7355  ;;  %v6302_v59 = vadd.f32 2.5e-06, %v6293_v12 }
0x1599   : > { %v6329_v11 = vmul.f32 %v7356_v63, %v6301_v22  ;;  %vm6335_vm14 = vweird.f32 %v7356_v63 }
0x159a   : > { %7357 = vrsqrt.f32 %v6302_v59  ;;  %vm6336_vm2 = vmor %vm6334_vm6, %vm6335_vm14  ;;  %vm6344_vm1 = vweird.f32 %v6302_v59 }
0x159b   : > { %v6330_v47 = vmul.f32 %v7356_v63, %v6329_v11 }
0x159d   : > { %v6331_v45 = vmul.f32 0.5, %v6330_v47 }
0x159f   : > { %v6332_v32 = vsub.f32 1.5, %v6331_v45 }
0x15a0   : > { %v6277_v24 = vpop.xlane.xlu1 %6276  ;;  %v7358_v10 = vpop.eup %7357 }
0x15a1   : > { %v6333_v14 = vmul.f32 %v7356_v63, %v6332_v32  ;;  %v6294_v44 = vmul.f32 %v6277_v24, %v7884_v8  ;;  %v6339_v48 = vmul.f32 %v7358_v10, %v6302_v59  ;;  %vm6345_vm12 = vweird.f32 %v7358_v10 }
0x15a2   : > { %vm6346_vm9 = vmor %vm6344_vm1, %vm6345_vm12 }
0x15a3   : > { %v6337_v31 = vsel %vm6336_vm2, %v7356_v63, %v6333_v14  ;;  %v6303_v30 = vadd.f32 2.5e-06, %v6294_v44  ;;  %v6340_v37 = vmul.f32 %v7358_v10, %v6339_v48 }
0x15a4   : > { %v6400_v20 = vmul.f32 %v6337_v31, %v10329_v56 }
0x15a5   : > { %7359 = vrsqrt.f32 %v6303_v30  ;;  %v6341_v49 = vmul.f32 0.5, %v6340_v37  ;;  %vm6354_vm13 = vweird.f32 %v6303_v30 }
0x15a6   : > { %v6410_v62 = vmul.f32 %v10373_v6, %v6400_v20 }
0x15a7   : > { %v6342_v23 = vsub.f32 1.5, %v6341_v49 }
0x15a8   : > { %v6420_v41 = vadd.f32 %v10376_v34, %v6410_v62 }
0x15a9   : > { %v6280_v40 = vpop.xlane.xlu2 %6279  ;;  %v6343_v51 = vmul.f32 %v7358_v10, %v6342_v23 }
0x15aa   : > { %6429 = vst.msk [vmem:[%s10384_s24 + $0x10] sm:$0xff] %vm794_vm0, %v6420_v41  ;;  %v6295_v61 = vmul.f32 %v6280_v40, %v7884_v8 }
0x15ab   : > { %v7360_v38 = vpop.eup %7359  ;;  %v6347_v56 = vsel %vm6346_vm9, %v7358_v10, %v6343_v51 }
0x15ac   : > { %v6349_v50 = vmul.f32 %v7360_v38, %v6303_v30  ;;  %v6304_v28 = vadd.f32 2.5e-06, %v6295_v61  ;;  %v6401_v36 = vmul.f32 %v6347_v56, %v10335_v39  ;;  %vm6355_vm8 = vweird.f32 %v7360_v38 }
0x15ad   : > { %vm6356_vm11 = vmor %vm6354_vm13, %vm6355_vm8 }
0x15ae   : > { %v6350_v54 = vmul.f32 %v7360_v38, %v6349_v50  ;;  %7361 = vrsqrt.f32 %v6304_v28  ;;  %v6411_v55 = vmul.f32 %v10373_v6, %v6401_v36  ;;  %vm6364_vm4 = vweird.f32 %v6304_v28 }
0x15b0   : > { %v6351_v4 = vmul.f32 0.5, %v6350_v54  ;;  %v6421_v46 = vadd.f32 %v10376_v34, %v6411_v55 }
0x15b1   : > { %v6283_v2 = vpop.xlane.xlu0 %6282 }
0x15b2   : > { %v6352_v16 = vsub.f32 1.5, %v6351_v4  ;;  %v6296_v33 = vmul.f32 %v6283_v2, %v7884_v8  ;;  %6430 = vst.msk [vmem:[%s10384_s24 + $0x18] sm:$0xff] %vm794_vm0, %v6421_v46 }
0x15b4   : > { %v7362_v5 = vpop.eup %7361  ;;  %v6353_v19 = vmul.f32 %v7360_v38, %v6352_v16  ;;  %v6305_v18 = vadd.f32 2.5e-06, %v6296_v33 }
0x15b5   : > { %v6359_v39 = vmul.f32 %v7362_v5, %v6304_v28  ;;  %vm6365_vm7 = vweird.f32 %v7362_v5 }
0x15b6   : > { %v6357_v52 = vsel %vm6356_vm11, %v7360_v38, %v6353_v19  ;;  %7363 = vrsqrt.f32 %v6305_v18  ;;  %vm6366_vm15 = vmor %vm6364_vm4, %vm6365_vm7  ;;  %vm6374_vm5 = vweird.f32 %v6305_v18 }
0x15b7   : > { %v6402_v35 = vmul.f32 %v6357_v52, %v10341_v29  ;;  %v6360_v17 = vmul.f32 %v7362_v5, %v6359_v39 }
0x15b9   : > { %v6412_v42 = vmul.f32 %v10373_v6, %v6402_v35  ;;  %v6361_v27 = vmul.f32 0.5, %v6360_v17 }
0x15bb   : > { %v6422_v25 = vadd.f32 %v10376_v34, %v6412_v42  ;;  %v6362_v21 = vsub.f32 1.5, %v6361_v27 }
0x15bc   : > { %v7364_v9 = vpop.eup %7363  ;;  %v6286_v1 = vpop.xlane.xlu1 %6285 }
0x15bd   : > { %6431 = vst.msk [vmem:[%s10384_s24 + $0x20] sm:$0xff] %vm794_vm0, %v6422_v25  ;;  %v6363_v0 = vmul.f32 %v7362_v5, %v6362_v21  ;;  %v6369_v58 = vmul.f32 %v7364_v9, %v6305_v18  ;;  %v6297_v13 = vmul.f32 %v6286_v1, %v7884_v8  ;;  %vm6375_vm3 = vweird.f32 %v7364_v9 }
0x15be   : > { %vm6376_vm10 = vmor %vm6374_vm5, %vm6375_vm3 }
0x15bf   : > { %v6367_v29 = vsel %vm6366_vm15, %v7362_v5, %v6363_v0  ;;  %v6370_v57 = vmul.f32 %v7364_v9, %v6369_v58  ;;  %v6306_v60 = vadd.f32 2.5e-06, %v6297_v13 }
0x15c0   : > { %v6403_v26 = vmul.f32 %v6367_v29, %v10347_v7 }
0x15c1   : > { %v6371_v22 = vmul.f32 0.5, %v6370_v57  ;;  %7365 = vrsqrt.f32 %v6306_v60  ;;  %vm6384_vm6 = vweird.f32 %v6306_v60 }
0x15c2   : > { %v6413_v3 = vmul.f32 %v10373_v6, %v6403_v26 }
0x15c3   : > { %v6372_v12 = vsub.f32 1.5, %v6371_v22 }
0x15c4   : > { %v6423_v63 = vadd.f32 %v10376_v34, %v6413_v3 }
0x15c5   : > { %v6373_v11 = vmul.f32 %v7364_v9, %v6372_v12  ;;  %v6289_v59 = vpop.xlane.xlu2 %6288 }
0x15c6   : > { %6432 = vst.msk [vmem:[%s10384_s24 + $0x28] sm:$0xff] %vm794_vm0, %v6423_v63  ;;  %v6298_v47 = vmul.f32 %v6289_v59, %v7884_v8 }
0x15c7   : > { %v6377_v45 = vsel %vm6376_vm10, %v7364_v9, %v6373_v11  ;;  %v7366_v7 = vpop.eup %7365 }
0x15c8   : > { %v6404_v32 = vmul.f32 %v6377_v45, %v10353_v43  ;;  %v6307_v24 = vadd.f32 2.5e-06, %v6298_v47  ;;  %v6379_v10 = vmul.f32 %v7366_v7, %v6306_v60  ;;  %vm6385_vm14 = vweird.f32 %v7366_v7 }
0x15c9   : > { %vm6386_vm2 = vmor %vm6384_vm6, %vm6385_vm14 }
0x15ca   : > { %v6414_v14 = vmul.f32 %v10373_v6, %v6404_v32  ;;  %7367 = vrsqrt.f32 %v6307_v24  ;;  %v6380_v44 = vmul.f32 %v7366_v7, %v6379_v10  ;;  %vm6394_vm1 = vweird.f32 %v6307_v24 }
0x15cc   : > { %v6424_v48 = vadd.f32 %v10376_v34, %v6414_v14  ;;  %v6381_v31 = vmul.f32 0.5, %v6380_v44 }
0x15ce   : > { %6433 = vst.msk [vmem:[%s10384_s24 + $0x30] sm:$0xff] %vm794_vm0, %v6424_v48  ;;  %v6382_v30 = vsub.f32 1.5, %v6381_v31 }
0x15d0   : > { %v7368_v20 = vpop.eup %7367  ;;  %v6383_v8 = vmul.f32 %v7366_v7, %v6382_v30 }
0x15d1   : > { %v6389_v37 = vmul.f32 %v7368_v20, %v6307_v24  ;;  %vm6395_vm12 = vweird.f32 %v7368_v20 }
0x15d2   : > { %v6387_v43 = vsel %vm6386_vm2, %v7366_v7, %v6383_v8  ;;  %vm6396_vm9 = vmor %vm6394_vm1, %vm6395_vm12 }
0x15d3   : > { %v6390_v62 = vmul.f32 %v7368_v20, %v6389_v37  ;;  %v6405_v49 = vmul.f32 %v6387_v43, %v10360_v15 }
0x15d5   : > { %v6391_v41 = vmul.f32 0.5, %v6390_v62  ;;  %v6415_v23 = vmul.f32 %v10373_v6, %v6405_v49 }
0x15d7   : > { %v6392_v40 = vsub.f32 1.5, %v6391_v41  ;;  %v6425_v51 = vadd.f32 %v10376_v34, %v6415_v23 }
0x15d9   : > { %v6393_v61 = vmul.f32 %v7368_v20, %v6392_v40  ;;  %6434 = vst.msk [vmem:[%s10384_s24 + $0x38] sm:$0xff] %vm794_vm0, %v6425_v51 }
0x15db   : > { %v6397_v38 = vsel %vm6396_vm9, %v7368_v20, %v6393_v61 }
0x15dc   : > { %v6406_v56 = vmul.f32 %v6397_v38, %v10367_v53 }
0x15de   : > { %v6416_v50 = vmul.f32 %v10373_v6, %v6406_v56 }
0x15e0   : > { %v6426_v28 = vadd.f32 %v10376_v34, %v6416_v50 }
0x15e2   : > { %6435 = vst.msk [vmem:[%s10384_s24 + $0x40] sm:$0xff] %vm794_vm0, %v6426_v28 }
0x15e3 PF: > { %s30_s0 = sadd.s32 1, %s7431_s0  }
0x15e4   : > { %p27_p9 = scmp.ge.s32.totalorder %s30_s0, 4  }
0x15e6   :  { %29 = sbr.rel (!%p27_p9) target bundleno = 6 (0x6), region = 158 }
0x15eb   :  { %6458 = vsyncpa [#allocation3], 1 }
0x15ec   :  { %6460 = vsyncpa [#allocation3 + $0x1], 1 }

</bundles_post_ra>
